<compile_context>
chip_gen: v5e
topology: v5e:2x2
jax: 0.10.0
libtpu: 0.0.40
codegen_flags: <defaults>
</compile_context>

<pallas_src>
import functools

import jax
import jax.numpy as jnp
from jax.experimental import pallas as pl
from jax.experimental.pallas import tpu as pltpu


def _gru_kernel(gi_ref, whh_ref, bhn_ref, o_ref, *, seq_len, hidden, matmul_dtype):
    """Whole recurrence in one kernel invocation.

    gi_ref : (T, B, 3H) f32   input projections, r/z/n biases already folded in
    whh_ref: (H, 3H)    matmul_dtype   W_hh^T, VMEM-resident
    bhn_ref: (1, H)     f32   b_hn (must be applied inside the r-gating)
    o_ref  : (T, B, H)        full output block, VMEM-resident
    """
    w_hh = whh_ref[...]          # load once, reused every step
    b_hn = bhn_ref[...]          # (1, H)
    batch = o_ref.shape[1]

    def step(t, h_prev):
        gi = gi_ref[t]                                           # (B, 3H) f32
        gh = jnp.dot(h_prev.astype(matmul_dtype), w_hh,
                     preferred_element_type=jnp.float32)         # (B, 3H) f32
        r = jax.nn.sigmoid(gi[:, :hidden] + gh[:, :hidden])
        z = jax.nn.sigmoid(gi[:, hidden:2 * hidden] + gh[:, hidden:2 * hidden])
        n = jnp.tanh(gi[:, 2 * hidden:] + r * (gh[:, 2 * hidden:] + b_hn))
        h_new = (1.0 - z) * n + z * h_prev                       # f32 carry
        o_ref[t] = h_new.astype(o_ref.dtype)
        return h_new

    h0 = jnp.zeros((batch, hidden), jnp.float32)
    # Short fixed trip count -> full unroll gives the LLO scheduler visibility.
    jax.lax.fori_loop(0, seq_len, step, h0,
                      unroll=True if seq_len <= 32 else 8)


@functools.partial(jax.jit, static_argnames=("matmul_dtype",))
def gru_pallas(x_btI, w_ih, w_hh, b_ih, b_hh, *, matmul_dtype=jnp.bfloat16):
    """x_btI: (B, T, I) batch_first like PyTorch. Returns (B, T, H)."""
    B, T, I = x_btI.shape
    H = w_hh.shape[1]

    # ---- Hoisted input projection: one big matmul over all timesteps --------
    # Straight from the batch_first layout (no transpose of x).
    x2d = x_btI.reshape(B * T, I).astype(matmul_dtype)
    wih_t = jnp.transpose(w_ih, (1, 0)).astype(matmul_dtype)       # (I, 3H)
    # Fold b_ir+b_hr and b_iz+b_hz into the input projection; keep b_hn apart.
    b_gi = jnp.concatenate([b_ih[:2 * H] + b_hh[:2 * H], b_ih[2 * H:]])   # (3H,)
    gi = jnp.dot(x2d, wih_t, preferred_element_type=jnp.float32) + b_gi   # f32
    # Time-major layout for the recurrence (lane-dense (B, 3H) read per step).
    gi_tb = jnp.transpose(gi.reshape(B, T, 3 * H), (1, 0, 2))             # (T, B, 3H)

    whh_t = jnp.transpose(w_hh, (1, 0)).astype(matmul_dtype)       # (H, 3H)
    b_hn = b_hh[2 * H:].reshape(1, H).astype(jnp.float32)

    # VMEM footprint at these sizes is tiny (<1 MiB); if H is scaled up,
    # set pltpu.CompilerParams(vmem_limit_bytes=...) explicitly (v7x: 64 MiB phys).
    out_tbH = pl.pallas_call(
        functools.partial(_gru_kernel, seq_len=T, hidden=H,
                          matmul_dtype=matmul_dtype),
        out_shape=jax.ShapeDtypeStruct((T, B, H), x_btI.dtype),
        grid=(1,),
        in_specs=[
            pl.BlockSpec((T, B, 3 * H), lambda i: (0, 0, 0)),   # gi (resident)
            pl.BlockSpec((H, 3 * H), lambda i: (0, 0)),         # W_hh^T (resident)
            pl.BlockSpec((1, H), lambda i: (0, 0)),             # b_hn
        ],
        out_specs=pl.BlockSpec((T, B, H), lambda i: (0, 0, 0)),  # single writeback
        compiler_params=pltpu.CompilerParams(
            dimension_semantics=("arbitrary",),                  # sequential recurrence
        ),
    )(gi_tb, whh_t, b_hn)

    # TODO(synk): for large B, add a leading "parallel" batch grid axis so
    # v7x's second TensorCore runs an independent batch shard; at B=2 it would
    # only add sublane padding.
    return jnp.transpose(out_tbH, (1, 0, 2))          # back to batch_first (B, T, H)


def gru_reference(x_btI, w_ih, w_hh, b_ih, b_hh):
    """Pure-JAX f32 reference matching torch.nn.GRU semantics."""
    B, T, I = x_btI.shape
    H = w_hh.shape[1]

    def step(h, x_t):
        gi = x_t @ w_ih.T + b_ih
        gh = h @ w_hh.T + b_hh
        i_r, i_z, i_n = gi[:, :H], gi[:, H:2 * H], gi[:, 2 * H:]
        h_r, h_z, h_n = gh[:, :H], gh[:, H:2 * H], gh[:, 2 * H:]
        r = jax.nn.sigmoid(i_r + h_r)
        z = jax.nn.sigmoid(i_z + h_z)
        n = jnp.tanh(i_n + r * h_n)
        h_new = (1.0 - z) * n + z * h
        return h_new, h_new

    h0 = jnp.zeros((B, H), jnp.float32)
    _, ys = jax.lax.scan(step, h0, jnp.transpose(x_btI, (1, 0, 2)))
    return jnp.transpose(ys, (1, 0, 2))


if __name__ == "__main__":
    mel_bins = 128
    hidden_size = 256
    B, T = 2, 8

    key = jax.random.PRNGKey(0)
    k_x, k_wih, k_whh, k_bih, k_bhh = jax.random.split(key, 5)

    # Deterministic parameter init, PyTorch-style U(-1/sqrt(H), 1/sqrt(H)).
    bound = 1.0 / (hidden_size ** 0.5)
    w_ih = jax.random.uniform(k_wih, (3 * hidden_size, mel_bins), jnp.float32, -bound, bound)
    w_hh = jax.random.uniform(k_whh, (3 * hidden_size, hidden_size), jnp.float32, -bound, bound)
    b_ih = jax.random.uniform(k_bih, (3 * hidden_size,), jnp.float32, -bound, bound)
    b_hh = jax.random.uniform(k_bhh, (3 * hidden_size,), jnp.float32, -bound, bound)

    x = jax.random.normal(k_x, (B, T, mel_bins), jnp.float32)

    y_ref = gru_reference(x, w_ih, w_hh, b_ih, b_hh)

    # Accuracy path: f32 MXU operands, tight check against the f32 reference.
    y_f32 = jax.block_until_ready(
        gru_pallas(x, w_ih, w_hh, b_ih, b_hh, matmul_dtype=jnp.float32))
    assert y_f32.shape == (B, T, hidden_size), y_f32.shape
    assert jnp.allclose(y_f32, y_ref, atol=1e-4, rtol=1e-4), "f32 path mismatch vs reference"

    # Fast path (default): bf16 MXU operands, f32 state/accumulation.
    y = jax.block_until_ready(gru_pallas(x, w_ih, w_hh, b_ih, b_hh))
    assert y.shape == (B, T, hidden_size), y.shape
    assert jnp.allclose(y, y_ref, atol=3e-2, rtol=3e-2), "bf16 path mismatch vs reference"

    print("KERNEL_OK")
</pallas_src>

<mosaic_0001>
module attributes {stable_mosaic.version = 11 : i64} {
  func.func @_gru_kernel(%arg0: i32, %arg1: memref<8x2x768xf32, #tpu.memory_space<vmem>>, %arg2: memref<256x768xf32, #tpu.memory_space<vmem>>, %arg3: memref<1x256xf32, #tpu.memory_space<vmem>>, %arg4: memref<8x2x256xf32, #tpu.memory_space<vmem>>) attributes {dimension_semantics = [#tpu.dimension_semantics<arbitrary>], iteration_bounds = array<i64: 1>, scalar_prefetch = 0 : i64, scratch_operands = 0 : i64, tpu.core_type = #tpu.core_type<tc>, window_params = [{pipeline_mode = #tpu.pipeline_mode<synchronous>, transform_indices = @transform_0, window_bounds = array<i64: 8, 2, 768>}, {pipeline_mode = #tpu.pipeline_mode<synchronous>, transform_indices = @transform_1, window_bounds = array<i64: 256, 768>}, {pipeline_mode = #tpu.pipeline_mode<synchronous>, transform_indices = @transform_2, window_bounds = array<i64: 1, 256>}, {pipeline_mode = #tpu.pipeline_mode<synchronous>, transform_indices = @transform_3, window_bounds = array<i64: 8, 2, 256>}]} {
    %c0 = arith.constant 0 : index
    %c0_0 = arith.constant 0 : index
    %0 = vector.load %arg2[%c0, %c0_0] : memref<256x768xf32, #tpu.memory_space<vmem>>, vector<256x768xf32>
    %c0_1 = arith.constant 0 : index
    %c0_2 = arith.constant 0 : index
    %1 = vector.load %arg3[%c0_1, %c0_2] : memref<1x256xf32, #tpu.memory_space<vmem>>, vector<1x256xf32>
    %cst = arith.constant 0.000000e+00 : f32
    %2 = vector.broadcast %cst : f32 to vector<2x256xf32>
    %c0_i32 = arith.constant 0 : i32
    %3 = arith.index_cast %c0_i32 : i32 to index
    %c0_3 = arith.constant 0 : index
    %c0_4 = arith.constant 0 : index
    %4 = vector.load %arg1[%3, %c0_3, %c0_4] : memref<8x2x768xf32, #tpu.memory_space<vmem>>, vector<1x2x768xf32>
    %5 = vector.shape_cast %4 : vector<1x2x768xf32> to vector<2x768xf32>
    %cst_5 = arith.constant dense<0.000000e+00> : vector<2x768xf32>
    %6 = tpu.matmul %2, %0, %cst_5 {dimension_numbers = #tpu.dot_dimension_numbers<[1], [0], [0], [1], [0, 0, 1, 1], [], []>} : vector<2x256xf32>, vector<256x768xf32>, vector<2x768xf32> -> vector<2x768xf32>
    %7 = vector.extract_strided_slice %5 {offsets = [0, 0], sizes = [2, 256], strides = [1, 1]} : vector<2x768xf32> to vector<2x256xf32>
    %8 = vector.extract_strided_slice %6 {offsets = [0, 0], sizes = [2, 256], strides = [1, 1]} : vector<2x768xf32> to vector<2x256xf32>
    %9 = arith.addf %7, %8 : vector<2x256xf32>
    %10 = arith.negf %9 : vector<2x256xf32>
    %11 = math.exp %10 : vector<2x256xf32>
    %cst_6 = arith.constant 1.000000e+00 : f32
    %12 = vector.broadcast %cst_6 : f32 to vector<2x256xf32>
    %13 = arith.addf %12, %11 : vector<2x256xf32>
    %14 = arith.divf %12, %13 : vector<2x256xf32>
    %15 = vector.extract_strided_slice %5 {offsets = [0, 256], sizes = [2, 256], strides = [1, 1]} : vector<2x768xf32> to vector<2x256xf32>
    %16 = vector.extract_strided_slice %6 {offsets = [0, 256], sizes = [2, 256], strides = [1, 1]} : vector<2x768xf32> to vector<2x256xf32>
    %17 = arith.addf %15, %16 : vector<2x256xf32>
    %18 = arith.negf %17 : vector<2x256xf32>
    %19 = math.exp %18 : vector<2x256xf32>
    %cst_7 = arith.constant 1.000000e+00 : f32
    %20 = vector.broadcast %cst_7 : f32 to vector<2x256xf32>
    %21 = arith.addf %20, %19 : vector<2x256xf32>
    %22 = arith.divf %20, %21 : vector<2x256xf32>
    %23 = vector.extract_strided_slice %5 {offsets = [0, 512], sizes = [2, 256], strides = [1, 1]} : vector<2x768xf32> to vector<2x256xf32>
    %24 = vector.extract_strided_slice %6 {offsets = [0, 512], sizes = [2, 256], strides = [1, 1]} : vector<2x768xf32> to vector<2x256xf32>
    %25 = vector.broadcast %1 : vector<1x256xf32> to vector<2x256xf32>
    %26 = arith.addf %24, %25 : vector<2x256xf32>
    %27 = arith.mulf %14, %26 : vector<2x256xf32>
    %28 = arith.addf %23, %27 : vector<2x256xf32>
    %29 = math.tanh %28 : vector<2x256xf32>
    %cst_8 = arith.constant 1.000000e+00 : f32
    %30 = vector.broadcast %cst_8 : f32 to vector<2x256xf32>
    %31 = arith.subf %30, %22 : vector<2x256xf32>
    %32 = arith.mulf %31, %29 : vector<2x256xf32>
    %33 = arith.mulf %22, %2 : vector<2x256xf32>
    %34 = arith.addf %32, %33 : vector<2x256xf32>
    %35 = arith.index_cast %c0_i32 : i32 to index
    %c0_9 = arith.constant 0 : index
    %c0_10 = arith.constant 0 : index
    %36 = vector.load %arg4[%35, %c0_9, %c0_10] : memref<8x2x256xf32, #tpu.memory_space<vmem>>, vector<1x2x256xf32>
    %37 = vector.shape_cast %36 : vector<1x2x256xf32> to vector<2x256xf32>
    %38 = vector.shape_cast %34 : vector<2x256xf32> to vector<1x2x256xf32>
    tpu.vector_store %arg4[%35, %c0_9, %c0_10], %38 {strides = array<i32>} : memref<8x2x256xf32, #tpu.memory_space<vmem>>, vector<1x2x256xf32>,
    %c1_i32 = arith.constant 1 : i32
    %39 = arith.index_cast %c1_i32 : i32 to index
    %c0_11 = arith.constant 0 : index
    %c0_12 = arith.constant 0 : index
    %40 = vector.load %arg1[%39, %c0_11, %c0_12] : memref<8x2x768xf32, #tpu.memory_space<vmem>>, vector<1x2x768xf32>
    %41 = vector.shape_cast %40 : vector<1x2x768xf32> to vector<2x768xf32>
    %cst_13 = arith.constant dense<0.000000e+00> : vector<2x768xf32>
    %42 = tpu.matmul %34, %0, %cst_13 {dimension_numbers = #tpu.dot_dimension_numbers<[1], [0], [0], [1], [0, 0, 1, 1], [], []>} : vector<2x256xf32>, vector<256x768xf32>, vector<2x768xf32> -> vector<2x768xf32>
    %43 = vector.extract_strided_slice %41 {offsets = [0, 0], sizes = [2, 256], strides = [1, 1]} : vector<2x768xf32> to vector<2x256xf32>
    %44 = vector.extract_strided_slice %42 {offsets = [0, 0], sizes = [2, 256], strides = [1, 1]} : vector<2x768xf32> to vector<2x256xf32>
    %45 = arith.addf %43, %44 : vector<2x256xf32>
    %46 = arith.negf %45 : vector<2x256xf32>
    %47 = math.exp %46 : vector<2x256xf32>
    %cst_14 = arith.constant 1.000000e+00 : f32
    %48 = vector.broadcast %cst_14 : f32 to vector<2x256xf32>
    %49 = arith.addf %48, %47 : vector<2x256xf32>
    %50 = arith.divf %48, %49 : vector<2x256xf32>
    %51 = vector.extract_strided_slice %41 {offsets = [0, 256], sizes = [2, 256], strides = [1, 1]} : vector<2x768xf32> to vector<2x256xf32>
    %52 = vector.extract_strided_slice %42 {offsets = [0, 256], sizes = [2, 256], strides = [1, 1]} : vector<2x768xf32> to vector<2x256xf32>
    %53 = arith.addf %51, %52 : vector<2x256xf32>
    %54 = arith.negf %53 : vector<2x256xf32>
    %55 = math.exp %54 : vector<2x256xf32>
    %cst_15 = arith.constant 1.000000e+00 : f32
    %56 = vector.broadcast %cst_15 : f32 to vector<2x256xf32>
    %57 = arith.addf %56, %55 : vector<2x256xf32>
    %58 = arith.divf %56, %57 : vector<2x256xf32>
    %59 = vector.extract_strided_slice %41 {offsets = [0, 512], sizes = [2, 256], strides = [1, 1]} : vector<2x768xf32> to vector<2x256xf32>
    %60 = vector.extract_strided_slice %42 {offsets = [0, 512], sizes = [2, 256], strides = [1, 1]} : vector<2x768xf32> to vector<2x256xf32>
    %61 = vector.broadcast %1 : vector<1x256xf32> to vector<2x256xf32>
    %62 = arith.addf %60, %61 : vector<2x256xf32>
    %63 = arith.mulf %50, %62 : vector<2x256xf32>
    %64 = arith.addf %59, %63 : vector<2x256xf32>
    %65 = math.tanh %64 : vector<2x256xf32>
    %cst_16 = arith.constant 1.000000e+00 : f32
    %66 = vector.broadcast %cst_16 : f32 to vector<2x256xf32>
    %67 = arith.subf %66, %58 : vector<2x256xf32>
    %68 = arith.mulf %67, %65 : vector<2x256xf32>
    %69 = arith.mulf %58, %34 : vector<2x256xf32>
    %70 = arith.addf %68, %69 : vector<2x256xf32>
    %71 = arith.index_cast %c1_i32 : i32 to index
    %c0_17 = arith.constant 0 : index
    %c0_18 = arith.constant 0 : index
    %72 = vector.load %arg4[%71, %c0_17, %c0_18] : memref<8x2x256xf32, #tpu.memory_space<vmem>>, vector<1x2x256xf32>
    %73 = vector.shape_cast %72 : vector<1x2x256xf32> to vector<2x256xf32>
    %74 = vector.shape_cast %70 : vector<2x256xf32> to vector<1x2x256xf32>
    tpu.vector_store %arg4[%71, %c0_17, %c0_18], %74 {strides = array<i32>} : memref<8x2x256xf32, #tpu.memory_space<vmem>>, vector<1x2x256xf32>,
    %c2_i32 = arith.constant 2 : i32
    %75 = arith.index_cast %c2_i32 : i32 to index
    %c0_19 = arith.constant 0 : index
    %c0_20 = arith.constant 0 : index
    %76 = vector.load %arg1[%75, %c0_19, %c0_20] : memref<8x2x768xf32, #tpu.memory_space<vmem>>, vector<1x2x768xf32>
    %77 = vector.shape_cast %76 : vector<1x2x768xf32> to vector<2x768xf32>
    %cst_21 = arith.constant dense<0.000000e+00> : vector<2x768xf32>
    %78 = tpu.matmul %70, %0, %cst_21 {dimension_numbers = #tpu.dot_dimension_numbers<[1], [0], [0], [1], [0, 0, 1, 1], [], []>} : vector<2x256xf32>, vector<256x768xf32>, vector<2x768xf32> -> vector<2x768xf32>
    %79 = vector.extract_strided_slice %77 {offsets = [0, 0], sizes = [2, 256], strides = [1, 1]} : vector<2x768xf32> to vector<2x256xf32>
    %80 = vector.extract_strided_slice %78 {offsets = [0, 0], sizes = [2, 256], strides = [1, 1]} : vector<2x768xf32> to vector<2x256xf32>
    %81 = arith.addf %79, %80 : vector<2x256xf32>
    %82 = arith.negf %81 : vector<2x256xf32>
    %83 = math.exp %82 : vector<2x256xf32>
    %cst_22 = arith.constant 1.000000e+00 : f32
    %84 = vector.broadcast %cst_22 : f32 to vector<2x256xf32>
    %85 = arith.addf %84, %83 : vector<2x256xf32>
    %86 = arith.divf %84, %85 : vector<2x256xf32>
    %87 = vector.extract_strided_slice %77 {offsets = [0, 256], sizes = [2, 256], strides = [1, 1]} : vector<2x768xf32> to vector<2x256xf32>
    %88 = vector.extract_strided_slice %78 {offsets = [0, 256], sizes = [2, 256], strides = [1, 1]} : vector<2x768xf32> to vector<2x256xf32>
    %89 = arith.addf %87, %88 : vector<2x256xf32>
    %90 = arith.negf %89 : vector<2x256xf32>
    %91 = math.exp %90 : vector<2x256xf32>
    %cst_23 = arith.constant 1.000000e+00 : f32
    %92 = vector.broadcast %cst_23 : f32 to vector<2x256xf32>
    %93 = arith.addf %92, %91 : vector<2x256xf32>
    %94 = arith.divf %92, %93 : vector<2x256xf32>
    %95 = vector.extract_strided_slice %77 {offsets = [0, 512], sizes = [2, 256], strides = [1, 1]} : vector<2x768xf32> to vector<2x256xf32>
    %96 = vector.extract_strided_slice %78 {offsets = [0, 512], sizes = [2, 256], strides = [1, 1]} : vector<2x768xf32> to vector<2x256xf32>
    %97 = vector.broadcast %1 : vector<1x256xf32> to vector<2x256xf32>
    %98 = arith.addf %96, %97 : vector<2x256xf32>
    %99 = arith.mulf %86, %98 : vector<2x256xf32>
    %100 = arith.addf %95, %99 : vector<2x256xf32>
    %101 = math.tanh %100 : vector<2x256xf32>
    %cst_24 = arith.constant 1.000000e+00 : f32
    %102 = vector.broadcast %cst_24 : f32 to vector<2x256xf32>
    %103 = arith.subf %102, %94 : vector<2x256xf32>
    %104 = arith.mulf %103, %101 : vector<2x256xf32>
    %105 = arith.mulf %94, %70 : vector<2x256xf32>
    %106 = arith.addf %104, %105 : vector<2x256xf32>
    %107 = arith.index_cast %c2_i32 : i32 to index
    %c0_25 = arith.constant 0 : index
    %c0_26 = arith.constant 0 : index
    %108 = vector.load %arg4[%107, %c0_25, %c0_26] : memref<8x2x256xf32, #tpu.memory_space<vmem>>, vector<1x2x256xf32>
    %109 = vector.shape_cast %108 : vector<1x2x256xf32> to vector<2x256xf32>
    %110 = vector.shape_cast %106 : vector<2x256xf32> to vector<1x2x256xf32>
    tpu.vector_store %arg4[%107, %c0_25, %c0_26], %110 {strides = array<i32>} : memref<8x2x256xf32, #tpu.memory_space<vmem>>, vector<1x2x256xf32>,
    %c3_i32 = arith.constant 3 : i32
    %111 = arith.index_cast %c3_i32 : i32 to index
    %c0_27 = arith.constant 0 : index
    %c0_28 = arith.constant 0 : index
    %112 = vector.load %arg1[%111, %c0_27, %c0_28] : memref<8x2x768xf32, #tpu.memory_space<vmem>>, vector<1x2x768xf32>
    %113 = vector.shape_cast %112 : vector<1x2x768xf32> to vector<2x768xf32>
    %cst_29 = arith.constant dense<0.000000e+00> : vector<2x768xf32>
    %114 = tpu.matmul %106, %0, %cst_29 {dimension_numbers = #tpu.dot_dimension_numbers<[1], [0], [0], [1], [0, 0, 1, 1], [], []>} : vector<2x256xf32>, vector<256x768xf32>, vector<2x768xf32> -> vector<2x768xf32>
    %115 = vector.extract_strided_slice %113 {offsets = [0, 0], sizes = [2, 256], strides = [1, 1]} : vector<2x768xf32> to vector<2x256xf32>
    %116 = vector.extract_strided_slice %114 {offsets = [0, 0], sizes = [2, 256], strides = [1, 1]} : vector<2x768xf32> to vector<2x256xf32>
    %117 = arith.addf %115, %116 : vector<2x256xf32>
    %118 = arith.negf %117 : vector<2x256xf32>
    %119 = math.exp %118 : vector<2x256xf32>
    %cst_30 = arith.constant 1.000000e+00 : f32
    %120 = vector.broadcast %cst_30 : f32 to vector<2x256xf32>
    %121 = arith.addf %120, %119 : vector<2x256xf32>
    %122 = arith.divf %120, %121 : vector<2x256xf32>
    %123 = vector.extract_strided_slice %113 {offsets = [0, 256], sizes = [2, 256], strides = [1, 1]} : vector<2x768xf32> to vector<2x256xf32>
    %124 = vector.extract_strided_slice %114 {offsets = [0, 256], sizes = [2, 256], strides = [1, 1]} : vector<2x768xf32> to vector<2x256xf32>
    %125 = arith.addf %123, %124 : vector<2x256xf32>
    %126 = arith.negf %125 : vector<2x256xf32>
    %127 = math.exp %126 : vector<2x256xf32>
    %cst_31 = arith.constant 1.000000e+00 : f32
    %128 = vector.broadcast %cst_31 : f32 to vector<2x256xf32>
    %129 = arith.addf %128, %127 : vector<2x256xf32>
    %130 = arith.divf %128, %129 : vector<2x256xf32>
    %131 = vector.extract_strided_slice %113 {offsets = [0, 512], sizes = [2, 256], strides = [1, 1]} : vector<2x768xf32> to vector<2x256xf32>
    %132 = vector.extract_strided_slice %114 {offsets = [0, 512], sizes = [2, 256], strides = [1, 1]} : vector<2x768xf32> to vector<2x256xf32>
    %133 = vector.broadcast %1 : vector<1x256xf32> to vector<2x256xf32>
    %134 = arith.addf %132, %133 : vector<2x256xf32>
    %135 = arith.mulf %122, %134 : vector<2x256xf32>
    %136 = arith.addf %131, %135 : vector<2x256xf32>
    %137 = math.tanh %136 : vector<2x256xf32>
    %cst_32 = arith.constant 1.000000e+00 : f32
    %138 = vector.broadcast %cst_32 : f32 to vector<2x256xf32>
    %139 = arith.subf %138, %130 : vector<2x256xf32>
    %140 = arith.mulf %139, %137 : vector<2x256xf32>
    %141 = arith.mulf %130, %106 : vector<2x256xf32>
    %142 = arith.addf %140, %141 : vector<2x256xf32>
    %143 = arith.index_cast %c3_i32 : i32 to index
    %c0_33 = arith.constant 0 : index
    %c0_34 = arith.constant 0 : index
    %144 = vector.load %arg4[%143, %c0_33, %c0_34] : memref<8x2x256xf32, #tpu.memory_space<vmem>>, vector<1x2x256xf32>
    %145 = vector.shape_cast %144 : vector<1x2x256xf32> to vector<2x256xf32>
    %146 = vector.shape_cast %142 : vector<2x256xf32> to vector<1x2x256xf32>
    tpu.vector_store %arg4[%143, %c0_33, %c0_34], %146 {strides = array<i32>} : memref<8x2x256xf32, #tpu.memory_space<vmem>>, vector<1x2x256xf32>,
    %c4_i32 = arith.constant 4 : i32
    %147 = arith.index_cast %c4_i32 : i32 to index
    %c0_35 = arith.constant 0 : index
    %c0_36 = arith.constant 0 : index
    %148 = vector.load %arg1[%147, %c0_35, %c0_36] : memref<8x2x768xf32, #tpu.memory_space<vmem>>, vector<1x2x768xf32>
    %149 = vector.shape_cast %148 : vector<1x2x768xf32> to vector<2x768xf32>
    %cst_37 = arith.constant dense<0.000000e+00> : vector<2x768xf32>
    %150 = tpu.matmul %142, %0, %cst_37 {dimension_numbers = #tpu.dot_dimension_numbers<[1], [0], [0], [1], [0, 0, 1, 1], [], []>} : vector<2x256xf32>, vector<256x768xf32>, vector<2x768xf32> -> vector<2x768xf32>
    %151 = vector.extract_strided_slice %149 {offsets = [0, 0], sizes = [2, 256], strides = [1, 1]} : vector<2x768xf32> to vector<2x256xf32>
    %152 = vector.extract_strided_slice %150 {offsets = [0, 0], sizes = [2, 256], strides = [1, 1]} : vector<2x768xf32> to vector<2x256xf32>
    %153 = arith.addf %151, %152 : vector<2x256xf32>
    %154 = arith.negf %153 : vector<2x256xf32>
    %155 = math.exp %154 : vector<2x256xf32>
    %cst_38 = arith.constant 1.000000e+00 : f32
    %156 = vector.broadcast %cst_38 : f32 to vector<2x256xf32>
    %157 = arith.addf %156, %155 : vector<2x256xf32>
    %158 = arith.divf %156, %157 : vector<2x256xf32>
    %159 = vector.extract_strided_slice %149 {offsets = [0, 256], sizes = [2, 256], strides = [1, 1]} : vector<2x768xf32> to vector<2x256xf32>
    %160 = vector.extract_strided_slice %150 {offsets = [0, 256], sizes = [2, 256], strides = [1, 1]} : vector<2x768xf32> to vector<2x256xf32>
    %161 = arith.addf %159, %160 : vector<2x256xf32>
    %162 = arith.negf %161 : vector<2x256xf32>
    %163 = math.exp %162 : vector<2x256xf32>
    %cst_39 = arith.constant 1.000000e+00 : f32
    %164 = vector.broadcast %cst_39 : f32 to vector<2x256xf32>
    %165 = arith.addf %164, %163 : vector<2x256xf32>
    %166 = arith.divf %164, %165 : vector<2x256xf32>
    %167 = vector.extract_strided_slice %149 {offsets = [0, 512], sizes = [2, 256], strides = [1, 1]} : vector<2x768xf32> to vector<2x256xf32>
    %168 = vector.extract_strided_slice %150 {offsets = [0, 512], sizes = [2, 256], strides = [1, 1]} : vector<2x768xf32> to vector<2x256xf32>
    %169 = vector.broadcast %1 : vector<1x256xf32> to vector<2x256xf32>
    %170 = arith.addf %168, %169 : vector<2x256xf32>
    %171 = arith.mulf %158, %170 : vector<2x256xf32>
    %172 = arith.addf %167, %171 : vector<2x256xf32>
    %173 = math.tanh %172 : vector<2x256xf32>
    %cst_40 = arith.constant 1.000000e+00 : f32
    %174 = vector.broadcast %cst_40 : f32 to vector<2x256xf32>
    %175 = arith.subf %174, %166 : vector<2x256xf32>
    %176 = arith.mulf %175, %173 : vector<2x256xf32>
    %177 = arith.mulf %166, %142 : vector<2x256xf32>
    %178 = arith.addf %176, %177 : vector<2x256xf32>
    %179 = arith.index_cast %c4_i32 : i32 to index
    %c0_41 = arith.constant 0 : index
    %c0_42 = arith.constant 0 : index
    %180 = vector.load %arg4[%179, %c0_41, %c0_42] : memref<8x2x256xf32, #tpu.memory_space<vmem>>, vector<1x2x256xf32>
    %181 = vector.shape_cast %180 : vector<1x2x256xf32> to vector<2x256xf32>
    %182 = vector.shape_cast %178 : vector<2x256xf32> to vector<1x2x256xf32>
    tpu.vector_store %arg4[%179, %c0_41, %c0_42], %182 {strides = array<i32>} : memref<8x2x256xf32, #tpu.memory_space<vmem>>, vector<1x2x256xf32>,
    %c5_i32 = arith.constant 5 : i32
    %183 = arith.index_cast %c5_i32 : i32 to index
    %c0_43 = arith.constant 0 : index
    %c0_44 = arith.constant 0 : index
    %184 = vector.load %arg1[%183, %c0_43, %c0_44] : memref<8x2x768xf32, #tpu.memory_space<vmem>>, vector<1x2x768xf32>
    %185 = vector.shape_cast %184 : vector<1x2x768xf32> to vector<2x768xf32>
    %cst_45 = arith.constant dense<0.000000e+00> : vector<2x768xf32>
    %186 = tpu.matmul %178, %0, %cst_45 {dimension_numbers = #tpu.dot_dimension_numbers<[1], [0], [0], [1], [0, 0, 1, 1], [], []>} : vector<2x256xf32>, vector<256x768xf32>, vector<2x768xf32> -> vector<2x768xf32>
    %187 = vector.extract_strided_slice %185 {offsets = [0, 0], sizes = [2, 256], strides = [1, 1]} : vector<2x768xf32> to vector<2x256xf32>
    %188 = vector.extract_strided_slice %186 {offsets = [0, 0], sizes = [2, 256], strides = [1, 1]} : vector<2x768xf32> to vector<2x256xf32>
    %189 = arith.addf %187, %188 : vector<2x256xf32>
    %190 = arith.negf %189 : vector<2x256xf32>
    %191 = math.exp %190 : vector<2x256xf32>
    %cst_46 = arith.constant 1.000000e+00 : f32
    %192 = vector.broadcast %cst_46 : f32 to vector<2x256xf32>
    %193 = arith.addf %192, %191 : vector<2x256xf32>
    %194 = arith.divf %192, %193 : vector<2x256xf32>
    %195 = vector.extract_strided_slice %185 {offsets = [0, 256], sizes = [2, 256], strides = [1, 1]} : vector<2x768xf32> to vector<2x256xf32>
    %196 = vector.extract_strided_slice %186 {offsets = [0, 256], sizes = [2, 256], strides = [1, 1]} : vector<2x768xf32> to vector<2x256xf32>
    %197 = arith.addf %195, %196 : vector<2x256xf32>
    %198 = arith.negf %197 : vector<2x256xf32>
    %199 = math.exp %198 : vector<2x256xf32>
    %cst_47 = arith.constant 1.000000e+00 : f32
    %200 = vector.broadcast %cst_47 : f32 to vector<2x256xf32>
    %201 = arith.addf %200, %199 : vector<2x256xf32>
    %202 = arith.divf %200, %201 : vector<2x256xf32>
    %203 = vector.extract_strided_slice %185 {offsets = [0, 512], sizes = [2, 256], strides = [1, 1]} : vector<2x768xf32> to vector<2x256xf32>
    %204 = vector.extract_strided_slice %186 {offsets = [0, 512], sizes = [2, 256], strides = [1, 1]} : vector<2x768xf32> to vector<2x256xf32>
    %205 = vector.broadcast %1 : vector<1x256xf32> to vector<2x256xf32>
    %206 = arith.addf %204, %205 : vector<2x256xf32>
    %207 = arith.mulf %194, %206 : vector<2x256xf32>
    %208 = arith.addf %203, %207 : vector<2x256xf32>
    %209 = math.tanh %208 : vector<2x256xf32>
    %cst_48 = arith.constant 1.000000e+00 : f32
    %210 = vector.broadcast %cst_48 : f32 to vector<2x256xf32>
    %211 = arith.subf %210, %202 : vector<2x256xf32>
    %212 = arith.mulf %211, %209 : vector<2x256xf32>
    %213 = arith.mulf %202, %178 : vector<2x256xf32>
    %214 = arith.addf %212, %213 : vector<2x256xf32>
    %215 = arith.index_cast %c5_i32 : i32 to index
    %c0_49 = arith.constant 0 : index
    %c0_50 = arith.constant 0 : index
    %216 = vector.load %arg4[%215, %c0_49, %c0_50] : memref<8x2x256xf32, #tpu.memory_space<vmem>>, vector<1x2x256xf32>
    %217 = vector.shape_cast %216 : vector<1x2x256xf32> to vector<2x256xf32>
    %218 = vector.shape_cast %214 : vector<2x256xf32> to vector<1x2x256xf32>
    tpu.vector_store %arg4[%215, %c0_49, %c0_50], %218 {strides = array<i32>} : memref<8x2x256xf32, #tpu.memory_space<vmem>>, vector<1x2x256xf32>,
    %c6_i32 = arith.constant 6 : i32
    %219 = arith.index_cast %c6_i32 : i32 to index
    %c0_51 = arith.constant 0 : index
    %c0_52 = arith.constant 0 : index
    %220 = vector.load %arg1[%219, %c0_51, %c0_52] : memref<8x2x768xf32, #tpu.memory_space<vmem>>, vector<1x2x768xf32>
    %221 = vector.shape_cast %220 : vector<1x2x768xf32> to vector<2x768xf32>
    %cst_53 = arith.constant dense<0.000000e+00> : vector<2x768xf32>
    %222 = tpu.matmul %214, %0, %cst_53 {dimension_numbers = #tpu.dot_dimension_numbers<[1], [0], [0], [1], [0, 0, 1, 1], [], []>} : vector<2x256xf32>, vector<256x768xf32>, vector<2x768xf32> -> vector<2x768xf32>
    %223 = vector.extract_strided_slice %221 {offsets = [0, 0], sizes = [2, 256], strides = [1, 1]} : vector<2x768xf32> to vector<2x256xf32>
    %224 = vector.extract_strided_slice %222 {offsets = [0, 0], sizes = [2, 256], strides = [1, 1]} : vector<2x768xf32> to vector<2x256xf32>
    %225 = arith.addf %223, %224 : vector<2x256xf32>
    %226 = arith.negf %225 : vector<2x256xf32>
    %227 = math.exp %226 : vector<2x256xf32>
    %cst_54 = arith.constant 1.000000e+00 : f32
    %228 = vector.broadcast %cst_54 : f32 to vector<2x256xf32>
    %229 = arith.addf %228, %227 : vector<2x256xf32>
    %230 = arith.divf %228, %229 : vector<2x256xf32>
    %231 = vector.extract_strided_slice %221 {offsets = [0, 256], sizes = [2, 256], strides = [1, 1]} : vector<2x768xf32> to vector<2x256xf32>
    %232 = vector.extract_strided_slice %222 {offsets = [0, 256], sizes = [2, 256], strides = [1, 1]} : vector<2x768xf32> to vector<2x256xf32>
    %233 = arith.addf %231, %232 : vector<2x256xf32>
    %234 = arith.negf %233 : vector<2x256xf32>
    %235 = math.exp %234 : vector<2x256xf32>
    %cst_55 = arith.constant 1.000000e+00 : f32
    %236 = vector.broadcast %cst_55 : f32 to vector<2x256xf32>
    %237 = arith.addf %236, %235 : vector<2x256xf32>
    %238 = arith.divf %236, %237 : vector<2x256xf32>
    %239 = vector.extract_strided_slice %221 {offsets = [0, 512], sizes = [2, 256], strides = [1, 1]} : vector<2x768xf32> to vector<2x256xf32>
    %240 = vector.extract_strided_slice %222 {offsets = [0, 512], sizes = [2, 256], strides = [1, 1]} : vector<2x768xf32> to vector<2x256xf32>
    %241 = vector.broadcast %1 : vector<1x256xf32> to vector<2x256xf32>
    %242 = arith.addf %240, %241 : vector<2x256xf32>
    %243 = arith.mulf %230, %242 : vector<2x256xf32>
    %244 = arith.addf %239, %243 : vector<2x256xf32>
    %245 = math.tanh %244 : vector<2x256xf32>
    %cst_56 = arith.constant 1.000000e+00 : f32
    %246 = vector.broadcast %cst_56 : f32 to vector<2x256xf32>
    %247 = arith.subf %246, %238 : vector<2x256xf32>
    %248 = arith.mulf %247, %245 : vector<2x256xf32>
    %249 = arith.mulf %238, %214 : vector<2x256xf32>
    %250 = arith.addf %248, %249 : vector<2x256xf32>
    %251 = arith.index_cast %c6_i32 : i32 to index
    %c0_57 = arith.constant 0 : index
    %c0_58 = arith.constant 0 : index
    %252 = vector.load %arg4[%251, %c0_57, %c0_58] : memref<8x2x256xf32, #tpu.memory_space<vmem>>, vector<1x2x256xf32>
    %253 = vector.shape_cast %252 : vector<1x2x256xf32> to vector<2x256xf32>
    %254 = vector.shape_cast %250 : vector<2x256xf32> to vector<1x2x256xf32>
    tpu.vector_store %arg4[%251, %c0_57, %c0_58], %254 {strides = array<i32>} : memref<8x2x256xf32, #tpu.memory_space<vmem>>, vector<1x2x256xf32>,
    %c7_i32 = arith.constant 7 : i32
    %255 = arith.index_cast %c7_i32 : i32 to index
    %c0_59 = arith.constant 0 : index
    %c0_60 = arith.constant 0 : index
    %256 = vector.load %arg1[%255, %c0_59, %c0_60] : memref<8x2x768xf32, #tpu.memory_space<vmem>>, vector<1x2x768xf32>
    %257 = vector.shape_cast %256 : vector<1x2x768xf32> to vector<2x768xf32>
    %cst_61 = arith.constant dense<0.000000e+00> : vector<2x768xf32>
    %258 = tpu.matmul %250, %0, %cst_61 {dimension_numbers = #tpu.dot_dimension_numbers<[1], [0], [0], [1], [0, 0, 1, 1], [], []>} : vector<2x256xf32>, vector<256x768xf32>, vector<2x768xf32> -> vector<2x768xf32>
    %259 = vector.extract_strided_slice %257 {offsets = [0, 0], sizes = [2, 256], strides = [1, 1]} : vector<2x768xf32> to vector<2x256xf32>
    %260 = vector.extract_strided_slice %258 {offsets = [0, 0], sizes = [2, 256], strides = [1, 1]} : vector<2x768xf32> to vector<2x256xf32>
    %261 = arith.addf %259, %260 : vector<2x256xf32>
    %262 = arith.negf %261 : vector<2x256xf32>
    %263 = math.exp %262 : vector<2x256xf32>
    %cst_62 = arith.constant 1.000000e+00 : f32
    %264 = vector.broadcast %cst_62 : f32 to vector<2x256xf32>
    %265 = arith.addf %264, %263 : vector<2x256xf32>
    %266 = arith.divf %264, %265 : vector<2x256xf32>
    %267 = vector.extract_strided_slice %257 {offsets = [0, 256], sizes = [2, 256], strides = [1, 1]} : vector<2x768xf32> to vector<2x256xf32>
    %268 = vector.extract_strided_slice %258 {offsets = [0, 256], sizes = [2, 256], strides = [1, 1]} : vector<2x768xf32> to vector<2x256xf32>
    %269 = arith.addf %267, %268 : vector<2x256xf32>
    %270 = arith.negf %269 : vector<2x256xf32>
    %271 = math.exp %270 : vector<2x256xf32>
    %cst_63 = arith.constant 1.000000e+00 : f32
    %272 = vector.broadcast %cst_63 : f32 to vector<2x256xf32>
    %273 = arith.addf %272, %271 : vector<2x256xf32>
    %274 = arith.divf %272, %273 : vector<2x256xf32>
    %275 = vector.extract_strided_slice %257 {offsets = [0, 512], sizes = [2, 256], strides = [1, 1]} : vector<2x768xf32> to vector<2x256xf32>
    %276 = vector.extract_strided_slice %258 {offsets = [0, 512], sizes = [2, 256], strides = [1, 1]} : vector<2x768xf32> to vector<2x256xf32>
    %277 = vector.broadcast %1 : vector<1x256xf32> to vector<2x256xf32>
    %278 = arith.addf %276, %277 : vector<2x256xf32>
    %279 = arith.mulf %266, %278 : vector<2x256xf32>
    %280 = arith.addf %275, %279 : vector<2x256xf32>
    %281 = math.tanh %280 : vector<2x256xf32>
    %cst_64 = arith.constant 1.000000e+00 : f32
    %282 = vector.broadcast %cst_64 : f32 to vector<2x256xf32>
    %283 = arith.subf %282, %274 : vector<2x256xf32>
    %284 = arith.mulf %283, %281 : vector<2x256xf32>
    %285 = arith.mulf %274, %250 : vector<2x256xf32>
    %286 = arith.addf %284, %285 : vector<2x256xf32>
    %287 = arith.index_cast %c7_i32 : i32 to index
    %c0_65 = arith.constant 0 : index
    %c0_66 = arith.constant 0 : index
    %288 = vector.load %arg4[%287, %c0_65, %c0_66] : memref<8x2x256xf32, #tpu.memory_space<vmem>>, vector<1x2x256xf32>
    %289 = vector.shape_cast %288 : vector<1x2x256xf32> to vector<2x256xf32>
    %290 = vector.shape_cast %286 : vector<2x256xf32> to vector<1x2x256xf32>
    tpu.vector_store %arg4[%287, %c0_65, %c0_66], %290 {strides = array<i32>} : memref<8x2x256xf32, #tpu.memory_space<vmem>>, vector<1x2x256xf32>,
    %c8_i32 = arith.constant 8 : i32
    return
  }
  func.func @transform_0(%arg0: i32) -> (i32, i32, i32) {
    %c0_i32 = arith.constant 0 : i32
    %c0_i32_0 = arith.constant 0 : i32
    %c0_i32_1 = arith.constant 0 : i32
    %c0_i32_2 = arith.constant 0 : i32
    return %c0_i32, %c0_i32_0, %c0_i32_1 : i32, i32, i32
  }
  func.func @transform_1(%arg0: i32) -> (i32, i32) {
    %c0_i32 = arith.constant 0 : i32
    %c0_i32_0 = arith.constant 0 : i32
    %c0_i32_1 = arith.constant 0 : i32
    return %c0_i32, %c0_i32_0 : i32, i32
  }
  func.func @transform_2(%arg0: i32) -> (i32, i32) {
    %c0_i32 = arith.constant 0 : i32
    %c0_i32_0 = arith.constant 0 : i32
    %c0_i32_1 = arith.constant 0 : i32
    return %c0_i32, %c0_i32_0 : i32, i32
  }
  func.func @transform_3(%arg0: i32) -> (i32, i32, i32) {
    %c0_i32 = arith.constant 0 : i32
    %c0_i32_0 = arith.constant 0 : i32
    %c0_i32_1 = arith.constant 0 : i32
    %c0_i32_2 = arith.constant 0 : i32
    return %c0_i32, %c0_i32_0, %c0_i32_1 : i32, i32, i32
  }
}

</mosaic_0001>

<bundles_post_ra>
// kernel: gru_pallas.1
= control target key start
LH: loop header
LB: loop body
LE: loop exit
PB: predicated region body
PF: predicated region fallthrough
CT: control target
= control target key end

     0   :  { %vm452_vm0 = vcmask 1041408   ;;  %s9128_s1 = inlined_call_operand.vmem [shape: f32[256,768], index: 1, kind: input, shape index: {}]   ;;  %s9129_s0 = inlined_call_operand.vmem [shape: f32[8,2,768], index: 0, kind: input, shape index: {}]   ;;  %s9130_s2 = inlined_call_operand.vmem [shape: f32[1,256], index: 2, kind: input, shape index: {}]   ;;  %s9131_s3 = inlined_call_operand.vmem [shape: f32[8,2,256], index: 3, kind: output, shape index: {}]  }
   0x1   :  { %v3471_v0 = vld [vmem:[%s9128_s1 + $0x2d8] sm:$0xff]  ;;  %v3481_v2 = vld [vmem:[%s9128_s1 + $0x2a8] sm:$0xff]  ;;  %v3503_v6 = vld [vmem:[%s9128_s1 + $0x2d0] sm:$0xff] }
   0x2   :  { %v3476_v1 = vld [vmem:[%s9128_s1 + $0x5d8] sm:$0xff]  ;;  %249 = vmatpush.msra.mxu2 %v3471_v0  ;;  %v3488_v3 = vld [vmem:[%s9128_s1 + $0x5a8] sm:$0xff]  ;;  %v3515_v8 = vld [vmem:[%s9128_s1 + $0x5d0] sm:$0xff]  ;;  %209 = vmatpush.msra.mxu0 %v3503_v6 }
   0x3   :  { %269 = vmatpush.msra.mxu3 %v3476_v1  ;;  %v3493_v4 = vld [vmem:[%s9128_s1 + $0x278] sm:$0xff]  ;;  %v3510_v7 = vld [vmem:[%s9128_s1 + $0x248] sm:$0xff]  ;;  %229 = vmatpush.msra.mxu1 %v3515_v8  ;;  %v3527_v10 = vld [vmem:[%s9128_s1 + $0x2a0] sm:$0xff] }
   0x4   :  { %v3498_v5 = vld [vmem:[%s9128_s1 + $0x578] sm:$0xff]  ;;  %250 = vmatpush.msra.mxu2 %v3481_v2  ;;  %v3520_v9 = vld [vmem:[%s9128_s1 + $0x548] sm:$0xff]  ;;  %v3532_v11 = vld [vmem:[%s9128_s1 + $0x5a0] sm:$0xff]  ;;  %210 = vmatpush.msra.mxu0 %v3527_v10 }
   0x5   :  { %270 = vmatpush.msra.mxu3 %v3488_v3  ;;  %v3539_v12 = vld [vmem:[%s9128_s1 + $0x270] sm:$0xff]  ;;  %v3549_v14 = vld [vmem:[%s9128_s1 + $0x218] sm:$0xff]  ;;  %230 = vmatpush.msra.mxu1 %v3532_v11  ;;  %v3563_v16 = vld [vmem:[%s9128_s1 + $0x240] sm:$0xff] }
   0x6   :  { %251 = vmatpush.msra.mxu2 %v3493_v4  ;;  %v3544_v13 = vld [vmem:[%s9128_s1 + $0x570] sm:$0xff]  ;;  %v3554_v15 = vld [vmem:[%s9128_s1 + $0x518] sm:$0xff]  ;;  %v3568_v17 = vld [vmem:[%s9128_s1 + $0x540] sm:$0xff]  ;;  %211 = vmatpush.msra.mxu0 %v3539_v12 }
   0x7   :  { %271 = vmatpush.msra.mxu3 %v3498_v5  ;;  %v3573_v18 = vld [vmem:[%s9128_s1 + $0x1e8] sm:$0xff]  ;;  %231 = vmatpush.msra.mxu1 %v3544_v13  ;;  %v3587_v20 = vld [vmem:[%s9128_s1 + $0x210] sm:$0xff]  ;;  %v3597_v22 = vld [vmem:[%s9128_s1 + $0x1b8] sm:$0xff] }
   0x8   :  { %252 = vmatpush.msra.mxu2 %v3510_v7  ;;  %v3578_v19 = vld [vmem:[%s9128_s1 + $0x4e8] sm:$0xff]  ;;  %v3592_v21 = vld [vmem:[%s9128_s1 + $0x510] sm:$0xff]  ;;  %v3602_v23 = vld [vmem:[%s9128_s1 + $0x4b8] sm:$0xff]  ;;  %212 = vmatpush.msra.mxu0 %v3563_v16 }
   0x9   :  { %272 = vmatpush.msra.mxu3 %v3520_v9  ;;  %232 = vmatpush.msra.mxu1 %v3568_v17  ;;  %v3611_v24 = vld [vmem:[%s9128_s1 + $0x1e0] sm:$0xff]  ;;  %v3621_v26 = vld [vmem:[%s9128_s1 + $0x188] sm:$0xff]  ;;  %v3635_v28 = vld [vmem:[%s9128_s1 + $0x1b0] sm:$0xff] }
   0xa   :  { %253 = vmatpush.msra.mxu2 %v3549_v14  ;;  %v3616_v25 = vld [vmem:[%s9128_s1 + $0x4e0] sm:$0xff]  ;;  %v3626_v27 = vld [vmem:[%s9128_s1 + $0x488] sm:$0xff]  ;;  %213 = vmatpush.msra.mxu0 %v3587_v20  ;;  %v3640_v29 = vld [vmem:[%s9128_s1 + $0x4b0] sm:$0xff] }
   0xb   :  { %273 = vmatpush.msra.mxu3 %v3554_v15  ;;  %233 = vmatpush.msra.mxu1 %v3592_v21  ;;  %v3645_v30 = vld [vmem:[%s9128_s1 + $0x158] sm:$0xff]  ;;  %v3659_v32 = vld [vmem:[%s9128_s1 + $0x180] sm:$0xff]  ;;  %v3669_v34 = vld [vmem:[%s9128_s1 + $0x128] sm:$0xff] }
   0xc   :  { %254 = vmatpush.msra.mxu2 %v3573_v18  ;;  %v3650_v31 = vld [vmem:[%s9128_s1 + $0x458] sm:$0xff]  ;;  %214 = vmatpush.msra.mxu0 %v3611_v24  ;;  %v3664_v33 = vld [vmem:[%s9128_s1 + $0x480] sm:$0xff]  ;;  %v3674_v35 = vld [vmem:[%s9128_s1 + $0x428] sm:$0xff] }
   0xd   :  { %274 = vmatpush.msra.mxu3 %v3578_v19  ;;  %234 = vmatpush.msra.mxu1 %v3616_v25  ;;  %v3683_v36 = vld [vmem:[%s9128_s1 + $0x150] sm:$0xff]  ;;  %v3693_v38 = vld [vmem:[%s9128_s1 + $0xf8] sm:$0xff]  ;;  %v3707_v40 = vld [vmem:[%s9128_s1 + $0x120] sm:$0xff] }
   0xe   :  { %255 = vmatpush.msra.mxu2 %v3597_v22  ;;  %215 = vmatpush.msra.mxu0 %v3635_v28  ;;  %v3688_v37 = vld [vmem:[%s9128_s1 + $0x450] sm:$0xff]  ;;  %v3698_v39 = vld [vmem:[%s9128_s1 + $0x3f8] sm:$0xff]  ;;  %v3712_v41 = vld [vmem:[%s9128_s1 + $0x420] sm:$0xff] }
   0xf   :  { %275 = vmatpush.msra.mxu3 %v3602_v23  ;;  %235 = vmatpush.msra.mxu1 %v3640_v29  ;;  %v3717_v42 = vld [vmem:[%s9128_s1 + $0xc8] sm:$0xff]  ;;  %v3731_v44 = vld [vmem:[%s9128_s1 + $0xf0] sm:$0xff]  ;;  %v3741_v46 = vld [vmem:[%s9128_s1 + $0x98] sm:$0xff] }
  0x10   :  { %256 = vmatpush.msra.mxu2 %v3621_v26  ;;  %216 = vmatpush.msra.mxu0 %v3659_v32  ;;  %v3722_v43 = vld [vmem:[%s9128_s1 + $0x3c8] sm:$0xff]  ;;  %v3736_v45 = vld [vmem:[%s9128_s1 + $0x3f0] sm:$0xff]  ;;  %v3746_v47 = vld [vmem:[%s9128_s1 + $0x398] sm:$0xff] }
  0x11   :  { %276 = vmatpush.msra.mxu3 %v3626_v27  ;;  %236 = vmatpush.msra.mxu1 %v3664_v33  ;;  %v3755_v48 = vld [vmem:[%s9128_s1 + $0xc0] sm:$0xff]  ;;  %v3765_v50 = vld [vmem:[%s9128_s1 + $0x68] sm:$0xff]  ;;  %v3779_v52 = vld [vmem:[%s9128_s1 + $0x90] sm:$0xff] }
  0x12   :  { %257 = vmatpush.msra.mxu2 %v3645_v30  ;;  %217 = vmatpush.msra.mxu0 %v3683_v36  ;;  %v3760_v49 = vld [vmem:[%s9128_s1 + $0x3c0] sm:$0xff]  ;;  %v3770_v51 = vld [vmem:[%s9128_s1 + $0x368] sm:$0xff]  ;;  %9662 = vst [vmem:[#allocation2_spill] sm:$0xff] %v3779_v52  ;;  %v3784_v53 = vld [vmem:[%s9128_s1 + $0x390] sm:$0xff] }
  0x13   :  { %277 = vmatpush.msra.mxu3 %v3650_v31  ;;  %237 = vmatpush.msra.mxu1 %v3688_v37  ;;  %9663 = vst [vmem:[#allocation3_spill] sm:$0xff] %v3784_v53  ;;  %v3789_v54 = vld [vmem:[%s9128_s1 + $0x38] sm:$0xff]  ;;  %v3803_v56 = vld [vmem:[%s9128_s1 + $0x60] sm:$0xff]  ;;  %v3813_v58 = vld [vmem:[%s9128_s1 + $0x8] sm:$0xff] }
  0x14   :  { %258 = vmatpush.msra.mxu2 %v3669_v34  ;;  %218 = vmatpush.msra.mxu0 %v3707_v40  ;;  %v3794_v55 = vld [vmem:[%s9128_s1 + $0x338] sm:$0xff]  ;;  %9664 = vst [vmem:[#allocation4_spill] sm:$0xff] %v3803_v56  ;;  %v3808_v57 = vld [vmem:[%s9128_s1 + $0x360] sm:$0xff]  ;;  %v3818_v59 = vld [vmem:[%s9128_s1 + $0x308] sm:$0xff] }
  0x15   :  { %278 = vmatpush.msra.mxu3 %v3674_v35  ;;  %238 = vmatpush.msra.mxu1 %v3712_v41  ;;  %9665 = vst [vmem:[#allocation5_spill] sm:$0xff] %v3808_v57  ;;  %v3827_v60 = vld [vmem:[%s9128_s1 + $0x2e8] sm:$0xff]  ;;  %v3839_v62 = vld [vmem:[%s9128_s1 + $0x30] sm:$0xff] }
  0x16   :  { %259 = vmatpush.msra.mxu2 %v3693_v38  ;;  %219 = vmatpush.msra.mxu0 %v3731_v44  ;;  %9666 = vst [vmem:[#allocation6_spill] sm:$0xff] %v3813_v58  ;;  %v3832_v61 = vld [vmem:[%s9128_s1 + $0x5e8] sm:$0xff]  ;;  %v3844_v63 = vld [vmem:[%s9128_s1 + $0x330] sm:$0xff] }
  0x17   :  { %279 = vmatpush.msra.mxu3 %v3698_v39  ;;  %239 = vmatpush.msra.mxu1 %v3736_v45  ;;  %9667 = vst [vmem:[#allocation7_spill] sm:$0xff] %v3818_v59 }
  0x18   :  { %260 = vmatpush.msra.mxu2 %v3717_v42  ;;  %220 = vmatpush.msra.mxu0 %v3755_v48  ;;  %9668 = vst [vmem:[#allocation8_spill] sm:$0xff] %v3827_v60 }
  0x19   :  { %280 = vmatpush.msra.mxu3 %v3722_v43  ;;  %240 = vmatpush.msra.mxu1 %v3760_v49  ;;  %9669 = vst [vmem:[#allocation9_spill] sm:$0xff] %v3832_v61 }
  0x1a   :  { %261 = vmatpush.msra.mxu2 %v3741_v46  ;;  %221 = vmatpush.msra.mxu0 %v3779_v52  ;;  %9670 = vst [vmem:[#allocation10_spill] sm:$0xff] %v3839_v62  ;;  %v3892_v52 = vld [vmem:[%s9128_s1 + $0x5e0] sm:$0xff] }
  0x1b   :  { %281 = vmatpush.msra.mxu3 %v3746_v47  ;;  %241 = vmatpush.msra.mxu1 %v3784_v53  ;;  %9671 = vst [vmem:[#allocation11_spill] sm:$0xff] %v3844_v63  ;;  %v3873_v53 = vld [vmem:[%s9128_s1 + $0x288] sm:$0xff] }
  0x1c   :  { %262 = vmatpush.msra.mxu2 %v3765_v50  ;;  %222 = vmatpush.msra.mxu0 %v3803_v56  ;;  %v3851_v56 = vld [vmem:[%s9128_s1 + $0x2b8] sm:$0xff]  ;;  %9675 = vst [vmem:[#allocation15_spill] sm:$0xff] %v3873_v53 }
  0x1d   :  { %282 = vmatpush.msra.mxu3 %v3770_v51  ;;  %242 = vmatpush.msra.mxu1 %v3808_v57  ;;  %9672 = vst [vmem:[#allocation12_spill] sm:$0xff] %v3851_v56  ;;  %v3856_v57 = vld [vmem:[%s9128_s1 + $0x5b8] sm:$0xff] }
  0x1e   :  { %263 = vmatpush.msra.mxu2 %v3789_v54  ;;  %9673 = vst [vmem:[#allocation13_spill] sm:$0xff] %v3856_v57  ;;  %223 = vmatpush.msra.mxu0 %v3839_v62  ;;  %v3897_v62 = vld [vmem:[%s9128_s1 + $0x258] sm:$0xff] }
  0x1f   :  { %283 = vmatpush.msra.mxu3 %v3794_v55  ;;  %243 = vmatpush.msra.mxu1 %v3844_v63  ;;  %9678 = vst [vmem:[#allocation18_spill] sm:$0xff] %v3892_v52  ;;  %v3916_v63 = vld [vmem:[%s9128_s1 + $0x5b0] sm:$0xff] }
  0x20   :  { %264 = vmatpush.msra.mxu2 %v3813_v58  ;;  %v3863_v58 = vld [vmem:[%s9128_s1] sm:$0xff]  ;;  %9679 = vst [vmem:[#allocation19_spill] sm:$0xff] %v3897_v62 }
  0x21   :  { %284 = vmatpush.msra.mxu3 %v3818_v59  ;;  %v3868_v59 = vld [vmem:[%s9128_s1 + $0x300] sm:$0xff]  ;;  %224 = vmatpush.msra.mxu0 %v3863_v58  ;;  %9682 = vst [vmem:[#allocation22_spill] sm:$0xff] %v3916_v63 }
  0x22   :  { %329 = vmatpush.msrb.mxu2 %v3827_v60  ;;  %9674 = vst [vmem:[#allocation14_spill] sm:$0xff] %v3868_v59  ;;  %v3878_v60 = vld [vmem:[%s9128_s1 + $0x588] sm:$0xff]  ;;  %244 = vmatpush.msra.mxu1 %v3868_v59 }
  0x23   :  { %349 = vmatpush.msrb.mxu3 %v3832_v61  ;;  %9676 = vst [vmem:[#allocation16_spill] sm:$0xff] %v3878_v60  ;;  %v3887_v61 = vld [vmem:[%s9128_s1 + $0x2e0] sm:$0xff]  ;;  %v4160_v59 = vld [vmem:[%s9128_s1 + $0x348] sm:$0xff] }
  0x24   :  { %330 = vmatpush.msrb.mxu2 %v3851_v56  ;;  %9677 = vst [vmem:[#allocation17_spill] sm:$0xff] %v3887_v61  ;;  %v3902_v56 = vld [vmem:[%s9128_s1 + $0x558] sm:$0xff]  ;;  %289 = vmatpush.msrb.mxu0 %v3887_v61  ;;  %v3935_v61 = vld [vmem:[%s9128_s1 + $0x280] sm:$0xff] }
  0x25   :  { %350 = vmatpush.msrb.mxu3 %v3856_v57  ;;  %9680 = vst [vmem:[#allocation20_spill] sm:$0xff] %v3902_v56  ;;  %v3911_v57 = vld [vmem:[%s9128_s1 + $0x2b0] sm:$0xff]  ;;  %309 = vmatpush.msrb.mxu1 %v3892_v52  ;;  %v3940_v52 = vld [vmem:[%s9128_s1 + $0x580] sm:$0xff] }
  0x26   :  { %331 = vmatpush.msrb.mxu2 %v3873_v53  ;;  %9681 = vst [vmem:[#allocation21_spill] sm:$0xff] %v3911_v57  ;;  %v3923_v53 = vld [vmem:[%s9128_s1 + $0x228] sm:$0xff]  ;;  %290 = vmatpush.msrb.mxu0 %v3911_v57  ;;  %v3959_v57 = vld [vmem:[%s9128_s1 + $0x250] sm:$0xff] }
  0x27   :  { %351 = vmatpush.msrb.mxu3 %v3878_v60  ;;  %9683 = vst [vmem:[#allocation23_spill] sm:$0xff] %v3923_v53  ;;  %v3928_v60 = vld [vmem:[%s9128_s1 + $0x528] sm:$0xff]  ;;  %310 = vmatpush.msrb.mxu1 %v3916_v63  ;;  %v3964_v63 = vld [vmem:[%s9128_s1 + $0x550] sm:$0xff] }
  0x28   :  { %9684 = vst [vmem:[#allocation24_spill] sm:$0xff] %v3928_v60  ;;  %332 = vmatpush.msrb.mxu2 %v3897_v62  ;;  %v3947_v62 = vld [vmem:[%s9128_s1 + $0x1f8] sm:$0xff]  ;;  %291 = vmatpush.msrb.mxu0 %v3935_v61 }
  0x29   :  { %352 = vmatpush.msrb.mxu3 %v3902_v56  ;;  %9685 = vst [vmem:[#allocation25_spill] sm:$0xff] %v3935_v61  ;;  %v3952_v56 = vld [vmem:[%s9128_s1 + $0x4f8] sm:$0xff]  ;;  %311 = vmatpush.msrb.mxu1 %v3940_v52  ;;  %v3983_v61 = vld [vmem:[%s9128_s1 + $0x220] sm:$0xff] }
  0x2a   :  { %9686 = vst [vmem:[#allocation26_spill] sm:$0xff] %v3940_v52  ;;  %333 = vmatpush.msrb.mxu2 %v3923_v53  ;;  %v3971_v53 = vld [vmem:[%s9128_s1 + $0x1c8] sm:$0xff]  ;;  %v3988_v52 = vld [vmem:[%s9128_s1 + $0x520] sm:$0xff]  ;;  %292 = vmatpush.msrb.mxu0 %v3959_v57 }
  0x2b   :  { %9687 = vst [vmem:[#allocation27_spill] sm:$0xff] %v3947_v62  ;;  %353 = vmatpush.msrb.mxu3 %v3928_v60  ;;  %v3976_v60 = vld [vmem:[%s9128_s1 + $0x4c8] sm:$0xff]  ;;  %312 = vmatpush.msrb.mxu1 %v3964_v63 }
  0x2c   :  { %9688 = vst [vmem:[#allocation28_spill] sm:$0xff] %v3952_v56  ;;  %334 = vmatpush.msrb.mxu2 %v3947_v62  ;;  %v3995_v62 = vld [vmem:[%s9128_s1 + $0x198] sm:$0xff]  ;;  %293 = vmatpush.msrb.mxu0 %v3983_v61 }
  0x2d   :  { %9689 = vst [vmem:[#allocation29_spill] sm:$0xff] %v3959_v57  ;;  %354 = vmatpush.msrb.mxu3 %v3952_v56  ;;  %v4000_v56 = vld [vmem:[%s9128_s1 + $0x498] sm:$0xff]  ;;  %313 = vmatpush.msrb.mxu1 %v3988_v52  ;;  %v4014_v57 = vld [vmem:[%s9128_s1 + $0x468] sm:$0xff] }
  0x2e   :  { %9690 = vst [vmem:[#allocation30_spill] sm:$0xff] %v3964_v63  ;;  %335 = vmatpush.msrb.mxu2 %v3971_v53  ;;  %v4009_v63 = vld [vmem:[%s9128_s1 + $0x168] sm:$0xff] }
  0x2f   :  { %9691 = vst [vmem:[#allocation31_spill] sm:$0xff] %v3971_v53  ;;  %355 = vmatpush.msrb.mxu3 %v3976_v60  ;;  %v4026_v53 = vld [vmem:[%s9128_s1 + $0x4f0] sm:$0xff] }
  0x30   :  { %9692 = vst [vmem:[#allocation32_spill] sm:$0xff] %v3976_v60  ;;  %336 = vmatpush.msrb.mxu2 %v3995_v62  ;;  %v4021_v60 = vld [vmem:[%s9128_s1 + $0x1f0] sm:$0xff]  ;;  %314 = vmatpush.msrb.mxu1 %v4026_v53 }
  0x31   :  { %9693 = vst [vmem:[#allocation33_spill] sm:$0xff] %v3983_v61  ;;  %356 = vmatpush.msrb.mxu3 %v4000_v56  ;;  %v4045_v61 = vld [vmem:[%s9128_s1 + $0x1c0] sm:$0xff]  ;;  %294 = vmatpush.msrb.mxu0 %v4021_v60 }
  0x32   :  { %9694 = vst [vmem:[#allocation34_spill] sm:$0xff] %v3988_v52  ;;  %v9166_v52 = vmov 0.0   ;;  %337 = vmatpush.msrb.mxu2 %v4009_v63 }
  0x33   :  { %9695 = vst [vmem:[#allocation35_spill] sm:$0xff] %v3995_v62  ;;  %265 = vmatmul.f32.vlgmr.msra.gmra.mxu2 %v9166_v52  ;;  %285 = vmatmul.f32.vlgmr.msra.gmra.mxu3 %v9166_v52  ;;  %v4033_v62 = vld [vmem:[%s9128_s1 + $0x138] sm:$0xff]  ;;  %v4050_v52 = vld [vmem:[%s9128_s1 + $0x4c0] sm:$0xff] }
  0x34   :  { %9696 = vst [vmem:[#allocation36_spill] sm:$0xff] %v4000_v56  ;;  %v4038_v56 = vld [vmem:[%s9128_s1 + $0x438] sm:$0xff]  ;;  %357 = vmatpush.msrb.mxu3 %v4014_v57  ;;  %338 = vmatpush.msrb.mxu2 %v4033_v62 }
  0x35   :  { %9697 = vst [vmem:[#allocation37_spill] sm:$0xff] %v4009_v63  ;;  %v4057_v63 = vld [vmem:[%s9128_s1 + $0x108] sm:$0xff]  ;;  %295 = vmatpush.msrb.mxu0 %v4045_v61  ;;  %315 = vmatpush.msrb.mxu1 %v4050_v52 }
  0x36   :  { %9698 = vst [vmem:[#allocation38_spill] sm:$0xff] %v4014_v57  ;;  %v4062_v57 = vld [vmem:[%s9128_s1 + $0x408] sm:$0xff]  ;;  %358 = vmatpush.msrb.mxu3 %v4038_v56  ;;  %339 = vmatpush.msrb.mxu2 %v4057_v63 }
  0x37   :  { %9699 = vst [vmem:[#allocation39_spill] sm:$0xff] %v4021_v60  ;;  %v4069_v60 = vld [vmem:[%s9128_s1 + $0x190] sm:$0xff] }
  0x38   :  { %9700 = vst [vmem:[#allocation40_spill] sm:$0xff] %v4026_v53  ;;  %v4074_v53 = vld [vmem:[%s9128_s1 + $0x490] sm:$0xff]  ;;  %359 = vmatpush.msrb.mxu3 %v4062_v57  ;;  %296 = vmatpush.msrb.mxu0 %v4069_v60 }
  0x39   :  { %9701 = vst [vmem:[#allocation41_spill] sm:$0xff] %v4033_v62  ;;  %v4081_v62 = vld [vmem:[%s9128_s1 + $0xd8] sm:$0xff]  ;;  %316 = vmatpush.msrb.mxu1 %v4074_v53 }
  0x3a   :  { %9702 = vst [vmem:[#allocation42_spill] sm:$0xff] %v4038_v56  ;;  %v4086_v56 = vld [vmem:[%s9128_s1 + $0x3d8] sm:$0xff]  ;;  %340 = vmatpush.msrb.mxu2 %v4081_v62 }
  0x3b   :  { %9703 = vst [vmem:[#allocation43_spill] sm:$0xff] %v4045_v61  ;;  %v4093_v61 = vld [vmem:[%s9128_s1 + $0x160] sm:$0xff]  ;;  %360 = vmatpush.msrb.mxu3 %v4086_v56 }
  0x3c   :  { %9704 = vst [vmem:[#allocation44_spill] sm:$0xff] %v4050_v52  ;;  %v4098_v52 = vld [vmem:[%s9128_s1 + $0x460] sm:$0xff]  ;;  %297 = vmatpush.msrb.mxu0 %v4093_v61 }
  0x3d   :  { %9705 = vst [vmem:[#allocation45_spill] sm:$0xff] %v4057_v63  ;;  %v4105_v63 = vld [vmem:[%s9128_s1 + $0xa8] sm:$0xff]  ;;  %317 = vmatpush.msrb.mxu1 %v4098_v52 }
  0x3e   :  { %9706 = vst [vmem:[#allocation46_spill] sm:$0xff] %v4062_v57  ;;  %v4110_v57 = vld [vmem:[%s9128_s1 + $0x3a8] sm:$0xff]  ;;  %341 = vmatpush.msrb.mxu2 %v4105_v63 }
  0x3f   :  { %9707 = vst [vmem:[#allocation47_spill] sm:$0xff] %v4069_v60  ;;  %v4124_v60 = vld [vmem:[%s9128_s1 + $0x430] sm:$0xff]  ;;  %361 = vmatpush.msrb.mxu3 %v4110_v57 }
  0x40   :  { %9708 = vst [vmem:[#allocation48_spill] sm:$0xff] %v4074_v53  ;;  %v4119_v53 = vld [vmem:[%s9128_s1 + $0x130] sm:$0xff]  ;;  %318 = vmatpush.msrb.mxu1 %v4124_v60 }
  0x41   :  { %9709 = vst [vmem:[#allocation49_spill] sm:$0xff] %v4081_v62  ;;  %v4136_v62 = vld [vmem:[%s9128_s1 + $0x378] sm:$0xff]  ;;  %298 = vmatpush.msrb.mxu0 %v4119_v53 }
  0x42   :  { %9710 = vst [vmem:[#allocation50_spill] sm:$0xff] %v4086_v56  ;;  %v4131_v56 = vld [vmem:[%s9128_s1 + $0x78] sm:$0xff]  ;;  %362 = vmatpush.msrb.mxu3 %v4136_v62 }
  0x43   :  { %9711 = vst [vmem:[#allocation51_spill] sm:$0xff] %v4093_v61  ;;  %v4155_v61 = vld [vmem:[%s9128_s1 + $0x48] sm:$0xff]  ;;  %342 = vmatpush.msrb.mxu2 %v4131_v56 }
  0x44   :  { %9712 = vst [vmem:[#allocation52_spill] sm:$0xff] %v4098_v52  ;;  %v9719_v52 = vmov 0.0   ;;  %363 = vmatpush.msrb.mxu3 %v4160_v59 }
  0x45   :  { %9713 = vst [vmem:[#allocation53_spill] sm:$0xff] %v4105_v63  ;;  %225 = vmatmul.f32.vlgmr.msra.gmra.mxu0 %v9719_v52  ;;  %245 = vmatmul.f32.vlgmr.msra.gmra.mxu1 %v9719_v52  ;;  %v4143_v63 = vld [vmem:[%s9128_s1 + $0x100] sm:$0xff] }
  0x46   :  { %9714 = vst [vmem:[#allocation54_spill] sm:$0xff] %v4110_v57  ;;  %v4148_v57 = vld [vmem:[%s9128_s1 + $0x400] sm:$0xff]  ;;  %299 = vmatpush.msrb.mxu0 %v4143_v63  ;;  %343 = vmatpush.msrb.mxu2 %v4155_v61 }
  0x47   :  { %9715 = vst [vmem:[#allocation55_spill] sm:$0xff] %v4119_v53  ;;  %v4167_v53 = vld [vmem:[%s9128_s1 + $0xd0] sm:$0xff]  ;;  %319 = vmatpush.msrb.mxu1 %v4148_v57 }
  0x48   :  { %9716 = vst [vmem:[#allocation56_spill] sm:$0xff] %v4124_v60  ;;  %v4172_v60 = vld [vmem:[%s9128_s1 + $0x3d0] sm:$0xff]  ;;  %300 = vmatpush.msrb.mxu0 %v4167_v53 }
  0x49   :  { %9717 = vst [vmem:[#allocation57_spill] sm:$0xff] %v4131_v56  ;;  %v4179_v56 = vld [vmem:[%s9128_s1 + $0x18] sm:$0xff]  ;;  %320 = vmatpush.msrb.mxu1 %v4172_v60 }
  0x4a   :  { %9718 = vst [vmem:[#allocation58_spill] sm:$0xff] %v4136_v62  ;;  %v4184_v62 = vld [vmem:[%s9128_s1 + $0x318] sm:$0xff]  ;;  %344 = vmatpush.msrb.mxu2 %v4179_v56 }
  0x4b   :  { %9720 = vst [vmem:[#allocation59_spill] sm:$0xff] %v4143_v63  ;;  %v4198_v63 = vld [vmem:[%s9128_s1 + $0x5f8] sm:$0xff]  ;;  %364 = vmatpush.msrb.mxu3 %v4184_v62  ;;  %345 = vmatmul.f32.vlgmr.msrb.gmra.mxu2 %v9719_v52 }
  0x4c   :  { %9721 = vst [vmem:[#allocation60_spill] sm:$0xff] %v4148_v57  ;;  %v4193_v57 = vld [vmem:[%s9128_s1 + $0x2f8] sm:$0xff]  ;;  %365 = vmatmul.f32.vlgmr.msrb.gmra.mxu3 %v9719_v52 }
  0x4d   :  { %9722 = vst [vmem:[#allocation61_spill] sm:$0xff] %v4155_v61  ;;  %v4210_v61 = vld [vmem:[%s9128_s1 + $0x3a0] sm:$0xff]  ;;  %409 = vmatpush.msra.mxu2 %v4193_v57  ;;  %429 = vmatpush.msra.mxu3 %v4198_v63 }
  0x4e   :  { %9723 = vst [vmem:[#allocation62_spill] sm:$0xff] %v4160_v59  ;;  %v4205_v59 = vld [vmem:[%s9128_s1 + $0xa0] sm:$0xff]  ;;  %321 = vmatpush.msrb.mxu1 %v4210_v61 }
  0x4f   :  { %9724 = vst [vmem:[#allocation63_spill] sm:$0xff] %v4167_v53  ;;  %v4234_v53 = vld [vmem:[%s9128_s1 + $0x370] sm:$0xff]  ;;  %301 = vmatpush.msrb.mxu0 %v4205_v59 }
  0x50   :  { %9725 = vst [vmem:[#allocation64_spill] sm:$0xff] %v4172_v60  ;;  %v4229_v60 = vld [vmem:[%s9128_s1 + $0x70] sm:$0xff]  ;;  %322 = vmatpush.msrb.mxu1 %v4234_v53 }
  0x51   :  { %9726 = vst [vmem:[#allocation65_spill] sm:$0xff] %v4179_v56  ;;  %v4217_v56 = vld [vmem:[%s9128_s1 + $0x2c8] sm:$0xff]  ;;  %302 = vmatpush.msrb.mxu0 %v4229_v60 }
  0x52   :  { %9727 = vst [vmem:[#allocation66_spill] sm:$0xff] %v4184_v62  ;;  %v4222_v62 = vld [vmem:[%s9128_s1 + $0x5c8] sm:$0xff]  ;;  %410 = vmatpush.msra.mxu2 %v4217_v56 }
  0x53   :  { %9728 = vst [vmem:[#allocation67_spill] sm:$0xff] %v4193_v57  ;;  %v4241_v57 = vld [vmem:[%s9128_s1 + $0x298] sm:$0xff]  ;;  %430 = vmatpush.msra.mxu3 %v4222_v62 }
  0x54   :  { %9729 = vst [vmem:[#allocation68_spill] sm:$0xff] %v4198_v63  ;;  %v4246_v63 = vld [vmem:[%s9128_s1 + $0x598] sm:$0xff]  ;;  %411 = vmatpush.msra.mxu2 %v4241_v57 }
  0x55   :  { %9730 = vst [vmem:[#allocation69_spill] sm:$0xff] %v4205_v59  ;;  %v4253_v59 = vld [vmem:[%s9128_s1 + $0x40] sm:$0xff]  ;;  %431 = vmatpush.msra.mxu3 %v4246_v63 }
  0x56   :  { %9731 = vst [vmem:[#allocation70_spill] sm:$0xff] %v4210_v61  ;;  %v4258_v61 = vld [vmem:[%s9128_s1 + $0x340] sm:$0xff]  ;;  %303 = vmatpush.msrb.mxu0 %v4253_v59 }
  0x57   :  { %9732 = vst [vmem:[#allocation71_spill] sm:$0xff] %v4217_v56  ;;  %v4265_v56 = vld [vmem:[%s9128_s1 + $0x268] sm:$0xff]  ;;  %323 = vmatpush.msrb.mxu1 %v4258_v61 }
  0x58   :  { %9733 = vst [vmem:[#allocation72_spill] sm:$0xff] %v4222_v62  ;;  %v4270_v62 = vld [vmem:[%s9128_s1 + $0x568] sm:$0xff]  ;;  %412 = vmatpush.msra.mxu2 %v4265_v56 }
  0x59   :  { %9734 = vst [vmem:[#allocation73_spill] sm:$0xff] %v4229_v60  ;;  %v4277_v60 = vld [vmem:[%s9128_s1 + $0x10] sm:$0xff]  ;;  %432 = vmatpush.msra.mxu3 %v4270_v62 }
  0x5a   :  { %9735 = vst [vmem:[#allocation74_spill] sm:$0xff] %v4234_v53  ;;  %v4282_v53 = vld [vmem:[%s9128_s1 + $0x310] sm:$0xff]  ;;  %304 = vmatpush.msrb.mxu0 %v4277_v60 }
  0x5b   :  { %9736 = vst [vmem:[#allocation75_spill] sm:$0xff] %v4241_v57  ;;  %v4296_v57 = vld [vmem:[%s9128_s1 + $0x5f0] sm:$0xff]  ;;  %324 = vmatpush.msrb.mxu1 %v4282_v53  ;;  %305 = vmatmul.f32.vlgmr.msrb.gmra.mxu0 %v9719_v52 }
  0x5c   :  { %9737 = vst [vmem:[#allocation76_spill] sm:$0xff] %v4246_v63  ;;  %v4291_v63 = vld [vmem:[%s9128_s1 + $0x2f0] sm:$0xff]  ;;  %325 = vmatmul.f32.vlgmr.msrb.gmra.mxu1 %v9719_v52 }
  0x5d   :  { %9738 = vst [vmem:[#allocation77_spill] sm:$0xff] %v4253_v59  ;;  %369 = vmatpush.msra.mxu0 %v4291_v63  ;;  %389 = vmatpush.msra.mxu1 %v4296_v57  ;;  %v4332_v59 = vld [vmem:[%s9128_s1 + $0x508] sm:$0xff] }
  0x5e   :  { %9739 = vst [vmem:[#allocation78_spill] sm:$0xff] %v4258_v61  ;;  %v4327_v61 = vld [vmem:[%s9128_s1 + $0x208] sm:$0xff] }
  0x5f   :  { %9740 = vst [vmem:[#allocation79_spill] sm:$0xff] %v4265_v56  ;;  %v4303_v56 = vld [vmem:[%s9128_s1 + $0x238] sm:$0xff] }
  0x60   :  { %9741 = vst [vmem:[#allocation80_spill] sm:$0xff] %v4270_v62  ;;  %v4308_v62 = vld [vmem:[%s9128_s1 + $0x538] sm:$0xff]  ;;  %413 = vmatpush.msra.mxu2 %v4303_v56 }
  0x61   :  { %9742 = vst [vmem:[#allocation81_spill] sm:$0xff] %v4277_v60  ;;  %v4315_v60 = vld [vmem:[%s9128_s1 + $0x2c0] sm:$0xff]  ;;  %433 = vmatpush.msra.mxu3 %v4308_v62 }
  0x62   :  { %9743 = vst [vmem:[#allocation82_spill] sm:$0xff] %v4282_v53  ;;  %v4320_v53 = vld [vmem:[%s9128_s1 + $0x5c0] sm:$0xff]  ;;  %370 = vmatpush.msra.mxu0 %v4315_v60  ;;  %414 = vmatpush.msra.mxu2 %v4327_v61 }
  0x63   :  { %9744 = vst [vmem:[#allocation83_spill] sm:$0xff] %v4291_v63  ;;  %v4339_v63 = vld [vmem:[%s9128_s1 + $0x290] sm:$0xff]  ;;  %390 = vmatpush.msra.mxu1 %v4320_v53  ;;  %434 = vmatpush.msra.mxu3 %v4332_v59 }
  0x64   :  { %9745 = vst [vmem:[#allocation84_spill] sm:$0xff] %v4296_v57  ;;  %v4344_v57 = vld [vmem:[%s9128_s1 + $0x590] sm:$0xff]  ;;  %371 = vmatpush.msra.mxu0 %v4339_v63 }
  0x65   :  { %9746 = vst [vmem:[#allocation85_spill] sm:$0xff] %v4303_v56  ;;  %v4351_v56 = vld [vmem:[%s9128_s1 + $0x1d8] sm:$0xff]  ;;  %391 = vmatpush.msra.mxu1 %v4344_v57 }
  0x66   :  { %9747 = vst [vmem:[#allocation86_spill] sm:$0xff] %v4308_v62  ;;  %v4356_v62 = vld [vmem:[%s9128_s1 + $0x4d8] sm:$0xff]  ;;  %415 = vmatpush.msra.mxu2 %v4351_v56 }
  0x67   :  { %9748 = vst [vmem:[#allocation87_spill] sm:$0xff] %v4315_v60  ;;  %v4363_v60 = vld [vmem:[%s9128_s1 + $0x260] sm:$0xff]  ;;  %435 = vmatpush.msra.mxu3 %v4356_v62 }
  0x68   :  { %9749 = vst [vmem:[#allocation88_spill] sm:$0xff] %v4320_v53  ;;  %v4368_v53 = vld [vmem:[%s9128_s1 + $0x560] sm:$0xff]  ;;  %372 = vmatpush.msra.mxu0 %v4363_v60 }
  0x69   :  { %9750 = vst [vmem:[#allocation89_spill] sm:$0xff] %v4327_v61  ;;  %v4375_v61 = vld [vmem:[%s9128_s1 + $0x1a8] sm:$0xff]  ;;  %392 = vmatpush.msra.mxu1 %v4368_v53 }
  0x6a   :  { %9751 = vst [vmem:[#allocation90_spill] sm:$0xff] %v4332_v59  ;;  %v4380_v59 = vld [vmem:[%s9128_s1 + $0x4a8] sm:$0xff]  ;;  %416 = vmatpush.msra.mxu2 %v4375_v61 }
  0x6b   :  { %9752 = vst [vmem:[#allocation91_spill] sm:$0xff] %v4339_v63  ;;  %v4387_v63 = vld [vmem:[%s9128_s1 + $0x230] sm:$0xff]  ;;  %436 = vmatpush.msra.mxu3 %v4380_v59 }
  0x6c   :  { %9753 = vst [vmem:[#allocation92_spill] sm:$0xff] %v4344_v57  ;;  %v4392_v57 = vld [vmem:[%s9128_s1 + $0x530] sm:$0xff]  ;;  %373 = vmatpush.msra.mxu0 %v4387_v63 }
  0x6d   :  { %9754 = vst [vmem:[#allocation93_spill] sm:$0xff] %v4351_v56  ;;  %v4399_v56 = vld [vmem:[%s9128_s1 + $0x178] sm:$0xff]  ;;  %393 = vmatpush.msra.mxu1 %v4392_v57 }
  0x6e   :  { %9755 = vst [vmem:[#allocation94_spill] sm:$0xff] %v4356_v62  ;;  %v4404_v62 = vld [vmem:[%s9128_s1 + $0x478] sm:$0xff]  ;;  %417 = vmatpush.msra.mxu2 %v4399_v56 }
  0x6f   :  { %9756 = vst [vmem:[#allocation95_spill] sm:$0xff] %v4363_v60  ;;  %v4411_v60 = vld [vmem:[%s9128_s1 + $0x200] sm:$0xff]  ;;  %437 = vmatpush.msra.mxu3 %v4404_v62 }
  0x70   :  { %9757 = vst [vmem:[#allocation96_spill] sm:$0xff] %v4368_v53  ;;  %v4416_v53 = vld [vmem:[%s9128_s1 + $0x500] sm:$0xff]  ;;  %374 = vmatpush.msra.mxu0 %v4411_v60 }
  0x71   :  { %9758 = vst [vmem:[#allocation97_spill] sm:$0xff] %v4375_v61  ;;  %v4423_v61 = vld [vmem:[%s9128_s1 + $0x148] sm:$0xff]  ;;  %394 = vmatpush.msra.mxu1 %v4416_v53 }
  0x72   :  { %9759 = vst [vmem:[#allocation98_spill] sm:$0xff] %v4380_v59  ;;  %v4428_v59 = vld [vmem:[%s9128_s1 + $0x448] sm:$0xff]  ;;  %418 = vmatpush.msra.mxu2 %v4423_v61 }
  0x73   :  { %9760 = vst [vmem:[#allocation99_spill] sm:$0xff] %v4387_v63  ;;  %v4435_v63 = vld [vmem:[%s9128_s1 + $0x1d0] sm:$0xff]  ;;  %438 = vmatpush.msra.mxu3 %v4428_v59 }
  0x74   :  { %9761 = vst [vmem:[#allocation100_spill] sm:$0xff] %v4392_v57  ;;  %v4440_v57 = vld [vmem:[%s9128_s1 + $0x4d0] sm:$0xff]  ;;  %375 = vmatpush.msra.mxu0 %v4435_v63 }
  0x75   :  { %9762 = vst [vmem:[#allocation101_spill] sm:$0xff] %v4399_v56  ;;  %v4447_v56 = vld [vmem:[%s9128_s1 + $0x118] sm:$0xff]  ;;  %395 = vmatpush.msra.mxu1 %v4440_v57 }
  0x76   :  { %9763 = vst [vmem:[#allocation102_spill] sm:$0xff] %v4404_v62  ;;  %v4452_v62 = vld [vmem:[%s9128_s1 + $0x418] sm:$0xff]  ;;  %419 = vmatpush.msra.mxu2 %v4447_v56 }
  0x77   :  { %9764 = vst [vmem:[#allocation103_spill] sm:$0xff] %v4411_v60  ;;  %v4459_v60 = vld [vmem:[%s9128_s1 + $0x1a0] sm:$0xff]  ;;  %439 = vmatpush.msra.mxu3 %v4452_v62 }
  0x78   :  { %9765 = vst [vmem:[#allocation104_spill] sm:$0xff] %v4416_v53  ;;  %v4464_v53 = vld [vmem:[%s9128_s1 + $0x4a0] sm:$0xff]  ;;  %376 = vmatpush.msra.mxu0 %v4459_v60 }
  0x79   :  { %9766 = vst [vmem:[#allocation105_spill] sm:$0xff] %v4423_v61  ;;  %v4471_v61 = vld [vmem:[%s9128_s1 + $0xe8] sm:$0xff]  ;;  %396 = vmatpush.msra.mxu1 %v4464_v53 }
  0x7a   :  { %9767 = vst [vmem:[#allocation106_spill] sm:$0xff] %v4428_v59  ;;  %v4476_v59 = vld [vmem:[%s9128_s1 + $0x3e8] sm:$0xff]  ;;  %420 = vmatpush.msra.mxu2 %v4471_v61 }
  0x7b   :  { %9768 = vst [vmem:[#allocation107_spill] sm:$0xff] %v4435_v63  ;;  %v4483_v63 = vld [vmem:[%s9128_s1 + $0x170] sm:$0xff]  ;;  %440 = vmatpush.msra.mxu3 %v4476_v59 }
  0x7c   :  { %9769 = vst [vmem:[#allocation108_spill] sm:$0xff] %v4440_v57  ;;  %v4488_v57 = vld [vmem:[%s9128_s1 + $0x470] sm:$0xff]  ;;  %377 = vmatpush.msra.mxu0 %v4483_v63 }
  0x7d   :  { %9770 = vst [vmem:[#allocation109_spill] sm:$0xff] %v4447_v56  ;;  %v4495_v56 = vld [vmem:[%s9128_s1 + $0xb8] sm:$0xff]  ;;  %397 = vmatpush.msra.mxu1 %v4488_v57 }
  0x7e   :  { %9771 = vst [vmem:[#allocation110_spill] sm:$0xff] %v4452_v62  ;;  %v4500_v62 = vld [vmem:[%s9128_s1 + $0x3b8] sm:$0xff]  ;;  %421 = vmatpush.msra.mxu2 %v4495_v56 }
  0x7f   :  { %9772 = vst [vmem:[#allocation111_spill] sm:$0xff] %v4459_v60  ;;  %v4507_v60 = vld [vmem:[%s9128_s1 + $0x140] sm:$0xff]  ;;  %441 = vmatpush.msra.mxu3 %v4500_v62 }
  0x80   :  { %9773 = vst [vmem:[#allocation112_spill] sm:$0xff] %v4464_v53  ;;  %v4512_v53 = vld [vmem:[%s9128_s1 + $0x440] sm:$0xff]  ;;  %378 = vmatpush.msra.mxu0 %v4507_v60 }
  0x81   :  { %9774 = vst [vmem:[#allocation113_spill] sm:$0xff] %v4471_v61  ;;  %v4519_v61 = vld [vmem:[%s9128_s1 + $0x88] sm:$0xff]  ;;  %398 = vmatpush.msra.mxu1 %v4512_v53 }
  0x82   :  { %9775 = vst [vmem:[#allocation114_spill] sm:$0xff] %v4476_v59  ;;  %v4524_v59 = vld [vmem:[%s9128_s1 + $0x388] sm:$0xff]  ;;  %422 = vmatpush.msra.mxu2 %v4519_v61 }
  0x83   :  { %9776 = vst [vmem:[#allocation115_spill] sm:$0xff] %v4483_v63  ;;  %v4531_v63 = vld [vmem:[%s9128_s1 + $0x110] sm:$0xff]  ;;  %442 = vmatpush.msra.mxu3 %v4524_v59 }
  0x84   :  { %9777 = vst [vmem:[#allocation116_spill] sm:$0xff] %v4488_v57  ;;  %v4536_v57 = vld [vmem:[%s9128_s1 + $0x410] sm:$0xff]  ;;  %379 = vmatpush.msra.mxu0 %v4531_v63 }
  0x85   :  { %9778 = vst [vmem:[#allocation117_spill] sm:$0xff] %v4495_v56  ;;  %v4543_v56 = vld [vmem:[%s9128_s1 + $0x58] sm:$0xff]  ;;  %399 = vmatpush.msra.mxu1 %v4536_v57 }
  0x86   :  { %9779 = vst [vmem:[#allocation118_spill] sm:$0xff] %v4500_v62  ;;  %v4548_v62 = vld [vmem:[%s9128_s1 + $0x358] sm:$0xff]  ;;  %423 = vmatpush.msra.mxu2 %v4543_v56 }
  0x87   :  { %9780 = vst [vmem:[#allocation119_spill] sm:$0xff] %v4507_v60  ;;  %v4555_v60 = vld [vmem:[%s9128_s1 + $0xe0] sm:$0xff]  ;;  %443 = vmatpush.msra.mxu3 %v4548_v62 }
  0x88   :  { %9781 = vst [vmem:[#allocation120_spill] sm:$0xff] %v4512_v53  ;;  %v4560_v53 = vld [vmem:[%s9128_s1 + $0x3e0] sm:$0xff]  ;;  %380 = vmatpush.msra.mxu0 %v4555_v60 }
  0x89   :  { %9782 = vst [vmem:[#allocation121_spill] sm:$0xff] %v4519_v61  ;;  %v4567_v61 = vld [vmem:[%s9128_s1 + $0x28] sm:$0xff]  ;;  %400 = vmatpush.msra.mxu1 %v4560_v53 }
  0x8a   :  { %9783 = vst [vmem:[#allocation122_spill] sm:$0xff] %v4524_v59  ;;  %v4572_v59 = vld [vmem:[%s9128_s1 + $0x328] sm:$0xff]  ;;  %424 = vmatpush.msra.mxu2 %v4567_v61 }
  0x8b   :  { %9784 = vst [vmem:[#allocation123_spill] sm:$0xff] %v4531_v63  ;;  %v4586_v63 = vld [vmem:[%s9128_s1 + $0x3b0] sm:$0xff]  ;;  %444 = vmatpush.msra.mxu3 %v4572_v59  ;;  %425 = vmatmul.f32.vlgmr.msra.gmra.mxu2 %v9719_v52 }
  0x8c   :  { %9785 = vst [vmem:[#allocation124_spill] sm:$0xff] %v4536_v57  ;;  %v4581_v57 = vld [vmem:[%s9128_s1 + $0xb0] sm:$0xff]  ;;  %445 = vmatmul.f32.vlgmr.msra.gmra.mxu3 %v9719_v52  ;;  %401 = vmatpush.msra.mxu1 %v4586_v63 }
  0x8d   :  { %9786 = vst [vmem:[#allocation125_spill] sm:$0xff] %v4543_v56  ;;  %v4600_v56 = vld [vmem:[%s9128_s1 + $0x380] sm:$0xff]  ;;  %381 = vmatpush.msra.mxu0 %v4581_v57  ;;  %572 = vmatpush.msrb.mxu2 %v3471_v0  ;;  %v9792_v0 = vld [vmem:[#allocation2_spill] sm:$0xff] }
  0x8e   :  { %9787 = vst [vmem:[#allocation126_spill] sm:$0xff] %v4548_v62  ;;  %v4595_v62 = vld [vmem:[%s9128_s1 + $0x80] sm:$0xff]  ;;  %592 = vmatpush.msrb.mxu3 %v3476_v1  ;;  %402 = vmatpush.msra.mxu1 %v4600_v56  ;;  %v9793_v1 = vld [vmem:[#allocation3_spill] sm:$0xff] }
  0x8f   :  { %9788 = vst [vmem:[#allocation127_spill] sm:$0xff] %v4567_v61  ;;  %v4612_v61 = vld [vmem:[%s9128_s1 + $0x350] sm:$0xff]  ;;  %382 = vmatpush.msra.mxu0 %v4595_v62  ;;  %573 = vmatpush.msrb.mxu2 %v3481_v2  ;;  %v9794_v2 = vld [vmem:[#allocation6_spill] sm:$0xff] }
  0x90   :  { %9789 = vst [vmem:[#allocation128_spill] sm:$0xff] %v4572_v59  ;;  %v4607_v59 = vld [vmem:[%s9128_s1 + $0x50] sm:$0xff]  ;;  %593 = vmatpush.msrb.mxu3 %v3488_v3  ;;  %403 = vmatpush.msra.mxu1 %v4612_v61 }
  0x91   :  { %9790 = vst [vmem:[#allocation129_spill] sm:$0xff] %v4581_v57  ;;  %v4626_v57 = vld [vmem:[%s9128_s1 + $0x320] sm:$0xff]  ;;  %383 = vmatpush.msra.mxu0 %v4607_v59  ;;  %574 = vmatpush.msrb.mxu2 %v3493_v4  ;;  %v9795_v3 = vld [vmem:[#allocation7_spill] sm:$0xff]  ;;  %v9796_v4 = vld [vmem:[#allocation4_spill] sm:$0xff] }
  0x92   :  { %9791 = vst [vmem:[#allocation130_spill] sm:$0xff] %v4586_v63  ;;  %v4621_v63 = vld [vmem:[%s9128_s1 + $0x20] sm:$0xff]  ;;  %594 = vmatpush.msrb.mxu3 %v3498_v5  ;;  %404 = vmatpush.msra.mxu1 %v4626_v57 }
  0x93   :  { %384 = vmatpush.msra.mxu0 %v4621_v63  ;;  %405 = vmatmul.f32.vlgmr.msra.gmra.mxu1 %v9719_v52  ;;  %v9797_v5 = vld [vmem:[#allocation5_spill] sm:$0xff] }
  0x94   :  { %385 = vmatmul.f32.vlgmr.msra.gmra.mxu0 %v9719_v52  ;;  %552 = vmatpush.msrb.mxu1 %v3515_v8  ;;  %v9800_v8 = vld [vmem:[#allocation10_spill] sm:$0xff] }
  0x95   :  { %532 = vmatpush.msrb.mxu0 %v3503_v6  ;;  %575 = vmatpush.msrb.mxu2 %v3510_v7  ;;  %v9798_v6 = vld [vmem:[#allocation8_spill] sm:$0xff]  ;;  %v9799_v7 = vld [vmem:[#allocation9_spill] sm:$0xff]  ;;  %v9844_v52 = vld [vmem:[#allocation50_spill] sm:$0xff] }
  0x96   :  { %595 = vmatpush.msrb.mxu3 %v3520_v9  ;;  %553 = vmatpush.msrb.mxu1 %v3532_v11  ;;  %v9801_v9 = vld [vmem:[#allocation11_spill] sm:$0xff]  ;;  %v9803_v11 = vld [vmem:[#allocation13_spill] sm:$0xff] }
  0x97   :  { %533 = vmatpush.msrb.mxu0 %v3527_v10  ;;  %576 = vmatpush.msrb.mxu2 %v3549_v14  ;;  %v9802_v10 = vld [vmem:[#allocation12_spill] sm:$0xff]  ;;  %v9806_v14 = vld [vmem:[#allocation18_spill] sm:$0xff] }
  0x98   :  { %596 = vmatpush.msrb.mxu3 %v3554_v15  ;;  %554 = vmatpush.msrb.mxu1 %v3544_v13  ;;  %v9805_v13 = vld [vmem:[#allocation17_spill] sm:$0xff]  ;;  %v9807_v15 = vld [vmem:[#allocation15_spill] sm:$0xff] }
  0x99   :  { %534 = vmatpush.msrb.mxu0 %v3539_v12  ;;  %577 = vmatpush.msrb.mxu2 %v3573_v18  ;;  %v9804_v12 = vld [vmem:[#allocation14_spill] sm:$0xff] }
  0x9a   :  { %597 = vmatpush.msrb.mxu3 %v3578_v19  ;;  %555 = vmatpush.msrb.mxu1 %v3568_v17  ;;  %v9809_v17 = vld [vmem:[#allocation21_spill] sm:$0xff]  ;;  %v9810_v18 = vld [vmem:[#allocation22_spill] sm:$0xff]  ;;  %v9811_v19 = vld [vmem:[#allocation19_spill] sm:$0xff] }
  0x9b   :  { %535 = vmatpush.msrb.mxu0 %v3563_v16  ;;  %578 = vmatpush.msrb.mxu2 %v3597_v22  ;;  %v9808_v16 = vld [vmem:[#allocation16_spill] sm:$0xff]  ;;  %v9814_v22 = vld [vmem:[#allocation26_spill] sm:$0xff] }
  0x9c   :  { %598 = vmatpush.msrb.mxu3 %v3602_v23  ;;  %556 = vmatpush.msrb.mxu1 %v3592_v21  ;;  %v9813_v21 = vld [vmem:[#allocation25_spill] sm:$0xff]  ;;  %v9815_v23 = vld [vmem:[#allocation23_spill] sm:$0xff] }
  0x9d   :  { %536 = vmatpush.msrb.mxu0 %v3587_v20  ;;  %579 = vmatpush.msrb.mxu2 %v3621_v26  ;;  %v9812_v20 = vld [vmem:[#allocation20_spill] sm:$0xff]  ;;  %v9818_v26 = vld [vmem:[#allocation30_spill] sm:$0xff] }
  0x9e   :  { %599 = vmatpush.msrb.mxu3 %v3626_v27  ;;  %557 = vmatpush.msrb.mxu1 %v3616_v25  ;;  %v9817_v25 = vld [vmem:[#allocation29_spill] sm:$0xff]  ;;  %v9819_v27 = vld [vmem:[#allocation27_spill] sm:$0xff] }
  0x9f   :  { %537 = vmatpush.msrb.mxu0 %v3611_v24  ;;  %580 = vmatpush.msrb.mxu2 %v3645_v30  ;;  %v9816_v24 = vld [vmem:[#allocation24_spill] sm:$0xff]  ;;  %v9822_v30 = vld [vmem:[#allocation34_spill] sm:$0xff] }
  0xa0   :  { %600 = vmatpush.msrb.mxu3 %v3650_v31  ;;  %558 = vmatpush.msrb.mxu1 %v3640_v29  ;;  %v9821_v29 = vld [vmem:[#allocation33_spill] sm:$0xff]  ;;  %v9823_v31 = vld [vmem:[#allocation31_spill] sm:$0xff] }
  0xa1   :  { %538 = vmatpush.msrb.mxu0 %v3635_v28  ;;  %581 = vmatpush.msrb.mxu2 %v3669_v34  ;;  %v9820_v28 = vld [vmem:[#allocation28_spill] sm:$0xff] }
  0xa2   :  { %601 = vmatpush.msrb.mxu3 %v3674_v35  ;;  %559 = vmatpush.msrb.mxu1 %v3664_v33  ;;  %v9825_v33 = vld [vmem:[#allocation39_spill] sm:$0xff]  ;;  %v9826_v34 = vld [vmem:[#allocation40_spill] sm:$0xff] }
  0xa3   :  { %539 = vmatpush.msrb.mxu0 %v3659_v32  ;;  %582 = vmatpush.msrb.mxu2 %v3693_v38  ;;  %v9824_v32 = vld [vmem:[#allocation32_spill] sm:$0xff]  ;;  %v9827_v35 = vld [vmem:[#allocation35_spill] sm:$0xff] }
  0xa4   :  { %602 = vmatpush.msrb.mxu3 %v3698_v39  ;;  %560 = vmatpush.msrb.mxu1 %v3688_v37  ;;  %v9829_v37 = vld [vmem:[#allocation43_spill] sm:$0xff]  ;;  %v9830_v38 = vld [vmem:[#allocation44_spill] sm:$0xff]  ;;  %v9831_v39 = vld [vmem:[#allocation37_spill] sm:$0xff] }
  0xa5   :  { %540 = vmatpush.msrb.mxu0 %v3683_v36  ;;  %583 = vmatpush.msrb.mxu2 %v3717_v42  ;;  %v9828_v36 = vld [vmem:[#allocation36_spill] sm:$0xff] }
  0xa6   :  { %603 = vmatpush.msrb.mxu3 %v3722_v43  ;;  %561 = vmatpush.msrb.mxu1 %v3712_v41  ;;  %v9833_v41 = vld [vmem:[#allocation47_spill] sm:$0xff]  ;;  %v9834_v42 = vld [vmem:[#allocation48_spill] sm:$0xff]  ;;  %v9835_v43 = vld [vmem:[#allocation41_spill] sm:$0xff] }
  0xa7   :  { %541 = vmatpush.msrb.mxu0 %v3707_v40  ;;  %584 = vmatpush.msrb.mxu2 %v3741_v46  ;;  %v9832_v40 = vld [vmem:[#allocation38_spill] sm:$0xff]  ;;  %v9838_v46 = vld [vmem:[#allocation52_spill] sm:$0xff] }
  0xa8   :  { %604 = vmatpush.msrb.mxu3 %v3746_v47  ;;  %562 = vmatpush.msrb.mxu1 %v3736_v45  ;;  %v9837_v45 = vld [vmem:[#allocation51_spill] sm:$0xff]  ;;  %v9839_v47 = vld [vmem:[#allocation45_spill] sm:$0xff] }
  0xa9   :  { %542 = vmatpush.msrb.mxu0 %v3731_v44  ;;  %585 = vmatpush.msrb.mxu2 %v3765_v50  ;;  %v9836_v44 = vld [vmem:[#allocation42_spill] sm:$0xff]  ;;  %v9842_v50 = vld [vmem:[#allocation56_spill] sm:$0xff] }
  0xaa   :  { %605 = vmatpush.msrb.mxu3 %v3770_v51  ;;  %563 = vmatpush.msrb.mxu1 %v3760_v49  ;;  %v9841_v49 = vld [vmem:[#allocation55_spill] sm:$0xff]  ;;  %v9843_v51 = vld [vmem:[#allocation49_spill] sm:$0xff] }
  0xab   :  { %543 = vmatpush.msrb.mxu0 %v3755_v48  ;;  %586 = vmatpush.msrb.mxu2 %v3789_v54  ;;  %v9840_v48 = vld [vmem:[#allocation46_spill] sm:$0xff]  ;;  %v9845_v54 = vld [vmem:[#allocation59_spill] sm:$0xff] }
  0xac   :  { %606 = vmatpush.msrb.mxu3 %v3794_v55  ;;  %564 = vmatpush.msrb.mxu1 %v9793_v1  ;;  %v9846_v55 = vld [vmem:[#allocation60_spill] sm:$0xff]  ;;  %v9849_v1 = vld [vmem:[#allocation63_spill] sm:$0xff] }
  0xad   :  { %544 = vmatpush.msrb.mxu0 %v9792_v0  ;;  %587 = vmatpush.msrb.mxu2 %v9794_v2  ;;  %v9848_v0 = vld [vmem:[#allocation54_spill] sm:$0xff]  ;;  %v9850_v2 = vld [vmem:[#allocation64_spill] sm:$0xff] }
  0xae   :  { %607 = vmatpush.msrb.mxu3 %v9795_v3  ;;  %565 = vmatpush.msrb.mxu1 %v9797_v5  ;;  %v9851_v3 = vld [vmem:[#allocation57_spill] sm:$0xff] }
  0xaf   :  { %545 = vmatpush.msrb.mxu0 %v9796_v4  ;;  %652 = vmatpush.msra.mxu2 %v9798_v6  ;;  %v9852_v4 = vld [vmem:[#allocation58_spill] sm:$0xff]  ;;  %v9853_v5 = vld [vmem:[#allocation69_spill] sm:$0xff] }
  0xb0   :  { %672 = vmatpush.msra.mxu3 %v9799_v7  ;;  %566 = vmatpush.msrb.mxu1 %v9801_v9  ;;  %v9854_v6 = vld [vmem:[#allocation70_spill] sm:$0xff]  ;;  %v9855_v7 = vld [vmem:[#allocation61_spill] sm:$0xff] }
  0xb1   :  { %546 = vmatpush.msrb.mxu0 %v9800_v8  ;;  %653 = vmatpush.msra.mxu2 %v9802_v10  ;;  %v9856_v8 = vld [vmem:[#allocation62_spill] sm:$0xff]  ;;  %v9857_v9 = vld [vmem:[#allocation73_spill] sm:$0xff] }
  0xb2   :  { %673 = vmatpush.msra.mxu3 %v9803_v11  ;;  %567 = vmatpush.msrb.mxu1 %v9804_v12  ;;  %v9858_v10 = vld [vmem:[#allocation74_spill] sm:$0xff]  ;;  %v9859_v11 = vld [vmem:[#allocation65_spill] sm:$0xff] }
  0xb3   :  { %547 = vmatpush.msrb.mxu0 %v3863_v58  ;;  %654 = vmatpush.msra.mxu2 %v9807_v15  ;;  %v9847_v58 = vld [vmem:[#allocation53_spill] sm:$0xff]  ;;  %v9860_v12 = vld [vmem:[#allocation66_spill] sm:$0xff] }
  0xb4   :  { %632 = vmatpush.msra.mxu1 %v9806_v14  ;;  %674 = vmatpush.msra.mxu3 %v9808_v16  ;;  %v9862_v14 = vld [vmem:[#allocation78_spill] sm:$0xff]  ;;  %v9863_v15 = vld [vmem:[#allocation81_spill] sm:$0xff] }
  0xb5   :  { %612 = vmatpush.msra.mxu0 %v9805_v13  ;;  %655 = vmatpush.msra.mxu2 %v9811_v19  ;;  %v9861_v13 = vld [vmem:[#allocation77_spill] sm:$0xff]  ;;  %v9864_v16 = vld [vmem:[#allocation82_spill] sm:$0xff] }
  0xb6   :  { %633 = vmatpush.msra.mxu1 %v9810_v18  ;;  %675 = vmatpush.msra.mxu3 %v9812_v20  ;;  %v286_v18 = vpop.f32.mrf.mxu3 }
  0xb7   :  { %613 = vmatpush.msra.mxu0 %v9809_v17  ;;  %656 = vmatpush.msra.mxu2 %v9815_v23  ;;  %v266_v17 = vpop.f32.mrf.mxu2 }
  0xb8   :  { %634 = vmatpush.msra.mxu1 %v9814_v22  ;;  %676 = vmatpush.msra.mxu3 %v9816_v24  ;;  %v287_v19 = vadd.f32 %v286_v18, %v266_v17  ;;  %v207_v24 = vld [vmem:[%s9129_s0] sm:$0xff] }
  0xb9   :  { %614 = vmatpush.msra.mxu0 %v9813_v21  ;;  %657 = vmatpush.msra.mxu2 %v9819_v27 }
  0xba   :  { %635 = vmatpush.msra.mxu1 %v9818_v26  ;;  %677 = vmatpush.msra.mxu3 %v9820_v28  ;;  %v451_v20 = vrot.slane %v287_v19, 6 }
  0xbb   :  { %615 = vmatpush.msra.mxu0 %v9817_v25  ;;  %658 = vmatpush.msra.mxu2 %v9823_v31 }
  0xbc   :  { %636 = vmatpush.msra.mxu1 %v9822_v30  ;;  %678 = vmatpush.msra.mxu3 %v9824_v32 }
  0xbd   :  { %616 = vmatpush.msra.mxu0 %v9821_v29  ;;  %659 = vmatpush.msra.mxu2 %v9827_v35 }
  0xbe   :  { %637 = vmatpush.msra.mxu1 %v9826_v34  ;;  %679 = vmatpush.msra.mxu3 %v9828_v36  ;;  %v476_v34 = vrot.slane %v207_v24, 4 }
  0xbf   :  { %617 = vmatpush.msra.mxu0 %v9825_v33  ;;  %660 = vmatpush.msra.mxu2 %v9831_v39 }
  0xc0   :  { %638 = vmatpush.msra.mxu1 %v9830_v38  ;;  %680 = vmatpush.msra.mxu3 %v9832_v40 }
  0xc1   :  { %618 = vmatpush.msra.mxu0 %v9829_v37  ;;  %661 = vmatpush.msra.mxu2 %v9835_v43 }
  0xc2   :  { %639 = vmatpush.msra.mxu1 %v9834_v42  ;;  %681 = vmatpush.msra.mxu3 %v9836_v44  ;;  %v226_v21 = vpop.f32.mrf.mxu0  ;;  %v246_v22 = vpop.f32.mrf.mxu1 }
  0xc3   :  { %619 = vmatpush.msra.mxu0 %v9833_v41  ;;  %662 = vmatpush.msra.mxu2 %v9839_v47  ;;  %v247_v23 = vadd.f32 %v246_v22, %v226_v21 }
  0xc4   :  { %640 = vmatpush.msra.mxu1 %v9838_v46  ;;  %682 = vmatpush.msra.mxu3 %v9840_v48  ;;  %v206_v48 = vld [vmem:[%s9130_s2] sm:$0x3] }
  0xc5   :  { %620 = vmatpush.msra.mxu0 %v9837_v45  ;;  %663 = vmatpush.msra.mxu2 %v9843_v51  ;;  %v453_v25 = vsel %vm452_vm0, %v247_v23, %v451_v20  ;;  %v4768_v51 = vperm.slane %v206_v48, 1 }
  0xc6   :  { %641 = vmatpush.msra.mxu1 %v9842_v50  ;;  %683 = vmatpush.msra.mxu3 %v9844_v52  ;;  %v455_v26 = vadd.f32 %v453_v25, %v207_v24 }
  0xc7   :  { %621 = vmatpush.msra.mxu0 %v9841_v49  ;;  %664 = vmatpush.msra.mxu2 %v9847_v58 }
  0xc8   :  { %642 = vmatpush.msra.mxu1 %v9846_v55  ;;  %684 = vmatpush.msra.mxu3 %v9848_v0  ;;  %v2753_v27 = vmul.f32 -1.442695, %v455_v26 }
  0xc9   :  { %622 = vmatpush.msra.mxu0 %v9845_v54  ;;  %665 = vmatpush.msra.mxu2 %v9851_v3  ;;  %v4774_v3 = vperm.slane %v206_v48, 0  ;;  %v9884_v48 = vld [vmem:[#allocation100_spill] sm:$0xff] }
  0xca   :  { %643 = vmatpush.msra.mxu1 %v9850_v2  ;;  %685 = vmatpush.msra.mxu3 %v9852_v4  ;;  %2791 = vpow2.f32 %v2753_v27  ;;  %v9893_v2 = vld [vmem:[#allocation93_spill] sm:$0xff] }
  0xcb   :  { %623 = vmatpush.msra.mxu0 %v9849_v1  ;;  %666 = vmatpush.msra.mxu2 %v9855_v7 }
  0xcc   :  { %644 = vmatpush.msra.mxu1 %v9854_v6  ;;  %686 = vmatpush.msra.mxu3 %v9856_v8 }
  0xcd   :  { %624 = vmatpush.msra.mxu0 %v9853_v5  ;;  %667 = vmatpush.msra.mxu2 %v9859_v11 }
  0xce   :  { %645 = vmatpush.msra.mxu1 %v9858_v10  ;;  %687 = vmatpush.msra.mxu3 %v9860_v12  ;;  %v346_v28 = vpop.f32.mrf.mxu2 }
  0xcf   :  { %625 = vmatpush.msra.mxu0 %v9857_v9  ;;  %v366_v29 = vpop.f32.mrf.mxu3 }
  0xd0   :  { %646 = vmatpush.msra.mxu1 %v9862_v14  ;;  %v367_v30 = vadd.f32 %v366_v29, %v346_v28  ;;  %v2792_v36 = vpop.eup %2791 }
  0xd1   :  { %626 = vmatpush.msra.mxu0 %v9861_v13  ;;  %v459_v39 = vadd.f32 1.0, %v2792_v36  ;;  %v9872_v36 = vld [vmem:[#allocation88_spill] sm:$0xff] }
  0xd2   :  { %647 = vmatpush.msra.mxu1 %v9864_v16  ;;  %v480_v31 = vrot.slane %v367_v30, 6  ;;  %v208_v16 = vld [vmem:[%s9129_s0 + $0x8] sm:$0xf] }
  0xd3   :  { %627 = vmatpush.msra.mxu0 %v9863_v15  ;;  %vm465_vm1 = vweird.f32 %v459_v39  ;;  %v471_v52 = vand.u32 2147483648, %v459_v39  ;;  %v469_v0 = vand.u32 2147483647, %v459_v39 }
  0xd5   :  { %v472_v9 = vor.u32 1.1754944e-38, %v471_v52  ;;  %vm470_vm4 = vcmp.eq.f32.partialorder %v469_v0, 8.507059e+37  ;;  %v9887_v52 = vld [vmem:[#allocation103_spill] sm:$0xff] }
  0xd6   :  { %v9891_v0 = vld [vmem:[#allocation107_spill] sm:$0xff] }
  0xd8   :  { %v306_v32 = vpop.f32.mrf.mxu0 }
  0xd9   :  { %v326_v33 = vpop.f32.mrf.mxu1 }
  0xda   :  { %v327_v35 = vadd.f32 %v326_v33, %v306_v32  ;;  %v9868_v32 = vld [vmem:[#allocation84_spill] sm:$0xff]  ;;  %v9869_v33 = vld [vmem:[#allocation67_spill] sm:$0xff] }
  0xdc   :  { %v481_v37 = vsel %vm452_vm0, %v327_v35, %v480_v31  ;;  %v9867_v31 = vld [vmem:[#allocation83_spill] sm:$0xff] }
  0xdd   :  { %v483_v38 = vadd.f32 %v481_v37, %v476_v34  ;;  %v9870_v34 = vld [vmem:[#allocation68_spill] sm:$0xff]  ;;  %v9871_v35 = vld [vmem:[#allocation87_spill] sm:$0xff] }
  0xde   :  { %v9873_v37 = vld [vmem:[#allocation71_spill] sm:$0xff] }
  0xdf   :  { %v2754_v40 = vmul.f32 -1.442695, %v483_v38  ;;  %v9874_v38 = vld [vmem:[#allocation72_spill] sm:$0xff] }
  0xe1   :  { %2793 = vpow2.f32 %v2754_v40  ;;  %v9876_v40 = vld [vmem:[#allocation92_spill] sm:$0xff] }
  0xe2   :  { %2795 = vrcp.f32 %v459_v39 }
  0xe7   :  { %v2794_v41 = vpop.eup %2793 }
  0xe8   :  { %v487_v42 = vadd.f32 1.0, %v2794_v41  ;;  %v2796_v43 = vpop.eup %2795  ;;  %v9877_v41 = vld [vmem:[#allocation75_spill] sm:$0xff] }
  0xe9   :  { %v461_v44 = vmul.f32 %v2796_v43, %v459_v39  ;;  %vm466_vm2 = vweird.f32 %v2796_v43  ;;  %v9875_v39 = vld [vmem:[#allocation91_spill] sm:$0xff] }
  0xea   :  { %2797 = vrcp.f32 %v487_v42  ;;  %vm4770_vm3 = vmor %vm465_vm1, %vm466_vm2  ;;  %vm493_vm5 = vweird.f32 %v487_v42  ;;  %v499_v13 = vand.u32 2147483648, %v487_v42  ;;  %v497_v15 = vand.u32 2147483647, %v487_v42 }
  0xeb   :  { %v462_v46 = vsub.f32 1.0, %v461_v44  ;;  %v9880_v44 = vld [vmem:[#allocation96_spill] sm:$0xff] }
  0xec   :  { %v500_v20 = vor.u32 1.1754944e-38, %v499_v13  ;;  %vm498_vm8 = vcmp.eq.f32.partialorder %v497_v15, 8.507059e+37  ;;  %v9903_v13 = vld [vmem:[#allocation119_spill] sm:$0xff]  ;;  %v9905_v15 = vld [vmem:[#allocation105_spill] sm:$0xff] }
  0xed   :  { %v463_v49 = vmul.f32 %v2796_v43, %v462_v46  ;;  %v9882_v46 = vld [vmem:[#allocation80_spill] sm:$0xff] }
  0xef   :  { %v464_v58 = vadd.f32 %v2796_v43, %v463_v49  ;;  %v9885_v49 = vld [vmem:[#allocation85_spill] sm:$0xff] }
  0xf0   :  { %v2798_v45 = vpop.eup %2797 }
  0xf1   :  { %v489_v47 = vmul.f32 %v2798_v45, %v487_v42  ;;  %v468_v10 = vsel %vm4770_vm3, %v2796_v43, %v464_v58  ;;  %vm494_vm6 = vweird.f32 %v2798_v45  ;;  %v9878_v42 = vld [vmem:[#allocation76_spill] sm:$0xff]  ;;  %v9879_v43 = vld [vmem:[#allocation95_spill] sm:$0xff]  ;;  %v9890_v58 = vld [vmem:[#allocation90_spill] sm:$0xff] }
  0xf2   :  { %v473_v17 = vsel %vm470_vm4, %v472_v9, %v468_v10  ;;  %vm495_vm7 = vmor %vm493_vm5, %vm494_vm6  ;;  %v9899_v9 = vld [vmem:[#allocation115_spill] sm:$0xff]  ;;  %v9900_v10 = vld [vmem:[#allocation116_spill] sm:$0xff] }
  0xf3   :  { %v490_v50 = vsub.f32 1.0, %v489_v47  ;;  %v9883_v47 = vld [vmem:[#allocation99_spill] sm:$0xff] }
  0xf5   :  { %v491_v6 = vmul.f32 %v2798_v45, %v490_v50  ;;  %v9886_v50 = vld [vmem:[#allocation86_spill] sm:$0xff] }
  0xf7   :  { %v492_v14 = vadd.f32 %v2798_v45, %v491_v6  ;;  %v9896_v6 = vld [vmem:[#allocation112_spill] sm:$0xff] }
  0xf9   :  { %v496_v22 = vsel %vm495_vm7, %v2798_v45, %v492_v14  ;;  %v9881_v45 = vld [vmem:[#allocation79_spill] sm:$0xff]  ;;  %v9904_v14 = vld [vmem:[#allocation120_spill] sm:$0xff] }
  0xfa   :  { %v501_v23 = vsel %vm498_vm8, %v500_v20, %v496_v22  ;;  %v9910_v20 = vld [vmem:[#allocation110_spill] sm:$0xff] }
  0xfb   :  { %v518_v24 = vsub.f32 1.0, %v501_v23  ;;  %v520_v27 = vmul.f32 0.0, %v501_v23  ;;  %v9912_v22 = vld [vmem:[#allocation114_spill] sm:$0xff]  ;;  %v9913_v23 = vld [vmem:[#allocation129_spill] sm:$0xff] }
 0x10e   :  { %v426_v54 = vpop.f32.mrf.mxu2 }
 0x10f   :  { %v446_v55 = vpop.f32.mrf.mxu3 }
 0x110   :  { %v447_v1 = vadd.f32 %v446_v55, %v426_v54  ;;  %v406_v5 = vpop.f32.mrf.mxu1  ;;  %v9888_v54 = vld [vmem:[#allocation104_spill] sm:$0xff]  ;;  %v9889_v55 = vld [vmem:[#allocation89_spill] sm:$0xff] }
 0x111   :  { %v386_v4 = vpop.f32.mrf.mxu0 }
 0x112   :  { %v509_v7 = vadd.f32 %v4768_v51, %v447_v1  ;;  %v407_v8 = vadd.f32 %v406_v5, %v386_v4  ;;  %v9892_v1 = vld [vmem:[#allocation108_spill] sm:$0xff]  ;;  %v9894_v4 = vld [vmem:[#allocation94_spill] sm:$0xff]  ;;  %v9895_v5 = vld [vmem:[#allocation111_spill] sm:$0xff] }
 0x114   :  { %v512_v11 = vrot.slane %v509_v7, 6  ;;  %v508_v12 = vadd.f32 %v4774_v3, %v407_v8  ;;  %v9897_v7 = vld [vmem:[#allocation97_spill] sm:$0xff]  ;;  %v9898_v8 = vld [vmem:[#allocation98_spill] sm:$0xff] }
 0x116   :  { %v513_v18 = vsel %vm452_vm0, %v508_v12, %v512_v11  ;;  %v9901_v11 = vld [vmem:[#allocation101_spill] sm:$0xff]  ;;  %v9902_v12 = vld [vmem:[#allocation102_spill] sm:$0xff] }
 0x117   :  { %v515_v19 = vmul.f32 %v513_v18, %v473_v17  ;;  %v9907_v17 = vld [vmem:[#allocation123_spill] sm:$0xff]  ;;  %v9908_v18 = vld [vmem:[#allocation124_spill] sm:$0xff] }
 0x119   :  { %v516_v21 = vadd.f32 %v515_v19, %v208_v16  ;;  %v9906_v16 = vld [vmem:[#allocation106_spill] sm:$0xff]  ;;  %v9909_v19 = vld [vmem:[#allocation109_spill] sm:$0xff] }
 0x11b   :  { %2799 = vtanh.f32 %v516_v21  ;;  %v9911_v21 = vld [vmem:[#allocation113_spill] sm:$0xff] }
 0x121   :  { %v2800_v25 = vpop.eup %2799 }
 0x122   :  { %v519_v26 = vmul.f32 %v2800_v25, %v518_v24  ;;  %v9914_v24 = vld [vmem:[#allocation130_spill] sm:$0xff]  ;;  %v9915_v25 = vld [vmem:[#allocation117_spill] sm:$0xff] }
 0x124   :  { %v4784_v28 = vadd.f32 %v520_v27, %v519_v26  ;;  %v9916_v26 = vld [vmem:[#allocation118_spill] sm:$0xff]  ;;  %v9917_v27 = vld [vmem:[#allocation121_spill] sm:$0xff] }
 0x126   :  { %522 = vst [vmem:[%s9131_s3] sm:$0xf] %v4784_v28 }
 0x127   :  { %527 = vst [vmem:[#allocation1] ss:$4 sm:$0xff] %v4784_v28 }
 0x12e   :  { %v4791_v29 = vld.sshfl [vmem:[#allocation1] sm:$0xff pattern:$0x73625140]  ;;  %v4793_v30 = vld.sshfl [vmem:[#allocation1 + $0x8] sm:$0xff pattern:$0x73625140] }
 0x12f   :  { %548 = vmatmul.f32.vlgmr.msrb.gmra.mxu0 %v4791_v29  ;;  %568 = vmatmul.f32.vlgmr.msrb.gmra.mxu1 %v4793_v30 }
 0x130   :  { %588 = vmatmul.f32.vlgmr.msrb.gmra.mxu2 %v4791_v29  ;;  %608 = vmatmul.f32.vlgmr.msrb.gmra.mxu3 %v4793_v30 }
 0x131   :  { %692 = vmatpush.msrb.mxu0 %v9867_v31  ;;  %712 = vmatpush.msrb.mxu1 %v9868_v32  ;;  %v9920_v31 = vld [vmem:[#allocation126_spill] sm:$0xff]  ;;  %v9921_v32 = vld [vmem:[#allocation127_spill] sm:$0xff] }
 0x132   :  { %732 = vmatpush.msrb.mxu2 %v9869_v33  ;;  %752 = vmatpush.msrb.mxu3 %v9870_v34  ;;  %v4916_v33 = vld [vmem:[%s9128_s1 + $0x5a8] sm:$0xff]  ;;  %v4922_v34 = vld [vmem:[%s9128_s1 + $0x270] sm:$0xff] }
 0x133   :  { %693 = vmatpush.msrb.mxu0 %v9871_v35  ;;  %713 = vmatpush.msrb.mxu1 %v9872_v36  ;;  %v4928_v35 = vld [vmem:[%s9128_s1 + $0x570] sm:$0xff]  ;;  %v4934_v36 = vld [vmem:[%s9128_s1 + $0x278] sm:$0xff] }
 0x134   :  { %733 = vmatpush.msrb.mxu2 %v9873_v37  ;;  %753 = vmatpush.msrb.mxu3 %v9874_v38  ;;  %v4940_v37 = vld [vmem:[%s9128_s1 + $0x578] sm:$0xff]  ;;  %v4946_v38 = vld [vmem:[%s9128_s1 + $0x240] sm:$0xff] }
 0x135   :  { %694 = vmatpush.msrb.mxu0 %v9875_v39  ;;  %714 = vmatpush.msrb.mxu1 %v9876_v40  ;;  %v4952_v39 = vld [vmem:[%s9128_s1 + $0x540] sm:$0xff]  ;;  %v4958_v40 = vld [vmem:[%s9128_s1 + $0x248] sm:$0xff] }
 0x136   :  { %734 = vmatpush.msrb.mxu2 %v9877_v41  ;;  %754 = vmatpush.msrb.mxu3 %v9878_v42  ;;  %v4964_v41 = vld [vmem:[%s9128_s1 + $0x548] sm:$0xff]  ;;  %v4970_v42 = vld [vmem:[%s9128_s1 + $0x210] sm:$0xff] }
 0x137   :  { %695 = vmatpush.msrb.mxu0 %v9879_v43  ;;  %715 = vmatpush.msrb.mxu1 %v9880_v44  ;;  %v4976_v43 = vld [vmem:[%s9128_s1 + $0x510] sm:$0xff]  ;;  %v4982_v44 = vld [vmem:[%s9128_s1 + $0x218] sm:$0xff] }
 0x138   :  { %735 = vmatpush.msrb.mxu2 %v9881_v45  ;;  %755 = vmatpush.msrb.mxu3 %v9882_v46  ;;  %v4988_v45 = vld [vmem:[%s9128_s1 + $0x518] sm:$0xff]  ;;  %v4994_v46 = vld [vmem:[%s9128_s1 + $0x1e0] sm:$0xff] }
 0x139   :  { %628 = vmatmul.f32.vlgmr.msra.gmra.mxu0 %v4791_v29  ;;  %648 = vmatmul.f32.vlgmr.msra.gmra.mxu1 %v4793_v30 }
 0x13a   :  { %668 = vmatmul.f32.vlgmr.msra.gmra.mxu2 %v4791_v29  ;;  %688 = vmatmul.f32.vlgmr.msra.gmra.mxu3 %v4793_v30 }
 0x13b   :  { %696 = vmatpush.msrb.mxu0 %v9883_v47  ;;  %716 = vmatpush.msrb.mxu1 %v9884_v48  ;;  %v5000_v47 = vld [vmem:[%s9128_s1 + $0x4e0] sm:$0xff]  ;;  %v5006_v48 = vld [vmem:[%s9128_s1 + $0x1e8] sm:$0xff] }
 0x13c   :  { %736 = vmatpush.msrb.mxu2 %v9885_v49  ;;  %756 = vmatpush.msrb.mxu3 %v9886_v50  ;;  %v5012_v49 = vld [vmem:[%s9128_s1 + $0x4e8] sm:$0xff]  ;;  %v5018_v50 = vld [vmem:[%s9128_s1 + $0x1b0] sm:$0xff] }
 0x13d   :  { %697 = vmatpush.msrb.mxu0 %v9887_v52  ;;  %717 = vmatpush.msrb.mxu1 %v9888_v54  ;;  %v5024_v52 = vld [vmem:[%s9128_s1 + $0x4b0] sm:$0xff]  ;;  %v5030_v54 = vld [vmem:[%s9128_s1 + $0x1b8] sm:$0xff] }
 0x13e   :  { %737 = vmatpush.msrb.mxu2 %v9889_v55  ;;  %757 = vmatpush.msrb.mxu3 %v9890_v58  ;;  %v5036_v55 = vld [vmem:[%s9128_s1 + $0x4b8] sm:$0xff]  ;;  %v5042_v58 = vld [vmem:[%s9128_s1 + $0x180] sm:$0xff] }
 0x13f   :  { %698 = vmatpush.msrb.mxu0 %v9891_v0  ;;  %718 = vmatpush.msrb.mxu1 %v9892_v1  ;;  %v5048_v0 = vld [vmem:[%s9128_s1 + $0x480] sm:$0xff]  ;;  %v5054_v1 = vld [vmem:[%s9128_s1 + $0x188] sm:$0xff] }
 0x140   :  { %738 = vmatpush.msrb.mxu2 %v9893_v2  ;;  %758 = vmatpush.msrb.mxu3 %v9894_v4  ;;  %v5060_v2 = vld [vmem:[%s9128_s1 + $0x488] sm:$0xff]  ;;  %v5066_v4 = vld [vmem:[%s9128_s1 + $0x150] sm:$0xff] }
 0x141   :  { %699 = vmatpush.msrb.mxu0 %v9895_v5  ;;  %719 = vmatpush.msrb.mxu1 %v9896_v6  ;;  %v5072_v5 = vld [vmem:[%s9128_s1 + $0x450] sm:$0xff]  ;;  %v5078_v6 = vld [vmem:[%s9128_s1 + $0x158] sm:$0xff] }
 0x142   :  { %739 = vmatpush.msrb.mxu2 %v9897_v7  ;;  %759 = vmatpush.msrb.mxu3 %v9898_v8  ;;  %v5084_v7 = vld [vmem:[%s9128_s1 + $0x458] sm:$0xff]  ;;  %v5090_v8 = vld [vmem:[%s9128_s1 + $0x120] sm:$0xff] }
 0x143   :  { %700 = vmatpush.msrb.mxu0 %v9899_v9  ;;  %720 = vmatpush.msrb.mxu1 %v9900_v10  ;;  %v5096_v9 = vld [vmem:[%s9128_s1 + $0x420] sm:$0xff]  ;;  %v5102_v10 = vld [vmem:[%s9128_s1 + $0x128] sm:$0xff] }
 0x144   :  { %740 = vmatpush.msrb.mxu2 %v9901_v11  ;;  %760 = vmatpush.msrb.mxu3 %v9902_v12  ;;  %9923 = vst [vmem:[#allocation2_spill] sm:$0xff] %v5102_v10  ;;  %v5108_v11 = vld [vmem:[%s9128_s1 + $0x428] sm:$0xff]  ;;  %v5114_v12 = vld [vmem:[%s9128_s1 + $0xf0] sm:$0xff] }
 0x145   :  { %701 = vmatpush.msrb.mxu0 %v9903_v13  ;;  %721 = vmatpush.msrb.mxu1 %v9904_v14  ;;  %9924 = vst [vmem:[#allocation3_spill] sm:$0xff] %v5108_v11  ;;  %v5120_v13 = vld [vmem:[%s9128_s1 + $0x3f0] sm:$0xff]  ;;  %v5126_v14 = vld [vmem:[%s9128_s1 + $0xf8] sm:$0xff] }
 0x146   :  { %741 = vmatpush.msrb.mxu2 %v9905_v15  ;;  %761 = vmatpush.msrb.mxu3 %v9906_v16  ;;  %9925 = vst [vmem:[#allocation6_spill] sm:$0xff] %v5114_v12  ;;  %v5132_v15 = vld [vmem:[%s9128_s1 + $0x3f8] sm:$0xff]  ;;  %v5138_v16 = vld [vmem:[%s9128_s1 + $0xc0] sm:$0xff] }
 0x147   :  { %702 = vmatpush.msrb.mxu0 %v9907_v17  ;;  %722 = vmatpush.msrb.mxu1 %v9908_v18  ;;  %9926 = vst [vmem:[#allocation7_spill] sm:$0xff] %v5120_v13  ;;  %v5144_v17 = vld [vmem:[%s9128_s1 + $0x3c0] sm:$0xff]  ;;  %v5150_v18 = vld [vmem:[%s9128_s1 + $0xc8] sm:$0xff] }
 0x148   :  { %742 = vmatpush.msrb.mxu2 %v9909_v19  ;;  %762 = vmatpush.msrb.mxu3 %v9910_v20  ;;  %9927 = vst [vmem:[#allocation4_spill] sm:$0xff] %v5126_v14  ;;  %v5156_v19 = vld [vmem:[%s9128_s1 + $0x3c8] sm:$0xff]  ;;  %v5162_v20 = vld [vmem:[%s9128_s1 + $0x90] sm:$0xff] }
 0x149   :  { %703 = vmatpush.msrb.mxu0 %v4555_v60  ;;  %723 = vmatpush.msrb.mxu1 %v4560_v53  ;;  %v9918_v60 = vld [vmem:[#allocation122_spill] sm:$0xff]  ;;  %v9919_v53 = vld [vmem:[#allocation125_spill] sm:$0xff]  ;;  %9928 = vst [vmem:[#allocation5_spill] sm:$0xff] %v5132_v15 }
 0x14a   :  { %743 = vmatpush.msrb.mxu2 %v9911_v21  ;;  %763 = vmatpush.msrb.mxu3 %v9912_v22  ;;  %9929 = vst [vmem:[#allocation8_spill] sm:$0xff] %v5138_v16  ;;  %v5168_v21 = vld [vmem:[%s9128_s1 + $0x390] sm:$0xff]  ;;  %v5174_v22 = vld [vmem:[%s9128_s1 + $0x98] sm:$0xff] }
 0x14b   :  { %704 = vmatpush.msrb.mxu0 %v9913_v23  ;;  %724 = vmatpush.msrb.mxu1 %v9914_v24  ;;  %9930 = vst [vmem:[#allocation9_spill] sm:$0xff] %v5144_v17  ;;  %v5180_v23 = vld [vmem:[%s9128_s1 + $0x398] sm:$0xff]  ;;  %v5186_v24 = vld [vmem:[%s9128_s1 + $0x60] sm:$0xff] }
 0x14c   :  { %744 = vmatpush.msrb.mxu2 %v9915_v25  ;;  %764 = vmatpush.msrb.mxu3 %v9916_v26  ;;  %9931 = vst [vmem:[#allocation10_spill] sm:$0xff] %v5150_v18  ;;  %v5192_v25 = vld [vmem:[%s9128_s1 + $0x360] sm:$0xff]  ;;  %v5198_v26 = vld [vmem:[%s9128_s1 + $0x68] sm:$0xff] }
 0x14d   :  { %705 = vmatpush.msrb.mxu0 %v4595_v62  ;;  %725 = vmatpush.msrb.mxu1 %v4600_v56  ;;  %v9922_v62 = vld [vmem:[#allocation128_spill] sm:$0xff]  ;;  %v4874_v56 = vld [vmem:[%s9128_s1 + $0x2d0] sm:$0xff]  ;;  %9932 = vst [vmem:[#allocation11_spill] sm:$0xff] %v5156_v19 }
 0x14e   :  { %745 = vmatpush.msrb.mxu2 %v9917_v27  ;;  %765 = vmatpush.msrb.mxu3 %v9918_v60  ;;  %9933 = vst [vmem:[#allocation12_spill] sm:$0xff] %v5162_v20  ;;  %v5204_v27 = vld [vmem:[%s9128_s1 + $0x368] sm:$0xff]  ;;  %v5210_v60 = vld [vmem:[%s9128_s1 + $0x30] sm:$0xff] }
 0x14f   :  { %706 = vmatpush.msrb.mxu0 %v4607_v59  ;;  %726 = vmatpush.msrb.mxu1 %v4612_v61  ;;  %v4886_v59 = vld [vmem:[%s9128_s1 + $0x2d8] sm:$0xff]  ;;  %9934 = vst [vmem:[#allocation13_spill] sm:$0xff] %v5168_v21 }
 0x150   :  { %746 = vmatpush.msrb.mxu2 %v9919_v53  ;;  %766 = vmatpush.msrb.mxu3 %v9920_v31  ;;  %v4892_v61 = vld [vmem:[%s9128_s1 + $0x5d8] sm:$0xff]  ;;  %9935 = vst [vmem:[#allocation14_spill] sm:$0xff] %v5174_v22  ;;  %v5216_v53 = vld [vmem:[%s9128_s1 + $0x330] sm:$0xff] }
 0x151   :  { %707 = vmatpush.msrb.mxu0 %v4621_v63  ;;  %727 = vmatpush.msrb.mxu1 %v4626_v57  ;;  %v4880_v57 = vld [vmem:[%s9128_s1 + $0x5d0] sm:$0xff]  ;;  %v4898_v63 = vld [vmem:[%s9128_s1 + $0x2a0] sm:$0xff]  ;;  %9936 = vst [vmem:[#allocation17_spill] sm:$0xff] %v5180_v23  ;;  %v5222_v31 = vld [vmem:[%s9128_s1 + $0x38] sm:$0xff] }
 0x152   :  { %747 = vmatpush.msrb.mxu2 %v9921_v32  ;;  %767 = vmatpush.msrb.mxu3 %v9922_v62  ;;  %9937 = vst [vmem:[#allocation18_spill] sm:$0xff] %v5186_v24  ;;  %v5228_v32 = vld [vmem:[%s9128_s1 + $0x338] sm:$0xff]  ;;  %v5234_v62 = vld [vmem:[%s9128_s1] sm:$0xff] }
 0x153   :  { %708 = vmatmul.f32.vlgmr.msrb.gmra.mxu0 %v4791_v29  ;;  %728 = vmatmul.f32.vlgmr.msrb.gmra.mxu1 %v4793_v30  ;;  %9938 = vst [vmem:[#allocation15_spill] sm:$0xff] %v5192_v25 }
 0x154   :  { %748 = vmatmul.f32.vlgmr.msrb.gmra.mxu2 %v4791_v29  ;;  %768 = vmatmul.f32.vlgmr.msrb.gmra.mxu3 %v4793_v30  ;;  %v4904_v29 = vld [vmem:[%s9128_s1 + $0x5a0] sm:$0xff]  ;;  %v4910_v30 = vld [vmem:[%s9128_s1 + $0x2a8] sm:$0xff]  ;;  %9939 = vst [vmem:[#allocation16_spill] sm:$0xff] %v5198_v26 }
 0x155   :  { %850 = vmatpush.msra.mxu0 %v4874_v56  ;;  %870 = vmatpush.msra.mxu1 %v4880_v57  ;;  %9940 = vst [vmem:[#allocation21_spill] sm:$0xff] %v5204_v27 }
 0x156   :  { %890 = vmatpush.msra.mxu2 %v4886_v59  ;;  %910 = vmatpush.msra.mxu3 %v4892_v61  ;;  %9941 = vst [vmem:[#allocation22_spill] sm:$0xff] %v5210_v60 }
 0x157   :  { %851 = vmatpush.msra.mxu0 %v4898_v63  ;;  %871 = vmatpush.msra.mxu1 %v4904_v29  ;;  %9942 = vst [vmem:[#allocation19_spill] sm:$0xff] %v5216_v53 }
 0x158   :  { %891 = vmatpush.msra.mxu2 %v4910_v30  ;;  %911 = vmatpush.msra.mxu3 %v4916_v33  ;;  %9943 = vst [vmem:[#allocation20_spill] sm:$0xff] %v5222_v31 }
 0x159   :  { %852 = vmatpush.msra.mxu0 %v4922_v34  ;;  %872 = vmatpush.msra.mxu1 %v4928_v35  ;;  %9944 = vst [vmem:[#allocation25_spill] sm:$0xff] %v5228_v32 }
 0x15a   :  { %892 = vmatpush.msra.mxu2 %v4934_v36  ;;  %912 = vmatpush.msra.mxu3 %v4940_v37  ;;  %9945 = vst [vmem:[#allocation26_spill] sm:$0xff] %v5234_v62 }
 0x15b   :  { %853 = vmatpush.msra.mxu0 %v4946_v38  ;;  %873 = vmatpush.msra.mxu1 %v4952_v39 }
 0x15c   :  { %893 = vmatpush.msra.mxu2 %v4958_v40  ;;  %913 = vmatpush.msra.mxu3 %v4964_v41 }
 0x15d   :  { %854 = vmatpush.msra.mxu0 %v4970_v42  ;;  %874 = vmatpush.msra.mxu1 %v4976_v43 }
 0x15e   :  { %894 = vmatpush.msra.mxu2 %v4982_v44  ;;  %914 = vmatpush.msra.mxu3 %v4988_v45 }
 0x15f   :  { %855 = vmatpush.msra.mxu0 %v4994_v46  ;;  %875 = vmatpush.msra.mxu1 %v5000_v47 }
 0x160   :  { %895 = vmatpush.msra.mxu2 %v5006_v48  ;;  %915 = vmatpush.msra.mxu3 %v5012_v49 }
 0x161   :  { %856 = vmatpush.msra.mxu0 %v5018_v50  ;;  %876 = vmatpush.msra.mxu1 %v5024_v52 }
 0x162   :  { %896 = vmatpush.msra.mxu2 %v5030_v54  ;;  %916 = vmatpush.msra.mxu3 %v5036_v55 }
 0x163   :  { %857 = vmatpush.msra.mxu0 %v5042_v58  ;;  %877 = vmatpush.msra.mxu1 %v5048_v0 }
 0x164   :  { %897 = vmatpush.msra.mxu2 %v5054_v1  ;;  %917 = vmatpush.msra.mxu3 %v5060_v2 }
 0x165   :  { %858 = vmatpush.msra.mxu0 %v5066_v4  ;;  %878 = vmatpush.msra.mxu1 %v5072_v5 }
 0x166   :  { %898 = vmatpush.msra.mxu2 %v5078_v6  ;;  %918 = vmatpush.msra.mxu3 %v5084_v7 }
 0x167   :  { %859 = vmatpush.msra.mxu0 %v5090_v8  ;;  %879 = vmatpush.msra.mxu1 %v5096_v9 }
 0x168   :  { %899 = vmatpush.msra.mxu2 %v5102_v10  ;;  %919 = vmatpush.msra.mxu3 %v5108_v11 }
 0x169   :  { %860 = vmatpush.msra.mxu0 %v5114_v12  ;;  %880 = vmatpush.msra.mxu1 %v5120_v13 }
 0x16a   :  { %900 = vmatpush.msra.mxu2 %v5126_v14  ;;  %920 = vmatpush.msra.mxu3 %v5132_v15 }
 0x16b   :  { %861 = vmatpush.msra.mxu0 %v5138_v16  ;;  %881 = vmatpush.msra.mxu1 %v5144_v17 }
 0x16c   :  { %901 = vmatpush.msra.mxu2 %v5150_v18  ;;  %921 = vmatpush.msra.mxu3 %v5156_v19 }
 0x16d   :  { %862 = vmatpush.msra.mxu0 %v5162_v20  ;;  %882 = vmatpush.msra.mxu1 %v5168_v21 }
 0x16e   :  { %902 = vmatpush.msra.mxu2 %v5174_v22  ;;  %922 = vmatpush.msra.mxu3 %v5180_v23 }
 0x16f   :  { %863 = vmatpush.msra.mxu0 %v5186_v24  ;;  %883 = vmatpush.msra.mxu1 %v5192_v25  ;;  %v2755_v24 = vld [vmem:[%s9129_s0 + $0xc] sm:$0xff] }
 0x170   :  { %903 = vmatpush.msra.mxu2 %v5198_v26  ;;  %923 = vmatpush.msra.mxu3 %v5204_v27  ;;  %v798_v16 = vrot.slane %v2755_v24, 4 }
 0x171   :  { %864 = vmatpush.msra.mxu0 %v5210_v60  ;;  %884 = vmatpush.msra.mxu1 %v5216_v53  ;;  %v5240_v53 = vld [vmem:[%s9128_s1 + $0x300] sm:$0xff] }
 0x172   :  { %904 = vmatpush.msra.mxu2 %v5222_v31  ;;  %924 = vmatpush.msra.mxu3 %v5228_v32  ;;  %9946 = vst [vmem:[#allocation23_spill] sm:$0xff] %v5240_v53  ;;  %v5246_v31 = vld [vmem:[%s9128_s1 + $0x8] sm:$0xff] }
 0x173   :  { %865 = vmatpush.msra.mxu0 %v5234_v62  ;;  %885 = vmatpush.msra.mxu1 %v5240_v53  ;;  %9947 = vst [vmem:[#allocation24_spill] sm:$0xff] %v5246_v31  ;;  %v5252_v32 = vld [vmem:[%s9128_s1 + $0x308] sm:$0xff]  ;;  %v5258_v62 = vld [vmem:[%s9128_s1 + $0x2e0] sm:$0xff] }
 0x174   :  { %905 = vmatpush.msra.mxu2 %v5246_v31  ;;  %9948 = vst [vmem:[#allocation29_spill] sm:$0xff] %v5252_v32  ;;  %925 = vmatpush.msra.mxu3 %v5252_v32  ;;  %v5264_v53 = vld [vmem:[%s9128_s1 + $0x5e0] sm:$0xff]  ;;  %v5270_v31 = vld [vmem:[%s9128_s1 + $0x2e8] sm:$0xff] }
 0x175   :  { %9949 = vst [vmem:[#allocation30_spill] sm:$0xff] %v5258_v62  ;;  %930 = vmatpush.msrb.mxu0 %v5258_v62  ;;  %950 = vmatpush.msrb.mxu1 %v5264_v53  ;;  %v5276_v32 = vld [vmem:[%s9128_s1 + $0x5e8] sm:$0xff]  ;;  %v5282_v62 = vld [vmem:[%s9128_s1 + $0x2b0] sm:$0xff] }
 0x176   :  { %9950 = vst [vmem:[#allocation27_spill] sm:$0xff] %v5264_v53  ;;  %970 = vmatpush.msrb.mxu2 %v5270_v31  ;;  %990 = vmatpush.msrb.mxu3 %v5276_v32  ;;  %v5288_v53 = vld [vmem:[%s9128_s1 + $0x5b0] sm:$0xff] }
 0x177   :  { %9951 = vst [vmem:[#allocation28_spill] sm:$0xff] %v5270_v31  ;;  %931 = vmatpush.msrb.mxu0 %v5282_v62  ;;  %951 = vmatpush.msrb.mxu1 %v5288_v53  ;;  %v5294_v31 = vld [vmem:[%s9128_s1 + $0x2b8] sm:$0xff] }
 0x178   :  { %9952 = vst [vmem:[#allocation33_spill] sm:$0xff] %v5276_v32  ;;  %971 = vmatpush.msrb.mxu2 %v5294_v31  ;;  %v5300_v32 = vld [vmem:[%s9128_s1 + $0x5b8] sm:$0xff] }
 0x179   :  { %9953 = vst [vmem:[#allocation34_spill] sm:$0xff] %v5282_v62  ;;  %991 = vmatpush.msrb.mxu3 %v5300_v32  ;;  %v5306_v62 = vld [vmem:[%s9128_s1 + $0x280] sm:$0xff] }
 0x17a   :  { %9954 = vst [vmem:[#allocation31_spill] sm:$0xff] %v5288_v53  ;;  %932 = vmatpush.msrb.mxu0 %v5306_v62  ;;  %v5312_v53 = vld [vmem:[%s9128_s1 + $0x580] sm:$0xff] }
 0x17b   :  { %9955 = vst [vmem:[#allocation32_spill] sm:$0xff] %v5294_v31  ;;  %952 = vmatpush.msrb.mxu1 %v5312_v53  ;;  %v5318_v31 = vld [vmem:[%s9128_s1 + $0x288] sm:$0xff] }
 0x17c   :  { %9956 = vst [vmem:[#allocation39_spill] sm:$0xff] %v5300_v32  ;;  %972 = vmatpush.msrb.mxu2 %v5318_v31  ;;  %v5324_v32 = vld [vmem:[%s9128_s1 + $0x588] sm:$0xff] }
 0x17d   :  { %9957 = vst [vmem:[#allocation40_spill] sm:$0xff] %v5306_v62  ;;  %992 = vmatpush.msrb.mxu3 %v5324_v32  ;;  %v5330_v62 = vld [vmem:[%s9128_s1 + $0x250] sm:$0xff] }
 0x17e   :  { %9958 = vst [vmem:[#allocation35_spill] sm:$0xff] %v5312_v53  ;;  %933 = vmatpush.msrb.mxu0 %v5330_v62  ;;  %v5336_v53 = vld [vmem:[%s9128_s1 + $0x550] sm:$0xff] }
 0x17f   :  { %9959 = vst [vmem:[#allocation36_spill] sm:$0xff] %v5318_v31  ;;  %953 = vmatpush.msrb.mxu1 %v5336_v53  ;;  %v5342_v31 = vld [vmem:[%s9128_s1 + $0x258] sm:$0xff] }
 0x180   :  { %9960 = vst [vmem:[#allocation43_spill] sm:$0xff] %v5324_v32  ;;  %973 = vmatpush.msrb.mxu2 %v5342_v31  ;;  %v5348_v32 = vld [vmem:[%s9128_s1 + $0x558] sm:$0xff] }
 0x181   :  { %9961 = vst [vmem:[#allocation44_spill] sm:$0xff] %v5330_v62  ;;  %993 = vmatpush.msrb.mxu3 %v5348_v32  ;;  %v5354_v62 = vld [vmem:[%s9128_s1 + $0x220] sm:$0xff] }
 0x182   :  { %9962 = vst [vmem:[#allocation37_spill] sm:$0xff] %v5336_v53  ;;  %934 = vmatpush.msrb.mxu0 %v5354_v62  ;;  %v5360_v53 = vld [vmem:[%s9128_s1 + $0x520] sm:$0xff] }
 0x183   :  { %9963 = vst [vmem:[#allocation38_spill] sm:$0xff] %v5342_v31  ;;  %954 = vmatpush.msrb.mxu1 %v5360_v53  ;;  %v5366_v31 = vld [vmem:[%s9128_s1 + $0x228] sm:$0xff] }
 0x184   :  { %9964 = vst [vmem:[#allocation47_spill] sm:$0xff] %v5348_v32  ;;  %974 = vmatpush.msrb.mxu2 %v5366_v31  ;;  %v5372_v32 = vld [vmem:[%s9128_s1 + $0x528] sm:$0xff] }
 0x185   :  { %9965 = vst [vmem:[#allocation48_spill] sm:$0xff] %v5354_v62  ;;  %994 = vmatpush.msrb.mxu3 %v5372_v32  ;;  %v5378_v62 = vld [vmem:[%s9128_s1 + $0x1f0] sm:$0xff] }
 0x186   :  { %9966 = vst [vmem:[#allocation41_spill] sm:$0xff] %v5360_v53  ;;  %935 = vmatpush.msrb.mxu0 %v5378_v62  ;;  %v5384_v53 = vld [vmem:[%s9128_s1 + $0x4f0] sm:$0xff] }
 0x187   :  { %9967 = vst [vmem:[#allocation42_spill] sm:$0xff] %v5366_v31  ;;  %955 = vmatpush.msrb.mxu1 %v5384_v53  ;;  %v5390_v31 = vld [vmem:[%s9128_s1 + $0x1f8] sm:$0xff] }
 0x188   :  { %9968 = vst [vmem:[#allocation51_spill] sm:$0xff] %v5372_v32  ;;  %975 = vmatpush.msrb.mxu2 %v5390_v31  ;;  %v5396_v32 = vld [vmem:[%s9128_s1 + $0x4f8] sm:$0xff] }
 0x189   :  { %9969 = vst [vmem:[#allocation52_spill] sm:$0xff] %v5378_v62  ;;  %995 = vmatpush.msrb.mxu3 %v5396_v32  ;;  %v5402_v62 = vld [vmem:[%s9128_s1 + $0x1c0] sm:$0xff] }
 0x18a   :  { %9970 = vst [vmem:[#allocation45_spill] sm:$0xff] %v5384_v53  ;;  %936 = vmatpush.msrb.mxu0 %v5402_v62  ;;  %v5408_v53 = vld [vmem:[%s9128_s1 + $0x4c0] sm:$0xff] }
 0x18b   :  { %9971 = vst [vmem:[#allocation46_spill] sm:$0xff] %v5390_v31  ;;  %956 = vmatpush.msrb.mxu1 %v5408_v53  ;;  %v5414_v31 = vld [vmem:[%s9128_s1 + $0x1c8] sm:$0xff] }
 0x18c   :  { %9972 = vst [vmem:[#allocation55_spill] sm:$0xff] %v5396_v32  ;;  %976 = vmatpush.msrb.mxu2 %v5414_v31  ;;  %v5420_v32 = vld [vmem:[%s9128_s1 + $0x4c8] sm:$0xff] }
 0x18d   :  { %9973 = vst [vmem:[#allocation56_spill] sm:$0xff] %v5402_v62  ;;  %996 = vmatpush.msrb.mxu3 %v5420_v32  ;;  %v5426_v62 = vld [vmem:[%s9128_s1 + $0x190] sm:$0xff] }
 0x18e   :  { %9974 = vst [vmem:[#allocation49_spill] sm:$0xff] %v5408_v53  ;;  %937 = vmatpush.msrb.mxu0 %v5426_v62  ;;  %v5432_v53 = vld [vmem:[%s9128_s1 + $0x490] sm:$0xff] }
 0x18f   :  { %9975 = vst [vmem:[#allocation50_spill] sm:$0xff] %v5414_v31  ;;  %957 = vmatpush.msrb.mxu1 %v5432_v53  ;;  %v5438_v31 = vld [vmem:[%s9128_s1 + $0x198] sm:$0xff] }
 0x190   :  { %9976 = vst [vmem:[#allocation59_spill] sm:$0xff] %v5420_v32  ;;  %977 = vmatpush.msrb.mxu2 %v5438_v31  ;;  %v5444_v32 = vld [vmem:[%s9128_s1 + $0x498] sm:$0xff] }
 0x191   :  { %9977 = vst [vmem:[#allocation60_spill] sm:$0xff] %v5426_v62  ;;  %997 = vmatpush.msrb.mxu3 %v5444_v32  ;;  %v5450_v62 = vld [vmem:[%s9128_s1 + $0x160] sm:$0xff] }
 0x192   :  { %9978 = vst [vmem:[#allocation53_spill] sm:$0xff] %v5432_v53  ;;  %938 = vmatpush.msrb.mxu0 %v5450_v62  ;;  %v5456_v53 = vld [vmem:[%s9128_s1 + $0x460] sm:$0xff] }
 0x193   :  { %9979 = vst [vmem:[#allocation54_spill] sm:$0xff] %v5438_v31  ;;  %958 = vmatpush.msrb.mxu1 %v5456_v53  ;;  %v5462_v31 = vld [vmem:[%s9128_s1 + $0x168] sm:$0xff] }
 0x194   :  { %9980 = vst [vmem:[#allocation63_spill] sm:$0xff] %v5444_v32  ;;  %978 = vmatpush.msrb.mxu2 %v5462_v31  ;;  %v5468_v32 = vld [vmem:[%s9128_s1 + $0x468] sm:$0xff] }
 0x195   :  { %9981 = vst [vmem:[#allocation64_spill] sm:$0xff] %v5450_v62  ;;  %998 = vmatpush.msrb.mxu3 %v5468_v32  ;;  %v5474_v62 = vld [vmem:[%s9128_s1 + $0x130] sm:$0xff] }
 0x196   :  { %9982 = vst [vmem:[#allocation57_spill] sm:$0xff] %v5456_v53  ;;  %939 = vmatpush.msrb.mxu0 %v5474_v62  ;;  %v5480_v53 = vld [vmem:[%s9128_s1 + $0x430] sm:$0xff] }
 0x197   :  { %9983 = vst [vmem:[#allocation58_spill] sm:$0xff] %v5462_v31  ;;  %959 = vmatpush.msrb.mxu1 %v5480_v53  ;;  %v5486_v31 = vld [vmem:[%s9128_s1 + $0x138] sm:$0xff] }
 0x198   :  { %9984 = vst [vmem:[#allocation69_spill] sm:$0xff] %v5468_v32  ;;  %979 = vmatpush.msrb.mxu2 %v5486_v31  ;;  %v5492_v32 = vld [vmem:[%s9128_s1 + $0x438] sm:$0xff] }
 0x199   :  { %9985 = vst [vmem:[#allocation70_spill] sm:$0xff] %v5474_v62  ;;  %999 = vmatpush.msrb.mxu3 %v5492_v32  ;;  %v5498_v62 = vld [vmem:[%s9128_s1 + $0x100] sm:$0xff] }
 0x19a   :  { %9986 = vst [vmem:[#allocation61_spill] sm:$0xff] %v5480_v53  ;;  %940 = vmatpush.msrb.mxu0 %v5498_v62  ;;  %v5504_v53 = vld [vmem:[%s9128_s1 + $0x400] sm:$0xff] }
 0x19b   :  { %9987 = vst [vmem:[#allocation62_spill] sm:$0xff] %v5486_v31  ;;  %960 = vmatpush.msrb.mxu1 %v5504_v53  ;;  %v5510_v31 = vld [vmem:[%s9128_s1 + $0x108] sm:$0xff] }
 0x19c   :  { %9988 = vst [vmem:[#allocation73_spill] sm:$0xff] %v5492_v32  ;;  %980 = vmatpush.msrb.mxu2 %v5510_v31  ;;  %v5516_v32 = vld [vmem:[%s9128_s1 + $0x408] sm:$0xff] }
 0x19d   :  { %9989 = vst [vmem:[#allocation74_spill] sm:$0xff] %v5498_v62  ;;  %1000 = vmatpush.msrb.mxu3 %v5516_v32  ;;  %v5522_v62 = vld [vmem:[%s9128_s1 + $0xd0] sm:$0xff] }
 0x19e   :  { %9990 = vst [vmem:[#allocation65_spill] sm:$0xff] %v5504_v53  ;;  %941 = vmatpush.msrb.mxu0 %v5522_v62  ;;  %v5528_v53 = vld [vmem:[%s9128_s1 + $0x3d0] sm:$0xff] }
 0x19f   :  { %9991 = vst [vmem:[#allocation66_spill] sm:$0xff] %v5510_v31  ;;  %961 = vmatpush.msrb.mxu1 %v5528_v53  ;;  %v5534_v31 = vld [vmem:[%s9128_s1 + $0xd8] sm:$0xff] }
 0x1a0   :  { %9992 = vst [vmem:[#allocation77_spill] sm:$0xff] %v5516_v32  ;;  %981 = vmatpush.msrb.mxu2 %v5534_v31  ;;  %v5540_v32 = vld [vmem:[%s9128_s1 + $0x3d8] sm:$0xff] }
 0x1a1   :  { %9993 = vst [vmem:[#allocation78_spill] sm:$0xff] %v5522_v62  ;;  %1001 = vmatpush.msrb.mxu3 %v5540_v32  ;;  %v5546_v62 = vld [vmem:[%s9128_s1 + $0xa0] sm:$0xff] }
 0x1a2   :  { %9994 = vst [vmem:[#allocation81_spill] sm:$0xff] %v5528_v53  ;;  %942 = vmatpush.msrb.mxu0 %v5546_v62  ;;  %v5552_v53 = vld [vmem:[%s9128_s1 + $0x3a0] sm:$0xff] }
 0x1a3   :  { %9995 = vst [vmem:[#allocation82_spill] sm:$0xff] %v5534_v31  ;;  %962 = vmatpush.msrb.mxu1 %v5552_v53  ;;  %v5558_v31 = vld [vmem:[%s9128_s1 + $0xa8] sm:$0xff] }
 0x1a4   :  { %9996 = vst [vmem:[#allocation83_spill] sm:$0xff] %v5540_v32  ;;  %982 = vmatpush.msrb.mxu2 %v5558_v31  ;;  %v5564_v32 = vld [vmem:[%s9128_s1 + $0x3a8] sm:$0xff] }
 0x1a5   :  { %9997 = vst [vmem:[#allocation84_spill] sm:$0xff] %v5546_v62  ;;  %1002 = vmatpush.msrb.mxu3 %v5564_v32  ;;  %v5570_v62 = vld [vmem:[%s9128_s1 + $0x70] sm:$0xff] }
 0x1a6   :  { %9998 = vst [vmem:[#allocation67_spill] sm:$0xff] %v5552_v53  ;;  %943 = vmatpush.msrb.mxu0 %v5570_v62  ;;  %v5576_v53 = vld [vmem:[%s9128_s1 + $0x370] sm:$0xff] }
 0x1a7   :  { %9999 = vst [vmem:[#allocation68_spill] sm:$0xff] %v5558_v31  ;;  %963 = vmatpush.msrb.mxu1 %v5576_v53  ;;  %v5582_v31 = vld [vmem:[%s9128_s1 + $0x78] sm:$0xff] }
 0x1a8   :  { %10000 = vst [vmem:[#allocation87_spill] sm:$0xff] %v5564_v32  ;;  %983 = vmatpush.msrb.mxu2 %v5582_v31  ;;  %v5588_v32 = vld [vmem:[%s9128_s1 + $0x378] sm:$0xff] }
 0x1a9   :  { %10001 = vst [vmem:[#allocation88_spill] sm:$0xff] %v5570_v62  ;;  %1003 = vmatpush.msrb.mxu3 %v5588_v32  ;;  %v5594_v62 = vld [vmem:[%s9128_s1 + $0x40] sm:$0xff] }
 0x1aa   :  { %10002 = vst [vmem:[#allocation71_spill] sm:$0xff] %v5576_v53  ;;  %944 = vmatpush.msrb.mxu0 %v5594_v62  ;;  %v5600_v53 = vld [vmem:[%s9128_s1 + $0x340] sm:$0xff] }
 0x1ab   :  { %10003 = vst [vmem:[#allocation72_spill] sm:$0xff] %v5582_v31  ;;  %964 = vmatpush.msrb.mxu1 %v5600_v53  ;;  %v5606_v31 = vld [vmem:[%s9128_s1 + $0x48] sm:$0xff] }
 0x1ac   :  { %10004 = vst [vmem:[#allocation91_spill] sm:$0xff] %v5588_v32  ;;  %984 = vmatpush.msrb.mxu2 %v5606_v31  ;;  %v5612_v32 = vld [vmem:[%s9128_s1 + $0x348] sm:$0xff]  ;;  %v569_v60 = vpop.f32.mrf.mxu1 }
 0x1ad   :  { %10005 = vst [vmem:[#allocation92_spill] sm:$0xff] %v5594_v62  ;;  %1004 = vmatpush.msrb.mxu3 %v5612_v32  ;;  %v5618_v62 = vld [vmem:[%s9128_s1 + $0x10] sm:$0xff] }
 0x1ae   :  { %10006 = vst [vmem:[#allocation75_spill] sm:$0xff] %v5600_v53  ;;  %945 = vmatpush.msrb.mxu0 %v5618_v62  ;;  %v5624_v53 = vld [vmem:[%s9128_s1 + $0x310] sm:$0xff] }
 0x1af   :  { %10007 = vst [vmem:[#allocation76_spill] sm:$0xff] %v5606_v31  ;;  %965 = vmatpush.msrb.mxu1 %v5624_v53  ;;  %v5630_v31 = vld [vmem:[%s9128_s1 + $0x18] sm:$0xff] }
 0x1b0   :  { %10008 = vst [vmem:[#allocation95_spill] sm:$0xff] %v5612_v32  ;;  %985 = vmatpush.msrb.mxu2 %v5630_v31  ;;  %v5636_v32 = vld [vmem:[%s9128_s1 + $0x318] sm:$0xff] }
 0x1b1   :  { %10009 = vst [vmem:[#allocation96_spill] sm:$0xff] %v5618_v62  ;;  %1005 = vmatpush.msrb.mxu3 %v5636_v32  ;;  %v549_v62 = vpop.f32.mrf.mxu0 }
 0x1b2   :  { %10010 = vst [vmem:[#allocation79_spill] sm:$0xff] %v5624_v53  ;;  %v570_v53 = vadd.f32 %v569_v60, %v549_v62 }
 0x1b3   :  { %10011 = vst [vmem:[#allocation80_spill] sm:$0xff] %v5630_v31  ;;  %v589_v27 = vpop.f32.mrf.mxu2  ;;  %v609_v26 = vpop.f32.mrf.mxu3 }
 0x1b4   :  { %10012 = vst [vmem:[#allocation99_spill] sm:$0xff] %v5636_v32  ;;  %v610_v25 = vadd.f32 %v609_v26, %v589_v27 }
 0x1b6   :  { %v774_v23 = vrot.slane %v610_v25, 6  ;;  %v649_v19 = vpop.f32.mrf.mxu1 }
 0x1b8   :  { %v775_v31 = vsel %vm452_vm0, %v570_v53, %v774_v23 }
 0x1b9   :  { %v777_v22 = vadd.f32 %v2755_v24, %v775_v31  ;;  %v629_v20 = vpop.f32.mrf.mxu0 }
 0x1ba   :  { %v650_v15 = vadd.f32 %v649_v19, %v629_v20 }
 0x1bb   :  { %v2757_v21 = vmul.f32 -1.442695, %v777_v22 }
 0x1bd   :  { %2801 = vpow2.f32 %v2757_v21  ;;  %v669_v18 = vpop.f32.mrf.mxu2  ;;  %v689_v32 = vpop.f32.mrf.mxu3 }
 0x1be   :  { %v690_v17 = vadd.f32 %v689_v32, %v669_v18 }
 0x1c0   :  { %v802_v14 = vrot.slane %v690_v17, 6 }
 0x1c2   :  { %v803_v26 = vsel %vm452_vm0, %v650_v15, %v802_v14 }
 0x1c3   :  { %v2802_v27 = vpop.eup %2801  ;;  %v805_v60 = vadd.f32 %v803_v26, %v798_v16 }
 0x1c4   :  { %v781_v62 = vadd.f32 1.0, %v2802_v27 }
 0x1c5   :  { %v2758_v13 = vmul.f32 -1.442695, %v805_v60 }
 0x1c6   :  { %2803 = vrcp.f32 %v781_v62  ;;  %v793_v32 = vand.u32 2147483648, %v781_v62  ;;  %vm787_vm10 = vweird.f32 %v781_v62 }
 0x1c7   :  { %2805 = vpow2.f32 %v2758_v13  ;;  %v791_v13 = vand.u32 2147483647, %v781_v62 }
 0x1c9   :  { %vm792_vm12 = vcmp.eq.f32.partialorder %v791_v13, 8.507059e+37 }
 0x1cc   :  { %v2804_v23 = vpop.eup %2803 }
 0x1cd   :  { %v2806_v25 = vpop.eup %2805  ;;  %v783_v22 = vmul.f32 %v2804_v23, %v781_v62  ;;  %vm788_vm9 = vweird.f32 %v2804_v23 }
 0x1ce   :  { %v809_v53 = vadd.f32 1.0, %v2806_v25  ;;  %vm789_vm11 = vmor %vm787_vm10, %vm788_vm9 }
 0x1cf   :  { %v784_v31 = vsub.f32 1.0, %v783_v22 }
 0x1d0   :  { %2807 = vrcp.f32 %v809_v53  ;;  %v709_v12 = vpop.f32.mrf.mxu0  ;;  %v729_v18 = vpop.f32.mrf.mxu1  ;;  %v821_v62 = vand.u32 2147483648, %v809_v53  ;;  %vm815_vm14 = vweird.f32 %v809_v53 }
 0x1d1   :  { %v785_v21 = vmul.f32 %v2804_v23, %v784_v31  ;;  %v730_v15 = vadd.f32 %v729_v18, %v709_v12  ;;  %v794_v31 = vor.u32 1.1754944e-38, %v793_v32  ;;  %v2756_v12 = vld [vmem:[%s9129_s0 + $0x14] sm:$0xf] }
 0x1d3   :  { %v786_v14 = vadd.f32 %v2804_v23, %v785_v21  ;;  %v825_v22 = vadd.f32 %v730_v15, %v4774_v3 }
 0x1d5   :  { %v790_v25 = vsel %vm789_vm11, %v2804_v23, %v786_v14  ;;  %v822_v14 = vor.u32 1.1754944e-38, %v821_v62  ;;  %v5729_v62 = vld [vmem:[%s9128_s1 + $0x298] sm:$0xff] }
 0x1d6   :  { %v2808_v24 = vpop.eup %2807  ;;  %v795_v21 = vsel %vm792_vm12, %v794_v31, %v790_v25  ;;  %v5693_v25 = vld [vmem:[%s9128_s1 + $0x2c0] sm:$0xff]  ;;  %v5705_v31 = vld [vmem:[%s9128_s1 + $0x2c8] sm:$0xff] }
 0x1d7   :  { %v811_v19 = vmul.f32 %v2808_v24, %v809_v53  ;;  %v749_v17 = vpop.f32.mrf.mxu2  ;;  %v769_v20 = vpop.f32.mrf.mxu3  ;;  %vm816_vm13 = vweird.f32 %v2808_v24 }
 0x1d8   :  { %v770_v16 = vadd.f32 %v769_v20, %v749_v17  ;;  %v819_v17 = vand.u32 2147483647, %v809_v53  ;;  %vm817_vm15 = vmor %vm815_vm14, %vm816_vm13  ;;  %v5675_v53 = vld [vmem:[%s9128_s1 + $0x5f0] sm:$0xff] }
 0x1d9   :  { %v812_v26 = vsub.f32 1.0, %v811_v19 }
 0x1da   :  { %v826_v27 = vadd.f32 %v770_v16, %v4768_v51  ;;  %vm820_vm1 = vcmp.eq.f32.partialorder %v819_v17, 8.507059e+37  ;;  %v5741_v17 = vld [vmem:[%s9128_s1 + $0x260] sm:$0xff] }
 0x1db   :  { %v813_v60 = vmul.f32 %v2808_v24, %v812_v26 }
 0x1dc   :  { %v829_v11 = vrot.slane %v826_v27, 6 }
 0x1dd   :  { %v814_v10 = vadd.f32 %v2808_v24, %v813_v60  ;;  %v5687_v60 = vld [vmem:[%s9128_s1 + $0x5f8] sm:$0xff] }
 0x1de   :  { %v830_v18 = vsel %vm452_vm0, %v825_v22, %v829_v11  ;;  %v5699_v22 = vld [vmem:[%s9128_s1 + $0x5c0] sm:$0xff] }
 0x1df   :  { %v832_v19 = vmul.f32 %v830_v18, %v795_v21  ;;  %v818_v20 = vsel %vm817_vm15, %v2808_v24, %v814_v10  ;;  %v5681_v24 = vld [vmem:[%s9128_s1 + $0x2f8] sm:$0xff]  ;;  %v5717_v21 = vld [vmem:[%s9128_s1 + $0x290] sm:$0xff] }
 0x1e0   :  { %v823_v15 = vsel %vm820_vm1, %v822_v14, %v818_v20  ;;  %v5723_v18 = vld [vmem:[%s9128_s1 + $0x590] sm:$0xff]  ;;  %v5753_v20 = vld [vmem:[%s9128_s1 + $0x268] sm:$0xff] }
 0x1e1   :  { %v833_v23 = vadd.f32 %v2756_v12, %v832_v19  ;;  %v835_v16 = vsub.f32 1.0, %v823_v15  ;;  %v837_v13 = vmul.f32 %v823_v15, %v4784_v28  ;;  %v5669_v28 = vld [vmem:[%s9128_s1 + $0x2f0] sm:$0xff]  ;;  %v5711_v12 = vld [vmem:[%s9128_s1 + $0x5c8] sm:$0xff]  ;;  %v5735_v19 = vld [vmem:[%s9128_s1 + $0x598] sm:$0xff] }
 0x1e2   :  { %v5759_v14 = vld [vmem:[%s9128_s1 + $0x568] sm:$0xff]  ;;  %v5769_v15 = vld [vmem:[%s9128_s1 + $0x230] sm:$0xff] }
 0x1e3   :  { %2809 = vtanh.f32 %v833_v23  ;;  %v5747_v23 = vld [vmem:[%s9128_s1 + $0x560] sm:$0xff] }
 0x1e9   :  { %v2810_v32 = vpop.eup %2809 }
 0x1ea   :  { %v836_v26 = vmul.f32 %v2810_v32, %v835_v16  ;;  %v5775_v16 = vld [vmem:[%s9128_s1 + $0x530] sm:$0xff]  ;;  %v5781_v32 = vld [vmem:[%s9128_s1 + $0x238] sm:$0xff] }
 0x1eb   :  { %10013 = vst [vmem:[#allocation100_spill] sm:$0xff] %v5775_v16 }
 0x1ec   :  { %v5651_v27 = vadd.f32 %v837_v13, %v836_v26  ;;  %10014 = vst [vmem:[#allocation85_spill] sm:$0xff] %v5781_v32  ;;  %v5787_v26 = vld [vmem:[%s9128_s1 + $0x538] sm:$0xff]  ;;  %v5793_v13 = vld [vmem:[%s9128_s1 + $0x200] sm:$0xff] }
 0x1ed   :  { %10015 = vst [vmem:[#allocation86_spill] sm:$0xff] %v5787_v26 }
 0x1ee   :  { %2759 = vst [vmem:[%s9131_s3 + $0x4] sm:$0xf] %v5651_v27 }
 0x1ef   :  { %845 = vst [vmem:[#allocation1] ss:$4 sm:$0xff] %v5651_v27 }
 0x1f0   :  { %10016 = vst [vmem:[#allocation103_spill] sm:$0xff] %v5793_v13 }
 0x1f6   :  { %v5658_v11 = vld.sshfl [vmem:[#allocation1] sm:$0xff pattern:$0x73625140]  ;;  %v5660_v10 = vld.sshfl [vmem:[#allocation1 + $0x8] sm:$0xff pattern:$0x73625140] }
 0x1f7   :  { %866 = vmatmul.f32.vlgmr.msra.gmra.mxu0 %v5658_v11  ;;  %886 = vmatmul.f32.vlgmr.msra.gmra.mxu1 %v5660_v10 }
 0x1f8   :  { %906 = vmatmul.f32.vlgmr.msra.gmra.mxu2 %v5658_v11  ;;  %926 = vmatmul.f32.vlgmr.msra.gmra.mxu3 %v5660_v10 }
 0x1f9   :  { %1010 = vmatpush.msra.mxu0 %v5669_v28  ;;  %1030 = vmatpush.msra.mxu1 %v5675_v53 }
 0x1fa   :  { %1050 = vmatpush.msra.mxu2 %v5681_v24  ;;  %1070 = vmatpush.msra.mxu3 %v5687_v60 }
 0x1fb   :  { %1011 = vmatpush.msra.mxu0 %v5693_v25  ;;  %1031 = vmatpush.msra.mxu1 %v5699_v22 }
 0x1fc   :  { %1051 = vmatpush.msra.mxu2 %v5705_v31  ;;  %1071 = vmatpush.msra.mxu3 %v5711_v12 }
 0x1fd   :  { %1012 = vmatpush.msra.mxu0 %v5717_v21  ;;  %1032 = vmatpush.msra.mxu1 %v5723_v18 }
 0x1fe   :  { %1052 = vmatpush.msra.mxu2 %v5729_v62  ;;  %1072 = vmatpush.msra.mxu3 %v5735_v19 }
 0x1ff   :  { %1013 = vmatpush.msra.mxu0 %v5741_v17  ;;  %1033 = vmatpush.msra.mxu1 %v5747_v23 }
 0x200   :  { %1053 = vmatpush.msra.mxu2 %v5753_v20  ;;  %1073 = vmatpush.msra.mxu3 %v5759_v14 }
 0x201   :  { %946 = vmatmul.f32.vlgmr.msrb.gmra.mxu0 %v5658_v11  ;;  %966 = vmatmul.f32.vlgmr.msrb.gmra.mxu1 %v5660_v10 }
 0x202   :  { %986 = vmatmul.f32.vlgmr.msrb.gmra.mxu2 %v5658_v11  ;;  %1006 = vmatmul.f32.vlgmr.msrb.gmra.mxu3 %v5660_v10 }
 0x203   :  { %1014 = vmatpush.msra.mxu0 %v5769_v15  ;;  %1034 = vmatpush.msra.mxu1 %v5775_v16  ;;  %v5799_v16 = vld [vmem:[%s9128_s1 + $0x500] sm:$0xff] }
 0x204   :  { %1054 = vmatpush.msra.mxu2 %v5781_v32  ;;  %1074 = vmatpush.msra.mxu3 %v5787_v26  ;;  %10017 = vst [vmem:[#allocation104_spill] sm:$0xff] %v5799_v16  ;;  %v5805_v32 = vld [vmem:[%s9128_s1 + $0x208] sm:$0xff] }
 0x205   :  { %1015 = vmatpush.msra.mxu0 %v5793_v13  ;;  %1035 = vmatpush.msra.mxu1 %v5799_v16  ;;  %10018 = vst [vmem:[#allocation89_spill] sm:$0xff] %v5805_v32  ;;  %v5811_v26 = vld [vmem:[%s9128_s1 + $0x508] sm:$0xff]  ;;  %v5817_v13 = vld [vmem:[%s9128_s1 + $0x1d0] sm:$0xff] }
 0x206   :  { %1055 = vmatpush.msra.mxu2 %v5805_v32  ;;  %10019 = vst [vmem:[#allocation90_spill] sm:$0xff] %v5811_v26  ;;  %1075 = vmatpush.msra.mxu3 %v5811_v26  ;;  %v5823_v16 = vld [vmem:[%s9128_s1 + $0x4d0] sm:$0xff]  ;;  %v5829_v32 = vld [vmem:[%s9128_s1 + $0x1d8] sm:$0xff] }
 0x207   :  { %10020 = vst [vmem:[#allocation107_spill] sm:$0xff] %v5817_v13  ;;  %1016 = vmatpush.msra.mxu0 %v5817_v13  ;;  %1036 = vmatpush.msra.mxu1 %v5823_v16  ;;  %v5835_v26 = vld [vmem:[%s9128_s1 + $0x4d8] sm:$0xff]  ;;  %v5841_v13 = vld [vmem:[%s9128_s1 + $0x1a0] sm:$0xff] }
 0x208   :  { %10021 = vst [vmem:[#allocation108_spill] sm:$0xff] %v5823_v16  ;;  %1056 = vmatpush.msra.mxu2 %v5829_v32  ;;  %1076 = vmatpush.msra.mxu3 %v5835_v26  ;;  %v5847_v16 = vld [vmem:[%s9128_s1 + $0x4a0] sm:$0xff] }
 0x209   :  { %10022 = vst [vmem:[#allocation93_spill] sm:$0xff] %v5829_v32  ;;  %1017 = vmatpush.msra.mxu0 %v5841_v13  ;;  %1037 = vmatpush.msra.mxu1 %v5847_v16  ;;  %v5853_v32 = vld [vmem:[%s9128_s1 + $0x1a8] sm:$0xff] }
 0x20a   :  { %10023 = vst [vmem:[#allocation94_spill] sm:$0xff] %v5835_v26  ;;  %1057 = vmatpush.msra.mxu2 %v5853_v32  ;;  %v5859_v26 = vld [vmem:[%s9128_s1 + $0x4a8] sm:$0xff] }
 0x20b   :  { %10024 = vst [vmem:[#allocation111_spill] sm:$0xff] %v5841_v13  ;;  %1077 = vmatpush.msra.mxu3 %v5859_v26  ;;  %v5865_v13 = vld [vmem:[%s9128_s1 + $0x170] sm:$0xff] }
 0x20c   :  { %10025 = vst [vmem:[#allocation112_spill] sm:$0xff] %v5847_v16  ;;  %1018 = vmatpush.msra.mxu0 %v5865_v13  ;;  %v5871_v16 = vld [vmem:[%s9128_s1 + $0x470] sm:$0xff] }
 0x20d   :  { %10026 = vst [vmem:[#allocation97_spill] sm:$0xff] %v5853_v32  ;;  %1038 = vmatpush.msra.mxu1 %v5871_v16  ;;  %v5877_v32 = vld [vmem:[%s9128_s1 + $0x178] sm:$0xff] }
 0x20e   :  { %10027 = vst [vmem:[#allocation98_spill] sm:$0xff] %v5859_v26  ;;  %1058 = vmatpush.msra.mxu2 %v5877_v32  ;;  %v5883_v26 = vld [vmem:[%s9128_s1 + $0x478] sm:$0xff] }
 0x20f   :  { %10028 = vst [vmem:[#allocation115_spill] sm:$0xff] %v5865_v13  ;;  %1078 = vmatpush.msra.mxu3 %v5883_v26  ;;  %v5889_v13 = vld [vmem:[%s9128_s1 + $0x140] sm:$0xff] }
 0x210   :  { %10029 = vst [vmem:[#allocation116_spill] sm:$0xff] %v5871_v16  ;;  %1019 = vmatpush.msra.mxu0 %v5889_v13  ;;  %v5895_v16 = vld [vmem:[%s9128_s1 + $0x440] sm:$0xff] }
 0x211   :  { %10030 = vst [vmem:[#allocation101_spill] sm:$0xff] %v5877_v32  ;;  %1039 = vmatpush.msra.mxu1 %v5895_v16  ;;  %v5901_v32 = vld [vmem:[%s9128_s1 + $0x148] sm:$0xff] }
 0x212   :  { %10031 = vst [vmem:[#allocation102_spill] sm:$0xff] %v5883_v26  ;;  %1059 = vmatpush.msra.mxu2 %v5901_v32  ;;  %v5907_v26 = vld [vmem:[%s9128_s1 + $0x448] sm:$0xff] }
 0x213   :  { %10032 = vst [vmem:[#allocation119_spill] sm:$0xff] %v5889_v13  ;;  %1079 = vmatpush.msra.mxu3 %v5907_v26  ;;  %v5913_v13 = vld [vmem:[%s9128_s1 + $0x110] sm:$0xff] }
 0x214   :  { %10033 = vst [vmem:[#allocation120_spill] sm:$0xff] %v5895_v16  ;;  %1020 = vmatpush.msra.mxu0 %v5913_v13  ;;  %v5919_v16 = vld [vmem:[%s9128_s1 + $0x410] sm:$0xff] }
 0x215   :  { %10034 = vst [vmem:[#allocation105_spill] sm:$0xff] %v5901_v32  ;;  %1040 = vmatpush.msra.mxu1 %v5919_v16  ;;  %v5925_v32 = vld [vmem:[%s9128_s1 + $0x118] sm:$0xff] }
 0x216   :  { %10035 = vst [vmem:[#allocation106_spill] sm:$0xff] %v5907_v26  ;;  %1060 = vmatpush.msra.mxu2 %v5925_v32  ;;  %v5931_v26 = vld [vmem:[%s9128_s1 + $0x418] sm:$0xff] }
 0x217   :  { %10036 = vst [vmem:[#allocation123_spill] sm:$0xff] %v5913_v13  ;;  %1080 = vmatpush.msra.mxu3 %v5931_v26  ;;  %v5937_v13 = vld [vmem:[%s9128_s1 + $0xe0] sm:$0xff] }
 0x218   :  { %10037 = vst [vmem:[#allocation124_spill] sm:$0xff] %v5919_v16  ;;  %1021 = vmatpush.msra.mxu0 %v5937_v13  ;;  %v5943_v16 = vld [vmem:[%s9128_s1 + $0x3e0] sm:$0xff] }
 0x219   :  { %10038 = vst [vmem:[#allocation109_spill] sm:$0xff] %v5925_v32  ;;  %1041 = vmatpush.msra.mxu1 %v5943_v16  ;;  %v5949_v32 = vld [vmem:[%s9128_s1 + $0xe8] sm:$0xff] }
 0x21a   :  { %10039 = vst [vmem:[#allocation110_spill] sm:$0xff] %v5931_v26  ;;  %1061 = vmatpush.msra.mxu2 %v5949_v32  ;;  %v5955_v26 = vld [vmem:[%s9128_s1 + $0x3e8] sm:$0xff] }
 0x21b   :  { %10040 = vst [vmem:[#allocation113_spill] sm:$0xff] %v5937_v13  ;;  %1081 = vmatpush.msra.mxu3 %v5955_v26  ;;  %v5961_v13 = vld [vmem:[%s9128_s1 + $0xb0] sm:$0xff] }
 0x21c   :  { %10041 = vst [vmem:[#allocation114_spill] sm:$0xff] %v5943_v16  ;;  %1022 = vmatpush.msra.mxu0 %v5961_v13  ;;  %v5967_v16 = vld [vmem:[%s9128_s1 + $0x3b0] sm:$0xff] }
 0x21d   :  { %10042 = vst [vmem:[#allocation129_spill] sm:$0xff] %v5949_v32  ;;  %1042 = vmatpush.msra.mxu1 %v5967_v16  ;;  %v5973_v32 = vld [vmem:[%s9128_s1 + $0xb8] sm:$0xff] }
 0x21e   :  { %10043 = vst [vmem:[#allocation130_spill] sm:$0xff] %v5955_v26  ;;  %1062 = vmatpush.msra.mxu2 %v5973_v32  ;;  %v5979_v26 = vld [vmem:[%s9128_s1 + $0x3b8] sm:$0xff] }
 0x21f   :  { %10044 = vst [vmem:[#allocation117_spill] sm:$0xff] %v5961_v13  ;;  %1082 = vmatpush.msra.mxu3 %v5979_v26  ;;  %v5985_v13 = vld [vmem:[%s9128_s1 + $0x80] sm:$0xff] }
 0x220   :  { %10045 = vst [vmem:[#allocation118_spill] sm:$0xff] %v5967_v16  ;;  %1023 = vmatpush.msra.mxu0 %v5985_v13  ;;  %v5991_v16 = vld [vmem:[%s9128_s1 + $0x380] sm:$0xff] }
 0x221   :  { %10046 = vst [vmem:[#allocation121_spill] sm:$0xff] %v5973_v32  ;;  %1043 = vmatpush.msra.mxu1 %v5991_v16  ;;  %v5997_v32 = vld [vmem:[%s9128_s1 + $0x88] sm:$0xff] }
 0x222   :  { %10047 = vst [vmem:[#allocation122_spill] sm:$0xff] %v5979_v26  ;;  %1063 = vmatpush.msra.mxu2 %v5997_v32  ;;  %v6003_v26 = vld [vmem:[%s9128_s1 + $0x388] sm:$0xff] }
 0x223   :  { %10048 = vst [vmem:[#allocation125_spill] sm:$0xff] %v5985_v13  ;;  %1083 = vmatpush.msra.mxu3 %v6003_v26  ;;  %v6009_v13 = vld [vmem:[%s9128_s1 + $0x50] sm:$0xff] }
 0x224   :  { %10049 = vst [vmem:[#allocation126_spill] sm:$0xff] %v5991_v16  ;;  %1024 = vmatpush.msra.mxu0 %v6009_v13  ;;  %v6015_v16 = vld [vmem:[%s9128_s1 + $0x350] sm:$0xff] }
 0x225   :  { %10050 = vst [vmem:[#allocation127_spill] sm:$0xff] %v5997_v32  ;;  %1044 = vmatpush.msra.mxu1 %v6015_v16  ;;  %v6021_v32 = vld [vmem:[%s9128_s1 + $0x58] sm:$0xff] }
 0x226   :  { %10051 = vst [vmem:[#allocation128_spill] sm:$0xff] %v6003_v26  ;;  %1064 = vmatpush.msra.mxu2 %v6021_v32  ;;  %v6027_v26 = vld [vmem:[%s9128_s1 + $0x358] sm:$0xff] }
 0x227   :  { %10052 = vst [vmem:[#allocation131_spill] sm:$0xff] %v6009_v13  ;;  %1084 = vmatpush.msra.mxu3 %v6027_v26  ;;  %v6033_v13 = vld [vmem:[%s9128_s1 + $0x20] sm:$0xff] }
 0x228   :  { %10053 = vst [vmem:[#allocation132_spill] sm:$0xff] %v6015_v16  ;;  %1025 = vmatpush.msra.mxu0 %v6033_v13  ;;  %v6039_v16 = vld [vmem:[%s9128_s1 + $0x320] sm:$0xff] }
 0x229   :  { %10054 = vst [vmem:[#allocation133_spill] sm:$0xff] %v6021_v32  ;;  %1045 = vmatpush.msra.mxu1 %v6039_v16  ;;  %v6045_v32 = vld [vmem:[%s9128_s1 + $0x28] sm:$0xff]  ;;  %1026 = vmatmul.f32.vlgmr.msra.gmra.mxu0 %v5658_v11 }
 0x22a   :  { %10055 = vst [vmem:[#allocation134_spill] sm:$0xff] %v6027_v26  ;;  %1065 = vmatpush.msra.mxu2 %v6045_v32  ;;  %v6051_v26 = vld [vmem:[%s9128_s1 + $0x328] sm:$0xff]  ;;  %1046 = vmatmul.f32.vlgmr.msra.gmra.mxu1 %v5660_v10 }
 0x22b   :  { %1085 = vmatpush.msra.mxu3 %v6051_v26  ;;  %1066 = vmatmul.f32.vlgmr.msra.gmra.mxu2 %v5658_v11  ;;  %v10094_v11 = vld [vmem:[#allocation44_spill] sm:$0xff] }
 0x22c   :  { %1086 = vmatmul.f32.vlgmr.msra.gmra.mxu3 %v5660_v10  ;;  %1168 = vmatpush.msrb.mxu0 %v4874_v56  ;;  %v10056_v56 = vld [vmem:[#allocation2_spill] sm:$0xff]  ;;  %v10095_v10 = vld [vmem:[#allocation37_spill] sm:$0xff] }
 0x22d   :  { %1188 = vmatpush.msrb.mxu1 %v4880_v57  ;;  %1208 = vmatpush.msrb.mxu2 %v4886_v59  ;;  %v10057_v57 = vld [vmem:[#allocation3_spill] sm:$0xff]  ;;  %v10058_v59 = vld [vmem:[#allocation6_spill] sm:$0xff] }
 0x22e   :  { %1228 = vmatpush.msrb.mxu3 %v4892_v61  ;;  %1169 = vmatpush.msrb.mxu0 %v4898_v63  ;;  %v10059_v61 = vld [vmem:[#allocation7_spill] sm:$0xff]  ;;  %v10060_v63 = vld [vmem:[#allocation4_spill] sm:$0xff] }
 0x22f   :  { %1189 = vmatpush.msrb.mxu1 %v4904_v29  ;;  %1209 = vmatpush.msrb.mxu2 %v4910_v30  ;;  %v10061_v29 = vld [vmem:[#allocation5_spill] sm:$0xff]  ;;  %v10062_v30 = vld [vmem:[#allocation8_spill] sm:$0xff] }
 0x230   :  { %1229 = vmatpush.msrb.mxu3 %v4916_v33  ;;  %1170 = vmatpush.msrb.mxu0 %v4922_v34  ;;  %v10063_v33 = vld [vmem:[#allocation9_spill] sm:$0xff]  ;;  %v10064_v34 = vld [vmem:[#allocation10_spill] sm:$0xff] }
 0x231   :  { %1190 = vmatpush.msrb.mxu1 %v4928_v35  ;;  %1210 = vmatpush.msrb.mxu2 %v4934_v36  ;;  %v10065_v35 = vld [vmem:[#allocation11_spill] sm:$0xff]  ;;  %v10066_v36 = vld [vmem:[#allocation12_spill] sm:$0xff] }
 0x232   :  { %1230 = vmatpush.msrb.mxu3 %v4940_v37  ;;  %1171 = vmatpush.msrb.mxu0 %v4946_v38  ;;  %v10067_v37 = vld [vmem:[#allocation13_spill] sm:$0xff]  ;;  %v10068_v38 = vld [vmem:[#allocation14_spill] sm:$0xff] }
 0x233   :  { %1191 = vmatpush.msrb.mxu1 %v4952_v39  ;;  %1211 = vmatpush.msrb.mxu2 %v4958_v40  ;;  %v10069_v39 = vld [vmem:[#allocation17_spill] sm:$0xff]  ;;  %v10070_v40 = vld [vmem:[#allocation18_spill] sm:$0xff] }
 0x234   :  { %1231 = vmatpush.msrb.mxu3 %v4964_v41  ;;  %1172 = vmatpush.msrb.mxu0 %v4970_v42  ;;  %v10071_v41 = vld [vmem:[#allocation15_spill] sm:$0xff]  ;;  %v10072_v42 = vld [vmem:[#allocation16_spill] sm:$0xff] }
 0x235   :  { %1192 = vmatpush.msrb.mxu1 %v4976_v43  ;;  %1212 = vmatpush.msrb.mxu2 %v4982_v44  ;;  %v10073_v43 = vld [vmem:[#allocation21_spill] sm:$0xff]  ;;  %v10074_v44 = vld [vmem:[#allocation22_spill] sm:$0xff] }
 0x236   :  { %1232 = vmatpush.msrb.mxu3 %v4988_v45  ;;  %1173 = vmatpush.msrb.mxu0 %v4994_v46  ;;  %v10075_v45 = vld [vmem:[#allocation19_spill] sm:$0xff]  ;;  %v10076_v46 = vld [vmem:[#allocation20_spill] sm:$0xff] }
 0x237   :  { %1193 = vmatpush.msrb.mxu1 %v5000_v47  ;;  %1213 = vmatpush.msrb.mxu2 %v5006_v48  ;;  %v10077_v47 = vld [vmem:[#allocation25_spill] sm:$0xff]  ;;  %v10078_v48 = vld [vmem:[#allocation26_spill] sm:$0xff] }
 0x238   :  { %1233 = vmatpush.msrb.mxu3 %v5012_v49  ;;  %1174 = vmatpush.msrb.mxu0 %v5018_v50  ;;  %v10079_v49 = vld [vmem:[#allocation23_spill] sm:$0xff]  ;;  %v10080_v50 = vld [vmem:[#allocation24_spill] sm:$0xff] }
 0x239   :  { %1194 = vmatpush.msrb.mxu1 %v5024_v52  ;;  %1214 = vmatpush.msrb.mxu2 %v5030_v54  ;;  %v10081_v52 = vld [vmem:[#allocation29_spill] sm:$0xff]  ;;  %v10082_v54 = vld [vmem:[#allocation30_spill] sm:$0xff] }
 0x23a   :  { %1234 = vmatpush.msrb.mxu3 %v5036_v55  ;;  %1175 = vmatpush.msrb.mxu0 %v5042_v58  ;;  %v10083_v55 = vld [vmem:[#allocation27_spill] sm:$0xff]  ;;  %v10084_v58 = vld [vmem:[#allocation28_spill] sm:$0xff] }
 0x23b   :  { %1195 = vmatpush.msrb.mxu1 %v5048_v0  ;;  %1215 = vmatpush.msrb.mxu2 %v5054_v1  ;;  %v10085_v0 = vld [vmem:[#allocation33_spill] sm:$0xff]  ;;  %v10086_v1 = vld [vmem:[#allocation34_spill] sm:$0xff] }
 0x23c   :  { %1235 = vmatpush.msrb.mxu3 %v5060_v2  ;;  %1176 = vmatpush.msrb.mxu0 %v5066_v4  ;;  %v10087_v2 = vld [vmem:[#allocation31_spill] sm:$0xff]  ;;  %v10088_v4 = vld [vmem:[#allocation32_spill] sm:$0xff] }
 0x23d   :  { %1196 = vmatpush.msrb.mxu1 %v5072_v5  ;;  %1216 = vmatpush.msrb.mxu2 %v5078_v6  ;;  %v10089_v5 = vld [vmem:[#allocation39_spill] sm:$0xff]  ;;  %v10090_v6 = vld [vmem:[#allocation40_spill] sm:$0xff] }
 0x23e   :  { %1236 = vmatpush.msrb.mxu3 %v5084_v7  ;;  %1177 = vmatpush.msrb.mxu0 %v5090_v8  ;;  %v10091_v7 = vld [vmem:[#allocation35_spill] sm:$0xff]  ;;  %v10092_v8 = vld [vmem:[#allocation36_spill] sm:$0xff] }
 0x23f   :  { %1197 = vmatpush.msrb.mxu1 %v5096_v9  ;;  %1217 = vmatpush.msrb.mxu2 %v10056_v56  ;;  %v10093_v9 = vld [vmem:[#allocation43_spill] sm:$0xff]  ;;  %v10096_v56 = vld [vmem:[#allocation38_spill] sm:$0xff] }
 0x240   :  { %1237 = vmatpush.msrb.mxu3 %v10057_v57  ;;  %1178 = vmatpush.msrb.mxu0 %v10058_v59  ;;  %v10097_v57 = vld [vmem:[#allocation47_spill] sm:$0xff]  ;;  %v10098_v59 = vld [vmem:[#allocation48_spill] sm:$0xff] }
 0x241   :  { %1198 = vmatpush.msrb.mxu1 %v10059_v61  ;;  %1218 = vmatpush.msrb.mxu2 %v10060_v63  ;;  %v10099_v61 = vld [vmem:[#allocation41_spill] sm:$0xff]  ;;  %v10100_v63 = vld [vmem:[#allocation42_spill] sm:$0xff] }
 0x242   :  { %1238 = vmatpush.msrb.mxu3 %v10061_v29  ;;  %1179 = vmatpush.msrb.mxu0 %v10062_v30  ;;  %v10101_v29 = vld [vmem:[#allocation51_spill] sm:$0xff]  ;;  %v10102_v30 = vld [vmem:[#allocation52_spill] sm:$0xff] }
 0x243   :  { %1199 = vmatpush.msrb.mxu1 %v10063_v33  ;;  %1219 = vmatpush.msrb.mxu2 %v10064_v34  ;;  %v10103_v33 = vld [vmem:[#allocation45_spill] sm:$0xff]  ;;  %v10104_v34 = vld [vmem:[#allocation46_spill] sm:$0xff] }
 0x244   :  { %1239 = vmatpush.msrb.mxu3 %v10065_v35  ;;  %1180 = vmatpush.msrb.mxu0 %v10066_v36  ;;  %v10105_v35 = vld [vmem:[#allocation55_spill] sm:$0xff]  ;;  %v10106_v36 = vld [vmem:[#allocation56_spill] sm:$0xff] }
 0x245   :  { %1200 = vmatpush.msrb.mxu1 %v10067_v37  ;;  %1220 = vmatpush.msrb.mxu2 %v10068_v38  ;;  %v10107_v37 = vld [vmem:[#allocation49_spill] sm:$0xff]  ;;  %v10108_v38 = vld [vmem:[#allocation50_spill] sm:$0xff] }
 0x246   :  { %1240 = vmatpush.msrb.mxu3 %v10069_v39  ;;  %1181 = vmatpush.msrb.mxu0 %v10070_v40  ;;  %v10109_v39 = vld [vmem:[#allocation59_spill] sm:$0xff]  ;;  %v10110_v40 = vld [vmem:[#allocation60_spill] sm:$0xff] }
 0x247   :  { %1201 = vmatpush.msrb.mxu1 %v10071_v41  ;;  %1221 = vmatpush.msrb.mxu2 %v10072_v42  ;;  %v10111_v41 = vld [vmem:[#allocation53_spill] sm:$0xff]  ;;  %v10112_v42 = vld [vmem:[#allocation54_spill] sm:$0xff] }
 0x248   :  { %1241 = vmatpush.msrb.mxu3 %v10073_v43  ;;  %1182 = vmatpush.msrb.mxu0 %v10074_v44  ;;  %v10113_v43 = vld [vmem:[#allocation63_spill] sm:$0xff]  ;;  %v10114_v44 = vld [vmem:[#allocation64_spill] sm:$0xff] }
 0x249   :  { %1202 = vmatpush.msrb.mxu1 %v10075_v45  ;;  %1222 = vmatpush.msrb.mxu2 %v10076_v46  ;;  %v10115_v45 = vld [vmem:[#allocation57_spill] sm:$0xff]  ;;  %v10116_v46 = vld [vmem:[#allocation58_spill] sm:$0xff] }
 0x24a   :  { %1242 = vmatpush.msrb.mxu3 %v10077_v47  ;;  %1183 = vmatpush.msrb.mxu0 %v10078_v48  ;;  %v10117_v47 = vld [vmem:[#allocation69_spill] sm:$0xff]  ;;  %v10118_v48 = vld [vmem:[#allocation70_spill] sm:$0xff] }
 0x24b   :  { %1203 = vmatpush.msrb.mxu1 %v10079_v49  ;;  %1223 = vmatpush.msrb.mxu2 %v10080_v50  ;;  %v10119_v49 = vld [vmem:[#allocation61_spill] sm:$0xff]  ;;  %v10120_v50 = vld [vmem:[#allocation62_spill] sm:$0xff] }
 0x24c   :  { %1243 = vmatpush.msrb.mxu3 %v10081_v52  ;;  %1248 = vmatpush.msra.mxu0 %v10082_v54  ;;  %v10121_v52 = vld [vmem:[#allocation73_spill] sm:$0xff]  ;;  %v10122_v54 = vld [vmem:[#allocation74_spill] sm:$0xff] }
 0x24d   :  { %1268 = vmatpush.msra.mxu1 %v10083_v55  ;;  %1288 = vmatpush.msra.mxu2 %v10084_v58  ;;  %v10123_v55 = vld [vmem:[#allocation65_spill] sm:$0xff]  ;;  %v10124_v58 = vld [vmem:[#allocation66_spill] sm:$0xff] }
 0x24e   :  { %1308 = vmatpush.msra.mxu3 %v10085_v0  ;;  %1249 = vmatpush.msra.mxu0 %v10086_v1  ;;  %v10125_v0 = vld [vmem:[#allocation77_spill] sm:$0xff]  ;;  %v10126_v1 = vld [vmem:[#allocation78_spill] sm:$0xff] }
 0x24f   :  { %1269 = vmatpush.msra.mxu1 %v10087_v2  ;;  %1289 = vmatpush.msra.mxu2 %v10088_v4  ;;  %v10127_v2 = vld [vmem:[#allocation81_spill] sm:$0xff]  ;;  %v10128_v4 = vld [vmem:[#allocation82_spill] sm:$0xff] }
 0x250   :  { %1309 = vmatpush.msra.mxu3 %v10089_v5  ;;  %1250 = vmatpush.msra.mxu0 %v10090_v6  ;;  %v10129_v5 = vld [vmem:[#allocation83_spill] sm:$0xff]  ;;  %v10130_v6 = vld [vmem:[#allocation84_spill] sm:$0xff] }
 0x251   :  { %1270 = vmatpush.msra.mxu1 %v10091_v7  ;;  %1290 = vmatpush.msra.mxu2 %v10092_v8  ;;  %v10131_v7 = vld [vmem:[#allocation67_spill] sm:$0xff]  ;;  %v10132_v8 = vld [vmem:[#allocation68_spill] sm:$0xff] }
 0x252   :  { %1310 = vmatpush.msra.mxu3 %v10093_v9  ;;  %1251 = vmatpush.msra.mxu0 %v10094_v11  ;;  %v10133_v9 = vld [vmem:[#allocation87_spill] sm:$0xff]  ;;  %v10134_v11 = vld [vmem:[#allocation88_spill] sm:$0xff] }
 0x253   :  { %1271 = vmatpush.msra.mxu1 %v10095_v10  ;;  %1291 = vmatpush.msra.mxu2 %v10096_v56  ;;  %v10135_v10 = vld [vmem:[#allocation71_spill] sm:$0xff]  ;;  %v10136_v56 = vld [vmem:[#allocation72_spill] sm:$0xff] }
 0x254   :  { %1311 = vmatpush.msra.mxu3 %v10097_v57  ;;  %1252 = vmatpush.msra.mxu0 %v10098_v59  ;;  %v10137_v57 = vld [vmem:[#allocation91_spill] sm:$0xff]  ;;  %v10138_v59 = vld [vmem:[#allocation92_spill] sm:$0xff] }
 0x255   :  { %1272 = vmatpush.msra.mxu1 %v10099_v61  ;;  %1292 = vmatpush.msra.mxu2 %v10100_v63  ;;  %v10139_v61 = vld [vmem:[#allocation75_spill] sm:$0xff]  ;;  %v10140_v63 = vld [vmem:[#allocation76_spill] sm:$0xff] }
 0x256   :  { %1312 = vmatpush.msra.mxu3 %v10101_v29  ;;  %1253 = vmatpush.msra.mxu0 %v10102_v30  ;;  %v10141_v29 = vld [vmem:[#allocation95_spill] sm:$0xff]  ;;  %v10142_v30 = vld [vmem:[#allocation96_spill] sm:$0xff] }
 0x257   :  { %1273 = vmatpush.msra.mxu1 %v10103_v33  ;;  %1293 = vmatpush.msra.mxu2 %v10104_v34  ;;  %v10143_v33 = vld [vmem:[#allocation79_spill] sm:$0xff]  ;;  %v10144_v34 = vld [vmem:[#allocation80_spill] sm:$0xff] }
 0x258   :  { %1313 = vmatpush.msra.mxu3 %v10105_v35  ;;  %1254 = vmatpush.msra.mxu0 %v10106_v36  ;;  %v10145_v35 = vld [vmem:[#allocation99_spill] sm:$0xff] }
 0x259   :  { %1274 = vmatpush.msra.mxu1 %v10107_v37  ;;  %1294 = vmatpush.msra.mxu2 %v10108_v38 }
 0x25a   :  { %1314 = vmatpush.msra.mxu3 %v10109_v39  ;;  %1255 = vmatpush.msra.mxu0 %v10110_v40 }
 0x25b   :  { %1275 = vmatpush.msra.mxu1 %v10111_v41  ;;  %1295 = vmatpush.msra.mxu2 %v10112_v42  ;;  %v2760_v42 = vld [vmem:[%s9129_s0 + $0x18] sm:$0xff] }
 0x25c   :  { %1315 = vmatpush.msra.mxu3 %v10113_v43  ;;  %1256 = vmatpush.msra.mxu0 %v10114_v44 }
 0x25d   :  { %1276 = vmatpush.msra.mxu1 %v10115_v45  ;;  %1296 = vmatpush.msra.mxu2 %v10116_v46 }
 0x25e   :  { %1316 = vmatpush.msra.mxu3 %v10117_v47  ;;  %1257 = vmatpush.msra.mxu0 %v10118_v48 }
 0x25f   :  { %1277 = vmatpush.msra.mxu1 %v10119_v49  ;;  %1297 = vmatpush.msra.mxu2 %v10120_v50 }
 0x260   :  { %1317 = vmatpush.msra.mxu3 %v10121_v52  ;;  %1258 = vmatpush.msra.mxu0 %v10122_v54  ;;  %v1116_v54 = vrot.slane %v2760_v42, 4 }
 0x261   :  { %1278 = vmatpush.msra.mxu1 %v10123_v55  ;;  %1298 = vmatpush.msra.mxu2 %v10124_v58 }
 0x262   :  { %1318 = vmatpush.msra.mxu3 %v10125_v0  ;;  %1259 = vmatpush.msra.mxu0 %v10126_v1 }
 0x263   :  { %1279 = vmatpush.msra.mxu1 %v10127_v2  ;;  %1299 = vmatpush.msra.mxu2 %v10128_v4 }
 0x264   :  { %1319 = vmatpush.msra.mxu3 %v10129_v5  ;;  %1260 = vmatpush.msra.mxu0 %v10130_v6 }
 0x265   :  { %1280 = vmatpush.msra.mxu1 %v10131_v7  ;;  %1300 = vmatpush.msra.mxu2 %v10132_v8 }
 0x266   :  { %1320 = vmatpush.msra.mxu3 %v10133_v9  ;;  %1261 = vmatpush.msra.mxu0 %v10134_v11 }
 0x267   :  { %1281 = vmatpush.msra.mxu1 %v10135_v10  ;;  %1301 = vmatpush.msra.mxu2 %v10136_v56 }
 0x268   :  { %1321 = vmatpush.msra.mxu3 %v10137_v57  ;;  %1262 = vmatpush.msra.mxu0 %v10138_v59 }
 0x269   :  { %1282 = vmatpush.msra.mxu1 %v10139_v61  ;;  %1302 = vmatpush.msra.mxu2 %v10140_v63 }
 0x26a   :  { %1322 = vmatpush.msra.mxu3 %v10141_v29  ;;  %1263 = vmatpush.msra.mxu0 %v10142_v30 }
 0x26b   :  { %1283 = vmatpush.msra.mxu1 %v10143_v33  ;;  %1303 = vmatpush.msra.mxu2 %v10144_v34 }
 0x26c   :  { %1323 = vmatpush.msra.mxu3 %v10145_v35 }
 0x274   :  { %v867_v36 = vpop.f32.mrf.mxu0  ;;  %v887_v37 = vpop.f32.mrf.mxu1 }
 0x275   :  { %v888_v41 = vadd.f32 %v887_v37, %v867_v36 }
 0x27b   :  { %v907_v38 = vpop.f32.mrf.mxu2  ;;  %v927_v39 = vpop.f32.mrf.mxu3 }
 0x27c   :  { %v928_v40 = vadd.f32 %v927_v39, %v907_v38 }
 0x27e   :  { %v1092_v43 = vrot.slane %v928_v40, 6  ;;  %v947_v47 = vpop.f32.mrf.mxu0  ;;  %v967_v48 = vpop.f32.mrf.mxu1 }
 0x27f   :  { %v968_v55 = vadd.f32 %v967_v48, %v947_v47 }
 0x280   :  { %v1093_v44 = vsel %vm452_vm0, %v888_v41, %v1092_v43 }
 0x281   :  { %v1095_v45 = vadd.f32 %v2760_v42, %v1093_v44 }
 0x283   :  { %v2762_v46 = vmul.f32 -1.442695, %v1095_v45  ;;  %v2761_v45 = vld [vmem:[%s9129_s0 + $0x20] sm:$0xf] }
 0x285   :  { %2811 = vpow2.f32 %v2762_v46  ;;  %v987_v49 = vpop.f32.mrf.mxu2  ;;  %v1007_v50 = vpop.f32.mrf.mxu3 }
 0x286   :  { %v1008_v52 = vadd.f32 %v1007_v50, %v987_v49 }
 0x288   :  { %v1120_v58 = vrot.slane %v1008_v52, 6 }
 0x28a   :  { %v1121_v0 = vsel %vm452_vm0, %v968_v55, %v1120_v58 }
 0x28b   :  { %v2812_v1 = vpop.eup %2811  ;;  %v1123_v2 = vadd.f32 %v1121_v0, %v1116_v54 }
 0x28c   :  { %v1099_v4 = vadd.f32 1.0, %v2812_v1 }
 0x28d   :  { %v2763_v5 = vmul.f32 -1.442695, %v1123_v2 }
 0x28e   :  { %2813 = vrcp.f32 %v1099_v4  ;;  %v1111_v35 = vand.u32 2147483648, %v1099_v4  ;;  %vm1105_vm3 = vweird.f32 %v1099_v4  ;;  %v1109_v37 = vand.u32 2147483647, %v1099_v4 }
 0x28f   :  { %2815 = vpow2.f32 %v2763_v5 }
 0x290   :  { %v1112_v42 = vor.u32 1.1754944e-38, %v1111_v35  ;;  %vm1110_vm5 = vcmp.eq.f32.partialorder %v1109_v37, 8.507059e+37  ;;  %v10177_v35 = vld [vmem:[#allocation117_spill] sm:$0xff] }
 0x291   :  { %v10179_v37 = vld [vmem:[#allocation121_spill] sm:$0xff] }
 0x294   :  { %v2814_v6 = vpop.eup %2813 }
 0x295   :  { %v2816_v7 = vpop.eup %2815  ;;  %v1101_v8 = vmul.f32 %v2814_v6, %v1099_v4  ;;  %vm1106_vm2 = vweird.f32 %v2814_v6 }
 0x296   :  { %v1127_v9 = vadd.f32 1.0, %v2816_v7  ;;  %vm1107_vm4 = vmor %vm1105_vm3, %vm1106_vm2 }
 0x297   :  { %v1102_v11 = vsub.f32 1.0, %v1101_v8  ;;  %v10164_v8 = vld [vmem:[#allocation102_spill] sm:$0xff] }
 0x298   :  { %2817 = vrcp.f32 %v1127_v9  ;;  %v1139_v48 = vand.u32 2147483648, %v1127_v9  ;;  %vm1133_vm7 = vweird.f32 %v1127_v9  ;;  %v1137_v50 = vand.u32 2147483647, %v1127_v9 }
 0x299   :  { %v1103_v10 = vmul.f32 %v2814_v6, %v1102_v11  ;;  %v10166_v11 = vld [vmem:[#allocation120_spill] sm:$0xff] }
 0x29a   :  { %v1140_v55 = vor.u32 1.1754944e-38, %v1139_v48  ;;  %vm1138_vm9 = vcmp.eq.f32.partialorder %v1137_v50, 8.507059e+37  ;;  %v6318_v48 = vld [vmem:[%s9128_s1 + $0x5a0] sm:$0xff]  ;;  %v6330_v50 = vld [vmem:[%s9128_s1 + $0x5a8] sm:$0xff] }
 0x29b   :  { %v1104_v30 = vadd.f32 %v2814_v6, %v1103_v10  ;;  %v10167_v10 = vld [vmem:[#allocation105_spill] sm:$0xff] }
 0x29d   :  { %v1108_v40 = vsel %vm1107_vm4, %v2814_v6, %v1104_v30  ;;  %v10174_v30 = vld [vmem:[#allocation114_spill] sm:$0xff] }
 0x29e   :  { %v2818_v59 = vpop.eup %2817  ;;  %v1113_v46 = vsel %vm1110_vm5, %v1112_v42, %v1108_v40  ;;  %v10182_v40 = vld [vmem:[#allocation126_spill] sm:$0xff]  ;;  %v10184_v42 = vld [vmem:[#allocation128_spill] sm:$0xff] }
 0x29f   :  { %v1129_v61 = vmul.f32 %v2818_v59, %v1127_v9  ;;  %vm1134_vm6 = vweird.f32 %v2818_v59  ;;  %v10165_v9 = vld [vmem:[#allocation119_spill] sm:$0xff] }
 0x2a0   :  { %vm1135_vm8 = vmor %vm1133_vm7, %vm1134_vm6 }
 0x2a1   :  { %v1130_v36 = vsub.f32 1.0, %v1129_v61  ;;  %v10171_v61 = vld [vmem:[#allocation109_spill] sm:$0xff] }
 0x2a3   :  { %v1131_v39 = vmul.f32 %v2818_v59, %v1130_v36  ;;  %v10178_v36 = vld [vmem:[#allocation118_spill] sm:$0xff] }
 0x2a5   :  { %v1132_v44 = vadd.f32 %v2818_v59, %v1131_v39  ;;  %v10181_v39 = vld [vmem:[#allocation125_spill] sm:$0xff] }
 0x2a6   :  { %v1027_v56 = vpop.f32.mrf.mxu0 }
 0x2a7   :  { %v1047_v57 = vpop.f32.mrf.mxu1  ;;  %v1136_v54 = vsel %vm1135_vm8, %v2818_v59, %v1132_v44  ;;  %v10170_v59 = vld [vmem:[#allocation124_spill] sm:$0xff] }
 0x2a8   :  { %v1048_v33 = vadd.f32 %v1047_v57, %v1027_v56  ;;  %v1141_v58 = vsel %vm1138_vm9, %v1140_v55, %v1136_v54  ;;  %v10168_v56 = vld [vmem:[#allocation106_spill] sm:$0xff]  ;;  %v10169_v57 = vld [vmem:[#allocation123_spill] sm:$0xff]  ;;  %v10186_v44 = vld [vmem:[#allocation132_spill] sm:$0xff] }
 0x2a9   :  { %v1153_v0 = vsub.f32 1.0, %v1141_v58  ;;  %v1155_v4 = vmul.f32 %v1141_v58, %v5651_v27  ;;  %v10146_v27 = vld [vmem:[#allocation100_spill] sm:$0xff]  ;;  %v6342_v54 = vld [vmem:[%s9128_s1 + $0x570] sm:$0xff] }
 0x2aa   :  { %v1143_v41 = vadd.f32 %v1048_v33, %v4774_v3  ;;  %v10175_v33 = vld [vmem:[#allocation129_spill] sm:$0xff]  ;;  %v6348_v55 = vld [vmem:[%s9128_s1 + $0x278] sm:$0xff] }
 0x2ab   :  { %v6354_v58 = vld [vmem:[%s9128_s1 + $0x578] sm:$0xff] }
 0x2ae   :  { %v1067_v63 = vpop.f32.mrf.mxu2 }
 0x2af   :  { %v1087_v29 = vpop.f32.mrf.mxu3 }
 0x2b0   :  { %v1088_v34 = vadd.f32 %v1087_v29, %v1067_v63  ;;  %v10172_v63 = vld [vmem:[#allocation110_spill] sm:$0xff]  ;;  %v10173_v29 = vld [vmem:[#allocation113_spill] sm:$0xff] }
 0x2b2   :  { %v1144_v38 = vadd.f32 %v1088_v34, %v4768_v51  ;;  %v10176_v34 = vld [vmem:[#allocation130_spill] sm:$0xff] }
 0x2b4   :  { %v1147_v43 = vrot.slane %v1144_v38, 6  ;;  %v10180_v38 = vld [vmem:[#allocation122_spill] sm:$0xff] }
 0x2b6   :  { %v1148_v47 = vsel %vm452_vm0, %v1143_v41, %v1147_v43  ;;  %v10183_v41 = vld [vmem:[#allocation127_spill] sm:$0xff] }
 0x2b7   :  { %v1150_v49 = vmul.f32 %v1148_v47, %v1113_v46  ;;  %v10185_v43 = vld [vmem:[#allocation131_spill] sm:$0xff]  ;;  %v10188_v46 = vld [vmem:[#allocation134_spill] sm:$0xff] }
 0x2b8   :  { %v6288_v47 = vld [vmem:[%s9128_s1 + $0x2d0] sm:$0xff] }
 0x2b9   :  { %v1151_v52 = vadd.f32 %v2761_v45, %v1150_v49  ;;  %v10187_v45 = vld [vmem:[#allocation133_spill] sm:$0xff]  ;;  %v6324_v49 = vld [vmem:[%s9128_s1 + $0x2a8] sm:$0xff] }
 0x2bb   :  { %2819 = vtanh.f32 %v1151_v52  ;;  %v6336_v52 = vld [vmem:[%s9128_s1 + $0x270] sm:$0xff] }
 0x2c1   :  { %v2820_v1 = vpop.eup %2819 }
 0x2c2   :  { %v1154_v2 = vmul.f32 %v2820_v1, %v1153_v0  ;;  %v6360_v0 = vld [vmem:[%s9128_s1 + $0x240] sm:$0xff] }
 0x2c3   :  { %v6366_v1 = vld [vmem:[%s9128_s1 + $0x540] sm:$0xff] }
 0x2c4   :  { %v6198_v5 = vadd.f32 %v1155_v4, %v1154_v2  ;;  %v6372_v2 = vld [vmem:[%s9128_s1 + $0x248] sm:$0xff] }
 0x2c5   :  { %v6378_v4 = vld [vmem:[%s9128_s1 + $0x548] sm:$0xff] }
 0x2c6   :  { %2764 = vst [vmem:[%s9131_s3 + $0x8] sm:$0xf] %v6198_v5 }
 0x2c7   :  { %1163 = vst [vmem:[#allocation1] ss:$4 sm:$0xff] %v6198_v5 }
 0x2ce   :  { %v6205_v6 = vld.sshfl [vmem:[#allocation1] sm:$0xff pattern:$0x73625140]  ;;  %v6207_v7 = vld.sshfl [vmem:[#allocation1 + $0x8] sm:$0xff pattern:$0x73625140] }
 0x2cf   :  { %1184 = vmatmul.f32.vlgmr.msrb.gmra.mxu0 %v6205_v6  ;;  %1204 = vmatmul.f32.vlgmr.msrb.gmra.mxu1 %v6207_v7 }
 0x2d0   :  { %1224 = vmatmul.f32.vlgmr.msrb.gmra.mxu2 %v6205_v6  ;;  %1244 = vmatmul.f32.vlgmr.msrb.gmra.mxu3 %v6207_v7 }
 0x2d1   :  { %1328 = vmatpush.msrb.mxu0 %v5669_v28  ;;  %1348 = vmatpush.msrb.mxu1 %v5675_v53  ;;  %v10147_v28 = vld [vmem:[#allocation85_spill] sm:$0xff]  ;;  %v10148_v53 = vld [vmem:[#allocation86_spill] sm:$0xff] }
 0x2d2   :  { %1368 = vmatpush.msrb.mxu2 %v5681_v24  ;;  %1388 = vmatpush.msrb.mxu3 %v5687_v60  ;;  %v10149_v24 = vld [vmem:[#allocation103_spill] sm:$0xff]  ;;  %v10150_v60 = vld [vmem:[#allocation104_spill] sm:$0xff] }
 0x2d3   :  { %1329 = vmatpush.msrb.mxu0 %v5693_v25  ;;  %1349 = vmatpush.msrb.mxu1 %v5699_v22  ;;  %v10151_v25 = vld [vmem:[#allocation89_spill] sm:$0xff]  ;;  %v10152_v22 = vld [vmem:[#allocation90_spill] sm:$0xff] }
 0x2d4   :  { %1369 = vmatpush.msrb.mxu2 %v5705_v31  ;;  %1389 = vmatpush.msrb.mxu3 %v5711_v12  ;;  %v10153_v31 = vld [vmem:[#allocation107_spill] sm:$0xff]  ;;  %v10154_v12 = vld [vmem:[#allocation108_spill] sm:$0xff] }
 0x2d5   :  { %1330 = vmatpush.msrb.mxu0 %v5717_v21  ;;  %1350 = vmatpush.msrb.mxu1 %v5723_v18  ;;  %v10155_v21 = vld [vmem:[#allocation93_spill] sm:$0xff]  ;;  %v10156_v18 = vld [vmem:[#allocation94_spill] sm:$0xff] }
 0x2d6   :  { %1370 = vmatpush.msrb.mxu2 %v5729_v62  ;;  %1390 = vmatpush.msrb.mxu3 %v5735_v19  ;;  %v10157_v62 = vld [vmem:[#allocation111_spill] sm:$0xff]  ;;  %v10158_v19 = vld [vmem:[#allocation112_spill] sm:$0xff] }
 0x2d7   :  { %1331 = vmatpush.msrb.mxu0 %v5741_v17  ;;  %1351 = vmatpush.msrb.mxu1 %v5747_v23  ;;  %v10159_v17 = vld [vmem:[#allocation97_spill] sm:$0xff]  ;;  %v10160_v23 = vld [vmem:[#allocation98_spill] sm:$0xff] }
 0x2d8   :  { %1371 = vmatpush.msrb.mxu2 %v5753_v20  ;;  %1391 = vmatpush.msrb.mxu3 %v5759_v14  ;;  %v10161_v20 = vld [vmem:[#allocation115_spill] sm:$0xff]  ;;  %v10162_v14 = vld [vmem:[#allocation116_spill] sm:$0xff] }
 0x2d9   :  { %1264 = vmatmul.f32.vlgmr.msra.gmra.mxu0 %v6205_v6  ;;  %1284 = vmatmul.f32.vlgmr.msra.gmra.mxu1 %v6207_v7 }
 0x2da   :  { %1304 = vmatmul.f32.vlgmr.msra.gmra.mxu2 %v6205_v6  ;;  %1324 = vmatmul.f32.vlgmr.msra.gmra.mxu3 %v6207_v7 }
 0x2db   :  { %1332 = vmatpush.msrb.mxu0 %v5769_v15  ;;  %1352 = vmatpush.msrb.mxu1 %v10146_v27  ;;  %v10163_v15 = vld [vmem:[#allocation101_spill] sm:$0xff]  ;;  %v6396_v27 = vld [vmem:[%s9128_s1 + $0x218] sm:$0xff] }
 0x2dc   :  { %1372 = vmatpush.msrb.mxu2 %v10147_v28  ;;  %1392 = vmatpush.msrb.mxu3 %v10148_v53  ;;  %v6402_v28 = vld [vmem:[%s9128_s1 + $0x518] sm:$0xff]  ;;  %v6408_v53 = vld [vmem:[%s9128_s1 + $0x1e0] sm:$0xff] }
 0x2dd   :  { %1333 = vmatpush.msrb.mxu0 %v10149_v24  ;;  %1353 = vmatpush.msrb.mxu1 %v10150_v60  ;;  %v6414_v24 = vld [vmem:[%s9128_s1 + $0x4e0] sm:$0xff]  ;;  %v6420_v60 = vld [vmem:[%s9128_s1 + $0x1e8] sm:$0xff] }
 0x2de   :  { %1373 = vmatpush.msrb.mxu2 %v10151_v25  ;;  %1393 = vmatpush.msrb.mxu3 %v10152_v22  ;;  %v6426_v25 = vld [vmem:[%s9128_s1 + $0x4e8] sm:$0xff]  ;;  %v6432_v22 = vld [vmem:[%s9128_s1 + $0x1b0] sm:$0xff] }
 0x2df   :  { %1334 = vmatpush.msrb.mxu0 %v10153_v31  ;;  %1354 = vmatpush.msrb.mxu1 %v10154_v12  ;;  %v6438_v31 = vld [vmem:[%s9128_s1 + $0x4b0] sm:$0xff]  ;;  %v6444_v12 = vld [vmem:[%s9128_s1 + $0x1b8] sm:$0xff] }
 0x2e0   :  { %1374 = vmatpush.msrb.mxu2 %v10155_v21  ;;  %1394 = vmatpush.msrb.mxu3 %v10156_v18  ;;  %v6450_v21 = vld [vmem:[%s9128_s1 + $0x4b8] sm:$0xff]  ;;  %v6456_v18 = vld [vmem:[%s9128_s1 + $0x180] sm:$0xff] }
 0x2e1   :  { %1335 = vmatpush.msrb.mxu0 %v10157_v62  ;;  %1355 = vmatpush.msrb.mxu1 %v10158_v19  ;;  %v6462_v62 = vld [vmem:[%s9128_s1 + $0x480] sm:$0xff]  ;;  %v6468_v19 = vld [vmem:[%s9128_s1 + $0x188] sm:$0xff] }
 0x2e2   :  { %1375 = vmatpush.msrb.mxu2 %v10159_v17  ;;  %1395 = vmatpush.msrb.mxu3 %v10160_v23  ;;  %v6474_v17 = vld [vmem:[%s9128_s1 + $0x488] sm:$0xff]  ;;  %v6480_v23 = vld [vmem:[%s9128_s1 + $0x150] sm:$0xff] }
 0x2e3   :  { %1336 = vmatpush.msrb.mxu0 %v10161_v20  ;;  %1356 = vmatpush.msrb.mxu1 %v10162_v14  ;;  %v6486_v20 = vld [vmem:[%s9128_s1 + $0x450] sm:$0xff]  ;;  %v6492_v14 = vld [vmem:[%s9128_s1 + $0x158] sm:$0xff] }
 0x2e4   :  { %1376 = vmatpush.msrb.mxu2 %v10163_v15  ;;  %1396 = vmatpush.msrb.mxu3 %v10164_v8  ;;  %v6498_v15 = vld [vmem:[%s9128_s1 + $0x458] sm:$0xff]  ;;  %v6504_v8 = vld [vmem:[%s9128_s1 + $0x120] sm:$0xff] }
 0x2e5   :  { %1337 = vmatpush.msrb.mxu0 %v10165_v9  ;;  %1357 = vmatpush.msrb.mxu1 %v10166_v11  ;;  %v6510_v9 = vld [vmem:[%s9128_s1 + $0x420] sm:$0xff]  ;;  %v6516_v11 = vld [vmem:[%s9128_s1 + $0x128] sm:$0xff] }
 0x2e6   :  { %1377 = vmatpush.msrb.mxu2 %v10167_v10  ;;  %1397 = vmatpush.msrb.mxu3 %v10168_v56  ;;  %10189 = vst [vmem:[#allocation2_spill] sm:$0xff] %v6516_v11  ;;  %v6522_v10 = vld [vmem:[%s9128_s1 + $0x428] sm:$0xff]  ;;  %v6528_v56 = vld [vmem:[%s9128_s1 + $0xf0] sm:$0xff] }
 0x2e7   :  { %1338 = vmatpush.msrb.mxu0 %v10169_v57  ;;  %1358 = vmatpush.msrb.mxu1 %v10170_v59  ;;  %10190 = vst [vmem:[#allocation3_spill] sm:$0xff] %v6522_v10  ;;  %v6534_v57 = vld [vmem:[%s9128_s1 + $0x3f0] sm:$0xff]  ;;  %v6540_v59 = vld [vmem:[%s9128_s1 + $0xf8] sm:$0xff] }
 0x2e8   :  { %1378 = vmatpush.msrb.mxu2 %v10171_v61  ;;  %1398 = vmatpush.msrb.mxu3 %v10172_v63  ;;  %10191 = vst [vmem:[#allocation6_spill] sm:$0xff] %v6528_v56  ;;  %v6546_v61 = vld [vmem:[%s9128_s1 + $0x3f8] sm:$0xff]  ;;  %v6552_v63 = vld [vmem:[%s9128_s1 + $0xc0] sm:$0xff] }
 0x2e9   :  { %1339 = vmatpush.msrb.mxu0 %v10173_v29  ;;  %1359 = vmatpush.msrb.mxu1 %v10174_v30  ;;  %10192 = vst [vmem:[#allocation7_spill] sm:$0xff] %v6534_v57  ;;  %v6558_v29 = vld [vmem:[%s9128_s1 + $0x3c0] sm:$0xff]  ;;  %v6564_v30 = vld [vmem:[%s9128_s1 + $0xc8] sm:$0xff] }
 0x2ea   :  { %1379 = vmatpush.msrb.mxu2 %v10175_v33  ;;  %1399 = vmatpush.msrb.mxu3 %v10176_v34  ;;  %10193 = vst [vmem:[#allocation4_spill] sm:$0xff] %v6540_v59  ;;  %v6570_v33 = vld [vmem:[%s9128_s1 + $0x3c8] sm:$0xff]  ;;  %v6576_v34 = vld [vmem:[%s9128_s1 + $0x90] sm:$0xff] }
 0x2eb   :  { %1340 = vmatpush.msrb.mxu0 %v10177_v35  ;;  %1360 = vmatpush.msrb.mxu1 %v10178_v36  ;;  %10194 = vst [vmem:[#allocation5_spill] sm:$0xff] %v6546_v61  ;;  %v6582_v35 = vld [vmem:[%s9128_s1 + $0x390] sm:$0xff]  ;;  %v6588_v36 = vld [vmem:[%s9128_s1 + $0x98] sm:$0xff] }
 0x2ec   :  { %1380 = vmatpush.msrb.mxu2 %v10179_v37  ;;  %1400 = vmatpush.msrb.mxu3 %v10180_v38  ;;  %10195 = vst [vmem:[#allocation8_spill] sm:$0xff] %v6552_v63  ;;  %v6594_v37 = vld [vmem:[%s9128_s1 + $0x398] sm:$0xff]  ;;  %v6600_v38 = vld [vmem:[%s9128_s1 + $0x60] sm:$0xff] }
 0x2ed   :  { %1341 = vmatpush.msrb.mxu0 %v10181_v39  ;;  %1361 = vmatpush.msrb.mxu1 %v10182_v40  ;;  %10196 = vst [vmem:[#allocation9_spill] sm:$0xff] %v6558_v29  ;;  %v6606_v39 = vld [vmem:[%s9128_s1 + $0x360] sm:$0xff]  ;;  %v6612_v40 = vld [vmem:[%s9128_s1 + $0x68] sm:$0xff] }
 0x2ee   :  { %1381 = vmatpush.msrb.mxu2 %v10183_v41  ;;  %1401 = vmatpush.msrb.mxu3 %v10184_v42  ;;  %10197 = vst [vmem:[#allocation10_spill] sm:$0xff] %v6564_v30  ;;  %v6618_v41 = vld [vmem:[%s9128_s1 + $0x368] sm:$0xff]  ;;  %v6624_v42 = vld [vmem:[%s9128_s1 + $0x30] sm:$0xff] }
 0x2ef   :  { %1342 = vmatpush.msrb.mxu0 %v10185_v43  ;;  %1362 = vmatpush.msrb.mxu1 %v10186_v44  ;;  %10198 = vst [vmem:[#allocation11_spill] sm:$0xff] %v6570_v33  ;;  %v6630_v43 = vld [vmem:[%s9128_s1 + $0x330] sm:$0xff]  ;;  %v6636_v44 = vld [vmem:[%s9128_s1 + $0x38] sm:$0xff] }
 0x2f0   :  { %1382 = vmatpush.msrb.mxu2 %v10187_v45  ;;  %1402 = vmatpush.msrb.mxu3 %v10188_v46  ;;  %10199 = vst [vmem:[#allocation12_spill] sm:$0xff] %v6576_v34  ;;  %v6642_v45 = vld [vmem:[%s9128_s1 + $0x338] sm:$0xff]  ;;  %v6648_v46 = vld [vmem:[%s9128_s1] sm:$0xff] }
 0x2f1   :  { %1343 = vmatpush.msrb.mxu0 %v6033_v13  ;;  %1363 = vmatpush.msrb.mxu1 %v6039_v16  ;;  %v6294_v16 = vld [vmem:[%s9128_s1 + $0x5d0] sm:$0xff]  ;;  %v6312_v13 = vld [vmem:[%s9128_s1 + $0x2a0] sm:$0xff]  ;;  %10200 = vst [vmem:[#allocation13_spill] sm:$0xff] %v6582_v35 }
 0x2f2   :  { %1383 = vmatpush.msrb.mxu2 %v6045_v32  ;;  %1403 = vmatpush.msrb.mxu3 %v6051_v26  ;;  %v6300_v32 = vld [vmem:[%s9128_s1 + $0x2d8] sm:$0xff]  ;;  %10201 = vst [vmem:[#allocation14_spill] sm:$0xff] %v6588_v36 }
 0x2f3   :  { %1344 = vmatmul.f32.vlgmr.msrb.gmra.mxu0 %v6205_v6  ;;  %1364 = vmatmul.f32.vlgmr.msrb.gmra.mxu1 %v6207_v7  ;;  %v6306_v26 = vld [vmem:[%s9128_s1 + $0x5d8] sm:$0xff]  ;;  %10202 = vst [vmem:[#allocation17_spill] sm:$0xff] %v6594_v37 }
 0x2f4   :  { %1384 = vmatmul.f32.vlgmr.msrb.gmra.mxu2 %v6205_v6  ;;  %1404 = vmatmul.f32.vlgmr.msrb.gmra.mxu3 %v6207_v7  ;;  %v6384_v6 = vld [vmem:[%s9128_s1 + $0x210] sm:$0xff]  ;;  %10203 = vst [vmem:[#allocation18_spill] sm:$0xff] %v6600_v38 }
 0x2f5   :  { %1486 = vmatpush.msra.mxu0 %v6288_v47  ;;  %1506 = vmatpush.msra.mxu1 %v6294_v16  ;;  %v6390_v7 = vld [vmem:[%s9128_s1 + $0x510] sm:$0xff]  ;;  %10204 = vst [vmem:[#allocation15_spill] sm:$0xff] %v6606_v39 }
 0x2f6   :  { %1526 = vmatpush.msra.mxu2 %v6300_v32  ;;  %1546 = vmatpush.msra.mxu3 %v6306_v26  ;;  %10205 = vst [vmem:[#allocation16_spill] sm:$0xff] %v6612_v40 }
 0x2f7   :  { %1487 = vmatpush.msra.mxu0 %v6312_v13  ;;  %1507 = vmatpush.msra.mxu1 %v6318_v48  ;;  %10206 = vst [vmem:[#allocation21_spill] sm:$0xff] %v6618_v41 }
 0x2f8   :  { %1527 = vmatpush.msra.mxu2 %v6324_v49  ;;  %1547 = vmatpush.msra.mxu3 %v6330_v50  ;;  %10207 = vst [vmem:[#allocation22_spill] sm:$0xff] %v6624_v42 }
 0x2f9   :  { %1488 = vmatpush.msra.mxu0 %v6336_v52  ;;  %1508 = vmatpush.msra.mxu1 %v6342_v54  ;;  %10208 = vst [vmem:[#allocation19_spill] sm:$0xff] %v6630_v43 }
 0x2fa   :  { %1528 = vmatpush.msra.mxu2 %v6348_v55  ;;  %1548 = vmatpush.msra.mxu3 %v6354_v58  ;;  %10209 = vst [vmem:[#allocation20_spill] sm:$0xff] %v6636_v44 }
 0x2fb   :  { %1489 = vmatpush.msra.mxu0 %v6360_v0  ;;  %1509 = vmatpush.msra.mxu1 %v6366_v1  ;;  %10210 = vst [vmem:[#allocation25_spill] sm:$0xff] %v6642_v45 }
 0x2fc   :  { %1529 = vmatpush.msra.mxu2 %v6372_v2  ;;  %1549 = vmatpush.msra.mxu3 %v6378_v4  ;;  %10211 = vst [vmem:[#allocation26_spill] sm:$0xff] %v6648_v46 }
 0x2fd   :  { %1490 = vmatpush.msra.mxu0 %v6384_v6  ;;  %1510 = vmatpush.msra.mxu1 %v6390_v7 }
 0x2fe   :  { %1530 = vmatpush.msra.mxu2 %v6396_v27  ;;  %1550 = vmatpush.msra.mxu3 %v6402_v28 }
 0x2ff   :  { %1491 = vmatpush.msra.mxu0 %v6408_v53  ;;  %1511 = vmatpush.msra.mxu1 %v6414_v24 }
 0x300   :  { %1531 = vmatpush.msra.mxu2 %v6420_v60  ;;  %1551 = vmatpush.msra.mxu3 %v6426_v25 }
 0x301   :  { %1492 = vmatpush.msra.mxu0 %v6432_v22  ;;  %1512 = vmatpush.msra.mxu1 %v6438_v31 }
 0x302   :  { %1532 = vmatpush.msra.mxu2 %v6444_v12  ;;  %1552 = vmatpush.msra.mxu3 %v6450_v21 }
 0x303   :  { %1493 = vmatpush.msra.mxu0 %v6456_v18  ;;  %1513 = vmatpush.msra.mxu1 %v6462_v62 }
 0x304   :  { %1533 = vmatpush.msra.mxu2 %v6468_v19  ;;  %1553 = vmatpush.msra.mxu3 %v6474_v17 }
 0x305   :  { %1494 = vmatpush.msra.mxu0 %v6480_v23  ;;  %1514 = vmatpush.msra.mxu1 %v6486_v20 }
 0x306   :  { %1534 = vmatpush.msra.mxu2 %v6492_v14  ;;  %1554 = vmatpush.msra.mxu3 %v6498_v15 }
 0x307   :  { %1495 = vmatpush.msra.mxu0 %v6504_v8  ;;  %1515 = vmatpush.msra.mxu1 %v6510_v9 }
 0x308   :  { %1535 = vmatpush.msra.mxu2 %v6516_v11  ;;  %1555 = vmatpush.msra.mxu3 %v6522_v10 }
 0x309   :  { %1496 = vmatpush.msra.mxu0 %v6528_v56  ;;  %1516 = vmatpush.msra.mxu1 %v6534_v57 }
 0x30a   :  { %1536 = vmatpush.msra.mxu2 %v6540_v59  ;;  %1556 = vmatpush.msra.mxu3 %v6546_v61 }
 0x30b   :  { %1497 = vmatpush.msra.mxu0 %v6552_v63  ;;  %1517 = vmatpush.msra.mxu1 %v6558_v29 }
 0x30c   :  { %1537 = vmatpush.msra.mxu2 %v6564_v30  ;;  %1557 = vmatpush.msra.mxu3 %v6570_v33 }
 0x30d   :  { %1498 = vmatpush.msra.mxu0 %v6576_v34  ;;  %1518 = vmatpush.msra.mxu1 %v6582_v35 }
 0x30e   :  { %1538 = vmatpush.msra.mxu2 %v6588_v36  ;;  %1558 = vmatpush.msra.mxu3 %v6594_v37 }
 0x30f   :  { %1499 = vmatpush.msra.mxu0 %v6600_v38  ;;  %1519 = vmatpush.msra.mxu1 %v6606_v39  ;;  %v2765_v38 = vld [vmem:[%s9129_s0 + $0x24] sm:$0xff] }
 0x310   :  { %1539 = vmatpush.msra.mxu2 %v6612_v40  ;;  %1559 = vmatpush.msra.mxu3 %v6618_v41  ;;  %v1434_v63 = vrot.slane %v2765_v38, 4 }
 0x311   :  { %1500 = vmatpush.msra.mxu0 %v6624_v42  ;;  %1520 = vmatpush.msra.mxu1 %v6630_v43  ;;  %v6654_v43 = vld [vmem:[%s9128_s1 + $0x300] sm:$0xff] }
 0x312   :  { %1540 = vmatpush.msra.mxu2 %v6636_v44  ;;  %1560 = vmatpush.msra.mxu3 %v6642_v45  ;;  %10212 = vst [vmem:[#allocation23_spill] sm:$0xff] %v6654_v43  ;;  %v6660_v44 = vld [vmem:[%s9128_s1 + $0x8] sm:$0xff] }
 0x313   :  { %1501 = vmatpush.msra.mxu0 %v6648_v46  ;;  %1521 = vmatpush.msra.mxu1 %v6654_v43  ;;  %10213 = vst [vmem:[#allocation24_spill] sm:$0xff] %v6660_v44  ;;  %v6666_v45 = vld [vmem:[%s9128_s1 + $0x308] sm:$0xff]  ;;  %v6672_v46 = vld [vmem:[%s9128_s1 + $0x2e0] sm:$0xff] }
 0x314   :  { %1541 = vmatpush.msra.mxu2 %v6660_v44  ;;  %10214 = vst [vmem:[#allocation29_spill] sm:$0xff] %v6666_v45  ;;  %1561 = vmatpush.msra.mxu3 %v6666_v45  ;;  %v6678_v43 = vld [vmem:[%s9128_s1 + $0x5e0] sm:$0xff]  ;;  %v6684_v44 = vld [vmem:[%s9128_s1 + $0x2e8] sm:$0xff] }
 0x315   :  { %10215 = vst [vmem:[#allocation30_spill] sm:$0xff] %v6672_v46  ;;  %1566 = vmatpush.msrb.mxu0 %v6672_v46  ;;  %1586 = vmatpush.msrb.mxu1 %v6678_v43  ;;  %v6690_v45 = vld [vmem:[%s9128_s1 + $0x5e8] sm:$0xff]  ;;  %v6696_v46 = vld [vmem:[%s9128_s1 + $0x2b0] sm:$0xff] }
 0x316   :  { %10216 = vst [vmem:[#allocation27_spill] sm:$0xff] %v6678_v43  ;;  %1606 = vmatpush.msrb.mxu2 %v6684_v44  ;;  %1626 = vmatpush.msrb.mxu3 %v6690_v45  ;;  %v6702_v43 = vld [vmem:[%s9128_s1 + $0x5b0] sm:$0xff] }
 0x317   :  { %10217 = vst [vmem:[#allocation28_spill] sm:$0xff] %v6684_v44  ;;  %1567 = vmatpush.msrb.mxu0 %v6696_v46  ;;  %1587 = vmatpush.msrb.mxu1 %v6702_v43  ;;  %v6708_v44 = vld [vmem:[%s9128_s1 + $0x2b8] sm:$0xff] }
 0x318   :  { %10218 = vst [vmem:[#allocation33_spill] sm:$0xff] %v6690_v45  ;;  %1607 = vmatpush.msrb.mxu2 %v6708_v44  ;;  %v6714_v45 = vld [vmem:[%s9128_s1 + $0x5b8] sm:$0xff] }
 0x319   :  { %10219 = vst [vmem:[#allocation34_spill] sm:$0xff] %v6696_v46  ;;  %1627 = vmatpush.msrb.mxu3 %v6714_v45  ;;  %v6720_v46 = vld [vmem:[%s9128_s1 + $0x280] sm:$0xff] }
 0x31a   :  { %10220 = vst [vmem:[#allocation31_spill] sm:$0xff] %v6702_v43  ;;  %1568 = vmatpush.msrb.mxu0 %v6720_v46  ;;  %v6726_v43 = vld [vmem:[%s9128_s1 + $0x580] sm:$0xff] }
 0x31b   :  { %10221 = vst [vmem:[#allocation32_spill] sm:$0xff] %v6708_v44  ;;  %1588 = vmatpush.msrb.mxu1 %v6726_v43  ;;  %v6732_v44 = vld [vmem:[%s9128_s1 + $0x288] sm:$0xff] }
 0x31c   :  { %10222 = vst [vmem:[#allocation39_spill] sm:$0xff] %v6714_v45  ;;  %1608 = vmatpush.msrb.mxu2 %v6732_v44  ;;  %v6738_v45 = vld [vmem:[%s9128_s1 + $0x588] sm:$0xff] }
 0x31d   :  { %10223 = vst [vmem:[#allocation40_spill] sm:$0xff] %v6720_v46  ;;  %1628 = vmatpush.msrb.mxu3 %v6738_v45  ;;  %v6744_v46 = vld [vmem:[%s9128_s1 + $0x250] sm:$0xff] }
 0x31e   :  { %10224 = vst [vmem:[#allocation35_spill] sm:$0xff] %v6726_v43  ;;  %1569 = vmatpush.msrb.mxu0 %v6744_v46  ;;  %v6750_v43 = vld [vmem:[%s9128_s1 + $0x550] sm:$0xff] }
 0x31f   :  { %10225 = vst [vmem:[#allocation36_spill] sm:$0xff] %v6732_v44  ;;  %1589 = vmatpush.msrb.mxu1 %v6750_v43  ;;  %v6756_v44 = vld [vmem:[%s9128_s1 + $0x258] sm:$0xff] }
 0x320   :  { %10226 = vst [vmem:[#allocation43_spill] sm:$0xff] %v6738_v45  ;;  %1609 = vmatpush.msrb.mxu2 %v6756_v44  ;;  %v6762_v45 = vld [vmem:[%s9128_s1 + $0x558] sm:$0xff] }
 0x321   :  { %10227 = vst [vmem:[#allocation44_spill] sm:$0xff] %v6744_v46  ;;  %1629 = vmatpush.msrb.mxu3 %v6762_v45  ;;  %v6768_v46 = vld [vmem:[%s9128_s1 + $0x220] sm:$0xff] }
 0x322   :  { %10228 = vst [vmem:[#allocation37_spill] sm:$0xff] %v6750_v43  ;;  %1570 = vmatpush.msrb.mxu0 %v6768_v46  ;;  %v6774_v43 = vld [vmem:[%s9128_s1 + $0x520] sm:$0xff] }
 0x323   :  { %10229 = vst [vmem:[#allocation38_spill] sm:$0xff] %v6756_v44  ;;  %1590 = vmatpush.msrb.mxu1 %v6774_v43  ;;  %v6780_v44 = vld [vmem:[%s9128_s1 + $0x228] sm:$0xff] }
 0x324   :  { %10230 = vst [vmem:[#allocation47_spill] sm:$0xff] %v6762_v45  ;;  %1610 = vmatpush.msrb.mxu2 %v6780_v44  ;;  %v6786_v45 = vld [vmem:[%s9128_s1 + $0x528] sm:$0xff] }
 0x325   :  { %10231 = vst [vmem:[#allocation48_spill] sm:$0xff] %v6768_v46  ;;  %1630 = vmatpush.msrb.mxu3 %v6786_v45  ;;  %v6792_v46 = vld [vmem:[%s9128_s1 + $0x1f0] sm:$0xff] }
 0x326   :  { %10232 = vst [vmem:[#allocation41_spill] sm:$0xff] %v6774_v43  ;;  %1571 = vmatpush.msrb.mxu0 %v6792_v46  ;;  %v6798_v43 = vld [vmem:[%s9128_s1 + $0x4f0] sm:$0xff] }
 0x327   :  { %10233 = vst [vmem:[#allocation42_spill] sm:$0xff] %v6780_v44  ;;  %1591 = vmatpush.msrb.mxu1 %v6798_v43  ;;  %v6804_v44 = vld [vmem:[%s9128_s1 + $0x1f8] sm:$0xff] }
 0x328   :  { %10234 = vst [vmem:[#allocation51_spill] sm:$0xff] %v6786_v45  ;;  %1611 = vmatpush.msrb.mxu2 %v6804_v44  ;;  %v6810_v45 = vld [vmem:[%s9128_s1 + $0x4f8] sm:$0xff] }
 0x329   :  { %10235 = vst [vmem:[#allocation52_spill] sm:$0xff] %v6792_v46  ;;  %1631 = vmatpush.msrb.mxu3 %v6810_v45  ;;  %v6816_v46 = vld [vmem:[%s9128_s1 + $0x1c0] sm:$0xff] }
 0x32a   :  { %10236 = vst [vmem:[#allocation45_spill] sm:$0xff] %v6798_v43  ;;  %1572 = vmatpush.msrb.mxu0 %v6816_v46  ;;  %v6822_v43 = vld [vmem:[%s9128_s1 + $0x4c0] sm:$0xff] }
 0x32b   :  { %10237 = vst [vmem:[#allocation46_spill] sm:$0xff] %v6804_v44  ;;  %1592 = vmatpush.msrb.mxu1 %v6822_v43  ;;  %v6828_v44 = vld [vmem:[%s9128_s1 + $0x1c8] sm:$0xff] }
 0x32c   :  { %10238 = vst [vmem:[#allocation55_spill] sm:$0xff] %v6810_v45  ;;  %1612 = vmatpush.msrb.mxu2 %v6828_v44  ;;  %v6834_v45 = vld [vmem:[%s9128_s1 + $0x4c8] sm:$0xff] }
 0x32d   :  { %10239 = vst [vmem:[#allocation56_spill] sm:$0xff] %v6816_v46  ;;  %1632 = vmatpush.msrb.mxu3 %v6834_v45  ;;  %v6840_v46 = vld [vmem:[%s9128_s1 + $0x190] sm:$0xff] }
 0x32e   :  { %10240 = vst [vmem:[#allocation49_spill] sm:$0xff] %v6822_v43  ;;  %1573 = vmatpush.msrb.mxu0 %v6840_v46  ;;  %v6846_v43 = vld [vmem:[%s9128_s1 + $0x490] sm:$0xff] }
 0x32f   :  { %10241 = vst [vmem:[#allocation50_spill] sm:$0xff] %v6828_v44  ;;  %1593 = vmatpush.msrb.mxu1 %v6846_v43  ;;  %v6852_v44 = vld [vmem:[%s9128_s1 + $0x198] sm:$0xff] }
 0x330   :  { %10242 = vst [vmem:[#allocation59_spill] sm:$0xff] %v6834_v45  ;;  %1613 = vmatpush.msrb.mxu2 %v6852_v44  ;;  %v6858_v45 = vld [vmem:[%s9128_s1 + $0x498] sm:$0xff] }
 0x331   :  { %10243 = vst [vmem:[#allocation60_spill] sm:$0xff] %v6840_v46  ;;  %1633 = vmatpush.msrb.mxu3 %v6858_v45  ;;  %v6864_v46 = vld [vmem:[%s9128_s1 + $0x160] sm:$0xff] }
 0x332   :  { %10244 = vst [vmem:[#allocation53_spill] sm:$0xff] %v6846_v43  ;;  %1574 = vmatpush.msrb.mxu0 %v6864_v46  ;;  %v6870_v43 = vld [vmem:[%s9128_s1 + $0x460] sm:$0xff] }
 0x333   :  { %10245 = vst [vmem:[#allocation54_spill] sm:$0xff] %v6852_v44  ;;  %1594 = vmatpush.msrb.mxu1 %v6870_v43  ;;  %v6876_v44 = vld [vmem:[%s9128_s1 + $0x168] sm:$0xff] }
 0x334   :  { %10246 = vst [vmem:[#allocation63_spill] sm:$0xff] %v6858_v45  ;;  %1614 = vmatpush.msrb.mxu2 %v6876_v44  ;;  %v6882_v45 = vld [vmem:[%s9128_s1 + $0x468] sm:$0xff] }
 0x335   :  { %10247 = vst [vmem:[#allocation64_spill] sm:$0xff] %v6864_v46  ;;  %1634 = vmatpush.msrb.mxu3 %v6882_v45  ;;  %v6888_v46 = vld [vmem:[%s9128_s1 + $0x130] sm:$0xff] }
 0x336   :  { %10248 = vst [vmem:[#allocation57_spill] sm:$0xff] %v6870_v43  ;;  %1575 = vmatpush.msrb.mxu0 %v6888_v46  ;;  %v6894_v43 = vld [vmem:[%s9128_s1 + $0x430] sm:$0xff] }
 0x337   :  { %10249 = vst [vmem:[#allocation58_spill] sm:$0xff] %v6876_v44  ;;  %1595 = vmatpush.msrb.mxu1 %v6894_v43  ;;  %v6900_v44 = vld [vmem:[%s9128_s1 + $0x138] sm:$0xff] }
 0x338   :  { %10250 = vst [vmem:[#allocation69_spill] sm:$0xff] %v6882_v45  ;;  %1615 = vmatpush.msrb.mxu2 %v6900_v44  ;;  %v6906_v45 = vld [vmem:[%s9128_s1 + $0x438] sm:$0xff] }
 0x339   :  { %10251 = vst [vmem:[#allocation70_spill] sm:$0xff] %v6888_v46  ;;  %1635 = vmatpush.msrb.mxu3 %v6906_v45  ;;  %v6912_v46 = vld [vmem:[%s9128_s1 + $0x100] sm:$0xff] }
 0x33a   :  { %10252 = vst [vmem:[#allocation61_spill] sm:$0xff] %v6894_v43  ;;  %1576 = vmatpush.msrb.mxu0 %v6912_v46  ;;  %v6918_v43 = vld [vmem:[%s9128_s1 + $0x400] sm:$0xff] }
 0x33b   :  { %10253 = vst [vmem:[#allocation62_spill] sm:$0xff] %v6900_v44  ;;  %1596 = vmatpush.msrb.mxu1 %v6918_v43  ;;  %v6924_v44 = vld [vmem:[%s9128_s1 + $0x108] sm:$0xff] }
 0x33c   :  { %10254 = vst [vmem:[#allocation73_spill] sm:$0xff] %v6906_v45  ;;  %1616 = vmatpush.msrb.mxu2 %v6924_v44  ;;  %v6930_v45 = vld [vmem:[%s9128_s1 + $0x408] sm:$0xff] }
 0x33d   :  { %10255 = vst [vmem:[#allocation74_spill] sm:$0xff] %v6912_v46  ;;  %1636 = vmatpush.msrb.mxu3 %v6930_v45  ;;  %v6936_v46 = vld [vmem:[%s9128_s1 + $0xd0] sm:$0xff] }
 0x33e   :  { %10256 = vst [vmem:[#allocation65_spill] sm:$0xff] %v6918_v43  ;;  %1577 = vmatpush.msrb.mxu0 %v6936_v46  ;;  %v6942_v43 = vld [vmem:[%s9128_s1 + $0x3d0] sm:$0xff] }
 0x33f   :  { %10257 = vst [vmem:[#allocation66_spill] sm:$0xff] %v6924_v44  ;;  %1597 = vmatpush.msrb.mxu1 %v6942_v43  ;;  %v6948_v44 = vld [vmem:[%s9128_s1 + $0xd8] sm:$0xff] }
 0x340   :  { %10258 = vst [vmem:[#allocation77_spill] sm:$0xff] %v6930_v45  ;;  %1617 = vmatpush.msrb.mxu2 %v6948_v44  ;;  %v6954_v45 = vld [vmem:[%s9128_s1 + $0x3d8] sm:$0xff] }
 0x341   :  { %10259 = vst [vmem:[#allocation78_spill] sm:$0xff] %v6936_v46  ;;  %1637 = vmatpush.msrb.mxu3 %v6954_v45  ;;  %v6960_v46 = vld [vmem:[%s9128_s1 + $0xa0] sm:$0xff] }
 0x342   :  { %10260 = vst [vmem:[#allocation81_spill] sm:$0xff] %v6942_v43  ;;  %1578 = vmatpush.msrb.mxu0 %v6960_v46  ;;  %v6966_v43 = vld [vmem:[%s9128_s1 + $0x3a0] sm:$0xff] }
 0x343   :  { %10261 = vst [vmem:[#allocation82_spill] sm:$0xff] %v6948_v44  ;;  %1598 = vmatpush.msrb.mxu1 %v6966_v43  ;;  %v6972_v44 = vld [vmem:[%s9128_s1 + $0xa8] sm:$0xff] }
 0x344   :  { %10262 = vst [vmem:[#allocation83_spill] sm:$0xff] %v6954_v45  ;;  %1618 = vmatpush.msrb.mxu2 %v6972_v44  ;;  %v6978_v45 = vld [vmem:[%s9128_s1 + $0x3a8] sm:$0xff] }
 0x345   :  { %10263 = vst [vmem:[#allocation84_spill] sm:$0xff] %v6960_v46  ;;  %1638 = vmatpush.msrb.mxu3 %v6978_v45  ;;  %v6984_v46 = vld [vmem:[%s9128_s1 + $0x70] sm:$0xff] }
 0x346   :  { %10264 = vst [vmem:[#allocation67_spill] sm:$0xff] %v6966_v43  ;;  %1579 = vmatpush.msrb.mxu0 %v6984_v46  ;;  %v6990_v43 = vld [vmem:[%s9128_s1 + $0x370] sm:$0xff] }
 0x347   :  { %10265 = vst [vmem:[#allocation68_spill] sm:$0xff] %v6972_v44  ;;  %1599 = vmatpush.msrb.mxu1 %v6990_v43  ;;  %v6996_v44 = vld [vmem:[%s9128_s1 + $0x78] sm:$0xff] }
 0x348   :  { %10266 = vst [vmem:[#allocation87_spill] sm:$0xff] %v6978_v45  ;;  %1619 = vmatpush.msrb.mxu2 %v6996_v44  ;;  %v7002_v45 = vld [vmem:[%s9128_s1 + $0x378] sm:$0xff] }
 0x349   :  { %10267 = vst [vmem:[#allocation88_spill] sm:$0xff] %v6984_v46  ;;  %1639 = vmatpush.msrb.mxu3 %v7002_v45  ;;  %v7008_v46 = vld [vmem:[%s9128_s1 + $0x40] sm:$0xff] }
 0x34a   :  { %10268 = vst [vmem:[#allocation71_spill] sm:$0xff] %v6990_v43  ;;  %1580 = vmatpush.msrb.mxu0 %v7008_v46  ;;  %v7014_v43 = vld [vmem:[%s9128_s1 + $0x340] sm:$0xff] }
 0x34b   :  { %10269 = vst [vmem:[#allocation72_spill] sm:$0xff] %v6996_v44  ;;  %1600 = vmatpush.msrb.mxu1 %v7014_v43  ;;  %v7020_v44 = vld [vmem:[%s9128_s1 + $0x48] sm:$0xff] }
 0x34c   :  { %10270 = vst [vmem:[#allocation91_spill] sm:$0xff] %v7002_v45  ;;  %1620 = vmatpush.msrb.mxu2 %v7020_v44  ;;  %v7026_v45 = vld [vmem:[%s9128_s1 + $0x348] sm:$0xff]  ;;  %v1205_v42 = vpop.f32.mrf.mxu1 }
 0x34d   :  { %10271 = vst [vmem:[#allocation92_spill] sm:$0xff] %v7008_v46  ;;  %1640 = vmatpush.msrb.mxu3 %v7026_v45  ;;  %v7032_v46 = vld [vmem:[%s9128_s1 + $0x10] sm:$0xff] }
 0x34e   :  { %10272 = vst [vmem:[#allocation75_spill] sm:$0xff] %v7014_v43  ;;  %1581 = vmatpush.msrb.mxu0 %v7032_v46  ;;  %v7038_v43 = vld [vmem:[%s9128_s1 + $0x310] sm:$0xff] }
 0x34f   :  { %10273 = vst [vmem:[#allocation76_spill] sm:$0xff] %v7020_v44  ;;  %1601 = vmatpush.msrb.mxu1 %v7038_v43  ;;  %v7044_v44 = vld [vmem:[%s9128_s1 + $0x18] sm:$0xff] }
 0x350   :  { %10274 = vst [vmem:[#allocation95_spill] sm:$0xff] %v7026_v45  ;;  %1621 = vmatpush.msrb.mxu2 %v7044_v44  ;;  %v7050_v45 = vld [vmem:[%s9128_s1 + $0x318] sm:$0xff] }
 0x351   :  { %10275 = vst [vmem:[#allocation96_spill] sm:$0xff] %v7032_v46  ;;  %1641 = vmatpush.msrb.mxu3 %v7050_v45  ;;  %v1185_v46 = vpop.f32.mrf.mxu0 }
 0x352   :  { %10276 = vst [vmem:[#allocation79_spill] sm:$0xff] %v7038_v43  ;;  %v1206_v43 = vadd.f32 %v1205_v42, %v1185_v46 }
 0x353   :  { %10277 = vst [vmem:[#allocation80_spill] sm:$0xff] %v7044_v44  ;;  %v1225_v41 = vpop.f32.mrf.mxu2  ;;  %v1245_v40 = vpop.f32.mrf.mxu3 }
 0x354   :  { %10278 = vst [vmem:[#allocation99_spill] sm:$0xff] %v7050_v45  ;;  %v1246_v39 = vadd.f32 %v1245_v40, %v1225_v41 }
 0x356   :  { %v1410_v37 = vrot.slane %v1246_v39, 6  ;;  %v1285_v33 = vpop.f32.mrf.mxu1 }
 0x358   :  { %v1411_v44 = vsel %vm452_vm0, %v1206_v43, %v1410_v37 }
 0x359   :  { %v1413_v36 = vadd.f32 %v2765_v38, %v1411_v44  ;;  %v1265_v34 = vpop.f32.mrf.mxu0 }
 0x35a   :  { %v1286_v61 = vadd.f32 %v1285_v33, %v1265_v34 }
 0x35b   :  { %v2767_v35 = vmul.f32 -1.442695, %v1413_v36 }
 0x35d   :  { %2821 = vpow2.f32 %v2767_v35  ;;  %v1305_v30 = vpop.f32.mrf.mxu2  ;;  %v1325_v45 = vpop.f32.mrf.mxu3 }
 0x35e   :  { %v1326_v29 = vadd.f32 %v1325_v45, %v1305_v30 }
 0x360   :  { %v1438_v59 = vrot.slane %v1326_v29, 6 }
 0x362   :  { %v1439_v40 = vsel %vm452_vm0, %v1286_v61, %v1438_v59 }
 0x363   :  { %v2822_v41 = vpop.eup %2821  ;;  %v1441_v42 = vadd.f32 %v1439_v40, %v1434_v63 }
 0x364   :  { %v1417_v46 = vadd.f32 1.0, %v2822_v41 }
 0x365   :  { %v2768_v57 = vmul.f32 -1.442695, %v1441_v42 }
 0x366   :  { %2823 = vrcp.f32 %v1417_v46  ;;  %v1429_v45 = vand.u32 2147483648, %v1417_v46  ;;  %vm1423_vm11 = vweird.f32 %v1417_v46 }
 0x367   :  { %2825 = vpow2.f32 %v2768_v57  ;;  %v1427_v57 = vand.u32 2147483647, %v1417_v46 }
 0x369   :  { %vm1428_vm13 = vcmp.eq.f32.partialorder %v1427_v57, 8.507059e+37 }
 0x36c   :  { %v2824_v37 = vpop.eup %2823 }
 0x36d   :  { %v2826_v39 = vpop.eup %2825  ;;  %v1419_v36 = vmul.f32 %v2824_v37, %v1417_v46  ;;  %vm1424_vm10 = vweird.f32 %v2824_v37 }
 0x36e   :  { %v1445_v43 = vadd.f32 1.0, %v2826_v39  ;;  %vm1425_vm12 = vmor %vm1423_vm11, %vm1424_vm10 }
 0x36f   :  { %v1420_v44 = vsub.f32 1.0, %v1419_v36 }
 0x370   :  { %2827 = vrcp.f32 %v1445_v43  ;;  %v1345_v56 = vpop.f32.mrf.mxu0  ;;  %v1365_v30 = vpop.f32.mrf.mxu1  ;;  %v1457_v46 = vand.u32 2147483648, %v1445_v43  ;;  %vm1451_vm15 = vweird.f32 %v1445_v43 }
 0x371   :  { %v1421_v35 = vmul.f32 %v2824_v37, %v1420_v44  ;;  %v1366_v61 = vadd.f32 %v1365_v30, %v1345_v56  ;;  %v1430_v44 = vor.u32 1.1754944e-38, %v1429_v45  ;;  %v2766_v56 = vld [vmem:[%s9129_s0 + $0x2c] sm:$0xf] }
 0x373   :  { %v1422_v59 = vadd.f32 %v2824_v37, %v1421_v35  ;;  %v1461_v36 = vadd.f32 %v1366_v61, %v4774_v3 }
 0x375   :  { %v1426_v39 = vsel %vm1425_vm12, %v2824_v37, %v1422_v59  ;;  %v1458_v59 = vor.u32 1.1754944e-38, %v1457_v46  ;;  %v7143_v46 = vld [vmem:[%s9128_s1 + $0x298] sm:$0xff] }
 0x376   :  { %v2828_v38 = vpop.eup %2827  ;;  %v1431_v35 = vsel %vm1428_vm13, %v1430_v44, %v1426_v39  ;;  %v7107_v39 = vld [vmem:[%s9128_s1 + $0x2c0] sm:$0xff]  ;;  %v7119_v44 = vld [vmem:[%s9128_s1 + $0x2c8] sm:$0xff] }
 0x377   :  { %v1447_v33 = vmul.f32 %v2828_v38, %v1445_v43  ;;  %v1385_v29 = vpop.f32.mrf.mxu2  ;;  %v1405_v34 = vpop.f32.mrf.mxu3  ;;  %vm1452_vm14 = vweird.f32 %v2828_v38 }
 0x378   :  { %v1406_v63 = vadd.f32 %v1405_v34, %v1385_v29  ;;  %v1455_v29 = vand.u32 2147483647, %v1445_v43  ;;  %vm1453_vm1 = vmor %vm1451_vm15, %vm1452_vm14  ;;  %v7089_v43 = vld [vmem:[%s9128_s1 + $0x5f0] sm:$0xff] }
 0x379   :  { %v1448_v40 = vsub.f32 1.0, %v1447_v33 }
 0x37a   :  { %v1462_v41 = vadd.f32 %v1406_v63, %v4768_v51  ;;  %vm1456_vm2 = vcmp.eq.f32.partialorder %v1455_v29, 8.507059e+37  ;;  %v7155_v29 = vld [vmem:[%s9128_s1 + $0x260] sm:$0xff] }
 0x37b   :  { %v1449_v42 = vmul.f32 %v2828_v38, %v1448_v40 }
 0x37c   :  { %v1465_v10 = vrot.slane %v1462_v41, 6 }
 0x37d   :  { %v1450_v11 = vadd.f32 %v2828_v38, %v1449_v42  ;;  %v7101_v42 = vld [vmem:[%s9128_s1 + $0x5f8] sm:$0xff] }
 0x37e   :  { %v1466_v30 = vsel %vm452_vm0, %v1461_v36, %v1465_v10  ;;  %v7113_v36 = vld [vmem:[%s9128_s1 + $0x5c0] sm:$0xff] }
 0x37f   :  { %v1468_v33 = vmul.f32 %v1466_v30, %v1431_v35  ;;  %v1454_v34 = vsel %vm1453_vm1, %v2828_v38, %v1450_v11  ;;  %v7095_v38 = vld [vmem:[%s9128_s1 + $0x2f8] sm:$0xff]  ;;  %v7131_v35 = vld [vmem:[%s9128_s1 + $0x290] sm:$0xff] }
 0x380   :  { %v1459_v61 = vsel %vm1456_vm2, %v1458_v59, %v1454_v34  ;;  %v7137_v30 = vld [vmem:[%s9128_s1 + $0x590] sm:$0xff]  ;;  %v7167_v34 = vld [vmem:[%s9128_s1 + $0x268] sm:$0xff] }
 0x381   :  { %v1469_v37 = vadd.f32 %v2766_v56, %v1468_v33  ;;  %v1471_v63 = vsub.f32 1.0, %v1459_v61  ;;  %v1473_v57 = vmul.f32 %v1459_v61, %v6198_v5  ;;  %v7083_v5 = vld [vmem:[%s9128_s1 + $0x2f0] sm:$0xff]  ;;  %v7125_v56 = vld [vmem:[%s9128_s1 + $0x5c8] sm:$0xff]  ;;  %v7149_v33 = vld [vmem:[%s9128_s1 + $0x598] sm:$0xff] }
 0x382   :  { %v7173_v59 = vld [vmem:[%s9128_s1 + $0x568] sm:$0xff]  ;;  %v7183_v61 = vld [vmem:[%s9128_s1 + $0x230] sm:$0xff] }
 0x383   :  { %2829 = vtanh.f32 %v1469_v37  ;;  %v7161_v37 = vld [vmem:[%s9128_s1 + $0x560] sm:$0xff] }
 0x389   :  { %v2830_v45 = vpop.eup %2829 }
 0x38a   :  { %v1472_v40 = vmul.f32 %v2830_v45, %v1471_v63  ;;  %v7189_v63 = vld [vmem:[%s9128_s1 + $0x530] sm:$0xff]  ;;  %v7195_v45 = vld [vmem:[%s9128_s1 + $0x238] sm:$0xff] }
 0x38b   :  { %10279 = vst [vmem:[#allocation100_spill] sm:$0xff] %v7189_v63 }
 0x38c   :  { %v7065_v41 = vadd.f32 %v1473_v57, %v1472_v40  ;;  %10280 = vst [vmem:[#allocation85_spill] sm:$0xff] %v7195_v45  ;;  %v7201_v40 = vld [vmem:[%s9128_s1 + $0x538] sm:$0xff]  ;;  %v7207_v57 = vld [vmem:[%s9128_s1 + $0x200] sm:$0xff] }
 0x38d   :  { %10281 = vst [vmem:[#allocation86_spill] sm:$0xff] %v7201_v40 }
 0x38e   :  { %2769 = vst [vmem:[%s9131_s3 + $0xc] sm:$0xf] %v7065_v41 }
 0x38f   :  { %1481 = vst [vmem:[#allocation1] ss:$4 sm:$0xff] %v7065_v41 }
 0x390   :  { %10282 = vst [vmem:[#allocation103_spill] sm:$0xff] %v7207_v57 }
 0x396   :  { %v7072_v10 = vld.sshfl [vmem:[#allocation1] sm:$0xff pattern:$0x73625140]  ;;  %v7074_v11 = vld.sshfl [vmem:[#allocation1 + $0x8] sm:$0xff pattern:$0x73625140] }
 0x397   :  { %1502 = vmatmul.f32.vlgmr.msra.gmra.mxu0 %v7072_v10  ;;  %1522 = vmatmul.f32.vlgmr.msra.gmra.mxu1 %v7074_v11 }
 0x398   :  { %1542 = vmatmul.f32.vlgmr.msra.gmra.mxu2 %v7072_v10  ;;  %1562 = vmatmul.f32.vlgmr.msra.gmra.mxu3 %v7074_v11 }
 0x399   :  { %1646 = vmatpush.msra.mxu0 %v7083_v5  ;;  %1666 = vmatpush.msra.mxu1 %v7089_v43 }
 0x39a   :  { %1686 = vmatpush.msra.mxu2 %v7095_v38  ;;  %1706 = vmatpush.msra.mxu3 %v7101_v42 }
 0x39b   :  { %1647 = vmatpush.msra.mxu0 %v7107_v39  ;;  %1667 = vmatpush.msra.mxu1 %v7113_v36 }
 0x39c   :  { %1687 = vmatpush.msra.mxu2 %v7119_v44  ;;  %1707 = vmatpush.msra.mxu3 %v7125_v56 }
 0x39d   :  { %1648 = vmatpush.msra.mxu0 %v7131_v35  ;;  %1668 = vmatpush.msra.mxu1 %v7137_v30 }
 0x39e   :  { %1688 = vmatpush.msra.mxu2 %v7143_v46  ;;  %1708 = vmatpush.msra.mxu3 %v7149_v33 }
 0x39f   :  { %1649 = vmatpush.msra.mxu0 %v7155_v29  ;;  %1669 = vmatpush.msra.mxu1 %v7161_v37 }
 0x3a0   :  { %1689 = vmatpush.msra.mxu2 %v7167_v34  ;;  %1709 = vmatpush.msra.mxu3 %v7173_v59 }
 0x3a1   :  { %1582 = vmatmul.f32.vlgmr.msrb.gmra.mxu0 %v7072_v10  ;;  %1602 = vmatmul.f32.vlgmr.msrb.gmra.mxu1 %v7074_v11 }
 0x3a2   :  { %1622 = vmatmul.f32.vlgmr.msrb.gmra.mxu2 %v7072_v10  ;;  %1642 = vmatmul.f32.vlgmr.msrb.gmra.mxu3 %v7074_v11 }
 0x3a3   :  { %1650 = vmatpush.msra.mxu0 %v7183_v61  ;;  %1670 = vmatpush.msra.mxu1 %v7189_v63  ;;  %v7213_v63 = vld [vmem:[%s9128_s1 + $0x500] sm:$0xff] }
 0x3a4   :  { %1690 = vmatpush.msra.mxu2 %v7195_v45  ;;  %1710 = vmatpush.msra.mxu3 %v7201_v40  ;;  %10283 = vst [vmem:[#allocation104_spill] sm:$0xff] %v7213_v63  ;;  %v7219_v45 = vld [vmem:[%s9128_s1 + $0x208] sm:$0xff] }
 0x3a5   :  { %1651 = vmatpush.msra.mxu0 %v7207_v57  ;;  %1671 = vmatpush.msra.mxu1 %v7213_v63  ;;  %10284 = vst [vmem:[#allocation89_spill] sm:$0xff] %v7219_v45  ;;  %v7225_v40 = vld [vmem:[%s9128_s1 + $0x508] sm:$0xff]  ;;  %v7231_v57 = vld [vmem:[%s9128_s1 + $0x1d0] sm:$0xff] }
 0x3a6   :  { %1691 = vmatpush.msra.mxu2 %v7219_v45  ;;  %10285 = vst [vmem:[#allocation90_spill] sm:$0xff] %v7225_v40  ;;  %1711 = vmatpush.msra.mxu3 %v7225_v40  ;;  %v7237_v63 = vld [vmem:[%s9128_s1 + $0x4d0] sm:$0xff]  ;;  %v7243_v45 = vld [vmem:[%s9128_s1 + $0x1d8] sm:$0xff] }
 0x3a7   :  { %10286 = vst [vmem:[#allocation107_spill] sm:$0xff] %v7231_v57  ;;  %1652 = vmatpush.msra.mxu0 %v7231_v57  ;;  %1672 = vmatpush.msra.mxu1 %v7237_v63  ;;  %v7249_v40 = vld [vmem:[%s9128_s1 + $0x4d8] sm:$0xff]  ;;  %v7255_v57 = vld [vmem:[%s9128_s1 + $0x1a0] sm:$0xff] }
 0x3a8   :  { %10287 = vst [vmem:[#allocation108_spill] sm:$0xff] %v7237_v63  ;;  %1692 = vmatpush.msra.mxu2 %v7243_v45  ;;  %1712 = vmatpush.msra.mxu3 %v7249_v40  ;;  %v7261_v63 = vld [vmem:[%s9128_s1 + $0x4a0] sm:$0xff] }
 0x3a9   :  { %10288 = vst [vmem:[#allocation93_spill] sm:$0xff] %v7243_v45  ;;  %1653 = vmatpush.msra.mxu0 %v7255_v57  ;;  %1673 = vmatpush.msra.mxu1 %v7261_v63  ;;  %v7267_v45 = vld [vmem:[%s9128_s1 + $0x1a8] sm:$0xff] }
 0x3aa   :  { %10289 = vst [vmem:[#allocation94_spill] sm:$0xff] %v7249_v40  ;;  %1693 = vmatpush.msra.mxu2 %v7267_v45  ;;  %v7273_v40 = vld [vmem:[%s9128_s1 + $0x4a8] sm:$0xff] }
 0x3ab   :  { %10290 = vst [vmem:[#allocation111_spill] sm:$0xff] %v7255_v57  ;;  %1713 = vmatpush.msra.mxu3 %v7273_v40  ;;  %v7279_v57 = vld [vmem:[%s9128_s1 + $0x170] sm:$0xff] }
 0x3ac   :  { %10291 = vst [vmem:[#allocation112_spill] sm:$0xff] %v7261_v63  ;;  %1654 = vmatpush.msra.mxu0 %v7279_v57  ;;  %v7285_v63 = vld [vmem:[%s9128_s1 + $0x470] sm:$0xff] }
 0x3ad   :  { %10292 = vst [vmem:[#allocation97_spill] sm:$0xff] %v7267_v45  ;;  %1674 = vmatpush.msra.mxu1 %v7285_v63  ;;  %v7291_v45 = vld [vmem:[%s9128_s1 + $0x178] sm:$0xff] }
 0x3ae   :  { %10293 = vst [vmem:[#allocation98_spill] sm:$0xff] %v7273_v40  ;;  %1694 = vmatpush.msra.mxu2 %v7291_v45  ;;  %v7297_v40 = vld [vmem:[%s9128_s1 + $0x478] sm:$0xff] }
 0x3af   :  { %10294 = vst [vmem:[#allocation115_spill] sm:$0xff] %v7279_v57  ;;  %1714 = vmatpush.msra.mxu3 %v7297_v40  ;;  %v7303_v57 = vld [vmem:[%s9128_s1 + $0x140] sm:$0xff] }
 0x3b0   :  { %10295 = vst [vmem:[#allocation116_spill] sm:$0xff] %v7285_v63  ;;  %1655 = vmatpush.msra.mxu0 %v7303_v57  ;;  %v7309_v63 = vld [vmem:[%s9128_s1 + $0x440] sm:$0xff] }
 0x3b1   :  { %10296 = vst [vmem:[#allocation101_spill] sm:$0xff] %v7291_v45  ;;  %1675 = vmatpush.msra.mxu1 %v7309_v63  ;;  %v7315_v45 = vld [vmem:[%s9128_s1 + $0x148] sm:$0xff] }
 0x3b2   :  { %10297 = vst [vmem:[#allocation102_spill] sm:$0xff] %v7297_v40  ;;  %1695 = vmatpush.msra.mxu2 %v7315_v45  ;;  %v7321_v40 = vld [vmem:[%s9128_s1 + $0x448] sm:$0xff] }
 0x3b3   :  { %10298 = vst [vmem:[#allocation119_spill] sm:$0xff] %v7303_v57  ;;  %1715 = vmatpush.msra.mxu3 %v7321_v40  ;;  %v7327_v57 = vld [vmem:[%s9128_s1 + $0x110] sm:$0xff] }
 0x3b4   :  { %10299 = vst [vmem:[#allocation120_spill] sm:$0xff] %v7309_v63  ;;  %1656 = vmatpush.msra.mxu0 %v7327_v57  ;;  %v7333_v63 = vld [vmem:[%s9128_s1 + $0x410] sm:$0xff] }
 0x3b5   :  { %10300 = vst [vmem:[#allocation105_spill] sm:$0xff] %v7315_v45  ;;  %1676 = vmatpush.msra.mxu1 %v7333_v63  ;;  %v7339_v45 = vld [vmem:[%s9128_s1 + $0x118] sm:$0xff] }
 0x3b6   :  { %10301 = vst [vmem:[#allocation106_spill] sm:$0xff] %v7321_v40  ;;  %1696 = vmatpush.msra.mxu2 %v7339_v45  ;;  %v7345_v40 = vld [vmem:[%s9128_s1 + $0x418] sm:$0xff] }
 0x3b7   :  { %10302 = vst [vmem:[#allocation123_spill] sm:$0xff] %v7327_v57  ;;  %1716 = vmatpush.msra.mxu3 %v7345_v40  ;;  %v7351_v57 = vld [vmem:[%s9128_s1 + $0xe0] sm:$0xff] }
 0x3b8   :  { %10303 = vst [vmem:[#allocation124_spill] sm:$0xff] %v7333_v63  ;;  %1657 = vmatpush.msra.mxu0 %v7351_v57  ;;  %v7357_v63 = vld [vmem:[%s9128_s1 + $0x3e0] sm:$0xff] }
 0x3b9   :  { %10304 = vst [vmem:[#allocation109_spill] sm:$0xff] %v7339_v45  ;;  %1677 = vmatpush.msra.mxu1 %v7357_v63  ;;  %v7363_v45 = vld [vmem:[%s9128_s1 + $0xe8] sm:$0xff] }
 0x3ba   :  { %10305 = vst [vmem:[#allocation110_spill] sm:$0xff] %v7345_v40  ;;  %1697 = vmatpush.msra.mxu2 %v7363_v45  ;;  %v7369_v40 = vld [vmem:[%s9128_s1 + $0x3e8] sm:$0xff] }
 0x3bb   :  { %10306 = vst [vmem:[#allocation113_spill] sm:$0xff] %v7351_v57  ;;  %1717 = vmatpush.msra.mxu3 %v7369_v40  ;;  %v7375_v57 = vld [vmem:[%s9128_s1 + $0xb0] sm:$0xff] }
 0x3bc   :  { %10307 = vst [vmem:[#allocation114_spill] sm:$0xff] %v7357_v63  ;;  %1658 = vmatpush.msra.mxu0 %v7375_v57  ;;  %v7381_v63 = vld [vmem:[%s9128_s1 + $0x3b0] sm:$0xff] }
 0x3bd   :  { %10308 = vst [vmem:[#allocation129_spill] sm:$0xff] %v7363_v45  ;;  %1678 = vmatpush.msra.mxu1 %v7381_v63  ;;  %v7387_v45 = vld [vmem:[%s9128_s1 + $0xb8] sm:$0xff] }
 0x3be   :  { %10309 = vst [vmem:[#allocation130_spill] sm:$0xff] %v7369_v40  ;;  %1698 = vmatpush.msra.mxu2 %v7387_v45  ;;  %v7393_v40 = vld [vmem:[%s9128_s1 + $0x3b8] sm:$0xff] }
 0x3bf   :  { %10310 = vst [vmem:[#allocation117_spill] sm:$0xff] %v7375_v57  ;;  %1718 = vmatpush.msra.mxu3 %v7393_v40  ;;  %v7399_v57 = vld [vmem:[%s9128_s1 + $0x80] sm:$0xff] }
 0x3c0   :  { %10311 = vst [vmem:[#allocation118_spill] sm:$0xff] %v7381_v63  ;;  %1659 = vmatpush.msra.mxu0 %v7399_v57  ;;  %v7405_v63 = vld [vmem:[%s9128_s1 + $0x380] sm:$0xff] }
 0x3c1   :  { %10312 = vst [vmem:[#allocation121_spill] sm:$0xff] %v7387_v45  ;;  %1679 = vmatpush.msra.mxu1 %v7405_v63  ;;  %v7411_v45 = vld [vmem:[%s9128_s1 + $0x88] sm:$0xff] }
 0x3c2   :  { %10313 = vst [vmem:[#allocation122_spill] sm:$0xff] %v7393_v40  ;;  %1699 = vmatpush.msra.mxu2 %v7411_v45  ;;  %v7417_v40 = vld [vmem:[%s9128_s1 + $0x388] sm:$0xff] }
 0x3c3   :  { %10314 = vst [vmem:[#allocation125_spill] sm:$0xff] %v7399_v57  ;;  %1719 = vmatpush.msra.mxu3 %v7417_v40  ;;  %v7423_v57 = vld [vmem:[%s9128_s1 + $0x50] sm:$0xff] }
 0x3c4   :  { %10315 = vst [vmem:[#allocation126_spill] sm:$0xff] %v7405_v63  ;;  %1660 = vmatpush.msra.mxu0 %v7423_v57  ;;  %v7429_v63 = vld [vmem:[%s9128_s1 + $0x350] sm:$0xff] }
 0x3c5   :  { %10316 = vst [vmem:[#allocation127_spill] sm:$0xff] %v7411_v45  ;;  %1680 = vmatpush.msra.mxu1 %v7429_v63  ;;  %v7435_v45 = vld [vmem:[%s9128_s1 + $0x58] sm:$0xff] }
 0x3c6   :  { %10317 = vst [vmem:[#allocation128_spill] sm:$0xff] %v7417_v40  ;;  %1700 = vmatpush.msra.mxu2 %v7435_v45  ;;  %v7441_v40 = vld [vmem:[%s9128_s1 + $0x358] sm:$0xff] }
 0x3c7   :  { %10318 = vst [vmem:[#allocation131_spill] sm:$0xff] %v7423_v57  ;;  %1720 = vmatpush.msra.mxu3 %v7441_v40  ;;  %v7447_v57 = vld [vmem:[%s9128_s1 + $0x20] sm:$0xff] }
 0x3c8   :  { %10319 = vst [vmem:[#allocation132_spill] sm:$0xff] %v7429_v63  ;;  %1661 = vmatpush.msra.mxu0 %v7447_v57  ;;  %v7453_v63 = vld [vmem:[%s9128_s1 + $0x320] sm:$0xff] }
 0x3c9   :  { %10320 = vst [vmem:[#allocation133_spill] sm:$0xff] %v7435_v45  ;;  %1681 = vmatpush.msra.mxu1 %v7453_v63  ;;  %v7459_v45 = vld [vmem:[%s9128_s1 + $0x28] sm:$0xff]  ;;  %1662 = vmatmul.f32.vlgmr.msra.gmra.mxu0 %v7072_v10 }
 0x3ca   :  { %10321 = vst [vmem:[#allocation134_spill] sm:$0xff] %v7441_v40  ;;  %1701 = vmatpush.msra.mxu2 %v7459_v45  ;;  %v7465_v40 = vld [vmem:[%s9128_s1 + $0x328] sm:$0xff]  ;;  %1682 = vmatmul.f32.vlgmr.msra.gmra.mxu1 %v7074_v11 }
 0x3cb   :  { %1721 = vmatpush.msra.mxu3 %v7465_v40  ;;  %1702 = vmatmul.f32.vlgmr.msra.gmra.mxu2 %v7072_v10  ;;  %v10360_v10 = vld [vmem:[#allocation44_spill] sm:$0xff] }
 0x3cc   :  { %1722 = vmatmul.f32.vlgmr.msra.gmra.mxu3 %v7074_v11  ;;  %1804 = vmatpush.msrb.mxu0 %v6288_v47  ;;  %v10322_v47 = vld [vmem:[#allocation2_spill] sm:$0xff]  ;;  %v10361_v11 = vld [vmem:[#allocation37_spill] sm:$0xff] }
 0x3cd   :  { %1824 = vmatpush.msrb.mxu1 %v6294_v16  ;;  %1844 = vmatpush.msrb.mxu2 %v6300_v32  ;;  %v10323_v16 = vld [vmem:[#allocation3_spill] sm:$0xff]  ;;  %v10324_v32 = vld [vmem:[#allocation6_spill] sm:$0xff] }
 0x3ce   :  { %1864 = vmatpush.msrb.mxu3 %v6306_v26  ;;  %1805 = vmatpush.msrb.mxu0 %v6312_v13  ;;  %v10325_v26 = vld [vmem:[#allocation7_spill] sm:$0xff]  ;;  %v10326_v13 = vld [vmem:[#allocation4_spill] sm:$0xff] }
 0x3cf   :  { %1825 = vmatpush.msrb.mxu1 %v6318_v48  ;;  %1845 = vmatpush.msrb.mxu2 %v6324_v49  ;;  %v10327_v48 = vld [vmem:[#allocation5_spill] sm:$0xff]  ;;  %v10328_v49 = vld [vmem:[#allocation8_spill] sm:$0xff] }
 0x3d0   :  { %1865 = vmatpush.msrb.mxu3 %v6330_v50  ;;  %1806 = vmatpush.msrb.mxu0 %v6336_v52  ;;  %v10329_v50 = vld [vmem:[#allocation9_spill] sm:$0xff]  ;;  %v10330_v52 = vld [vmem:[#allocation10_spill] sm:$0xff] }
 0x3d1   :  { %1826 = vmatpush.msrb.mxu1 %v6342_v54  ;;  %1846 = vmatpush.msrb.mxu2 %v6348_v55  ;;  %v10331_v54 = vld [vmem:[#allocation11_spill] sm:$0xff]  ;;  %v10332_v55 = vld [vmem:[#allocation12_spill] sm:$0xff] }
 0x3d2   :  { %1866 = vmatpush.msrb.mxu3 %v6354_v58  ;;  %1807 = vmatpush.msrb.mxu0 %v6360_v0  ;;  %v10333_v58 = vld [vmem:[#allocation13_spill] sm:$0xff]  ;;  %v10334_v0 = vld [vmem:[#allocation14_spill] sm:$0xff] }
 0x3d3   :  { %1827 = vmatpush.msrb.mxu1 %v6366_v1  ;;  %1847 = vmatpush.msrb.mxu2 %v6372_v2  ;;  %v10335_v1 = vld [vmem:[#allocation17_spill] sm:$0xff]  ;;  %v10336_v2 = vld [vmem:[#allocation18_spill] sm:$0xff] }
 0x3d4   :  { %1867 = vmatpush.msrb.mxu3 %v6378_v4  ;;  %1808 = vmatpush.msrb.mxu0 %v6384_v6  ;;  %v10337_v4 = vld [vmem:[#allocation15_spill] sm:$0xff]  ;;  %v10338_v6 = vld [vmem:[#allocation16_spill] sm:$0xff] }
 0x3d5   :  { %1828 = vmatpush.msrb.mxu1 %v6390_v7  ;;  %1848 = vmatpush.msrb.mxu2 %v6396_v27  ;;  %v10339_v7 = vld [vmem:[#allocation21_spill] sm:$0xff]  ;;  %v10340_v27 = vld [vmem:[#allocation22_spill] sm:$0xff] }
 0x3d6   :  { %1868 = vmatpush.msrb.mxu3 %v6402_v28  ;;  %1809 = vmatpush.msrb.mxu0 %v6408_v53  ;;  %v10341_v28 = vld [vmem:[#allocation19_spill] sm:$0xff]  ;;  %v10342_v53 = vld [vmem:[#allocation20_spill] sm:$0xff] }
 0x3d7   :  { %1829 = vmatpush.msrb.mxu1 %v6414_v24  ;;  %1849 = vmatpush.msrb.mxu2 %v6420_v60  ;;  %v10343_v24 = vld [vmem:[#allocation25_spill] sm:$0xff]  ;;  %v10344_v60 = vld [vmem:[#allocation26_spill] sm:$0xff] }
 0x3d8   :  { %1869 = vmatpush.msrb.mxu3 %v6426_v25  ;;  %1810 = vmatpush.msrb.mxu0 %v6432_v22  ;;  %v10345_v25 = vld [vmem:[#allocation23_spill] sm:$0xff]  ;;  %v10346_v22 = vld [vmem:[#allocation24_spill] sm:$0xff] }
 0x3d9   :  { %1830 = vmatpush.msrb.mxu1 %v6438_v31  ;;  %1850 = vmatpush.msrb.mxu2 %v6444_v12  ;;  %v10347_v31 = vld [vmem:[#allocation29_spill] sm:$0xff]  ;;  %v10348_v12 = vld [vmem:[#allocation30_spill] sm:$0xff] }
 0x3da   :  { %1870 = vmatpush.msrb.mxu3 %v6450_v21  ;;  %1811 = vmatpush.msrb.mxu0 %v6456_v18  ;;  %v10349_v21 = vld [vmem:[#allocation27_spill] sm:$0xff]  ;;  %v10350_v18 = vld [vmem:[#allocation28_spill] sm:$0xff] }
 0x3db   :  { %1831 = vmatpush.msrb.mxu1 %v6462_v62  ;;  %1851 = vmatpush.msrb.mxu2 %v6468_v19  ;;  %v10351_v62 = vld [vmem:[#allocation33_spill] sm:$0xff]  ;;  %v10352_v19 = vld [vmem:[#allocation34_spill] sm:$0xff] }
 0x3dc   :  { %1871 = vmatpush.msrb.mxu3 %v6474_v17  ;;  %1812 = vmatpush.msrb.mxu0 %v6480_v23  ;;  %v10353_v17 = vld [vmem:[#allocation31_spill] sm:$0xff]  ;;  %v10354_v23 = vld [vmem:[#allocation32_spill] sm:$0xff] }
 0x3dd   :  { %1832 = vmatpush.msrb.mxu1 %v6486_v20  ;;  %1852 = vmatpush.msrb.mxu2 %v6492_v14  ;;  %v10355_v20 = vld [vmem:[#allocation39_spill] sm:$0xff]  ;;  %v10356_v14 = vld [vmem:[#allocation40_spill] sm:$0xff] }
 0x3de   :  { %1872 = vmatpush.msrb.mxu3 %v6498_v15  ;;  %1813 = vmatpush.msrb.mxu0 %v6504_v8  ;;  %v10357_v15 = vld [vmem:[#allocation35_spill] sm:$0xff]  ;;  %v10358_v8 = vld [vmem:[#allocation36_spill] sm:$0xff] }
 0x3df   :  { %1833 = vmatpush.msrb.mxu1 %v6510_v9  ;;  %1853 = vmatpush.msrb.mxu2 %v10322_v47  ;;  %v10359_v9 = vld [vmem:[#allocation43_spill] sm:$0xff]  ;;  %v10362_v47 = vld [vmem:[#allocation38_spill] sm:$0xff] }
 0x3e0   :  { %1873 = vmatpush.msrb.mxu3 %v10323_v16  ;;  %1814 = vmatpush.msrb.mxu0 %v10324_v32  ;;  %v10363_v16 = vld [vmem:[#allocation47_spill] sm:$0xff]  ;;  %v10364_v32 = vld [vmem:[#allocation48_spill] sm:$0xff] }
 0x3e1   :  { %1834 = vmatpush.msrb.mxu1 %v10325_v26  ;;  %1854 = vmatpush.msrb.mxu2 %v10326_v13  ;;  %v10365_v26 = vld [vmem:[#allocation41_spill] sm:$0xff]  ;;  %v10366_v13 = vld [vmem:[#allocation42_spill] sm:$0xff] }
 0x3e2   :  { %1874 = vmatpush.msrb.mxu3 %v10327_v48  ;;  %1815 = vmatpush.msrb.mxu0 %v10328_v49  ;;  %v10367_v48 = vld [vmem:[#allocation51_spill] sm:$0xff]  ;;  %v10368_v49 = vld [vmem:[#allocation52_spill] sm:$0xff] }
 0x3e3   :  { %1835 = vmatpush.msrb.mxu1 %v10329_v50  ;;  %1855 = vmatpush.msrb.mxu2 %v10330_v52  ;;  %v10369_v50 = vld [vmem:[#allocation45_spill] sm:$0xff]  ;;  %v10370_v52 = vld [vmem:[#allocation46_spill] sm:$0xff] }
 0x3e4   :  { %1875 = vmatpush.msrb.mxu3 %v10331_v54  ;;  %1816 = vmatpush.msrb.mxu0 %v10332_v55  ;;  %v10371_v54 = vld [vmem:[#allocation55_spill] sm:$0xff]  ;;  %v10372_v55 = vld [vmem:[#allocation56_spill] sm:$0xff] }
 0x3e5   :  { %1836 = vmatpush.msrb.mxu1 %v10333_v58  ;;  %1856 = vmatpush.msrb.mxu2 %v10334_v0  ;;  %v10373_v58 = vld [vmem:[#allocation49_spill] sm:$0xff]  ;;  %v10374_v0 = vld [vmem:[#allocation50_spill] sm:$0xff] }
 0x3e6   :  { %1876 = vmatpush.msrb.mxu3 %v10335_v1  ;;  %1817 = vmatpush.msrb.mxu0 %v10336_v2  ;;  %v10375_v1 = vld [vmem:[#allocation59_spill] sm:$0xff]  ;;  %v10376_v2 = vld [vmem:[#allocation60_spill] sm:$0xff] }
 0x3e7   :  { %1837 = vmatpush.msrb.mxu1 %v10337_v4  ;;  %1857 = vmatpush.msrb.mxu2 %v10338_v6  ;;  %v10377_v4 = vld [vmem:[#allocation53_spill] sm:$0xff]  ;;  %v10378_v6 = vld [vmem:[#allocation54_spill] sm:$0xff] }
 0x3e8   :  { %1877 = vmatpush.msrb.mxu3 %v10339_v7  ;;  %1818 = vmatpush.msrb.mxu0 %v10340_v27  ;;  %v10379_v7 = vld [vmem:[#allocation63_spill] sm:$0xff]  ;;  %v10380_v27 = vld [vmem:[#allocation64_spill] sm:$0xff] }
 0x3e9   :  { %1838 = vmatpush.msrb.mxu1 %v10341_v28  ;;  %1858 = vmatpush.msrb.mxu2 %v10342_v53  ;;  %v10381_v28 = vld [vmem:[#allocation57_spill] sm:$0xff]  ;;  %v10382_v53 = vld [vmem:[#allocation58_spill] sm:$0xff] }
 0x3ea   :  { %1878 = vmatpush.msrb.mxu3 %v10343_v24  ;;  %1819 = vmatpush.msrb.mxu0 %v10344_v60  ;;  %v10383_v24 = vld [vmem:[#allocation69_spill] sm:$0xff]  ;;  %v10384_v60 = vld [vmem:[#allocation70_spill] sm:$0xff] }
 0x3eb   :  { %1839 = vmatpush.msrb.mxu1 %v10345_v25  ;;  %1859 = vmatpush.msrb.mxu2 %v10346_v22  ;;  %v10385_v25 = vld [vmem:[#allocation61_spill] sm:$0xff]  ;;  %v10386_v22 = vld [vmem:[#allocation62_spill] sm:$0xff] }
 0x3ec   :  { %1879 = vmatpush.msrb.mxu3 %v10347_v31  ;;  %1884 = vmatpush.msra.mxu0 %v10348_v12  ;;  %v10387_v31 = vld [vmem:[#allocation73_spill] sm:$0xff]  ;;  %v10388_v12 = vld [vmem:[#allocation74_spill] sm:$0xff] }
 0x3ed   :  { %1904 = vmatpush.msra.mxu1 %v10349_v21  ;;  %1924 = vmatpush.msra.mxu2 %v10350_v18  ;;  %v10389_v21 = vld [vmem:[#allocation65_spill] sm:$0xff]  ;;  %v10390_v18 = vld [vmem:[#allocation66_spill] sm:$0xff] }
 0x3ee   :  { %1944 = vmatpush.msra.mxu3 %v10351_v62  ;;  %1885 = vmatpush.msra.mxu0 %v10352_v19  ;;  %v10391_v62 = vld [vmem:[#allocation77_spill] sm:$0xff]  ;;  %v10392_v19 = vld [vmem:[#allocation78_spill] sm:$0xff] }
 0x3ef   :  { %1905 = vmatpush.msra.mxu1 %v10353_v17  ;;  %1925 = vmatpush.msra.mxu2 %v10354_v23  ;;  %v10393_v17 = vld [vmem:[#allocation81_spill] sm:$0xff]  ;;  %v10394_v23 = vld [vmem:[#allocation82_spill] sm:$0xff] }
 0x3f0   :  { %1945 = vmatpush.msra.mxu3 %v10355_v20  ;;  %1886 = vmatpush.msra.mxu0 %v10356_v14  ;;  %v10395_v20 = vld [vmem:[#allocation83_spill] sm:$0xff]  ;;  %v10396_v14 = vld [vmem:[#allocation84_spill] sm:$0xff] }
 0x3f1   :  { %1906 = vmatpush.msra.mxu1 %v10357_v15  ;;  %1926 = vmatpush.msra.mxu2 %v10358_v8  ;;  %v10397_v15 = vld [vmem:[#allocation67_spill] sm:$0xff]  ;;  %v10398_v8 = vld [vmem:[#allocation68_spill] sm:$0xff] }
 0x3f2   :  { %1946 = vmatpush.msra.mxu3 %v10359_v9  ;;  %1887 = vmatpush.msra.mxu0 %v10360_v10  ;;  %v10399_v9 = vld [vmem:[#allocation87_spill] sm:$0xff]  ;;  %v10400_v10 = vld [vmem:[#allocation88_spill] sm:$0xff] }
 0x3f3   :  { %1907 = vmatpush.msra.mxu1 %v10361_v11  ;;  %1927 = vmatpush.msra.mxu2 %v10362_v47  ;;  %v10401_v11 = vld [vmem:[#allocation71_spill] sm:$0xff]  ;;  %v10402_v47 = vld [vmem:[#allocation72_spill] sm:$0xff] }
 0x3f4   :  { %1947 = vmatpush.msra.mxu3 %v10363_v16  ;;  %1888 = vmatpush.msra.mxu0 %v10364_v32  ;;  %v10403_v16 = vld [vmem:[#allocation91_spill] sm:$0xff]  ;;  %v10404_v32 = vld [vmem:[#allocation92_spill] sm:$0xff] }
 0x3f5   :  { %1908 = vmatpush.msra.mxu1 %v10365_v26  ;;  %1928 = vmatpush.msra.mxu2 %v10366_v13  ;;  %v10405_v26 = vld [vmem:[#allocation75_spill] sm:$0xff]  ;;  %v10406_v13 = vld [vmem:[#allocation76_spill] sm:$0xff] }
 0x3f6   :  { %1948 = vmatpush.msra.mxu3 %v10367_v48  ;;  %1889 = vmatpush.msra.mxu0 %v10368_v49  ;;  %v10407_v48 = vld [vmem:[#allocation95_spill] sm:$0xff]  ;;  %v10408_v49 = vld [vmem:[#allocation96_spill] sm:$0xff] }
 0x3f7   :  { %1909 = vmatpush.msra.mxu1 %v10369_v50  ;;  %1929 = vmatpush.msra.mxu2 %v10370_v52  ;;  %v10409_v50 = vld [vmem:[#allocation79_spill] sm:$0xff]  ;;  %v10410_v52 = vld [vmem:[#allocation80_spill] sm:$0xff] }
 0x3f8   :  { %1949 = vmatpush.msra.mxu3 %v10371_v54  ;;  %1890 = vmatpush.msra.mxu0 %v10372_v55  ;;  %v10411_v54 = vld [vmem:[#allocation99_spill] sm:$0xff] }
 0x3f9   :  { %1910 = vmatpush.msra.mxu1 %v10373_v58  ;;  %1930 = vmatpush.msra.mxu2 %v10374_v0 }
 0x3fa   :  { %1950 = vmatpush.msra.mxu3 %v10375_v1  ;;  %1891 = vmatpush.msra.mxu0 %v10376_v2 }
 0x3fb   :  { %1911 = vmatpush.msra.mxu1 %v10377_v4  ;;  %1931 = vmatpush.msra.mxu2 %v10378_v6  ;;  %v2770_v6 = vld [vmem:[%s9129_s0 + $0x30] sm:$0xff] }
 0x3fc   :  { %1951 = vmatpush.msra.mxu3 %v10379_v7  ;;  %1892 = vmatpush.msra.mxu0 %v10380_v27 }
 0x3fd   :  { %1912 = vmatpush.msra.mxu1 %v10381_v28  ;;  %1932 = vmatpush.msra.mxu2 %v10382_v53 }
 0x3fe   :  { %1952 = vmatpush.msra.mxu3 %v10383_v24  ;;  %1893 = vmatpush.msra.mxu0 %v10384_v60 }
 0x3ff   :  { %1913 = vmatpush.msra.mxu1 %v10385_v25  ;;  %1933 = vmatpush.msra.mxu2 %v10386_v22 }
 0x400   :  { %1953 = vmatpush.msra.mxu3 %v10387_v31  ;;  %1894 = vmatpush.msra.mxu0 %v10388_v12  ;;  %v1752_v12 = vrot.slane %v2770_v6, 4 }
 0x401   :  { %1914 = vmatpush.msra.mxu1 %v10389_v21  ;;  %1934 = vmatpush.msra.mxu2 %v10390_v18 }
 0x402   :  { %1954 = vmatpush.msra.mxu3 %v10391_v62  ;;  %1895 = vmatpush.msra.mxu0 %v10392_v19 }
 0x403   :  { %1915 = vmatpush.msra.mxu1 %v10393_v17  ;;  %1935 = vmatpush.msra.mxu2 %v10394_v23 }
 0x404   :  { %1955 = vmatpush.msra.mxu3 %v10395_v20  ;;  %1896 = vmatpush.msra.mxu0 %v10396_v14 }
 0x405   :  { %1916 = vmatpush.msra.mxu1 %v10397_v15  ;;  %1936 = vmatpush.msra.mxu2 %v10398_v8 }
 0x406   :  { %1956 = vmatpush.msra.mxu3 %v10399_v9  ;;  %1897 = vmatpush.msra.mxu0 %v10400_v10 }
 0x407   :  { %1917 = vmatpush.msra.mxu1 %v10401_v11  ;;  %1937 = vmatpush.msra.mxu2 %v10402_v47 }
 0x408   :  { %1957 = vmatpush.msra.mxu3 %v10403_v16  ;;  %1898 = vmatpush.msra.mxu0 %v10404_v32 }
 0x409   :  { %1918 = vmatpush.msra.mxu1 %v10405_v26  ;;  %1938 = vmatpush.msra.mxu2 %v10406_v13 }
 0x40a   :  { %1958 = vmatpush.msra.mxu3 %v10407_v48  ;;  %1899 = vmatpush.msra.mxu0 %v10408_v49 }
 0x40b   :  { %1919 = vmatpush.msra.mxu1 %v10409_v50  ;;  %1939 = vmatpush.msra.mxu2 %v10410_v52 }
 0x40c   :  { %1959 = vmatpush.msra.mxu3 %v10411_v54 }
 0x414   :  { %v1503_v55 = vpop.f32.mrf.mxu0  ;;  %v1523_v58 = vpop.f32.mrf.mxu1 }
 0x415   :  { %v1524_v4 = vadd.f32 %v1523_v58, %v1503_v55 }
 0x41b   :  { %v1543_v0 = vpop.f32.mrf.mxu2  ;;  %v1563_v1 = vpop.f32.mrf.mxu3 }
 0x41c   :  { %v1564_v2 = vadd.f32 %v1563_v1, %v1543_v0 }
 0x41e   :  { %v1728_v7 = vrot.slane %v1564_v2, 6  ;;  %v1583_v24 = vpop.f32.mrf.mxu0  ;;  %v1603_v60 = vpop.f32.mrf.mxu1 }
 0x41f   :  { %v1604_v21 = vadd.f32 %v1603_v60, %v1583_v24 }
 0x420   :  { %v1729_v27 = vsel %vm452_vm0, %v1524_v4, %v1728_v7 }
 0x421   :  { %v1731_v28 = vadd.f32 %v2770_v6, %v1729_v27 }
 0x423   :  { %v2772_v53 = vmul.f32 -1.442695, %v1731_v28  ;;  %v2771_v28 = vld [vmem:[%s9129_s0 + $0x38] sm:$0xf] }
 0x425   :  { %2831 = vpow2.f32 %v2772_v53  ;;  %v1623_v25 = vpop.f32.mrf.mxu2  ;;  %v1643_v22 = vpop.f32.mrf.mxu3 }
 0x426   :  { %v1644_v31 = vadd.f32 %v1643_v22, %v1623_v25 }
 0x428   :  { %v1756_v18 = vrot.slane %v1644_v31, 6 }
 0x42a   :  { %v1757_v62 = vsel %vm452_vm0, %v1604_v21, %v1756_v18 }
 0x42b   :  { %v2832_v19 = vpop.eup %2831  ;;  %v1759_v17 = vadd.f32 %v1757_v62, %v1752_v12 }
 0x42c   :  { %v1735_v23 = vadd.f32 1.0, %v2832_v19 }
 0x42d   :  { %v2773_v20 = vmul.f32 -1.442695, %v1759_v17 }
 0x42e   :  { %2833 = vrcp.f32 %v1735_v23  ;;  %v1747_v54 = vand.u32 2147483648, %v1735_v23  ;;  %vm1741_vm4 = vweird.f32 %v1735_v23  ;;  %v1745_v58 = vand.u32 2147483647, %v1735_v23 }
 0x42f   :  { %2835 = vpow2.f32 %v2773_v20 }
 0x430   :  { %v1748_v6 = vor.u32 1.1754944e-38, %v1747_v54  ;;  %vm1746_vm6 = vcmp.eq.f32.partialorder %v1745_v58, 8.507059e+37  ;;  %v10443_v54 = vld [vmem:[#allocation117_spill] sm:$0xff] }
 0x431   :  { %v10445_v58 = vld [vmem:[#allocation121_spill] sm:$0xff] }
 0x434   :  { %v2834_v14 = vpop.eup %2833 }
 0x435   :  { %v2836_v15 = vpop.eup %2835  ;;  %v1737_v8 = vmul.f32 %v2834_v14, %v1735_v23  ;;  %vm1742_vm3 = vweird.f32 %v2834_v14 }
 0x436   :  { %v1763_v9 = vadd.f32 1.0, %v2836_v15  ;;  %vm1743_vm5 = vmor %vm1741_vm4, %vm1742_vm3 }
 0x437   :  { %v1738_v10 = vsub.f32 1.0, %v1737_v8  ;;  %v10430_v8 = vld [vmem:[#allocation102_spill] sm:$0xff] }
 0x438   :  { %2837 = vrcp.f32 %v1763_v9  ;;  %v1775_v60 = vand.u32 2147483648, %v1763_v9  ;;  %vm1769_vm8 = vweird.f32 %v1763_v9  ;;  %v1773_v22 = vand.u32 2147483647, %v1763_v9 }
 0x439   :  { %v1739_v11 = vmul.f32 %v2834_v14, %v1738_v10  ;;  %v10432_v10 = vld [vmem:[#allocation120_spill] sm:$0xff] }
 0x43a   :  { %v1776_v21 = vor.u32 1.1754944e-38, %v1775_v60  ;;  %vm1774_vm10 = vcmp.eq.f32.partialorder %v1773_v22, 8.507059e+37  ;;  %v7732_v60 = vld [vmem:[%s9128_s1 + $0x5a0] sm:$0xff]  ;;  %v7744_v22 = vld [vmem:[%s9128_s1 + $0x5a8] sm:$0xff] }
 0x43b   :  { %v1740_v49 = vadd.f32 %v2834_v14, %v1739_v11  ;;  %v10433_v11 = vld [vmem:[#allocation105_spill] sm:$0xff] }
 0x43d   :  { %v1744_v2 = vsel %vm1743_vm5, %v2834_v14, %v1740_v49  ;;  %v10440_v49 = vld [vmem:[#allocation114_spill] sm:$0xff] }
 0x43e   :  { %v2838_v32 = vpop.eup %2837  ;;  %v1749_v53 = vsel %vm1746_vm6, %v1748_v6, %v1744_v2  ;;  %v10448_v2 = vld [vmem:[#allocation126_spill] sm:$0xff]  ;;  %v10450_v6 = vld [vmem:[#allocation128_spill] sm:$0xff] }
 0x43f   :  { %v1765_v26 = vmul.f32 %v2838_v32, %v1763_v9  ;;  %vm1770_vm7 = vweird.f32 %v2838_v32  ;;  %v10431_v9 = vld [vmem:[#allocation119_spill] sm:$0xff] }
 0x440   :  { %vm1771_vm9 = vmor %vm1769_vm8, %vm1770_vm7 }
 0x441   :  { %v1766_v55 = vsub.f32 1.0, %v1765_v26  ;;  %v10437_v26 = vld [vmem:[#allocation109_spill] sm:$0xff] }
 0x443   :  { %v1767_v1 = vmul.f32 %v2838_v32, %v1766_v55  ;;  %v10444_v55 = vld [vmem:[#allocation118_spill] sm:$0xff] }
 0x445   :  { %v1768_v27 = vadd.f32 %v2838_v32, %v1767_v1  ;;  %v10447_v1 = vld [vmem:[#allocation125_spill] sm:$0xff] }
 0x446   :  { %v1663_v47 = vpop.f32.mrf.mxu0 }
 0x447   :  { %v1683_v16 = vpop.f32.mrf.mxu1  ;;  %v1772_v12 = vsel %vm1771_vm9, %v2838_v32, %v1768_v27  ;;  %v10436_v32 = vld [vmem:[#allocation124_spill] sm:$0xff] }
 0x448   :  { %v1684_v50 = vadd.f32 %v1683_v16, %v1663_v47  ;;  %v1777_v18 = vsel %vm1774_vm10, %v1776_v21, %v1772_v12  ;;  %v10434_v47 = vld [vmem:[#allocation106_spill] sm:$0xff]  ;;  %v10435_v16 = vld [vmem:[#allocation123_spill] sm:$0xff]  ;;  %v10452_v27 = vld [vmem:[#allocation132_spill] sm:$0xff] }
 0x449   :  { %v1789_v62 = vsub.f32 1.0, %v1777_v18  ;;  %v1791_v23 = vmul.f32 %v1777_v18, %v7065_v41  ;;  %v10412_v41 = vld [vmem:[#allocation100_spill] sm:$0xff]  ;;  %v7756_v12 = vld [vmem:[%s9128_s1 + $0x570] sm:$0xff] }
 0x44a   :  { %v1779_v4 = vadd.f32 %v1684_v50, %v4774_v3  ;;  %v10441_v50 = vld [vmem:[#allocation129_spill] sm:$0xff]  ;;  %v7762_v21 = vld [vmem:[%s9128_s1 + $0x278] sm:$0xff] }
 0x44b   :  { %v7768_v18 = vld [vmem:[%s9128_s1 + $0x578] sm:$0xff] }
 0x44e   :  { %v1703_v13 = vpop.f32.mrf.mxu2 }
 0x44f   :  { %v1723_v48 = vpop.f32.mrf.mxu3 }
 0x450   :  { %v1724_v52 = vadd.f32 %v1723_v48, %v1703_v13  ;;  %v10438_v13 = vld [vmem:[#allocation110_spill] sm:$0xff]  ;;  %v10439_v48 = vld [vmem:[#allocation113_spill] sm:$0xff] }
 0x452   :  { %v1780_v0 = vadd.f32 %v1724_v52, %v4768_v51  ;;  %v10442_v52 = vld [vmem:[#allocation130_spill] sm:$0xff] }
 0x454   :  { %v1783_v7 = vrot.slane %v1780_v0, 6  ;;  %v10446_v0 = vld [vmem:[#allocation122_spill] sm:$0xff] }
 0x456   :  { %v1784_v24 = vsel %vm452_vm0, %v1779_v4, %v1783_v7  ;;  %v10449_v4 = vld [vmem:[#allocation127_spill] sm:$0xff] }
 0x457   :  { %v1786_v25 = vmul.f32 %v1784_v24, %v1749_v53  ;;  %v10451_v7 = vld [vmem:[#allocation131_spill] sm:$0xff]  ;;  %v10454_v53 = vld [vmem:[#allocation134_spill] sm:$0xff] }
 0x458   :  { %v7702_v24 = vld [vmem:[%s9128_s1 + $0x2d0] sm:$0xff] }
 0x459   :  { %v1787_v31 = vadd.f32 %v2771_v28, %v1786_v25  ;;  %v10453_v28 = vld [vmem:[#allocation133_spill] sm:$0xff]  ;;  %v7738_v25 = vld [vmem:[%s9128_s1 + $0x2a8] sm:$0xff] }
 0x45b   :  { %2839 = vtanh.f32 %v1787_v31  ;;  %v7750_v31 = vld [vmem:[%s9128_s1 + $0x270] sm:$0xff] }
 0x461   :  { %v2840_v19 = vpop.eup %2839 }
 0x462   :  { %v1790_v17 = vmul.f32 %v2840_v19, %v1789_v62  ;;  %v7774_v62 = vld [vmem:[%s9128_s1 + $0x240] sm:$0xff] }
 0x463   :  { %v7780_v19 = vld [vmem:[%s9128_s1 + $0x540] sm:$0xff] }
 0x464   :  { %v7612_v20 = vadd.f32 %v1791_v23, %v1790_v17  ;;  %v7786_v17 = vld [vmem:[%s9128_s1 + $0x248] sm:$0xff] }
 0x465   :  { %v7792_v23 = vld [vmem:[%s9128_s1 + $0x548] sm:$0xff] }
 0x466   :  { %2774 = vst [vmem:[%s9131_s3 + $0x10] sm:$0xf] %v7612_v20 }
 0x467   :  { %1799 = vst [vmem:[#allocation1] ss:$4 sm:$0xff] %v7612_v20 }
 0x46e   :  { %v7619_v14 = vld.sshfl [vmem:[#allocation1] sm:$0xff pattern:$0x73625140]  ;;  %v7621_v15 = vld.sshfl [vmem:[#allocation1 + $0x8] sm:$0xff pattern:$0x73625140] }
 0x46f   :  { %1820 = vmatmul.f32.vlgmr.msrb.gmra.mxu0 %v7619_v14  ;;  %1840 = vmatmul.f32.vlgmr.msrb.gmra.mxu1 %v7621_v15 }
 0x470   :  { %1860 = vmatmul.f32.vlgmr.msrb.gmra.mxu2 %v7619_v14  ;;  %1880 = vmatmul.f32.vlgmr.msrb.gmra.mxu3 %v7621_v15 }
 0x471   :  { %1964 = vmatpush.msrb.mxu0 %v7083_v5  ;;  %1984 = vmatpush.msrb.mxu1 %v7089_v43  ;;  %v10413_v5 = vld [vmem:[#allocation85_spill] sm:$0xff]  ;;  %v10414_v43 = vld [vmem:[#allocation86_spill] sm:$0xff] }
 0x472   :  { %2004 = vmatpush.msrb.mxu2 %v7095_v38  ;;  %2024 = vmatpush.msrb.mxu3 %v7101_v42  ;;  %v10415_v38 = vld [vmem:[#allocation103_spill] sm:$0xff]  ;;  %v10416_v42 = vld [vmem:[#allocation104_spill] sm:$0xff] }
 0x473   :  { %1965 = vmatpush.msrb.mxu0 %v7107_v39  ;;  %1985 = vmatpush.msrb.mxu1 %v7113_v36  ;;  %v10417_v39 = vld [vmem:[#allocation89_spill] sm:$0xff]  ;;  %v10418_v36 = vld [vmem:[#allocation90_spill] sm:$0xff] }
 0x474   :  { %2005 = vmatpush.msrb.mxu2 %v7119_v44  ;;  %2025 = vmatpush.msrb.mxu3 %v7125_v56  ;;  %v10419_v44 = vld [vmem:[#allocation107_spill] sm:$0xff]  ;;  %v10420_v56 = vld [vmem:[#allocation108_spill] sm:$0xff] }
 0x475   :  { %1966 = vmatpush.msrb.mxu0 %v7131_v35  ;;  %1986 = vmatpush.msrb.mxu1 %v7137_v30  ;;  %v10421_v35 = vld [vmem:[#allocation93_spill] sm:$0xff]  ;;  %v10422_v30 = vld [vmem:[#allocation94_spill] sm:$0xff] }
 0x476   :  { %2006 = vmatpush.msrb.mxu2 %v7143_v46  ;;  %2026 = vmatpush.msrb.mxu3 %v7149_v33  ;;  %v10423_v46 = vld [vmem:[#allocation111_spill] sm:$0xff]  ;;  %v10424_v33 = vld [vmem:[#allocation112_spill] sm:$0xff] }
 0x477   :  { %1967 = vmatpush.msrb.mxu0 %v7155_v29  ;;  %1987 = vmatpush.msrb.mxu1 %v7161_v37  ;;  %v10425_v29 = vld [vmem:[#allocation97_spill] sm:$0xff]  ;;  %v10426_v37 = vld [vmem:[#allocation98_spill] sm:$0xff] }
 0x478   :  { %2007 = vmatpush.msrb.mxu2 %v7167_v34  ;;  %2027 = vmatpush.msrb.mxu3 %v7173_v59  ;;  %v10427_v34 = vld [vmem:[#allocation115_spill] sm:$0xff]  ;;  %v10428_v59 = vld [vmem:[#allocation116_spill] sm:$0xff] }
 0x479   :  { %1900 = vmatmul.f32.vlgmr.msra.gmra.mxu0 %v7619_v14  ;;  %1920 = vmatmul.f32.vlgmr.msra.gmra.mxu1 %v7621_v15 }
 0x47a   :  { %1940 = vmatmul.f32.vlgmr.msra.gmra.mxu2 %v7619_v14  ;;  %1960 = vmatmul.f32.vlgmr.msra.gmra.mxu3 %v7621_v15 }
 0x47b   :  { %1968 = vmatpush.msrb.mxu0 %v7183_v61  ;;  %1988 = vmatpush.msrb.mxu1 %v10412_v41  ;;  %v10429_v61 = vld [vmem:[#allocation101_spill] sm:$0xff]  ;;  %v7810_v41 = vld [vmem:[%s9128_s1 + $0x218] sm:$0xff] }
 0x47c   :  { %2008 = vmatpush.msrb.mxu2 %v10413_v5  ;;  %2028 = vmatpush.msrb.mxu3 %v10414_v43  ;;  %v7816_v5 = vld [vmem:[%s9128_s1 + $0x518] sm:$0xff]  ;;  %v7822_v43 = vld [vmem:[%s9128_s1 + $0x1e0] sm:$0xff] }
 0x47d   :  { %1969 = vmatpush.msrb.mxu0 %v10415_v38  ;;  %1989 = vmatpush.msrb.mxu1 %v10416_v42  ;;  %v7828_v38 = vld [vmem:[%s9128_s1 + $0x4e0] sm:$0xff]  ;;  %v7834_v42 = vld [vmem:[%s9128_s1 + $0x1e8] sm:$0xff] }
 0x47e   :  { %2009 = vmatpush.msrb.mxu2 %v10417_v39  ;;  %2029 = vmatpush.msrb.mxu3 %v10418_v36  ;;  %v7840_v39 = vld [vmem:[%s9128_s1 + $0x4e8] sm:$0xff]  ;;  %v7846_v36 = vld [vmem:[%s9128_s1 + $0x1b0] sm:$0xff] }
 0x47f   :  { %1970 = vmatpush.msrb.mxu0 %v10419_v44  ;;  %1990 = vmatpush.msrb.mxu1 %v10420_v56  ;;  %v7852_v44 = vld [vmem:[%s9128_s1 + $0x4b0] sm:$0xff]  ;;  %v7858_v56 = vld [vmem:[%s9128_s1 + $0x1b8] sm:$0xff] }
 0x480   :  { %2010 = vmatpush.msrb.mxu2 %v10421_v35  ;;  %2030 = vmatpush.msrb.mxu3 %v10422_v30  ;;  %v7864_v35 = vld [vmem:[%s9128_s1 + $0x4b8] sm:$0xff]  ;;  %v7870_v30 = vld [vmem:[%s9128_s1 + $0x180] sm:$0xff] }
 0x481   :  { %1971 = vmatpush.msrb.mxu0 %v10423_v46  ;;  %1991 = vmatpush.msrb.mxu1 %v10424_v33  ;;  %v7876_v46 = vld [vmem:[%s9128_s1 + $0x480] sm:$0xff]  ;;  %v7882_v33 = vld [vmem:[%s9128_s1 + $0x188] sm:$0xff] }
 0x482   :  { %2011 = vmatpush.msrb.mxu2 %v10425_v29  ;;  %2031 = vmatpush.msrb.mxu3 %v10426_v37  ;;  %v7888_v29 = vld [vmem:[%s9128_s1 + $0x488] sm:$0xff]  ;;  %v7894_v37 = vld [vmem:[%s9128_s1 + $0x150] sm:$0xff] }
 0x483   :  { %1972 = vmatpush.msrb.mxu0 %v10427_v34  ;;  %1992 = vmatpush.msrb.mxu1 %v10428_v59  ;;  %v7900_v34 = vld [vmem:[%s9128_s1 + $0x450] sm:$0xff]  ;;  %v7906_v59 = vld [vmem:[%s9128_s1 + $0x158] sm:$0xff] }
 0x484   :  { %2012 = vmatpush.msrb.mxu2 %v10429_v61  ;;  %2032 = vmatpush.msrb.mxu3 %v10430_v8  ;;  %v7912_v61 = vld [vmem:[%s9128_s1 + $0x458] sm:$0xff]  ;;  %v7918_v8 = vld [vmem:[%s9128_s1 + $0x120] sm:$0xff] }
 0x485   :  { %1973 = vmatpush.msrb.mxu0 %v10431_v9  ;;  %1993 = vmatpush.msrb.mxu1 %v10432_v10  ;;  %v7924_v9 = vld [vmem:[%s9128_s1 + $0x420] sm:$0xff]  ;;  %v7930_v10 = vld [vmem:[%s9128_s1 + $0x128] sm:$0xff] }
 0x486   :  { %2013 = vmatpush.msrb.mxu2 %v10433_v11  ;;  %2033 = vmatpush.msrb.mxu3 %v10434_v47  ;;  %10455 = vst [vmem:[#allocation2_spill] sm:$0xff] %v7930_v10  ;;  %v7936_v11 = vld [vmem:[%s9128_s1 + $0x428] sm:$0xff]  ;;  %v7942_v47 = vld [vmem:[%s9128_s1 + $0xf0] sm:$0xff] }
 0x487   :  { %1974 = vmatpush.msrb.mxu0 %v10435_v16  ;;  %1994 = vmatpush.msrb.mxu1 %v10436_v32  ;;  %10456 = vst [vmem:[#allocation3_spill] sm:$0xff] %v7936_v11  ;;  %v7948_v16 = vld [vmem:[%s9128_s1 + $0x3f0] sm:$0xff]  ;;  %v7954_v32 = vld [vmem:[%s9128_s1 + $0xf8] sm:$0xff] }
 0x488   :  { %2014 = vmatpush.msrb.mxu2 %v10437_v26  ;;  %2034 = vmatpush.msrb.mxu3 %v10438_v13  ;;  %10457 = vst [vmem:[#allocation6_spill] sm:$0xff] %v7942_v47  ;;  %v7960_v26 = vld [vmem:[%s9128_s1 + $0x3f8] sm:$0xff]  ;;  %v7966_v13 = vld [vmem:[%s9128_s1 + $0xc0] sm:$0xff] }
 0x489   :  { %1975 = vmatpush.msrb.mxu0 %v10439_v48  ;;  %1995 = vmatpush.msrb.mxu1 %v10440_v49  ;;  %10458 = vst [vmem:[#allocation7_spill] sm:$0xff] %v7948_v16  ;;  %v7972_v48 = vld [vmem:[%s9128_s1 + $0x3c0] sm:$0xff]  ;;  %v7978_v49 = vld [vmem:[%s9128_s1 + $0xc8] sm:$0xff] }
 0x48a   :  { %2015 = vmatpush.msrb.mxu2 %v10441_v50  ;;  %2035 = vmatpush.msrb.mxu3 %v10442_v52  ;;  %10459 = vst [vmem:[#allocation4_spill] sm:$0xff] %v7954_v32  ;;  %v7984_v50 = vld [vmem:[%s9128_s1 + $0x3c8] sm:$0xff]  ;;  %v7990_v52 = vld [vmem:[%s9128_s1 + $0x90] sm:$0xff] }
 0x48b   :  { %1976 = vmatpush.msrb.mxu0 %v10443_v54  ;;  %1996 = vmatpush.msrb.mxu1 %v10444_v55  ;;  %10460 = vst [vmem:[#allocation5_spill] sm:$0xff] %v7960_v26  ;;  %v7996_v54 = vld [vmem:[%s9128_s1 + $0x390] sm:$0xff]  ;;  %v8002_v55 = vld [vmem:[%s9128_s1 + $0x98] sm:$0xff] }
 0x48c   :  { %2016 = vmatpush.msrb.mxu2 %v10445_v58  ;;  %2036 = vmatpush.msrb.mxu3 %v10446_v0  ;;  %10461 = vst [vmem:[#allocation8_spill] sm:$0xff] %v7966_v13  ;;  %v8008_v58 = vld [vmem:[%s9128_s1 + $0x398] sm:$0xff]  ;;  %v8014_v0 = vld [vmem:[%s9128_s1 + $0x60] sm:$0xff] }
 0x48d   :  { %1977 = vmatpush.msrb.mxu0 %v10447_v1  ;;  %1997 = vmatpush.msrb.mxu1 %v10448_v2  ;;  %10462 = vst [vmem:[#allocation9_spill] sm:$0xff] %v7972_v48  ;;  %v8020_v1 = vld [vmem:[%s9128_s1 + $0x360] sm:$0xff]  ;;  %v8026_v2 = vld [vmem:[%s9128_s1 + $0x68] sm:$0xff] }
 0x48e   :  { %2017 = vmatpush.msrb.mxu2 %v10449_v4  ;;  %2037 = vmatpush.msrb.mxu3 %v10450_v6  ;;  %10463 = vst [vmem:[#allocation10_spill] sm:$0xff] %v7978_v49  ;;  %v8032_v4 = vld [vmem:[%s9128_s1 + $0x368] sm:$0xff]  ;;  %v8038_v6 = vld [vmem:[%s9128_s1 + $0x30] sm:$0xff] }
 0x48f   :  { %1978 = vmatpush.msrb.mxu0 %v10451_v7  ;;  %1998 = vmatpush.msrb.mxu1 %v10452_v27  ;;  %10464 = vst [vmem:[#allocation11_spill] sm:$0xff] %v7984_v50  ;;  %v8044_v7 = vld [vmem:[%s9128_s1 + $0x330] sm:$0xff]  ;;  %v8050_v27 = vld [vmem:[%s9128_s1 + $0x38] sm:$0xff] }
 0x490   :  { %2018 = vmatpush.msrb.mxu2 %v10453_v28  ;;  %2038 = vmatpush.msrb.mxu3 %v10454_v53  ;;  %10465 = vst [vmem:[#allocation12_spill] sm:$0xff] %v7990_v52  ;;  %v8056_v28 = vld [vmem:[%s9128_s1 + $0x338] sm:$0xff]  ;;  %v8062_v53 = vld [vmem:[%s9128_s1] sm:$0xff] }
 0x491   :  { %1979 = vmatpush.msrb.mxu0 %v7447_v57  ;;  %1999 = vmatpush.msrb.mxu1 %v7453_v63  ;;  %v7708_v63 = vld [vmem:[%s9128_s1 + $0x5d0] sm:$0xff]  ;;  %v7726_v57 = vld [vmem:[%s9128_s1 + $0x2a0] sm:$0xff]  ;;  %10466 = vst [vmem:[#allocation13_spill] sm:$0xff] %v7996_v54 }
 0x492   :  { %2019 = vmatpush.msrb.mxu2 %v7459_v45  ;;  %2039 = vmatpush.msrb.mxu3 %v7465_v40  ;;  %v7714_v45 = vld [vmem:[%s9128_s1 + $0x2d8] sm:$0xff]  ;;  %10467 = vst [vmem:[#allocation14_spill] sm:$0xff] %v8002_v55 }
 0x493   :  { %1980 = vmatmul.f32.vlgmr.msrb.gmra.mxu0 %v7619_v14  ;;  %2000 = vmatmul.f32.vlgmr.msrb.gmra.mxu1 %v7621_v15  ;;  %v7720_v40 = vld [vmem:[%s9128_s1 + $0x5d8] sm:$0xff]  ;;  %10468 = vst [vmem:[#allocation17_spill] sm:$0xff] %v8008_v58 }
 0x494   :  { %2020 = vmatmul.f32.vlgmr.msrb.gmra.mxu2 %v7619_v14  ;;  %2040 = vmatmul.f32.vlgmr.msrb.gmra.mxu3 %v7621_v15  ;;  %v7798_v14 = vld [vmem:[%s9128_s1 + $0x210] sm:$0xff]  ;;  %10469 = vst [vmem:[#allocation18_spill] sm:$0xff] %v8014_v0 }
 0x495   :  { %2122 = vmatpush.msra.mxu0 %v7702_v24  ;;  %2142 = vmatpush.msra.mxu1 %v7708_v63  ;;  %v7804_v15 = vld [vmem:[%s9128_s1 + $0x510] sm:$0xff]  ;;  %10470 = vst [vmem:[#allocation15_spill] sm:$0xff] %v8020_v1 }
 0x496   :  { %2162 = vmatpush.msra.mxu2 %v7714_v45  ;;  %2182 = vmatpush.msra.mxu3 %v7720_v40  ;;  %10471 = vst [vmem:[#allocation16_spill] sm:$0xff] %v8026_v2 }
 0x497   :  { %2123 = vmatpush.msra.mxu0 %v7726_v57  ;;  %2143 = vmatpush.msra.mxu1 %v7732_v60  ;;  %10472 = vst [vmem:[#allocation21_spill] sm:$0xff] %v8032_v4 }
 0x498   :  { %2163 = vmatpush.msra.mxu2 %v7738_v25  ;;  %2183 = vmatpush.msra.mxu3 %v7744_v22  ;;  %10473 = vst [vmem:[#allocation22_spill] sm:$0xff] %v8038_v6 }
 0x499   :  { %2124 = vmatpush.msra.mxu0 %v7750_v31  ;;  %2144 = vmatpush.msra.mxu1 %v7756_v12  ;;  %10474 = vst [vmem:[#allocation19_spill] sm:$0xff] %v8044_v7 }
 0x49a   :  { %2164 = vmatpush.msra.mxu2 %v7762_v21  ;;  %2184 = vmatpush.msra.mxu3 %v7768_v18  ;;  %10475 = vst [vmem:[#allocation20_spill] sm:$0xff] %v8050_v27 }
 0x49b   :  { %2125 = vmatpush.msra.mxu0 %v7774_v62  ;;  %2145 = vmatpush.msra.mxu1 %v7780_v19  ;;  %10476 = vst [vmem:[#allocation25_spill] sm:$0xff] %v8056_v28 }
 0x49c   :  { %2165 = vmatpush.msra.mxu2 %v7786_v17  ;;  %2185 = vmatpush.msra.mxu3 %v7792_v23  ;;  %10477 = vst [vmem:[#allocation26_spill] sm:$0xff] %v8062_v53 }
 0x49d   :  { %2126 = vmatpush.msra.mxu0 %v7798_v14  ;;  %2146 = vmatpush.msra.mxu1 %v7804_v15 }
 0x49e   :  { %2166 = vmatpush.msra.mxu2 %v7810_v41  ;;  %2186 = vmatpush.msra.mxu3 %v7816_v5 }
 0x49f   :  { %2127 = vmatpush.msra.mxu0 %v7822_v43  ;;  %2147 = vmatpush.msra.mxu1 %v7828_v38 }
 0x4a0   :  { %2167 = vmatpush.msra.mxu2 %v7834_v42  ;;  %2187 = vmatpush.msra.mxu3 %v7840_v39 }
 0x4a1   :  { %2128 = vmatpush.msra.mxu0 %v7846_v36  ;;  %2148 = vmatpush.msra.mxu1 %v7852_v44 }
 0x4a2   :  { %2168 = vmatpush.msra.mxu2 %v7858_v56  ;;  %2188 = vmatpush.msra.mxu3 %v7864_v35 }
 0x4a3   :  { %2129 = vmatpush.msra.mxu0 %v7870_v30  ;;  %2149 = vmatpush.msra.mxu1 %v7876_v46 }
 0x4a4   :  { %2169 = vmatpush.msra.mxu2 %v7882_v33  ;;  %2189 = vmatpush.msra.mxu3 %v7888_v29 }
 0x4a5   :  { %2130 = vmatpush.msra.mxu0 %v7894_v37  ;;  %2150 = vmatpush.msra.mxu1 %v7900_v34 }
 0x4a6   :  { %2170 = vmatpush.msra.mxu2 %v7906_v59  ;;  %2190 = vmatpush.msra.mxu3 %v7912_v61 }
 0x4a7   :  { %2131 = vmatpush.msra.mxu0 %v7918_v8  ;;  %2151 = vmatpush.msra.mxu1 %v7924_v9 }
 0x4a8   :  { %2171 = vmatpush.msra.mxu2 %v7930_v10  ;;  %2191 = vmatpush.msra.mxu3 %v7936_v11 }
 0x4a9   :  { %2132 = vmatpush.msra.mxu0 %v7942_v47  ;;  %2152 = vmatpush.msra.mxu1 %v7948_v16 }
 0x4aa   :  { %2172 = vmatpush.msra.mxu2 %v7954_v32  ;;  %2192 = vmatpush.msra.mxu3 %v7960_v26 }
 0x4ab   :  { %2133 = vmatpush.msra.mxu0 %v7966_v13  ;;  %2153 = vmatpush.msra.mxu1 %v7972_v48 }
 0x4ac   :  { %2173 = vmatpush.msra.mxu2 %v7978_v49  ;;  %2193 = vmatpush.msra.mxu3 %v7984_v50 }
 0x4ad   :  { %2134 = vmatpush.msra.mxu0 %v7990_v52  ;;  %2154 = vmatpush.msra.mxu1 %v7996_v54 }
 0x4ae   :  { %2174 = vmatpush.msra.mxu2 %v8002_v55  ;;  %2194 = vmatpush.msra.mxu3 %v8008_v58 }
 0x4af   :  { %2135 = vmatpush.msra.mxu0 %v8014_v0  ;;  %2155 = vmatpush.msra.mxu1 %v8020_v1  ;;  %v2775_v0 = vld [vmem:[%s9129_s0 + $0x3c] sm:$0xff] }
 0x4b0   :  { %2175 = vmatpush.msra.mxu2 %v8026_v2  ;;  %2195 = vmatpush.msra.mxu3 %v8032_v4  ;;  %v2070_v13 = vrot.slane %v2775_v0, 4 }
 0x4b1   :  { %2136 = vmatpush.msra.mxu0 %v8038_v6  ;;  %2156 = vmatpush.msra.mxu1 %v8044_v7  ;;  %v8068_v7 = vld [vmem:[%s9128_s1 + $0x300] sm:$0xff] }
 0x4b2   :  { %2176 = vmatpush.msra.mxu2 %v8050_v27  ;;  %2196 = vmatpush.msra.mxu3 %v8056_v28  ;;  %10478 = vst [vmem:[#allocation23_spill] sm:$0xff] %v8068_v7  ;;  %v8074_v27 = vld [vmem:[%s9128_s1 + $0x8] sm:$0xff] }
 0x4b3   :  { %2137 = vmatpush.msra.mxu0 %v8062_v53  ;;  %2157 = vmatpush.msra.mxu1 %v8068_v7  ;;  %10479 = vst [vmem:[#allocation24_spill] sm:$0xff] %v8074_v27  ;;  %v8080_v28 = vld [vmem:[%s9128_s1 + $0x308] sm:$0xff]  ;;  %v8086_v53 = vld [vmem:[%s9128_s1 + $0x2e0] sm:$0xff] }
 0x4b4   :  { %2177 = vmatpush.msra.mxu2 %v8074_v27  ;;  %10480 = vst [vmem:[#allocation29_spill] sm:$0xff] %v8080_v28  ;;  %2197 = vmatpush.msra.mxu3 %v8080_v28  ;;  %v8092_v7 = vld [vmem:[%s9128_s1 + $0x5e0] sm:$0xff]  ;;  %v8098_v27 = vld [vmem:[%s9128_s1 + $0x2e8] sm:$0xff] }
 0x4b5   :  { %10481 = vst [vmem:[#allocation30_spill] sm:$0xff] %v8086_v53  ;;  %2202 = vmatpush.msrb.mxu0 %v8086_v53  ;;  %2222 = vmatpush.msrb.mxu1 %v8092_v7  ;;  %v8104_v28 = vld [vmem:[%s9128_s1 + $0x5e8] sm:$0xff]  ;;  %v8110_v53 = vld [vmem:[%s9128_s1 + $0x2b0] sm:$0xff] }
 0x4b6   :  { %10482 = vst [vmem:[#allocation27_spill] sm:$0xff] %v8092_v7  ;;  %2242 = vmatpush.msrb.mxu2 %v8098_v27  ;;  %2262 = vmatpush.msrb.mxu3 %v8104_v28  ;;  %v8116_v7 = vld [vmem:[%s9128_s1 + $0x5b0] sm:$0xff] }
 0x4b7   :  { %10483 = vst [vmem:[#allocation28_spill] sm:$0xff] %v8098_v27  ;;  %2203 = vmatpush.msrb.mxu0 %v8110_v53  ;;  %2223 = vmatpush.msrb.mxu1 %v8116_v7  ;;  %v8122_v27 = vld [vmem:[%s9128_s1 + $0x2b8] sm:$0xff] }
 0x4b8   :  { %10484 = vst [vmem:[#allocation33_spill] sm:$0xff] %v8104_v28  ;;  %2243 = vmatpush.msrb.mxu2 %v8122_v27  ;;  %v8128_v28 = vld [vmem:[%s9128_s1 + $0x5b8] sm:$0xff] }
 0x4b9   :  { %10485 = vst [vmem:[#allocation34_spill] sm:$0xff] %v8110_v53  ;;  %2263 = vmatpush.msrb.mxu3 %v8128_v28  ;;  %v8134_v53 = vld [vmem:[%s9128_s1 + $0x280] sm:$0xff] }
 0x4ba   :  { %10486 = vst [vmem:[#allocation31_spill] sm:$0xff] %v8116_v7  ;;  %2204 = vmatpush.msrb.mxu0 %v8134_v53  ;;  %v8140_v7 = vld [vmem:[%s9128_s1 + $0x580] sm:$0xff] }
 0x4bb   :  { %10487 = vst [vmem:[#allocation32_spill] sm:$0xff] %v8122_v27  ;;  %2224 = vmatpush.msrb.mxu1 %v8140_v7  ;;  %v8146_v27 = vld [vmem:[%s9128_s1 + $0x288] sm:$0xff] }
 0x4bc   :  { %10488 = vst [vmem:[#allocation39_spill] sm:$0xff] %v8128_v28  ;;  %2244 = vmatpush.msrb.mxu2 %v8146_v27  ;;  %v8152_v28 = vld [vmem:[%s9128_s1 + $0x588] sm:$0xff] }
 0x4bd   :  { %10489 = vst [vmem:[#allocation40_spill] sm:$0xff] %v8134_v53  ;;  %2264 = vmatpush.msrb.mxu3 %v8152_v28  ;;  %v8158_v53 = vld [vmem:[%s9128_s1 + $0x250] sm:$0xff] }
 0x4be   :  { %10490 = vst [vmem:[#allocation35_spill] sm:$0xff] %v8140_v7  ;;  %2205 = vmatpush.msrb.mxu0 %v8158_v53  ;;  %v8164_v7 = vld [vmem:[%s9128_s1 + $0x550] sm:$0xff] }
 0x4bf   :  { %10491 = vst [vmem:[#allocation36_spill] sm:$0xff] %v8146_v27  ;;  %2225 = vmatpush.msrb.mxu1 %v8164_v7  ;;  %v8170_v27 = vld [vmem:[%s9128_s1 + $0x258] sm:$0xff] }
 0x4c0   :  { %10492 = vst [vmem:[#allocation43_spill] sm:$0xff] %v8152_v28  ;;  %2245 = vmatpush.msrb.mxu2 %v8170_v27  ;;  %v8176_v28 = vld [vmem:[%s9128_s1 + $0x558] sm:$0xff] }
 0x4c1   :  { %10493 = vst [vmem:[#allocation44_spill] sm:$0xff] %v8158_v53  ;;  %2265 = vmatpush.msrb.mxu3 %v8176_v28  ;;  %v8182_v53 = vld [vmem:[%s9128_s1 + $0x220] sm:$0xff] }
 0x4c2   :  { %10494 = vst [vmem:[#allocation37_spill] sm:$0xff] %v8164_v7  ;;  %2206 = vmatpush.msrb.mxu0 %v8182_v53  ;;  %v8188_v7 = vld [vmem:[%s9128_s1 + $0x520] sm:$0xff] }
 0x4c3   :  { %10495 = vst [vmem:[#allocation38_spill] sm:$0xff] %v8170_v27  ;;  %2226 = vmatpush.msrb.mxu1 %v8188_v7  ;;  %v8194_v27 = vld [vmem:[%s9128_s1 + $0x228] sm:$0xff] }
 0x4c4   :  { %10496 = vst [vmem:[#allocation47_spill] sm:$0xff] %v8176_v28  ;;  %2246 = vmatpush.msrb.mxu2 %v8194_v27  ;;  %v8200_v28 = vld [vmem:[%s9128_s1 + $0x528] sm:$0xff] }
 0x4c5   :  { %10497 = vst [vmem:[#allocation48_spill] sm:$0xff] %v8182_v53  ;;  %2266 = vmatpush.msrb.mxu3 %v8200_v28  ;;  %v8206_v53 = vld [vmem:[%s9128_s1 + $0x1f0] sm:$0xff] }
 0x4c6   :  { %10498 = vst [vmem:[#allocation41_spill] sm:$0xff] %v8188_v7  ;;  %2207 = vmatpush.msrb.mxu0 %v8206_v53  ;;  %v8212_v7 = vld [vmem:[%s9128_s1 + $0x4f0] sm:$0xff] }
 0x4c7   :  { %10499 = vst [vmem:[#allocation42_spill] sm:$0xff] %v8194_v27  ;;  %2227 = vmatpush.msrb.mxu1 %v8212_v7  ;;  %v8218_v27 = vld [vmem:[%s9128_s1 + $0x1f8] sm:$0xff] }
 0x4c8   :  { %10500 = vst [vmem:[#allocation51_spill] sm:$0xff] %v8200_v28  ;;  %2247 = vmatpush.msrb.mxu2 %v8218_v27  ;;  %v8224_v28 = vld [vmem:[%s9128_s1 + $0x4f8] sm:$0xff] }
 0x4c9   :  { %10501 = vst [vmem:[#allocation52_spill] sm:$0xff] %v8206_v53  ;;  %2267 = vmatpush.msrb.mxu3 %v8224_v28  ;;  %v8230_v53 = vld [vmem:[%s9128_s1 + $0x1c0] sm:$0xff] }
 0x4ca   :  { %10502 = vst [vmem:[#allocation45_spill] sm:$0xff] %v8212_v7  ;;  %2208 = vmatpush.msrb.mxu0 %v8230_v53  ;;  %v8236_v7 = vld [vmem:[%s9128_s1 + $0x4c0] sm:$0xff] }
 0x4cb   :  { %10503 = vst [vmem:[#allocation46_spill] sm:$0xff] %v8218_v27  ;;  %2228 = vmatpush.msrb.mxu1 %v8236_v7  ;;  %v8242_v27 = vld [vmem:[%s9128_s1 + $0x1c8] sm:$0xff] }
 0x4cc   :  { %10504 = vst [vmem:[#allocation55_spill] sm:$0xff] %v8224_v28  ;;  %2248 = vmatpush.msrb.mxu2 %v8242_v27  ;;  %v8248_v28 = vld [vmem:[%s9128_s1 + $0x4c8] sm:$0xff] }
 0x4cd   :  { %10505 = vst [vmem:[#allocation56_spill] sm:$0xff] %v8230_v53  ;;  %2268 = vmatpush.msrb.mxu3 %v8248_v28  ;;  %v8254_v53 = vld [vmem:[%s9128_s1 + $0x190] sm:$0xff] }
 0x4ce   :  { %10506 = vst [vmem:[#allocation49_spill] sm:$0xff] %v8236_v7  ;;  %2209 = vmatpush.msrb.mxu0 %v8254_v53  ;;  %v8260_v7 = vld [vmem:[%s9128_s1 + $0x490] sm:$0xff] }
 0x4cf   :  { %10507 = vst [vmem:[#allocation50_spill] sm:$0xff] %v8242_v27  ;;  %2229 = vmatpush.msrb.mxu1 %v8260_v7  ;;  %v8266_v27 = vld [vmem:[%s9128_s1 + $0x198] sm:$0xff] }
 0x4d0   :  { %10508 = vst [vmem:[#allocation59_spill] sm:$0xff] %v8248_v28  ;;  %2249 = vmatpush.msrb.mxu2 %v8266_v27  ;;  %v8272_v28 = vld [vmem:[%s9128_s1 + $0x498] sm:$0xff] }
 0x4d1   :  { %10509 = vst [vmem:[#allocation60_spill] sm:$0xff] %v8254_v53  ;;  %2269 = vmatpush.msrb.mxu3 %v8272_v28  ;;  %v8278_v53 = vld [vmem:[%s9128_s1 + $0x160] sm:$0xff] }
 0x4d2   :  { %10510 = vst [vmem:[#allocation53_spill] sm:$0xff] %v8260_v7  ;;  %2210 = vmatpush.msrb.mxu0 %v8278_v53  ;;  %v8284_v7 = vld [vmem:[%s9128_s1 + $0x460] sm:$0xff] }
 0x4d3   :  { %10511 = vst [vmem:[#allocation54_spill] sm:$0xff] %v8266_v27  ;;  %2230 = vmatpush.msrb.mxu1 %v8284_v7  ;;  %v8290_v27 = vld [vmem:[%s9128_s1 + $0x168] sm:$0xff] }
 0x4d4   :  { %10512 = vst [vmem:[#allocation63_spill] sm:$0xff] %v8272_v28  ;;  %2250 = vmatpush.msrb.mxu2 %v8290_v27  ;;  %v8296_v28 = vld [vmem:[%s9128_s1 + $0x468] sm:$0xff] }
 0x4d5   :  { %10513 = vst [vmem:[#allocation64_spill] sm:$0xff] %v8278_v53  ;;  %2270 = vmatpush.msrb.mxu3 %v8296_v28  ;;  %v8302_v53 = vld [vmem:[%s9128_s1 + $0x130] sm:$0xff] }
 0x4d6   :  { %10514 = vst [vmem:[#allocation57_spill] sm:$0xff] %v8284_v7  ;;  %2211 = vmatpush.msrb.mxu0 %v8302_v53  ;;  %v8308_v7 = vld [vmem:[%s9128_s1 + $0x430] sm:$0xff] }
 0x4d7   :  { %10515 = vst [vmem:[#allocation58_spill] sm:$0xff] %v8290_v27  ;;  %2231 = vmatpush.msrb.mxu1 %v8308_v7  ;;  %v8314_v27 = vld [vmem:[%s9128_s1 + $0x138] sm:$0xff] }
 0x4d8   :  { %10516 = vst [vmem:[#allocation69_spill] sm:$0xff] %v8296_v28  ;;  %2251 = vmatpush.msrb.mxu2 %v8314_v27  ;;  %v8320_v28 = vld [vmem:[%s9128_s1 + $0x438] sm:$0xff] }
 0x4d9   :  { %10517 = vst [vmem:[#allocation70_spill] sm:$0xff] %v8302_v53  ;;  %2271 = vmatpush.msrb.mxu3 %v8320_v28  ;;  %v8326_v53 = vld [vmem:[%s9128_s1 + $0x100] sm:$0xff] }
 0x4da   :  { %10518 = vst [vmem:[#allocation61_spill] sm:$0xff] %v8308_v7  ;;  %2212 = vmatpush.msrb.mxu0 %v8326_v53  ;;  %v8332_v7 = vld [vmem:[%s9128_s1 + $0x400] sm:$0xff] }
 0x4db   :  { %10519 = vst [vmem:[#allocation62_spill] sm:$0xff] %v8314_v27  ;;  %2232 = vmatpush.msrb.mxu1 %v8332_v7  ;;  %v8338_v27 = vld [vmem:[%s9128_s1 + $0x108] sm:$0xff] }
 0x4dc   :  { %10520 = vst [vmem:[#allocation73_spill] sm:$0xff] %v8320_v28  ;;  %2252 = vmatpush.msrb.mxu2 %v8338_v27  ;;  %v8344_v28 = vld [vmem:[%s9128_s1 + $0x408] sm:$0xff] }
 0x4dd   :  { %10521 = vst [vmem:[#allocation74_spill] sm:$0xff] %v8326_v53  ;;  %2272 = vmatpush.msrb.mxu3 %v8344_v28  ;;  %v8350_v53 = vld [vmem:[%s9128_s1 + $0xd0] sm:$0xff] }
 0x4de   :  { %10522 = vst [vmem:[#allocation65_spill] sm:$0xff] %v8332_v7  ;;  %2213 = vmatpush.msrb.mxu0 %v8350_v53  ;;  %v8356_v7 = vld [vmem:[%s9128_s1 + $0x3d0] sm:$0xff] }
 0x4df   :  { %10523 = vst [vmem:[#allocation66_spill] sm:$0xff] %v8338_v27  ;;  %2233 = vmatpush.msrb.mxu1 %v8356_v7  ;;  %v8362_v27 = vld [vmem:[%s9128_s1 + $0xd8] sm:$0xff] }
 0x4e0   :  { %10524 = vst [vmem:[#allocation77_spill] sm:$0xff] %v8344_v28  ;;  %2253 = vmatpush.msrb.mxu2 %v8362_v27  ;;  %v8368_v28 = vld [vmem:[%s9128_s1 + $0x3d8] sm:$0xff] }
 0x4e1   :  { %10525 = vst [vmem:[#allocation78_spill] sm:$0xff] %v8350_v53  ;;  %2273 = vmatpush.msrb.mxu3 %v8368_v28  ;;  %v8374_v53 = vld [vmem:[%s9128_s1 + $0xa0] sm:$0xff] }
 0x4e2   :  { %10526 = vst [vmem:[#allocation81_spill] sm:$0xff] %v8356_v7  ;;  %2214 = vmatpush.msrb.mxu0 %v8374_v53  ;;  %v8380_v7 = vld [vmem:[%s9128_s1 + $0x3a0] sm:$0xff] }
 0x4e3   :  { %10527 = vst [vmem:[#allocation82_spill] sm:$0xff] %v8362_v27  ;;  %2234 = vmatpush.msrb.mxu1 %v8380_v7  ;;  %v8386_v27 = vld [vmem:[%s9128_s1 + $0xa8] sm:$0xff] }
 0x4e4   :  { %10528 = vst [vmem:[#allocation83_spill] sm:$0xff] %v8368_v28  ;;  %2254 = vmatpush.msrb.mxu2 %v8386_v27  ;;  %v8392_v28 = vld [vmem:[%s9128_s1 + $0x3a8] sm:$0xff] }
 0x4e5   :  { %10529 = vst [vmem:[#allocation84_spill] sm:$0xff] %v8374_v53  ;;  %2274 = vmatpush.msrb.mxu3 %v8392_v28  ;;  %v8398_v53 = vld [vmem:[%s9128_s1 + $0x70] sm:$0xff] }
 0x4e6   :  { %10530 = vst [vmem:[#allocation67_spill] sm:$0xff] %v8380_v7  ;;  %2215 = vmatpush.msrb.mxu0 %v8398_v53  ;;  %v8404_v7 = vld [vmem:[%s9128_s1 + $0x370] sm:$0xff] }
 0x4e7   :  { %10531 = vst [vmem:[#allocation68_spill] sm:$0xff] %v8386_v27  ;;  %2235 = vmatpush.msrb.mxu1 %v8404_v7  ;;  %v8410_v27 = vld [vmem:[%s9128_s1 + $0x78] sm:$0xff] }
 0x4e8   :  { %10532 = vst [vmem:[#allocation87_spill] sm:$0xff] %v8392_v28  ;;  %2255 = vmatpush.msrb.mxu2 %v8410_v27  ;;  %v8416_v28 = vld [vmem:[%s9128_s1 + $0x378] sm:$0xff] }
 0x4e9   :  { %10533 = vst [vmem:[#allocation88_spill] sm:$0xff] %v8398_v53  ;;  %2275 = vmatpush.msrb.mxu3 %v8416_v28  ;;  %v8422_v53 = vld [vmem:[%s9128_s1 + $0x40] sm:$0xff] }
 0x4ea   :  { %10534 = vst [vmem:[#allocation71_spill] sm:$0xff] %v8404_v7  ;;  %2216 = vmatpush.msrb.mxu0 %v8422_v53  ;;  %v8428_v7 = vld [vmem:[%s9128_s1 + $0x340] sm:$0xff] }
 0x4eb   :  { %10535 = vst [vmem:[#allocation72_spill] sm:$0xff] %v8410_v27  ;;  %2236 = vmatpush.msrb.mxu1 %v8428_v7  ;;  %v8434_v27 = vld [vmem:[%s9128_s1 + $0x48] sm:$0xff] }
 0x4ec   :  { %10536 = vst [vmem:[#allocation91_spill] sm:$0xff] %v8416_v28  ;;  %2256 = vmatpush.msrb.mxu2 %v8434_v27  ;;  %v8440_v28 = vld [vmem:[%s9128_s1 + $0x348] sm:$0xff]  ;;  %v1841_v6 = vpop.f32.mrf.mxu1 }
 0x4ed   :  { %10537 = vst [vmem:[#allocation92_spill] sm:$0xff] %v8422_v53  ;;  %2276 = vmatpush.msrb.mxu3 %v8440_v28  ;;  %v8446_v53 = vld [vmem:[%s9128_s1 + $0x10] sm:$0xff] }
 0x4ee   :  { %10538 = vst [vmem:[#allocation75_spill] sm:$0xff] %v8428_v7  ;;  %2217 = vmatpush.msrb.mxu0 %v8446_v53  ;;  %v8452_v7 = vld [vmem:[%s9128_s1 + $0x310] sm:$0xff] }
 0x4ef   :  { %10539 = vst [vmem:[#allocation76_spill] sm:$0xff] %v8434_v27  ;;  %2237 = vmatpush.msrb.mxu1 %v8452_v7  ;;  %v8458_v27 = vld [vmem:[%s9128_s1 + $0x18] sm:$0xff] }
 0x4f0   :  { %10540 = vst [vmem:[#allocation95_spill] sm:$0xff] %v8440_v28  ;;  %2257 = vmatpush.msrb.mxu2 %v8458_v27  ;;  %v8464_v28 = vld [vmem:[%s9128_s1 + $0x318] sm:$0xff] }
 0x4f1   :  { %10541 = vst [vmem:[#allocation96_spill] sm:$0xff] %v8446_v53  ;;  %2277 = vmatpush.msrb.mxu3 %v8464_v28  ;;  %v1821_v53 = vpop.f32.mrf.mxu0 }
 0x4f2   :  { %10542 = vst [vmem:[#allocation79_spill] sm:$0xff] %v8452_v7  ;;  %v1842_v7 = vadd.f32 %v1841_v6, %v1821_v53 }
 0x4f3   :  { %10543 = vst [vmem:[#allocation80_spill] sm:$0xff] %v8458_v27  ;;  %v1861_v4 = vpop.f32.mrf.mxu2  ;;  %v1881_v2 = vpop.f32.mrf.mxu3 }
 0x4f4   :  { %10544 = vst [vmem:[#allocation99_spill] sm:$0xff] %v8464_v28  ;;  %v1882_v1 = vadd.f32 %v1881_v2, %v1861_v4 }
 0x4f6   :  { %v2046_v58 = vrot.slane %v1882_v1, 6  ;;  %v1921_v50 = vpop.f32.mrf.mxu1 }
 0x4f8   :  { %v2047_v27 = vsel %vm452_vm0, %v1842_v7, %v2046_v58 }
 0x4f9   :  { %v2049_v55 = vadd.f32 %v2775_v0, %v2047_v27  ;;  %v1901_v52 = vpop.f32.mrf.mxu0 }
 0x4fa   :  { %v1922_v26 = vadd.f32 %v1921_v50, %v1901_v52 }
 0x4fb   :  { %v2777_v54 = vmul.f32 -1.442695, %v2049_v55 }
 0x4fd   :  { %2841 = vpow2.f32 %v2777_v54  ;;  %v1941_v49 = vpop.f32.mrf.mxu2  ;;  %v1961_v28 = vpop.f32.mrf.mxu3 }
 0x4fe   :  { %v1962_v48 = vadd.f32 %v1961_v28, %v1941_v49 }
 0x500   :  { %v2074_v32 = vrot.slane %v1962_v48, 6 }
 0x502   :  { %v2075_v2 = vsel %vm452_vm0, %v1922_v26, %v2074_v32 }
 0x503   :  { %v2842_v4 = vpop.eup %2841  ;;  %v2077_v6 = vadd.f32 %v2075_v2, %v2070_v13 }
 0x504   :  { %v2053_v53 = vadd.f32 1.0, %v2842_v4 }
 0x505   :  { %v2778_v16 = vmul.f32 -1.442695, %v2077_v6 }
 0x506   :  { %2843 = vrcp.f32 %v2053_v53  ;;  %v2065_v28 = vand.u32 2147483648, %v2053_v53  ;;  %vm2059_vm12 = vweird.f32 %v2053_v53 }
 0x507   :  { %2845 = vpow2.f32 %v2778_v16  ;;  %v2063_v16 = vand.u32 2147483647, %v2053_v53 }
 0x509   :  { %vm2064_vm14 = vcmp.eq.f32.partialorder %v2063_v16, 8.507059e+37 }
 0x50c   :  { %v2844_v58 = vpop.eup %2843 }
 0x50d   :  { %v2846_v1 = vpop.eup %2845  ;;  %v2055_v55 = vmul.f32 %v2844_v58, %v2053_v53  ;;  %vm2060_vm11 = vweird.f32 %v2844_v58 }
 0x50e   :  { %v2081_v7 = vadd.f32 1.0, %v2846_v1  ;;  %vm2061_vm13 = vmor %vm2059_vm12, %vm2060_vm11 }
 0x50f   :  { %v2056_v27 = vsub.f32 1.0, %v2055_v55 }
 0x510   :  { %2847 = vrcp.f32 %v2081_v7  ;;  %v1981_v47 = vpop.f32.mrf.mxu0  ;;  %v2001_v49 = vpop.f32.mrf.mxu1  ;;  %v2093_v53 = vand.u32 2147483648, %v2081_v7  ;;  %vm2087_vm1 = vweird.f32 %v2081_v7 }
 0x511   :  { %v2057_v54 = vmul.f32 %v2844_v58, %v2056_v27  ;;  %v2002_v26 = vadd.f32 %v2001_v49, %v1981_v47  ;;  %v2066_v27 = vor.u32 1.1754944e-38, %v2065_v28  ;;  %v2776_v47 = vld [vmem:[%s9129_s0 + $0x44] sm:$0xf] }
 0x513   :  { %v2058_v32 = vadd.f32 %v2844_v58, %v2057_v54  ;;  %v2097_v55 = vadd.f32 %v2002_v26, %v4774_v3 }
 0x515   :  { %v2062_v1 = vsel %vm2061_vm13, %v2844_v58, %v2058_v32  ;;  %v2094_v32 = vor.u32 1.1754944e-38, %v2093_v53  ;;  %v8557_v53 = vld [vmem:[%s9128_s1 + $0x298] sm:$0xff] }
 0x516   :  { %v2848_v0 = vpop.eup %2847  ;;  %v2067_v54 = vsel %vm2064_vm14, %v2066_v27, %v2062_v1  ;;  %v8521_v1 = vld [vmem:[%s9128_s1 + $0x2c0] sm:$0xff]  ;;  %v8533_v27 = vld [vmem:[%s9128_s1 + $0x2c8] sm:$0xff] }
 0x517   :  { %v2083_v50 = vmul.f32 %v2848_v0, %v2081_v7  ;;  %v2021_v48 = vpop.f32.mrf.mxu2  ;;  %v2041_v52 = vpop.f32.mrf.mxu3  ;;  %vm2088_vm15 = vweird.f32 %v2848_v0 }
 0x518   :  { %v2042_v13 = vadd.f32 %v2041_v52, %v2021_v48  ;;  %v2091_v48 = vand.u32 2147483647, %v2081_v7  ;;  %vm2089_vm2 = vmor %vm2087_vm1, %vm2088_vm15  ;;  %v8503_v7 = vld [vmem:[%s9128_s1 + $0x5f0] sm:$0xff] }
 0x519   :  { %v2084_v2 = vsub.f32 1.0, %v2083_v50 }
 0x51a   :  { %v2098_v4 = vadd.f32 %v2042_v13, %v4768_v51  ;;  %vm2092_vm3 = vcmp.eq.f32.partialorder %v2091_v48, 8.507059e+37  ;;  %v8569_v48 = vld [vmem:[%s9128_s1 + $0x260] sm:$0xff] }
 0x51b   :  { %v2085_v6 = vmul.f32 %v2848_v0, %v2084_v2 }
 0x51c   :  { %v2101_v11 = vrot.slane %v2098_v4, 6 }
 0x51d   :  { %v2086_v10 = vadd.f32 %v2848_v0, %v2085_v6  ;;  %v8515_v6 = vld [vmem:[%s9128_s1 + $0x5f8] sm:$0xff] }
 0x51e   :  { %v2102_v49 = vsel %vm452_vm0, %v2097_v55, %v2101_v11  ;;  %v8527_v55 = vld [vmem:[%s9128_s1 + $0x5c0] sm:$0xff] }
 0x51f   :  { %v2104_v50 = vmul.f32 %v2102_v49, %v2067_v54  ;;  %v2090_v52 = vsel %vm2089_vm2, %v2848_v0, %v2086_v10  ;;  %v8509_v0 = vld [vmem:[%s9128_s1 + $0x2f8] sm:$0xff]  ;;  %v8545_v54 = vld [vmem:[%s9128_s1 + $0x290] sm:$0xff] }
 0x520   :  { %v2095_v26 = vsel %vm2092_vm3, %v2094_v32, %v2090_v52  ;;  %v8551_v49 = vld [vmem:[%s9128_s1 + $0x590] sm:$0xff]  ;;  %v8581_v52 = vld [vmem:[%s9128_s1 + $0x268] sm:$0xff] }
 0x521   :  { %v2105_v58 = vadd.f32 %v2776_v47, %v2104_v50  ;;  %v2107_v13 = vsub.f32 1.0, %v2095_v26  ;;  %v2109_v16 = vmul.f32 %v2095_v26, %v7612_v20  ;;  %v8497_v20 = vld [vmem:[%s9128_s1 + $0x2f0] sm:$0xff]  ;;  %v8539_v47 = vld [vmem:[%s9128_s1 + $0x5c8] sm:$0xff]  ;;  %v8563_v50 = vld [vmem:[%s9128_s1 + $0x598] sm:$0xff] }
 0x522   :  { %v8587_v32 = vld [vmem:[%s9128_s1 + $0x568] sm:$0xff]  ;;  %v8597_v26 = vld [vmem:[%s9128_s1 + $0x230] sm:$0xff] }
 0x523   :  { %2849 = vtanh.f32 %v2105_v58  ;;  %v8575_v58 = vld [vmem:[%s9128_s1 + $0x560] sm:$0xff] }
 0x529   :  { %v2850_v28 = vpop.eup %2849 }
 0x52a   :  { %v2108_v2 = vmul.f32 %v2850_v28, %v2107_v13  ;;  %v8603_v13 = vld [vmem:[%s9128_s1 + $0x530] sm:$0xff]  ;;  %v8609_v28 = vld [vmem:[%s9128_s1 + $0x238] sm:$0xff] }
 0x52b   :  { %10545 = vst [vmem:[#allocation100_spill] sm:$0xff] %v8603_v13 }
 0x52c   :  { %v8479_v4 = vadd.f32 %v2109_v16, %v2108_v2  ;;  %10546 = vst [vmem:[#allocation85_spill] sm:$0xff] %v8609_v28  ;;  %v8615_v2 = vld [vmem:[%s9128_s1 + $0x538] sm:$0xff]  ;;  %v8621_v16 = vld [vmem:[%s9128_s1 + $0x200] sm:$0xff] }
 0x52d   :  { %10547 = vst [vmem:[#allocation86_spill] sm:$0xff] %v8615_v2 }
 0x52e   :  { %2779 = vst [vmem:[%s9131_s3 + $0x14] sm:$0xf] %v8479_v4 }
 0x52f   :  { %2117 = vst [vmem:[#allocation1] ss:$4 sm:$0xff] %v8479_v4 }
 0x530   :  { %10548 = vst [vmem:[#allocation103_spill] sm:$0xff] %v8621_v16 }
 0x536   :  { %v8486_v11 = vld.sshfl [vmem:[#allocation1] sm:$0xff pattern:$0x73625140]  ;;  %v8488_v10 = vld.sshfl [vmem:[#allocation1 + $0x8] sm:$0xff pattern:$0x73625140] }
 0x537   :  { %2138 = vmatmul.f32.vlgmr.msra.gmra.mxu0 %v8486_v11  ;;  %2158 = vmatmul.f32.vlgmr.msra.gmra.mxu1 %v8488_v10 }
 0x538   :  { %2178 = vmatmul.f32.vlgmr.msra.gmra.mxu2 %v8486_v11  ;;  %2198 = vmatmul.f32.vlgmr.msra.gmra.mxu3 %v8488_v10 }
 0x539   :  { %2282 = vmatpush.msra.mxu0 %v8497_v20  ;;  %2302 = vmatpush.msra.mxu1 %v8503_v7 }
 0x53a   :  { %2322 = vmatpush.msra.mxu2 %v8509_v0  ;;  %2342 = vmatpush.msra.mxu3 %v8515_v6 }
 0x53b   :  { %2283 = vmatpush.msra.mxu0 %v8521_v1  ;;  %2303 = vmatpush.msra.mxu1 %v8527_v55 }
 0x53c   :  { %2323 = vmatpush.msra.mxu2 %v8533_v27  ;;  %2343 = vmatpush.msra.mxu3 %v8539_v47 }
 0x53d   :  { %2284 = vmatpush.msra.mxu0 %v8545_v54  ;;  %2304 = vmatpush.msra.mxu1 %v8551_v49 }
 0x53e   :  { %2324 = vmatpush.msra.mxu2 %v8557_v53  ;;  %2344 = vmatpush.msra.mxu3 %v8563_v50 }
 0x53f   :  { %2285 = vmatpush.msra.mxu0 %v8569_v48  ;;  %2305 = vmatpush.msra.mxu1 %v8575_v58 }
 0x540   :  { %2325 = vmatpush.msra.mxu2 %v8581_v52  ;;  %2345 = vmatpush.msra.mxu3 %v8587_v32 }
 0x541   :  { %2218 = vmatmul.f32.vlgmr.msrb.gmra.mxu0 %v8486_v11  ;;  %2238 = vmatmul.f32.vlgmr.msrb.gmra.mxu1 %v8488_v10 }
 0x542   :  { %2258 = vmatmul.f32.vlgmr.msrb.gmra.mxu2 %v8486_v11  ;;  %2278 = vmatmul.f32.vlgmr.msrb.gmra.mxu3 %v8488_v10 }
 0x543   :  { %2286 = vmatpush.msra.mxu0 %v8597_v26  ;;  %2306 = vmatpush.msra.mxu1 %v8603_v13  ;;  %v8627_v13 = vld [vmem:[%s9128_s1 + $0x500] sm:$0xff] }
 0x544   :  { %2326 = vmatpush.msra.mxu2 %v8609_v28  ;;  %2346 = vmatpush.msra.mxu3 %v8615_v2  ;;  %10549 = vst [vmem:[#allocation104_spill] sm:$0xff] %v8627_v13  ;;  %v8633_v28 = vld [vmem:[%s9128_s1 + $0x208] sm:$0xff] }
 0x545   :  { %2287 = vmatpush.msra.mxu0 %v8621_v16  ;;  %2307 = vmatpush.msra.mxu1 %v8627_v13  ;;  %10550 = vst [vmem:[#allocation89_spill] sm:$0xff] %v8633_v28  ;;  %v8639_v2 = vld [vmem:[%s9128_s1 + $0x508] sm:$0xff]  ;;  %v8645_v16 = vld [vmem:[%s9128_s1 + $0x1d0] sm:$0xff] }
 0x546   :  { %2327 = vmatpush.msra.mxu2 %v8633_v28  ;;  %10551 = vst [vmem:[#allocation90_spill] sm:$0xff] %v8639_v2  ;;  %2347 = vmatpush.msra.mxu3 %v8639_v2  ;;  %v8651_v13 = vld [vmem:[%s9128_s1 + $0x4d0] sm:$0xff]  ;;  %v8657_v28 = vld [vmem:[%s9128_s1 + $0x1d8] sm:$0xff] }
 0x547   :  { %10552 = vst [vmem:[#allocation107_spill] sm:$0xff] %v8645_v16  ;;  %2288 = vmatpush.msra.mxu0 %v8645_v16  ;;  %2308 = vmatpush.msra.mxu1 %v8651_v13  ;;  %v8663_v2 = vld [vmem:[%s9128_s1 + $0x4d8] sm:$0xff]  ;;  %v8669_v16 = vld [vmem:[%s9128_s1 + $0x1a0] sm:$0xff] }
 0x548   :  { %10553 = vst [vmem:[#allocation108_spill] sm:$0xff] %v8651_v13  ;;  %2328 = vmatpush.msra.mxu2 %v8657_v28  ;;  %2348 = vmatpush.msra.mxu3 %v8663_v2  ;;  %v8675_v13 = vld [vmem:[%s9128_s1 + $0x4a0] sm:$0xff] }
 0x549   :  { %10554 = vst [vmem:[#allocation93_spill] sm:$0xff] %v8657_v28  ;;  %2289 = vmatpush.msra.mxu0 %v8669_v16  ;;  %2309 = vmatpush.msra.mxu1 %v8675_v13  ;;  %v8681_v28 = vld [vmem:[%s9128_s1 + $0x1a8] sm:$0xff] }
 0x54a   :  { %10555 = vst [vmem:[#allocation94_spill] sm:$0xff] %v8663_v2  ;;  %2329 = vmatpush.msra.mxu2 %v8681_v28  ;;  %v8687_v2 = vld [vmem:[%s9128_s1 + $0x4a8] sm:$0xff] }
 0x54b   :  { %10556 = vst [vmem:[#allocation111_spill] sm:$0xff] %v8669_v16  ;;  %2349 = vmatpush.msra.mxu3 %v8687_v2  ;;  %v8693_v16 = vld [vmem:[%s9128_s1 + $0x170] sm:$0xff] }
 0x54c   :  { %10557 = vst [vmem:[#allocation112_spill] sm:$0xff] %v8675_v13  ;;  %2290 = vmatpush.msra.mxu0 %v8693_v16  ;;  %v8699_v13 = vld [vmem:[%s9128_s1 + $0x470] sm:$0xff] }
 0x54d   :  { %10558 = vst [vmem:[#allocation97_spill] sm:$0xff] %v8681_v28  ;;  %2310 = vmatpush.msra.mxu1 %v8699_v13  ;;  %v8705_v28 = vld [vmem:[%s9128_s1 + $0x178] sm:$0xff] }
 0x54e   :  { %10559 = vst [vmem:[#allocation98_spill] sm:$0xff] %v8687_v2  ;;  %2330 = vmatpush.msra.mxu2 %v8705_v28  ;;  %v8711_v2 = vld [vmem:[%s9128_s1 + $0x478] sm:$0xff] }
 0x54f   :  { %10560 = vst [vmem:[#allocation115_spill] sm:$0xff] %v8693_v16  ;;  %2350 = vmatpush.msra.mxu3 %v8711_v2  ;;  %v8717_v16 = vld [vmem:[%s9128_s1 + $0x140] sm:$0xff] }
 0x550   :  { %10561 = vst [vmem:[#allocation116_spill] sm:$0xff] %v8699_v13  ;;  %2291 = vmatpush.msra.mxu0 %v8717_v16  ;;  %v8723_v13 = vld [vmem:[%s9128_s1 + $0x440] sm:$0xff] }
 0x551   :  { %10562 = vst [vmem:[#allocation101_spill] sm:$0xff] %v8705_v28  ;;  %2311 = vmatpush.msra.mxu1 %v8723_v13  ;;  %v8729_v28 = vld [vmem:[%s9128_s1 + $0x148] sm:$0xff] }
 0x552   :  { %10563 = vst [vmem:[#allocation102_spill] sm:$0xff] %v8711_v2  ;;  %2331 = vmatpush.msra.mxu2 %v8729_v28  ;;  %v8735_v2 = vld [vmem:[%s9128_s1 + $0x448] sm:$0xff] }
 0x553   :  { %10564 = vst [vmem:[#allocation119_spill] sm:$0xff] %v8717_v16  ;;  %2351 = vmatpush.msra.mxu3 %v8735_v2  ;;  %v8741_v16 = vld [vmem:[%s9128_s1 + $0x110] sm:$0xff] }
 0x554   :  { %10565 = vst [vmem:[#allocation120_spill] sm:$0xff] %v8723_v13  ;;  %2292 = vmatpush.msra.mxu0 %v8741_v16  ;;  %v8747_v13 = vld [vmem:[%s9128_s1 + $0x410] sm:$0xff] }
 0x555   :  { %10566 = vst [vmem:[#allocation105_spill] sm:$0xff] %v8729_v28  ;;  %2312 = vmatpush.msra.mxu1 %v8747_v13  ;;  %v8753_v28 = vld [vmem:[%s9128_s1 + $0x118] sm:$0xff] }
 0x556   :  { %10567 = vst [vmem:[#allocation106_spill] sm:$0xff] %v8735_v2  ;;  %2332 = vmatpush.msra.mxu2 %v8753_v28  ;;  %v8759_v2 = vld [vmem:[%s9128_s1 + $0x418] sm:$0xff] }
 0x557   :  { %10568 = vst [vmem:[#allocation123_spill] sm:$0xff] %v8741_v16  ;;  %2352 = vmatpush.msra.mxu3 %v8759_v2  ;;  %v8765_v16 = vld [vmem:[%s9128_s1 + $0xe0] sm:$0xff] }
 0x558   :  { %10569 = vst [vmem:[#allocation124_spill] sm:$0xff] %v8747_v13  ;;  %2293 = vmatpush.msra.mxu0 %v8765_v16  ;;  %v8771_v13 = vld [vmem:[%s9128_s1 + $0x3e0] sm:$0xff] }
 0x559   :  { %10570 = vst [vmem:[#allocation109_spill] sm:$0xff] %v8753_v28  ;;  %2313 = vmatpush.msra.mxu1 %v8771_v13  ;;  %v8777_v28 = vld [vmem:[%s9128_s1 + $0xe8] sm:$0xff] }
 0x55a   :  { %10571 = vst [vmem:[#allocation110_spill] sm:$0xff] %v8759_v2  ;;  %2333 = vmatpush.msra.mxu2 %v8777_v28  ;;  %v8783_v2 = vld [vmem:[%s9128_s1 + $0x3e8] sm:$0xff] }
 0x55b   :  { %10572 = vst [vmem:[#allocation113_spill] sm:$0xff] %v8765_v16  ;;  %2353 = vmatpush.msra.mxu3 %v8783_v2  ;;  %v8789_v16 = vld [vmem:[%s9128_s1 + $0xb0] sm:$0xff] }
 0x55c   :  { %10573 = vst [vmem:[#allocation114_spill] sm:$0xff] %v8771_v13  ;;  %2294 = vmatpush.msra.mxu0 %v8789_v16  ;;  %v8795_v13 = vld [vmem:[%s9128_s1 + $0x3b0] sm:$0xff] }
 0x55d   :  { %10574 = vst [vmem:[#allocation129_spill] sm:$0xff] %v8777_v28  ;;  %2314 = vmatpush.msra.mxu1 %v8795_v13  ;;  %v8801_v28 = vld [vmem:[%s9128_s1 + $0xb8] sm:$0xff] }
 0x55e   :  { %10575 = vst [vmem:[#allocation130_spill] sm:$0xff] %v8783_v2  ;;  %2334 = vmatpush.msra.mxu2 %v8801_v28  ;;  %v8807_v2 = vld [vmem:[%s9128_s1 + $0x3b8] sm:$0xff] }
 0x55f   :  { %10576 = vst [vmem:[#allocation117_spill] sm:$0xff] %v8789_v16  ;;  %2354 = vmatpush.msra.mxu3 %v8807_v2  ;;  %v8813_v16 = vld [vmem:[%s9128_s1 + $0x80] sm:$0xff] }
 0x560   :  { %10577 = vst [vmem:[#allocation118_spill] sm:$0xff] %v8795_v13  ;;  %2295 = vmatpush.msra.mxu0 %v8813_v16  ;;  %v8819_v13 = vld [vmem:[%s9128_s1 + $0x380] sm:$0xff] }
 0x561   :  { %10578 = vst [vmem:[#allocation121_spill] sm:$0xff] %v8801_v28  ;;  %2315 = vmatpush.msra.mxu1 %v8819_v13  ;;  %v8825_v28 = vld [vmem:[%s9128_s1 + $0x88] sm:$0xff] }
 0x562   :  { %10579 = vst [vmem:[#allocation122_spill] sm:$0xff] %v8807_v2  ;;  %2335 = vmatpush.msra.mxu2 %v8825_v28  ;;  %v8831_v2 = vld [vmem:[%s9128_s1 + $0x388] sm:$0xff] }
 0x563   :  { %10580 = vst [vmem:[#allocation125_spill] sm:$0xff] %v8813_v16  ;;  %2355 = vmatpush.msra.mxu3 %v8831_v2  ;;  %v8837_v16 = vld [vmem:[%s9128_s1 + $0x50] sm:$0xff] }
 0x564   :  { %10581 = vst [vmem:[#allocation126_spill] sm:$0xff] %v8819_v13  ;;  %2296 = vmatpush.msra.mxu0 %v8837_v16  ;;  %v8843_v13 = vld [vmem:[%s9128_s1 + $0x350] sm:$0xff] }
 0x565   :  { %10582 = vst [vmem:[#allocation127_spill] sm:$0xff] %v8825_v28  ;;  %2316 = vmatpush.msra.mxu1 %v8843_v13  ;;  %v8849_v28 = vld [vmem:[%s9128_s1 + $0x58] sm:$0xff] }
 0x566   :  { %10583 = vst [vmem:[#allocation128_spill] sm:$0xff] %v8831_v2  ;;  %2336 = vmatpush.msra.mxu2 %v8849_v28  ;;  %v8855_v2 = vld [vmem:[%s9128_s1 + $0x358] sm:$0xff] }
 0x567   :  { %10584 = vst [vmem:[#allocation131_spill] sm:$0xff] %v8837_v16  ;;  %2356 = vmatpush.msra.mxu3 %v8855_v2  ;;  %v8861_v16 = vld [vmem:[%s9128_s1 + $0x20] sm:$0xff] }
 0x568   :  { %10585 = vst [vmem:[#allocation132_spill] sm:$0xff] %v8843_v13  ;;  %2297 = vmatpush.msra.mxu0 %v8861_v16  ;;  %v8867_v13 = vld [vmem:[%s9128_s1 + $0x320] sm:$0xff] }
 0x569   :  { %10586 = vst [vmem:[#allocation133_spill] sm:$0xff] %v8849_v28  ;;  %2317 = vmatpush.msra.mxu1 %v8867_v13  ;;  %v8873_v28 = vld [vmem:[%s9128_s1 + $0x28] sm:$0xff]  ;;  %2298 = vmatmul.f32.vlgmr.msra.gmra.mxu0 %v8486_v11 }
 0x56a   :  { %10587 = vst [vmem:[#allocation134_spill] sm:$0xff] %v8855_v2  ;;  %2337 = vmatpush.msra.mxu2 %v8873_v28  ;;  %v8879_v2 = vld [vmem:[%s9128_s1 + $0x328] sm:$0xff]  ;;  %2318 = vmatmul.f32.vlgmr.msra.gmra.mxu1 %v8488_v10 }
 0x56b   :  { %2357 = vmatpush.msra.mxu3 %v8879_v2  ;;  %2338 = vmatmul.f32.vlgmr.msra.gmra.mxu2 %v8486_v11  ;;  %v10626_v11 = vld [vmem:[#allocation44_spill] sm:$0xff] }
 0x56c   :  { %2358 = vmatmul.f32.vlgmr.msra.gmra.mxu3 %v8488_v10  ;;  %2440 = vmatpush.msrb.mxu0 %v7702_v24  ;;  %v10588_v24 = vld [vmem:[#allocation2_spill] sm:$0xff]  ;;  %v10627_v10 = vld [vmem:[#allocation37_spill] sm:$0xff] }
 0x56d   :  { %2460 = vmatpush.msrb.mxu1 %v7708_v63  ;;  %2480 = vmatpush.msrb.mxu2 %v7714_v45  ;;  %v10589_v63 = vld [vmem:[#allocation3_spill] sm:$0xff]  ;;  %v10590_v45 = vld [vmem:[#allocation6_spill] sm:$0xff] }
 0x56e   :  { %2500 = vmatpush.msrb.mxu3 %v7720_v40  ;;  %2441 = vmatpush.msrb.mxu0 %v7726_v57  ;;  %v10591_v40 = vld [vmem:[#allocation7_spill] sm:$0xff]  ;;  %v10592_v57 = vld [vmem:[#allocation4_spill] sm:$0xff] }
 0x56f   :  { %2461 = vmatpush.msrb.mxu1 %v7732_v60  ;;  %2481 = vmatpush.msrb.mxu2 %v7738_v25  ;;  %v10593_v60 = vld [vmem:[#allocation5_spill] sm:$0xff]  ;;  %v10594_v25 = vld [vmem:[#allocation8_spill] sm:$0xff] }
 0x570   :  { %2501 = vmatpush.msrb.mxu3 %v7744_v22  ;;  %2442 = vmatpush.msrb.mxu0 %v7750_v31  ;;  %v10595_v22 = vld [vmem:[#allocation9_spill] sm:$0xff]  ;;  %v10596_v31 = vld [vmem:[#allocation10_spill] sm:$0xff] }
 0x571   :  { %2462 = vmatpush.msrb.mxu1 %v7756_v12  ;;  %2482 = vmatpush.msrb.mxu2 %v7762_v21  ;;  %v10597_v12 = vld [vmem:[#allocation11_spill] sm:$0xff]  ;;  %v10598_v21 = vld [vmem:[#allocation12_spill] sm:$0xff] }
 0x572   :  { %2502 = vmatpush.msrb.mxu3 %v7768_v18  ;;  %2443 = vmatpush.msrb.mxu0 %v7774_v62  ;;  %v10599_v18 = vld [vmem:[#allocation13_spill] sm:$0xff]  ;;  %v10600_v62 = vld [vmem:[#allocation14_spill] sm:$0xff] }
 0x573   :  { %2463 = vmatpush.msrb.mxu1 %v7780_v19  ;;  %2483 = vmatpush.msrb.mxu2 %v7786_v17  ;;  %v10601_v19 = vld [vmem:[#allocation17_spill] sm:$0xff]  ;;  %v10602_v17 = vld [vmem:[#allocation18_spill] sm:$0xff] }
 0x574   :  { %2503 = vmatpush.msrb.mxu3 %v7792_v23  ;;  %2444 = vmatpush.msrb.mxu0 %v7798_v14  ;;  %v10603_v23 = vld [vmem:[#allocation15_spill] sm:$0xff]  ;;  %v10604_v14 = vld [vmem:[#allocation16_spill] sm:$0xff] }
 0x575   :  { %2464 = vmatpush.msrb.mxu1 %v7804_v15  ;;  %2484 = vmatpush.msrb.mxu2 %v7810_v41  ;;  %v10605_v15 = vld [vmem:[#allocation21_spill] sm:$0xff]  ;;  %v10606_v41 = vld [vmem:[#allocation22_spill] sm:$0xff] }
 0x576   :  { %2504 = vmatpush.msrb.mxu3 %v7816_v5  ;;  %2445 = vmatpush.msrb.mxu0 %v7822_v43  ;;  %v10607_v5 = vld [vmem:[#allocation19_spill] sm:$0xff]  ;;  %v10608_v43 = vld [vmem:[#allocation20_spill] sm:$0xff] }
 0x577   :  { %2465 = vmatpush.msrb.mxu1 %v7828_v38  ;;  %2485 = vmatpush.msrb.mxu2 %v7834_v42  ;;  %v10609_v38 = vld [vmem:[#allocation25_spill] sm:$0xff]  ;;  %v10610_v42 = vld [vmem:[#allocation26_spill] sm:$0xff] }
 0x578   :  { %2505 = vmatpush.msrb.mxu3 %v7840_v39  ;;  %2446 = vmatpush.msrb.mxu0 %v7846_v36  ;;  %v10611_v39 = vld [vmem:[#allocation23_spill] sm:$0xff]  ;;  %v10612_v36 = vld [vmem:[#allocation24_spill] sm:$0xff] }
 0x579   :  { %2466 = vmatpush.msrb.mxu1 %v7852_v44  ;;  %2486 = vmatpush.msrb.mxu2 %v7858_v56  ;;  %v10613_v44 = vld [vmem:[#allocation29_spill] sm:$0xff]  ;;  %v10614_v56 = vld [vmem:[#allocation30_spill] sm:$0xff] }
 0x57a   :  { %2506 = vmatpush.msrb.mxu3 %v7864_v35  ;;  %2447 = vmatpush.msrb.mxu0 %v7870_v30  ;;  %v10615_v35 = vld [vmem:[#allocation27_spill] sm:$0xff]  ;;  %v10616_v30 = vld [vmem:[#allocation28_spill] sm:$0xff] }
 0x57b   :  { %2467 = vmatpush.msrb.mxu1 %v7876_v46  ;;  %2487 = vmatpush.msrb.mxu2 %v7882_v33  ;;  %v10617_v46 = vld [vmem:[#allocation33_spill] sm:$0xff]  ;;  %v10618_v33 = vld [vmem:[#allocation34_spill] sm:$0xff] }
 0x57c   :  { %2507 = vmatpush.msrb.mxu3 %v7888_v29  ;;  %2448 = vmatpush.msrb.mxu0 %v7894_v37  ;;  %v10619_v29 = vld [vmem:[#allocation31_spill] sm:$0xff]  ;;  %v10620_v37 = vld [vmem:[#allocation32_spill] sm:$0xff] }
 0x57d   :  { %2468 = vmatpush.msrb.mxu1 %v7900_v34  ;;  %2488 = vmatpush.msrb.mxu2 %v7906_v59  ;;  %v10621_v34 = vld [vmem:[#allocation39_spill] sm:$0xff]  ;;  %v10622_v59 = vld [vmem:[#allocation40_spill] sm:$0xff] }
 0x57e   :  { %2508 = vmatpush.msrb.mxu3 %v7912_v61  ;;  %2449 = vmatpush.msrb.mxu0 %v7918_v8  ;;  %v10623_v61 = vld [vmem:[#allocation35_spill] sm:$0xff]  ;;  %v10624_v8 = vld [vmem:[#allocation36_spill] sm:$0xff] }
 0x57f   :  { %2469 = vmatpush.msrb.mxu1 %v7924_v9  ;;  %2489 = vmatpush.msrb.mxu2 %v10588_v24  ;;  %v10625_v9 = vld [vmem:[#allocation43_spill] sm:$0xff]  ;;  %v10628_v24 = vld [vmem:[#allocation38_spill] sm:$0xff] }
 0x580   :  { %2509 = vmatpush.msrb.mxu3 %v10589_v63  ;;  %2450 = vmatpush.msrb.mxu0 %v10590_v45  ;;  %v10629_v63 = vld [vmem:[#allocation47_spill] sm:$0xff]  ;;  %v10630_v45 = vld [vmem:[#allocation48_spill] sm:$0xff] }
 0x581   :  { %2470 = vmatpush.msrb.mxu1 %v10591_v40  ;;  %2490 = vmatpush.msrb.mxu2 %v10592_v57  ;;  %v10631_v40 = vld [vmem:[#allocation41_spill] sm:$0xff]  ;;  %v10632_v57 = vld [vmem:[#allocation42_spill] sm:$0xff] }
 0x582   :  { %2510 = vmatpush.msrb.mxu3 %v10593_v60  ;;  %2451 = vmatpush.msrb.mxu0 %v10594_v25  ;;  %v10633_v60 = vld [vmem:[#allocation51_spill] sm:$0xff]  ;;  %v10634_v25 = vld [vmem:[#allocation52_spill] sm:$0xff] }
 0x583   :  { %2471 = vmatpush.msrb.mxu1 %v10595_v22  ;;  %2491 = vmatpush.msrb.mxu2 %v10596_v31  ;;  %v10635_v22 = vld [vmem:[#allocation45_spill] sm:$0xff]  ;;  %v10636_v31 = vld [vmem:[#allocation46_spill] sm:$0xff] }
 0x584   :  { %2511 = vmatpush.msrb.mxu3 %v10597_v12  ;;  %2452 = vmatpush.msrb.mxu0 %v10598_v21  ;;  %v10637_v12 = vld [vmem:[#allocation55_spill] sm:$0xff]  ;;  %v10638_v21 = vld [vmem:[#allocation56_spill] sm:$0xff] }
 0x585   :  { %2472 = vmatpush.msrb.mxu1 %v10599_v18  ;;  %2492 = vmatpush.msrb.mxu2 %v10600_v62  ;;  %v10639_v18 = vld [vmem:[#allocation49_spill] sm:$0xff]  ;;  %v10640_v62 = vld [vmem:[#allocation50_spill] sm:$0xff] }
 0x586   :  { %2512 = vmatpush.msrb.mxu3 %v10601_v19  ;;  %2453 = vmatpush.msrb.mxu0 %v10602_v17  ;;  %v10641_v19 = vld [vmem:[#allocation59_spill] sm:$0xff]  ;;  %v10642_v17 = vld [vmem:[#allocation60_spill] sm:$0xff] }
 0x587   :  { %2473 = vmatpush.msrb.mxu1 %v10603_v23  ;;  %2493 = vmatpush.msrb.mxu2 %v10604_v14  ;;  %v10643_v23 = vld [vmem:[#allocation53_spill] sm:$0xff]  ;;  %v10644_v14 = vld [vmem:[#allocation54_spill] sm:$0xff] }
 0x588   :  { %2513 = vmatpush.msrb.mxu3 %v10605_v15  ;;  %2454 = vmatpush.msrb.mxu0 %v10606_v41  ;;  %v10645_v15 = vld [vmem:[#allocation63_spill] sm:$0xff]  ;;  %v10646_v41 = vld [vmem:[#allocation64_spill] sm:$0xff] }
 0x589   :  { %2474 = vmatpush.msrb.mxu1 %v10607_v5  ;;  %2494 = vmatpush.msrb.mxu2 %v10608_v43  ;;  %v10647_v5 = vld [vmem:[#allocation57_spill] sm:$0xff]  ;;  %v10648_v43 = vld [vmem:[#allocation58_spill] sm:$0xff] }
 0x58a   :  { %2514 = vmatpush.msrb.mxu3 %v10609_v38  ;;  %2455 = vmatpush.msrb.mxu0 %v10610_v42  ;;  %v10649_v38 = vld [vmem:[#allocation69_spill] sm:$0xff]  ;;  %v10650_v42 = vld [vmem:[#allocation70_spill] sm:$0xff] }
 0x58b   :  { %2475 = vmatpush.msrb.mxu1 %v10611_v39  ;;  %2495 = vmatpush.msrb.mxu2 %v10612_v36  ;;  %v10651_v39 = vld [vmem:[#allocation61_spill] sm:$0xff]  ;;  %v10652_v36 = vld [vmem:[#allocation62_spill] sm:$0xff] }
 0x58c   :  { %2515 = vmatpush.msrb.mxu3 %v10613_v44  ;;  %2520 = vmatpush.msra.mxu0 %v10614_v56  ;;  %v10653_v44 = vld [vmem:[#allocation73_spill] sm:$0xff]  ;;  %v10654_v56 = vld [vmem:[#allocation74_spill] sm:$0xff] }
 0x58d   :  { %2540 = vmatpush.msra.mxu1 %v10615_v35  ;;  %2560 = vmatpush.msra.mxu2 %v10616_v30  ;;  %v10655_v35 = vld [vmem:[#allocation65_spill] sm:$0xff]  ;;  %v10656_v30 = vld [vmem:[#allocation66_spill] sm:$0xff] }
 0x58e   :  { %2580 = vmatpush.msra.mxu3 %v10617_v46  ;;  %2521 = vmatpush.msra.mxu0 %v10618_v33  ;;  %v10657_v46 = vld [vmem:[#allocation77_spill] sm:$0xff]  ;;  %v10658_v33 = vld [vmem:[#allocation78_spill] sm:$0xff] }
 0x58f   :  { %2541 = vmatpush.msra.mxu1 %v10619_v29  ;;  %2561 = vmatpush.msra.mxu2 %v10620_v37  ;;  %v10659_v29 = vld [vmem:[#allocation81_spill] sm:$0xff]  ;;  %v10660_v37 = vld [vmem:[#allocation82_spill] sm:$0xff] }
 0x590   :  { %2581 = vmatpush.msra.mxu3 %v10621_v34  ;;  %2522 = vmatpush.msra.mxu0 %v10622_v59  ;;  %v10661_v34 = vld [vmem:[#allocation83_spill] sm:$0xff]  ;;  %v10662_v59 = vld [vmem:[#allocation84_spill] sm:$0xff] }
 0x591   :  { %2542 = vmatpush.msra.mxu1 %v10623_v61  ;;  %2562 = vmatpush.msra.mxu2 %v10624_v8  ;;  %v10663_v61 = vld [vmem:[#allocation67_spill] sm:$0xff]  ;;  %v10664_v8 = vld [vmem:[#allocation68_spill] sm:$0xff] }
 0x592   :  { %2582 = vmatpush.msra.mxu3 %v10625_v9  ;;  %2523 = vmatpush.msra.mxu0 %v10626_v11  ;;  %v10665_v9 = vld [vmem:[#allocation87_spill] sm:$0xff]  ;;  %v10666_v11 = vld [vmem:[#allocation88_spill] sm:$0xff] }
 0x593   :  { %2543 = vmatpush.msra.mxu1 %v10627_v10  ;;  %2563 = vmatpush.msra.mxu2 %v10628_v24  ;;  %v10667_v10 = vld [vmem:[#allocation71_spill] sm:$0xff]  ;;  %v10668_v24 = vld [vmem:[#allocation72_spill] sm:$0xff] }
 0x594   :  { %2583 = vmatpush.msra.mxu3 %v10629_v63  ;;  %2524 = vmatpush.msra.mxu0 %v10630_v45  ;;  %v10669_v63 = vld [vmem:[#allocation91_spill] sm:$0xff]  ;;  %v10670_v45 = vld [vmem:[#allocation92_spill] sm:$0xff] }
 0x595   :  { %2544 = vmatpush.msra.mxu1 %v10631_v40  ;;  %2564 = vmatpush.msra.mxu2 %v10632_v57  ;;  %v10671_v40 = vld [vmem:[#allocation75_spill] sm:$0xff]  ;;  %v10672_v57 = vld [vmem:[#allocation76_spill] sm:$0xff] }
 0x596   :  { %2584 = vmatpush.msra.mxu3 %v10633_v60  ;;  %2525 = vmatpush.msra.mxu0 %v10634_v25  ;;  %v10673_v60 = vld [vmem:[#allocation95_spill] sm:$0xff]  ;;  %v10674_v25 = vld [vmem:[#allocation96_spill] sm:$0xff] }
 0x597   :  { %2545 = vmatpush.msra.mxu1 %v10635_v22  ;;  %2565 = vmatpush.msra.mxu2 %v10636_v31  ;;  %v10675_v22 = vld [vmem:[#allocation79_spill] sm:$0xff]  ;;  %v10676_v31 = vld [vmem:[#allocation80_spill] sm:$0xff] }
 0x598   :  { %2585 = vmatpush.msra.mxu3 %v10637_v12  ;;  %2526 = vmatpush.msra.mxu0 %v10638_v21  ;;  %v10677_v12 = vld [vmem:[#allocation99_spill] sm:$0xff] }
 0x599   :  { %2546 = vmatpush.msra.mxu1 %v10639_v18  ;;  %2566 = vmatpush.msra.mxu2 %v10640_v62 }
 0x59a   :  { %2586 = vmatpush.msra.mxu3 %v10641_v19  ;;  %2527 = vmatpush.msra.mxu0 %v10642_v17 }
 0x59b   :  { %2547 = vmatpush.msra.mxu1 %v10643_v23  ;;  %2567 = vmatpush.msra.mxu2 %v10644_v14  ;;  %v2780_v14 = vld [vmem:[%s9129_s0 + $0x48] sm:$0xff] }
 0x59c   :  { %2587 = vmatpush.msra.mxu3 %v10645_v15  ;;  %2528 = vmatpush.msra.mxu0 %v10646_v41 }
 0x59d   :  { %2548 = vmatpush.msra.mxu1 %v10647_v5  ;;  %2568 = vmatpush.msra.mxu2 %v10648_v43 }
 0x59e   :  { %2588 = vmatpush.msra.mxu3 %v10649_v38  ;;  %2529 = vmatpush.msra.mxu0 %v10650_v42 }
 0x59f   :  { %2549 = vmatpush.msra.mxu1 %v10651_v39  ;;  %2569 = vmatpush.msra.mxu2 %v10652_v36 }
 0x5a0   :  { %2589 = vmatpush.msra.mxu3 %v10653_v44  ;;  %2530 = vmatpush.msra.mxu0 %v10654_v56  ;;  %v2388_v56 = vrot.slane %v2780_v14, 4 }
 0x5a1   :  { %2550 = vmatpush.msra.mxu1 %v10655_v35  ;;  %2570 = vmatpush.msra.mxu2 %v10656_v30 }
 0x5a2   :  { %2590 = vmatpush.msra.mxu3 %v10657_v46  ;;  %2531 = vmatpush.msra.mxu0 %v10658_v33 }
 0x5a3   :  { %2551 = vmatpush.msra.mxu1 %v10659_v29  ;;  %2571 = vmatpush.msra.mxu2 %v10660_v37 }
 0x5a4   :  { %2591 = vmatpush.msra.mxu3 %v10661_v34  ;;  %2532 = vmatpush.msra.mxu0 %v10662_v59 }
 0x5a5   :  { %2552 = vmatpush.msra.mxu1 %v10663_v61  ;;  %2572 = vmatpush.msra.mxu2 %v10664_v8 }
 0x5a6   :  { %2592 = vmatpush.msra.mxu3 %v10665_v9  ;;  %2533 = vmatpush.msra.mxu0 %v10666_v11 }
 0x5a7   :  { %2553 = vmatpush.msra.mxu1 %v10667_v10  ;;  %2573 = vmatpush.msra.mxu2 %v10668_v24 }
 0x5a8   :  { %2593 = vmatpush.msra.mxu3 %v10669_v63  ;;  %2534 = vmatpush.msra.mxu0 %v10670_v45 }
 0x5a9   :  { %2554 = vmatpush.msra.mxu1 %v10671_v40  ;;  %2574 = vmatpush.msra.mxu2 %v10672_v57 }
 0x5aa   :  { %2594 = vmatpush.msra.mxu3 %v10673_v60  ;;  %2535 = vmatpush.msra.mxu0 %v10674_v25 }
 0x5ab   :  { %2555 = vmatpush.msra.mxu1 %v10675_v22  ;;  %2575 = vmatpush.msra.mxu2 %v10676_v31 }
 0x5ac   :  { %2595 = vmatpush.msra.mxu3 %v10677_v12 }
 0x5b4   :  { %v2139_v21 = vpop.f32.mrf.mxu0  ;;  %v2159_v18 = vpop.f32.mrf.mxu1 }
 0x5b5   :  { %v2160_v23 = vadd.f32 %v2159_v18, %v2139_v21 }
 0x5bb   :  { %v2179_v62 = vpop.f32.mrf.mxu2  ;;  %v2199_v19 = vpop.f32.mrf.mxu3 }
 0x5bc   :  { %v2200_v17 = vadd.f32 %v2199_v19, %v2179_v62 }
 0x5be   :  { %v2364_v15 = vrot.slane %v2200_v17, 6  ;;  %v2219_v38 = vpop.f32.mrf.mxu0  ;;  %v2239_v42 = vpop.f32.mrf.mxu1 }
 0x5bf   :  { %v2240_v35 = vadd.f32 %v2239_v42, %v2219_v38 }
 0x5c0   :  { %v2365_v41 = vsel %vm452_vm0, %v2160_v23, %v2364_v15 }
 0x5c1   :  { %v2367_v5 = vadd.f32 %v2780_v14, %v2365_v41 }
 0x5c3   :  { %v2782_v43 = vmul.f32 -1.442695, %v2367_v5  ;;  %v2781_v5 = vld [vmem:[%s9129_s0 + $0x50] sm:$0xf] }
 0x5c5   :  { %2851 = vpow2.f32 %v2782_v43  ;;  %v2259_v39 = vpop.f32.mrf.mxu2  ;;  %v2279_v36 = vpop.f32.mrf.mxu3 }
 0x5c6   :  { %v2280_v44 = vadd.f32 %v2279_v36, %v2259_v39 }
 0x5c8   :  { %v2392_v30 = vrot.slane %v2280_v44, 6 }
 0x5ca   :  { %v2393_v46 = vsel %vm452_vm0, %v2240_v35, %v2392_v30 }
 0x5cb   :  { %v2852_v33 = vpop.eup %2851  ;;  %v2395_v29 = vadd.f32 %v2393_v46, %v2388_v56 }
 0x5cc   :  { %v2371_v37 = vadd.f32 1.0, %v2852_v33 }
 0x5cd   :  { %v2783_v34 = vmul.f32 -1.442695, %v2395_v29 }
 0x5ce   :  { %2853 = vrcp.f32 %v2371_v37  ;;  %v2383_v12 = vand.u32 2147483648, %v2371_v37  ;;  %vm2377_vm5 = vweird.f32 %v2371_v37  ;;  %v2381_v18 = vand.u32 2147483647, %v2371_v37 }
 0x5cf   :  { %2855 = vpow2.f32 %v2783_v34 }
 0x5d0   :  { %v2384_v14 = vor.u32 1.1754944e-38, %v2383_v12  ;;  %vm2382_vm7 = vcmp.eq.f32.partialorder %v2381_v18, 8.507059e+37  ;;  %v10709_v12 = vld [vmem:[#allocation117_spill] sm:$0xff] }
 0x5d1   :  { %v10711_v18 = vld [vmem:[#allocation121_spill] sm:$0xff] }
 0x5d4   :  { %v2854_v59 = vpop.eup %2853 }
 0x5d5   :  { %v2856_v61 = vpop.eup %2855  ;;  %v2373_v8 = vmul.f32 %v2854_v59, %v2371_v37  ;;  %vm2378_vm4 = vweird.f32 %v2854_v59 }
 0x5d6   :  { %v2399_v9 = vadd.f32 1.0, %v2856_v61  ;;  %vm2379_vm6 = vmor %vm2377_vm5, %vm2378_vm4 }
 0x5d7   :  { %v2374_v11 = vsub.f32 1.0, %v2373_v8  ;;  %v10696_v8 = vld [vmem:[#allocation102_spill] sm:$0xff] }
 0x5d8   :  { %2857 = vrcp.f32 %v2399_v9  ;;  %v2411_v42 = vand.u32 2147483648, %v2399_v9  ;;  %vm2405_vm9 = vweird.f32 %v2399_v9  ;;  %v2409_v36 = vand.u32 2147483647, %v2399_v9 }
 0x5d9   :  { %v2375_v10 = vmul.f32 %v2854_v59, %v2374_v11  ;;  %v10698_v11 = vld [vmem:[#allocation120_spill] sm:$0xff] }
 0x5da   :  { %v2412_v35 = vor.u32 1.1754944e-38, %v2411_v42  ;;  %vm2410_vm11 = vcmp.eq.f32.partialorder %v2409_v36, 8.507059e+37 }
 0x5db   :  { %v2376_v25 = vadd.f32 %v2854_v59, %v2375_v10  ;;  %v10699_v10 = vld [vmem:[#allocation105_spill] sm:$0xff] }
 0x5dd   :  { %v2380_v17 = vsel %vm2379_vm6, %v2854_v59, %v2376_v25  ;;  %v10706_v25 = vld [vmem:[#allocation114_spill] sm:$0xff] }
 0x5de   :  { %v2858_v45 = vpop.eup %2857  ;;  %v2385_v43 = vsel %vm2382_vm7, %v2384_v14, %v2380_v17  ;;  %v10714_v17 = vld [vmem:[#allocation126_spill] sm:$0xff]  ;;  %v10716_v14 = vld [vmem:[#allocation128_spill] sm:$0xff] }
 0x5df   :  { %v2401_v40 = vmul.f32 %v2858_v45, %v2399_v9  ;;  %vm2406_vm8 = vweird.f32 %v2858_v45  ;;  %v10697_v9 = vld [vmem:[#allocation119_spill] sm:$0xff] }
 0x5e0   :  { %vm2407_vm10 = vmor %vm2405_vm9, %vm2406_vm8 }
 0x5e1   :  { %v2402_v21 = vsub.f32 1.0, %v2401_v40  ;;  %v10703_v40 = vld [vmem:[#allocation109_spill] sm:$0xff] }
 0x5e3   :  { %v2403_v19 = vmul.f32 %v2858_v45, %v2402_v21  ;;  %v10710_v21 = vld [vmem:[#allocation118_spill] sm:$0xff] }
 0x5e5   :  { %v2404_v41 = vadd.f32 %v2858_v45, %v2403_v19  ;;  %v10713_v19 = vld [vmem:[#allocation125_spill] sm:$0xff] }
 0x5e6   :  { %v2299_v24 = vpop.f32.mrf.mxu0 }
 0x5e7   :  { %v2319_v63 = vpop.f32.mrf.mxu1  ;;  %v2408_v56 = vsel %vm2407_vm10, %v2858_v45, %v2404_v41  ;;  %v10702_v45 = vld [vmem:[#allocation124_spill] sm:$0xff] }
 0x5e8   :  { %v2320_v22 = vadd.f32 %v2319_v63, %v2299_v24  ;;  %v2413_v30 = vsel %vm2410_vm11, %v2412_v35, %v2408_v56  ;;  %v10700_v24 = vld [vmem:[#allocation106_spill] sm:$0xff]  ;;  %v10701_v63 = vld [vmem:[#allocation123_spill] sm:$0xff]  ;;  %v10718_v41 = vld [vmem:[#allocation132_spill] sm:$0xff] }
 0x5e9   :  { %v2425_v46 = vsub.f32 1.0, %v2413_v30  ;;  %v2427_v37 = vmul.f32 %v2413_v30, %v8479_v4  ;;  %v10678_v4 = vld [vmem:[#allocation100_spill] sm:$0xff] }
 0x5ea   :  { %v2415_v23 = vadd.f32 %v2320_v22, %v4774_v3  ;;  %v10707_v22 = vld [vmem:[#allocation129_spill] sm:$0xff] }
 0x5ee   :  { %v2339_v57 = vpop.f32.mrf.mxu2 }
 0x5ef   :  { %v2359_v60 = vpop.f32.mrf.mxu3 }
 0x5f0   :  { %v2360_v31 = vadd.f32 %v2359_v60, %v2339_v57  ;;  %v10704_v57 = vld [vmem:[#allocation110_spill] sm:$0xff]  ;;  %v10705_v60 = vld [vmem:[#allocation113_spill] sm:$0xff] }
 0x5f2   :  { %v2416_v62 = vadd.f32 %v2360_v31, %v4768_v51  ;;  %v10708_v31 = vld [vmem:[#allocation130_spill] sm:$0xff] }
 0x5f4   :  { %v2419_v15 = vrot.slane %v2416_v62, 6  ;;  %v10712_v62 = vld [vmem:[#allocation122_spill] sm:$0xff] }
 0x5f6   :  { %v2420_v38 = vsel %vm452_vm0, %v2415_v23, %v2419_v15  ;;  %v10715_v23 = vld [vmem:[#allocation127_spill] sm:$0xff] }
 0x5f7   :  { %v2422_v39 = vmul.f32 %v2420_v38, %v2385_v43  ;;  %v10717_v15 = vld [vmem:[#allocation131_spill] sm:$0xff]  ;;  %v10720_v43 = vld [vmem:[#allocation134_spill] sm:$0xff] }
 0x5f9   :  { %v2423_v44 = vadd.f32 %v2781_v5, %v2422_v39  ;;  %v10719_v5 = vld [vmem:[#allocation133_spill] sm:$0xff] }
 0x5fb   :  { %2859 = vtanh.f32 %v2423_v44 }
 0x601   :  { %v2860_v33 = vpop.eup %2859 }
 0x602   :  { %v2426_v29 = vmul.f32 %v2860_v33, %v2425_v46 }
 0x604   :  { %v9026_v34 = vadd.f32 %v2427_v37, %v2426_v29 }
 0x606   :  { %2784 = vst [vmem:[%s9131_s3 + $0x18] sm:$0xf] %v9026_v34 }
 0x607   :  { %2435 = vst [vmem:[#allocation1] ss:$4 sm:$0xff] %v9026_v34 }
 0x60e   :  { %v9033_v59 = vld.sshfl [vmem:[#allocation1] sm:$0xff pattern:$0x73625140]  ;;  %v9035_v61 = vld.sshfl [vmem:[#allocation1 + $0x8] sm:$0xff pattern:$0x73625140] }
 0x60f   :  { %2456 = vmatmul.f32.vlgmr.msrb.gmra.mxu0 %v9033_v59  ;;  %2476 = vmatmul.f32.vlgmr.msrb.gmra.mxu1 %v9035_v61 }
 0x610   :  { %2496 = vmatmul.f32.vlgmr.msrb.gmra.mxu2 %v9033_v59  ;;  %2516 = vmatmul.f32.vlgmr.msrb.gmra.mxu3 %v9035_v61 }
 0x611   :  { %2600 = vmatpush.msrb.mxu0 %v8497_v20  ;;  %2620 = vmatpush.msrb.mxu1 %v8503_v7  ;;  %v10679_v20 = vld [vmem:[#allocation85_spill] sm:$0xff]  ;;  %v10680_v7 = vld [vmem:[#allocation86_spill] sm:$0xff] }
 0x612   :  { %2640 = vmatpush.msrb.mxu2 %v8509_v0  ;;  %2660 = vmatpush.msrb.mxu3 %v8515_v6  ;;  %v10681_v0 = vld [vmem:[#allocation103_spill] sm:$0xff]  ;;  %v10682_v6 = vld [vmem:[#allocation104_spill] sm:$0xff] }
 0x613   :  { %2601 = vmatpush.msrb.mxu0 %v8521_v1  ;;  %2621 = vmatpush.msrb.mxu1 %v8527_v55  ;;  %v10683_v1 = vld [vmem:[#allocation89_spill] sm:$0xff]  ;;  %v10684_v55 = vld [vmem:[#allocation90_spill] sm:$0xff] }
 0x614   :  { %2641 = vmatpush.msrb.mxu2 %v8533_v27  ;;  %2661 = vmatpush.msrb.mxu3 %v8539_v47  ;;  %v10685_v27 = vld [vmem:[#allocation107_spill] sm:$0xff]  ;;  %v10686_v47 = vld [vmem:[#allocation108_spill] sm:$0xff] }
 0x615   :  { %2602 = vmatpush.msrb.mxu0 %v8545_v54  ;;  %2622 = vmatpush.msrb.mxu1 %v8551_v49  ;;  %v10687_v54 = vld [vmem:[#allocation93_spill] sm:$0xff]  ;;  %v10688_v49 = vld [vmem:[#allocation94_spill] sm:$0xff] }
 0x616   :  { %2642 = vmatpush.msrb.mxu2 %v8557_v53  ;;  %2662 = vmatpush.msrb.mxu3 %v8563_v50  ;;  %v10689_v53 = vld [vmem:[#allocation111_spill] sm:$0xff]  ;;  %v10690_v50 = vld [vmem:[#allocation112_spill] sm:$0xff] }
 0x617   :  { %2603 = vmatpush.msrb.mxu0 %v8569_v48  ;;  %2623 = vmatpush.msrb.mxu1 %v8575_v58  ;;  %v10691_v48 = vld [vmem:[#allocation97_spill] sm:$0xff]  ;;  %v10692_v58 = vld [vmem:[#allocation98_spill] sm:$0xff] }
 0x618   :  { %2643 = vmatpush.msrb.mxu2 %v8581_v52  ;;  %2663 = vmatpush.msrb.mxu3 %v8587_v32  ;;  %v10693_v52 = vld [vmem:[#allocation115_spill] sm:$0xff]  ;;  %v10694_v32 = vld [vmem:[#allocation116_spill] sm:$0xff] }
 0x619   :  { %2536 = vmatmul.f32.vlgmr.msra.gmra.mxu0 %v9033_v59  ;;  %2556 = vmatmul.f32.vlgmr.msra.gmra.mxu1 %v9035_v61 }
 0x61a   :  { %2576 = vmatmul.f32.vlgmr.msra.gmra.mxu2 %v9033_v59  ;;  %2596 = vmatmul.f32.vlgmr.msra.gmra.mxu3 %v9035_v61 }
 0x61b   :  { %2604 = vmatpush.msrb.mxu0 %v8597_v26  ;;  %2624 = vmatpush.msrb.mxu1 %v10678_v4  ;;  %v10695_v26 = vld [vmem:[#allocation101_spill] sm:$0xff] }
 0x61c   :  { %2644 = vmatpush.msrb.mxu2 %v10679_v20  ;;  %2664 = vmatpush.msrb.mxu3 %v10680_v7 }
 0x61d   :  { %2605 = vmatpush.msrb.mxu0 %v10681_v0  ;;  %2625 = vmatpush.msrb.mxu1 %v10682_v6 }
 0x61e   :  { %2645 = vmatpush.msrb.mxu2 %v10683_v1  ;;  %2665 = vmatpush.msrb.mxu3 %v10684_v55 }
 0x61f   :  { %2606 = vmatpush.msrb.mxu0 %v10685_v27  ;;  %2626 = vmatpush.msrb.mxu1 %v10686_v47 }
 0x620   :  { %2646 = vmatpush.msrb.mxu2 %v10687_v54  ;;  %2666 = vmatpush.msrb.mxu3 %v10688_v49 }
 0x621   :  { %2607 = vmatpush.msrb.mxu0 %v10689_v53  ;;  %2627 = vmatpush.msrb.mxu1 %v10690_v50 }
 0x622   :  { %2647 = vmatpush.msrb.mxu2 %v10691_v48  ;;  %2667 = vmatpush.msrb.mxu3 %v10692_v58 }
 0x623   :  { %2608 = vmatpush.msrb.mxu0 %v10693_v52  ;;  %2628 = vmatpush.msrb.mxu1 %v10694_v32 }
 0x624   :  { %2648 = vmatpush.msrb.mxu2 %v10695_v26  ;;  %2668 = vmatpush.msrb.mxu3 %v10696_v8 }
 0x625   :  { %2609 = vmatpush.msrb.mxu0 %v10697_v9  ;;  %2629 = vmatpush.msrb.mxu1 %v10698_v11 }
 0x626   :  { %2649 = vmatpush.msrb.mxu2 %v10699_v10  ;;  %2669 = vmatpush.msrb.mxu3 %v10700_v24 }
 0x627   :  { %2610 = vmatpush.msrb.mxu0 %v10701_v63  ;;  %2630 = vmatpush.msrb.mxu1 %v10702_v45 }
 0x628   :  { %2650 = vmatpush.msrb.mxu2 %v10703_v40  ;;  %2670 = vmatpush.msrb.mxu3 %v10704_v57 }
 0x629   :  { %2611 = vmatpush.msrb.mxu0 %v10705_v60  ;;  %2631 = vmatpush.msrb.mxu1 %v10706_v25 }
 0x62a   :  { %2651 = vmatpush.msrb.mxu2 %v10707_v22  ;;  %2671 = vmatpush.msrb.mxu3 %v10708_v31 }
 0x62b   :  { %2612 = vmatpush.msrb.mxu0 %v10709_v12  ;;  %2632 = vmatpush.msrb.mxu1 %v10710_v21  ;;  %v2786_v12 = vld [vmem:[%s9129_s0 + $0x5c] sm:$0xf] }
 0x62c   :  { %2652 = vmatpush.msrb.mxu2 %v10711_v18  ;;  %2672 = vmatpush.msrb.mxu3 %v10712_v62 }
 0x62d   :  { %2613 = vmatpush.msrb.mxu0 %v10713_v19  ;;  %2633 = vmatpush.msrb.mxu1 %v10714_v17 }
 0x62e   :  { %2653 = vmatpush.msrb.mxu2 %v10715_v23  ;;  %2673 = vmatpush.msrb.mxu3 %v10716_v14 }
 0x62f   :  { %2614 = vmatpush.msrb.mxu0 %v10717_v15  ;;  %2634 = vmatpush.msrb.mxu1 %v10718_v41 }
 0x630   :  { %2654 = vmatpush.msrb.mxu2 %v10719_v5  ;;  %2674 = vmatpush.msrb.mxu3 %v10720_v43 }
 0x631   :  { %2615 = vmatpush.msrb.mxu0 %v8861_v16  ;;  %2635 = vmatpush.msrb.mxu1 %v8867_v13  ;;  %v2785_v13 = vld [vmem:[%s9129_s0 + $0x54] sm:$0xff] }
 0x632   :  { %2655 = vmatpush.msrb.mxu2 %v8873_v28  ;;  %2675 = vmatpush.msrb.mxu3 %v8879_v2 }
 0x633   :  { %2616 = vmatmul.f32.vlgmr.msrb.gmra.mxu0 %v9033_v59  ;;  %2636 = vmatmul.f32.vlgmr.msrb.gmra.mxu1 %v9035_v61 }
 0x634   :  { %2656 = vmatmul.f32.vlgmr.msrb.gmra.mxu2 %v9033_v59  ;;  %2676 = vmatmul.f32.vlgmr.msrb.gmra.mxu3 %v9035_v61  ;;  %v2706_v59 = vrot.slane %v2785_v13, 4 }
 0x68c   :  { %v2457_v38 = vpop.f32.mrf.mxu0  ;;  %v2477_v42 = vpop.f32.mrf.mxu1 }
 0x68d   :  { %v2478_v16 = vadd.f32 %v2477_v42, %v2457_v38 }
 0x693   :  { %v2497_v39 = vpop.f32.mrf.mxu2  ;;  %v2517_v36 = vpop.f32.mrf.mxu3 }
 0x694   :  { %v2518_v44 = vadd.f32 %v2517_v36, %v2497_v39 }
 0x696   :  { %v2682_v28 = vrot.slane %v2518_v44, 6  ;;  %v2537_v30 = vpop.f32.mrf.mxu0  ;;  %v2557_v46 = vpop.f32.mrf.mxu1 }
 0x697   :  { %v2558_v61 = vadd.f32 %v2557_v46, %v2537_v30 }
 0x698   :  { %v2683_v2 = vsel %vm452_vm0, %v2478_v16, %v2682_v28 }
 0x699   :  { %v2685_v56 = vadd.f32 %v2785_v13, %v2683_v2 }
 0x69b   :  { %v2787_v35 = vmul.f32 -1.442695, %v2685_v56 }
 0x69d   :  { %2861 = vpow2.f32 %v2787_v35  ;;  %v2577_v33 = vpop.f32.mrf.mxu2  ;;  %v2597_v29 = vpop.f32.mrf.mxu3 }
 0x69e   :  { %v2598_v37 = vadd.f32 %v2597_v29, %v2577_v33 }
 0x6a0   :  { %v2710_v4 = vrot.slane %v2598_v37, 6 }
 0x6a2   :  { %v2711_v20 = vsel %vm452_vm0, %v2558_v61, %v2710_v4 }
 0x6a3   :  { %v2862_v7 = vpop.eup %2861  ;;  %v2713_v0 = vadd.f32 %v2711_v20, %v2706_v59 }
 0x6a4   :  { %v2689_v6 = vadd.f32 1.0, %v2862_v7 }
 0x6a5   :  { %v2788_v1 = vmul.f32 -1.442695, %v2713_v0 }
 0x6a6   :  { %2863 = vrcp.f32 %v2689_v6  ;;  %v2701_v10 = vand.u32 2147483648, %v2689_v6  ;;  %vm2695_vm13 = vweird.f32 %v2689_v6  ;;  %v2699_v63 = vand.u32 2147483647, %v2689_v6 }
 0x6a7   :  { %2865 = vpow2.f32 %v2788_v1 }
 0x6a8   :  { %v2702_v25 = vor.u32 1.1754944e-38, %v2701_v10  ;;  %vm2700_vm15 = vcmp.eq.f32.partialorder %v2699_v63, 8.507059e+37 }
 0x6ac   :  { %v2864_v55 = vpop.eup %2863 }
 0x6ad   :  { %v2866_v27 = vpop.eup %2865  ;;  %v2691_v47 = vmul.f32 %v2864_v55, %v2689_v6  ;;  %vm2696_vm12 = vweird.f32 %v2864_v55 }
 0x6ae   :  { %v2717_v54 = vadd.f32 1.0, %v2866_v27  ;;  %vm2697_vm14 = vmor %vm2695_vm13, %vm2696_vm12 }
 0x6af   :  { %v2692_v49 = vsub.f32 1.0, %v2691_v47 }
 0x6b0   :  { %2867 = vrcp.f32 %v2717_v54  ;;  %v2617_v50 = vpop.f32.mrf.mxu0  ;;  %v2637_v48 = vpop.f32.mrf.mxu1  ;;  %v2729_v62 = vand.u32 2147483648, %v2717_v54  ;;  %vm2723_vm2 = vweird.f32 %v2717_v54 }
 0x6b1   :  { %v2693_v53 = vmul.f32 %v2864_v55, %v2692_v49  ;;  %v2638_v9 = vadd.f32 %v2637_v48, %v2617_v50 }
 0x6b3   :  { %v2694_v8 = vadd.f32 %v2864_v55, %v2693_v53  ;;  %v2733_v60 = vadd.f32 %v2638_v9, %v4774_v3  ;;  %v2730_v3 = vor.u32 1.1754944e-38, %v2729_v62 }
 0x6b5   :  { %v2698_v57 = vsel %vm2697_vm14, %v2864_v55, %v2694_v8 }
 0x6b6   :  { %v2868_v58 = vpop.eup %2867  ;;  %v2703_v21 = vsel %vm2700_vm15, %v2702_v25, %v2698_v57 }
 0x6b7   :  { %v2719_v52 = vmul.f32 %v2868_v58, %v2717_v54  ;;  %v2657_v32 = vpop.f32.mrf.mxu2  ;;  %v2677_v26 = vpop.f32.mrf.mxu3  ;;  %vm2724_vm1 = vweird.f32 %v2868_v58 }
 0x6b8   :  { %v2678_v11 = vadd.f32 %v2677_v26, %v2657_v32  ;;  %vm2725_vm3 = vmor %vm2723_vm2, %vm2724_vm1 }
 0x6b9   :  { %v2720_v24 = vsub.f32 1.0, %v2719_v52 }
 0x6ba   :  { %v2734_v45 = vadd.f32 %v2678_v11, %v4768_v51  ;;  %v2727_v51 = vand.u32 2147483647, %v2717_v54 }
 0x6bb   :  { %v2721_v40 = vmul.f32 %v2868_v58, %v2720_v24 }
 0x6bc   :  { %v2737_v22 = vrot.slane %v2734_v45, 6  ;;  %vm2728_vm4 = vcmp.eq.f32.partialorder %v2727_v51, 8.507059e+37 }
 0x6bd   :  { %v2722_v31 = vadd.f32 %v2868_v58, %v2721_v40 }
 0x6be   :  { %v2738_v18 = vsel %vm452_vm0, %v2733_v60, %v2737_v22 }
 0x6bf   :  { %v2740_v19 = vmul.f32 %v2738_v18, %v2703_v21  ;;  %v2726_v23 = vsel %vm2725_vm3, %v2868_v58, %v2722_v31 }
 0x6c0   :  { %v2731_v14 = vsel %vm2728_vm4, %v2730_v3, %v2726_v23 }
 0x6c1   :  { %v2741_v17 = vadd.f32 %v2786_v12, %v2740_v19  ;;  %v2743_v15 = vsub.f32 1.0, %v2731_v14  ;;  %v2745_v43 = vmul.f32 %v2731_v14, %v9026_v34 }
 0x6c3   :  { %2869 = vtanh.f32 %v2741_v17 }
 0x6c9   :  { %v2870_v41 = vpop.eup %2869 }
 0x6ca   :  { %v2744_v5 = vmul.f32 %v2870_v41, %v2743_v15 }
 0x6cc   :  { %v2746_v38 = vadd.f32 %v2745_v43, %v2744_v5 }
 0x6ce   :  { %2789 = vst [vmem:[%s9131_s3 + $0x1c] sm:$0xf] %v2746_v38 }

</bundles_post_ra>
